<compile_context>
chip_gen: v7x
topology: tpu7x:2x2x1
jax: 0.10.0
libtpu: 0.0.40
codegen_flags: <defaults>
</compile_context>

<pallas_src>
import jax
import jax.numpy as jnp
from jax.experimental import pallas as pl
from jax.experimental.pallas import tpu as pltpu

EPS = 1e-5  # PyTorch BatchNorm default eps


# ----------------------------------------------------------------------------
# One-time parameter preparation: fold BN, band conv weights, pack fc weights.
# ----------------------------------------------------------------------------
def prepare_params(p, num_channels, board):
    C = num_channels
    H = W = board
    Wp = W + 2                      # padded grid width (zero ring)
    FH = FW = board - 4             # spatial extent after the two valid convs

    def fold(bn):
        s = bn["gamma"] / jnp.sqrt(bn["var"] + EPS)
        return s, bn["beta"] - bn["mean"] * s

    def band(wt, cin):
        # wt: (3, 3, cin, C) folded taps -> (3, Wp*cin, Wp*C) block-tridiagonal
        # R[di][w'*cin + ci, w*C + co] = wt[di, (w'-w)+1, ci, co] for |w'-w|<=1
        r = jnp.zeros((3, Wp * cin, Wp * C), jnp.float32)
        for w in range(Wp):
            for dj in range(3):
                wp_ = w + dj - 1
                if 0 <= wp_ < Wp:
                    r = r.at[:, wp_ * cin:(wp_ + 1) * cin,
                             w * C:(w + 1) * C].set(wt[:, dj])
        return r

    # --- conv1 (Cin = 1): banded K = Wp weights ------------------------------
    s, t = fold(p["bn1"])
    w = p["conv1_w"] * s[:, None, None, None]                 # (C,1,3,3) scaled
    wt = jnp.transpose(w, (2, 3, 1, 0))                       # (3,3,1,C)
    wc1 = band(wt, 1).astype(jnp.bfloat16)                    # (3, Wp, Wp*C)
    bc1 = jnp.tile(p["conv1_b"] * s + t, Wp)[None, :]         # (1, Wp*C) f32

    # --- conv2..conv4: banded K = Wp*C weights -------------------------------
    wconv_l, bconv_l = [], []
    for conv, bnn in (("conv2", "bn2"), ("conv3", "bn3"), ("conv4", "bn4")):
        s, t = fold(p[bnn])
        w = p[conv + "_w"] * s[:, None, None, None]           # (C,C,3,3)
        wt = jnp.transpose(w, (2, 3, 1, 0))                   # (3,3,C,C)
        wconv_l.append(band(wt, C))                           # (3, Wp*C, Wp*C)
        bconv_l.append(jnp.tile(p[conv + "_b"] * s + t, Wp)[None, :])
    wconv = jnp.concatenate(wconv_l, axis=0).astype(jnp.bfloat16)  # (9,WpC,WpC)
    bconv = jnp.stack(bconv_l)                                     # (3,1,WpC)

    # --- fc1: fold BN + NCHW flatten permutation; rows ordered (hh, ww, c) ---
    s1, t1 = fold(p["bn_fc1"])
    f1o = p["fc1_w"].shape[0]
    w1 = (p["fc1_w"] * s1[:, None]).reshape(f1o, C, FH, FW)
    w1 = jnp.transpose(w1, (2, 3, 1, 0)).reshape(FH * FW * C, f1o)
    w1 = w1.astype(jnp.bfloat16)                              # (FH*FW*C, 1024)
    b1 = (p["fc1_b"] * s1 + t1)[None, :]

    # --- fc2: fold BN, pre-transpose -----------------------------------------
    s2, t2 = fold(p["bn_fc2"])
    w2 = jnp.transpose(p["fc2_w"] * s2[:, None]).astype(jnp.bfloat16)  # (1024,512)
    b2 = (p["fc2_b"] * s2 + t2)[None, :]

    # --- merged, lane-dense heads: [pi | v | zeros], width multiple of 128 ---
    A = p["fc3_w"].shape[0]
    head_w = ((A + 1 + 127) // 128) * 128
    wh = jnp.transpose(jnp.concatenate([p["fc3_w"], p["fc4_w"]], axis=0))  # (512,A+1)
    wh = jnp.pad(wh, ((0, 0), (0, head_w - (A + 1)))).astype(jnp.bfloat16)
    bh = jnp.pad(jnp.concatenate([p["fc3_b"], p["fc4_b"]]),
                 (0, head_w - (A + 1)))[None, :]

    return dict(wc1=wc1, bc1=bc1, wconv=wconv, bconv=bconv,
                w1=w1, b1=b1, w2=w2, b2=b2, wh=wh, bh=bh)


# ----------------------------------------------------------------------------
# Fused forward pass (single Pallas kernel)
# ----------------------------------------------------------------------------
def netvp_forward(x, prep, action_size):
    """x: (N, 1, H, W) float32 (NCHW).  prep: output of prepare_params()."""
    N, _, H, W = x.shape
    Hp, Wp = H + 2, W + 2
    N_pad = ((N + 7) // 8) * 8            # sublane-aligned batch-minor stride
    ROWS = Hp * N_pad                     # activation rows (h major, n minor)
    BUF_ROWS = (Hp + 2) * N_pad           # + one slack h-slot above/below
    C = prep["bc1"].shape[1] // Wp
    WpC = Wp * C
    FH = FW = H - 4
    A = action_size
    head_w = prep["wh"].shape[1]
    F1 = prep["b1"].shape[1]
    F2 = prep["b2"].shape[1]
    K1 = prep["w1"].shape[0]              # = FH * FW * C

    # --- tiny per-call glue: padded-grid input slab + interior mask ----------
    xg = jnp.pad(x[:, 0], ((0, N_pad - N), (1, 1), (1, 1)))        # (N_pad,Hp,Wp)
    x1 = jnp.transpose(xg, (1, 0, 2)).reshape(ROWS, Wp)            # row = h*N_pad+n
    x1 = jnp.pad(x1, ((N_pad, N_pad), (0, 0))).astype(jnp.bfloat16)
    mh = ((jnp.arange(Hp) >= 1) & (jnp.arange(Hp) <= H)).astype(jnp.float32)
    mw = ((jnp.arange(Wp) >= 1) & (jnp.arange(Wp) <= W)).astype(jnp.float32)
    mask = jnp.repeat(jnp.repeat(mh[:, None] * mw[None, :], N_pad, axis=0),
                      C, axis=1)                                   # (ROWS, WpC)

    def kernel(x1_ref, mask_ref, wc1_ref, bc1_ref, bconv_ref, b1_ref, b2_ref,
               wh_ref, bh_ref, wconv_hbm, w1_hbm, w2_hbm,
               out_ref, abuf_ref, wconv_vmem, w1_vmem, w2_vmem, dma_sem):
        # -- kick off weight prefetch DMAs; they hide behind the conv phase --
        cp_wc = pltpu.make_async_copy(wconv_hbm, wconv_vmem, dma_sem.at[0])
        cp_w1 = pltpu.make_async_copy(w1_hbm, w1_vmem, dma_sem.at[1])
        cp_w2 = pltpu.make_async_copy(w2_hbm, w2_vmem, dma_sem.at[2])
        cp_wc.start()
        cp_w1.start()
        cp_w2.start()

        # -- conv1 (Cin=1): 3 banded matmuls; re-zero ring (padding=1) --------
        abuf_ref[...] = jnp.zeros_like(abuf_ref)      # zero slack rows h=-1,Hp
        a = jnp.zeros((ROWS, WpC), jnp.float32)
        for di in range(3):
            a = a + jnp.dot(x1_ref[pl.ds(di * N_pad, ROWS), :], wc1_ref[di],
                            preferred_element_type=jnp.float32)
        a = jnp.maximum(a + bc1_ref[...], 0.0) * mask_ref[...]
        abuf_ref[pl.ds(N_pad, ROWS), :] = a.astype(jnp.bfloat16)

        # -- conv2..conv4: block-tridiagonal K=Wp*C matmuls, aligned LHS ------
        cp_wc.wait()
        for layer in range(3):
            acc = jnp.zeros((ROWS, WpC), jnp.float32)
            for di in range(3):
                acc = acc + jnp.dot(abuf_ref[pl.ds(di * N_pad, ROWS), :],
                                    wconv_vmem[layer * 3 + di],
                                    preferred_element_type=jnp.float32)
            act = jnp.maximum(acc + bconv_ref[layer], 0.0)
            # NOTE: no ring re-masking needed after conv2..4 -- ring garbage
            # never reaches the valid 4x4 fc1 window.
            abuf_ref[pl.ds(N_pad, ROWS), :] = act.astype(jnp.bfloat16)

        # -- fc1: one K=FH*FW*C matmul on a lane-packed window slab -----------
        pieces = []
        for hh in range(FH):
            v = abuf_ref[pl.ds((4 + hh) * N_pad, N_pad), :]        # (N_pad, WpC)
            pieces.append(v[:, 3 * C:(3 + FW) * C])                # (N_pad, FW*C)
        slab = jnp.concatenate(pieces, axis=1)                     # (N_pad, K1)
        cp_w1.wait()
        h1 = jnp.dot(slab, w1_vmem[...], preferred_element_type=jnp.float32)
        h1 = jnp.maximum(h1 + b1_ref[...], 0.0)
        # TODO(synk): dropout is identity here (inference mode only).

        # -- fc2 ---------------------------------------------------------------
        cp_w2.wait()
        h2 = jnp.dot(h1.astype(jnp.bfloat16), w2_vmem[...],
                     preferred_element_type=jnp.float32)
        h2 = jnp.maximum(h2 + b2_ref[...], 0.0)

        # -- merged heads -> lane-dense (N_pad, 128) output --------------------
        y = jnp.dot(h2.astype(jnp.bfloat16), wh_ref[...],
                    preferred_element_type=jnp.float32) + bh_ref[...]
        col = jax.lax.broadcasted_iota(jnp.int32, y.shape, 1)
        is_pi = col < A
        m = jnp.max(jnp.where(is_pi, y, -jnp.inf), axis=1, keepdims=True)
        e = jnp.where(is_pi, jnp.exp(y - m), 0.0)
        lse = jnp.log(jnp.sum(e, axis=1, keepdims=True)) + m
        out_ref[...] = jnp.where(is_pi, y - lse,
                                 jnp.where(col == A, jnp.tanh(y), 0.0))

    def _full(a):
        nd = a.ndim
        return pl.BlockSpec(a.shape, lambda i, nd=nd: (0,) * nd)

    vmem_args = (x1, mask, prep["wc1"], prep["bc1"], prep["bconv"],
                 prep["b1"], prep["b2"], prep["wh"], prep["bh"])
    out = pl.pallas_call(
        kernel,
        out_shape=jax.ShapeDtypeStruct((N_pad, head_w), jnp.float32),
        grid=(1,),
        in_specs=[_full(a) for a in vmem_args] + [
            pl.BlockSpec(memory_space=pl.ANY),     # wconv stays in HBM
            pl.BlockSpec(memory_space=pl.ANY),     # w1 stays in HBM
            pl.BlockSpec(memory_space=pl.ANY),     # w2 stays in HBM
        ],
        out_specs=pl.BlockSpec((N_pad, head_w), lambda i: (0, 0)),
        scratch_shapes=[
            pltpu.VMEM((BUF_ROWS, WpC), jnp.bfloat16),        # activation grid
            pltpu.VMEM((9, WpC, WpC), jnp.bfloat16),          # banded conv wts
            pltpu.VMEM((K1, F1), jnp.bfloat16),               # fc1 weights
            pltpu.VMEM((F1, F2), jnp.bfloat16),               # fc2 weights
            pltpu.SemaphoreType.DMA((3,)),
        ],
        compiler_params=pltpu.CompilerParams(
            dimension_semantics=("arbitrary",),
            vmem_limit_bytes=32 * 1024 * 1024),
    )(*vmem_args, prep["wconv"], prep["w1"], prep["w2"])

    return out[:N, :A], out[:N, A:A + 1]


# ----------------------------------------------------------------------------
# Pure-JAX reference (no Pallas) for correctness checking -- eval-mode semantics
# ----------------------------------------------------------------------------
def im2col(x, kh, kw, pad):
    N, Cc, H, W = x.shape
    xp = jnp.pad(x, ((0, 0), (0, 0), (pad, pad), (pad, pad)))
    Ho = H + 2 * pad - kh + 1
    Wo = W + 2 * pad - kw + 1
    patches = []
    for di in range(kh):
        for dj in range(kw):
            patches.append(xp[:, :, di:di + Ho, dj:dj + Wo])
    p = jnp.stack(patches, axis=0).reshape(kh, kw, N, Cc, Ho, Wo)
    p = jnp.transpose(p, (2, 4, 5, 3, 0, 1))
    return p.reshape(N * Ho * Wo, Cc * kh * kw), Ho, Wo


def netvp_reference(x, params):
    N = x.shape[0]

    def bn(z, b):
        s = b["gamma"] / jnp.sqrt(b["var"] + EPS)
        return (z - b["mean"]) * s + b["beta"]

    h = x
    for name, bn_name, pad in (("conv1", "bn1", 1), ("conv2", "bn2", 1),
                               ("conv3", "bn3", 0), ("conv4", "bn4", 0)):
        w, b = params[name + "_w"], params[name + "_b"]
        col, Ho, Wo = im2col(h, 3, 3, pad)
        y = jnp.maximum(bn(col @ w.reshape(w.shape[0], -1).T + b, params[bn_name]), 0.0)
        h = y.reshape(N, Ho, Wo, w.shape[0]).transpose(0, 3, 1, 2)

    flat = h.reshape(N, -1)
    h1 = jnp.maximum(bn(flat @ params["fc1_w"].T + params["fc1_b"], params["bn_fc1"]), 0.0)
    h2 = jnp.maximum(bn(h1 @ params["fc2_w"].T + params["fc2_b"], params["bn_fc2"]), 0.0)
    pi = h2 @ params["fc3_w"].T + params["fc3_b"]
    vv = h2 @ params["fc4_w"].T + params["fc4_b"]
    return jax.nn.log_softmax(pi, axis=1), jnp.tanh(vv)


# ----------------------------------------------------------------------------
# Deterministic synthetic parameters (PyTorch layouts)
# ----------------------------------------------------------------------------
def init_params(key, num_channels, action_size, board):
    C = num_channels
    flat_dim = C * (board - 4) * (board - 4)
    ks = iter(jax.random.split(key, 40))
    nrm = lambda shape, s: (s * jax.random.normal(next(ks), shape)).astype(jnp.float32)

    def bn(n):
        return dict(
            gamma=1.0 + 0.05 * jax.random.normal(next(ks), (n,)).astype(jnp.float32),
            beta=0.05 * jax.random.normal(next(ks), (n,)).astype(jnp.float32),
            mean=0.05 * jax.random.normal(next(ks), (n,)).astype(jnp.float32),
            var=1.0 + 0.1 * jax.random.uniform(next(ks), (n,)).astype(jnp.float32),
        )

    p = {}
    p["conv1_w"], p["conv1_b"] = nrm((C, 1, 3, 3), 0.2), nrm((C,), 0.05)
    p["conv2_w"], p["conv2_b"] = nrm((C, C, 3, 3), 0.05), nrm((C,), 0.05)
    p["conv3_w"], p["conv3_b"] = nrm((C, C, 3, 3), 0.05), nrm((C,), 0.05)
    p["conv4_w"], p["conv4_b"] = nrm((C, C, 3, 3), 0.05), nrm((C,), 0.05)
    p["bn1"], p["bn2"], p["bn3"], p["bn4"] = bn(C), bn(C), bn(C), bn(C)
    p["fc1_w"], p["fc1_b"] = nrm((1024, flat_dim), 0.03), nrm((1024,), 0.05)
    p["bn_fc1"] = bn(1024)
    p["fc2_w"], p["fc2_b"] = nrm((512, 1024), 0.03), nrm((512,), 0.05)
    p["bn_fc2"] = bn(512)
    p["fc3_w"], p["fc3_b"] = nrm((action_size, 512), 0.03), nrm((action_size,), 0.05)
    p["fc4_w"], p["fc4_b"] = nrm((1, 512), 0.03), nrm((1,), 0.05)
    return p


# ----------------------------------------------------------------------------
if __name__ == "__main__":
    BATCH = 2
    NUM_CHANNELS = 32
    BOARD = 8                        # 8x8 board -> 4x4 after the two valid convs
    ACTION_SIZE = BOARD * BOARD + 1  # 65

    key = jax.random.PRNGKey(0)
    k_in, k_par = jax.random.split(key)
    x = jax.random.normal(k_in, (BATCH, 1, BOARD, BOARD), dtype=jnp.float32)
    params = init_params(k_par, NUM_CHANNELS, ACTION_SIZE, BOARD)
    prep = prepare_params(params, NUM_CHANNELS, BOARD)

    fwd = jax.jit(netvp_forward, static_argnums=(2,))
    log_pi, v = fwd(x, prep, ACTION_SIZE)
    jax.block_until_ready((log_pi, v))

    # correctness vs. pure-JAX f32 reference of the PyTorch module (eval mode);
    # kernel uses bf16 MXU operands (f32 accumulation) -> slightly looser tol.
    ref_log_pi, ref_v = netvp_reference(x, params)
    assert log_pi.shape == (BATCH, ACTION_SIZE)
    assert v.shape == (BATCH, 1)
    assert jnp.allclose(log_pi, ref_log_pi, atol=1e-2, rtol=1e-2), \
        float(jnp.max(jnp.abs(log_pi - ref_log_pi)))
    assert jnp.allclose(v, ref_v, atol=1e-2, rtol=1e-2), \
        float(jnp.max(jnp.abs(v - ref_v)))
    assert jnp.allclose(jnp.sum(jnp.exp(log_pi), axis=1), 1.0, atol=1e-4)
    print("KERNEL_OK")
</pallas_src>

<mosaic_0001>
module attributes {stable_mosaic.version = 11 : i64} {
  func.func @kernel(%arg0: i32, %arg1: memref<96x10xbf16, #tpu.memory_space<vmem>>, %arg2: memref<80x320xf32, #tpu.memory_space<vmem>>, %arg3: memref<3x10x320xbf16, #tpu.memory_space<vmem>>, %arg4: memref<1x320xf32, #tpu.memory_space<vmem>>, %arg5: memref<3x1x320xf32, #tpu.memory_space<vmem>>, %arg6: memref<1x1024xf32, #tpu.memory_space<vmem>>, %arg7: memref<1x512xf32, #tpu.memory_space<vmem>>, %arg8: memref<512x128xbf16, #tpu.memory_space<vmem>>, %arg9: memref<1x128xf32, #tpu.memory_space<vmem>>, %arg10: memref<9x320x320xbf16, #tpu.memory_space<any>>, %arg11: memref<512x1024xbf16, #tpu.memory_space<any>>, %arg12: memref<1024x512xbf16, #tpu.memory_space<any>>, %arg13: memref<8x128xf32, #tpu.memory_space<vmem>>, %arg14: memref<96x320xbf16, #tpu.memory_space<vmem>>, %arg15: memref<9x320x320xbf16, #tpu.memory_space<vmem>>, %arg16: memref<512x1024xbf16, #tpu.memory_space<vmem>>, %arg17: memref<1024x512xbf16, #tpu.memory_space<vmem>>, %arg18: memref<3x!tpu.dma_semaphore, #tpu.memory_space<semaphore_mem>>) attributes {dimension_semantics = [#tpu.dimension_semantics<arbitrary>], iteration_bounds = array<i64: 1>, scalar_prefetch = 0 : i64, scratch_operands = 5 : i64, tpu.core_type = #tpu.core_type<tc>, window_params = [{pipeline_mode = #tpu.pipeline_mode<synchronous>, transform_indices = @transform_0, window_bounds = array<i64: 96, 10>}, {pipeline_mode = #tpu.pipeline_mode<synchronous>, transform_indices = @transform_1, window_bounds = array<i64: 80, 320>}, {pipeline_mode = #tpu.pipeline_mode<synchronous>, transform_indices = @transform_2, window_bounds = array<i64: 3, 10, 320>}, {pipeline_mode = #tpu.pipeline_mode<synchronous>, transform_indices = @transform_3, window_bounds = array<i64: 1, 320>}, {pipeline_mode = #tpu.pipeline_mode<synchronous>, transform_indices = @transform_4, window_bounds = array<i64: 3, 1, 320>}, {pipeline_mode = #tpu.pipeline_mode<synchronous>, transform_indices = @transform_5, window_bounds = array<i64: 1, 1024>}, {pipeline_mode = #tpu.pipeline_mode<synchronous>, transform_indices = @transform_6, window_bounds = array<i64: 1, 512>}, {pipeline_mode = #tpu.pipeline_mode<synchronous>, transform_indices = @transform_7, window_bounds = array<i64: 512, 128>}, {pipeline_mode = #tpu.pipeline_mode<synchronous>, transform_indices = @transform_8, window_bounds = array<i64: 1, 128>}, {}, {}, {}, {pipeline_mode = #tpu.pipeline_mode<synchronous>, transform_indices = @transform_12, window_bounds = array<i64: 8, 128>}]} {
    %c0_i32 = arith.constant 0 : i32
    %0 = tpu.memref_slice %arg18[%c0_i32] : memref<3x!tpu.dma_semaphore, #tpu.memory_space<semaphore_mem>> -> memref<1x!tpu.dma_semaphore, #tpu.memory_space<semaphore_mem>>
    %1 = tpu.memref_squeeze %0 : memref<1x!tpu.dma_semaphore, #tpu.memory_space<semaphore_mem>> -> memref<!tpu.dma_semaphore, #tpu.memory_space<semaphore_mem>>
    tpu.enqueue_dma source(%arg10 : memref<9x320x320xbf16, #tpu.memory_space<any>>) target(%arg15 : memref<9x320x320xbf16, #tpu.memory_space<vmem>>) target_semaphore(%1 : memref<!tpu.dma_semaphore, #tpu.memory_space<semaphore_mem>>)
    %c1_i32 = arith.constant 1 : i32
    %2 = tpu.memref_slice %arg18[%c1_i32] : memref<3x!tpu.dma_semaphore, #tpu.memory_space<semaphore_mem>> -> memref<1x!tpu.dma_semaphore, #tpu.memory_space<semaphore_mem>>
    %3 = tpu.memref_squeeze %2 : memref<1x!tpu.dma_semaphore, #tpu.memory_space<semaphore_mem>> -> memref<!tpu.dma_semaphore, #tpu.memory_space<semaphore_mem>>
    tpu.enqueue_dma source(%arg11 : memref<512x1024xbf16, #tpu.memory_space<any>>) target(%arg16 : memref<512x1024xbf16, #tpu.memory_space<vmem>>) target_semaphore(%3 : memref<!tpu.dma_semaphore, #tpu.memory_space<semaphore_mem>>)
    %c2_i32 = arith.constant 2 : i32
    %4 = tpu.memref_slice %arg18[%c2_i32] : memref<3x!tpu.dma_semaphore, #tpu.memory_space<semaphore_mem>> -> memref<1x!tpu.dma_semaphore, #tpu.memory_space<semaphore_mem>>
    %5 = tpu.memref_squeeze %4 : memref<1x!tpu.dma_semaphore, #tpu.memory_space<semaphore_mem>> -> memref<!tpu.dma_semaphore, #tpu.memory_space<semaphore_mem>>
    tpu.enqueue_dma source(%arg12 : memref<1024x512xbf16, #tpu.memory_space<any>>) target(%arg17 : memref<1024x512xbf16, #tpu.memory_space<vmem>>) target_semaphore(%5 : memref<!tpu.dma_semaphore, #tpu.memory_space<semaphore_mem>>)
    %cst = arith.constant 0.000000e+00 : bf16
    %6 = vector.broadcast %cst : bf16 to vector<96x320xbf16>
    %c0 = arith.constant 0 : index
    %c0_0 = arith.constant 0 : index
    %7 = vector.load %arg14[%c0, %c0_0] : memref<96x320xbf16, #tpu.memory_space<vmem>>, vector<96x320xbf16>
    tpu.vector_store %arg14[%c0, %c0_0], %6 {strides = array<i32>} : memref<96x320xbf16, #tpu.memory_space<vmem>>, vector<96x320xbf16>,
    %cst_1 = arith.constant 0.000000e+00 : f32
    %8 = vector.broadcast %cst_1 : f32 to vector<80x320xf32>
    %c0_2 = arith.constant 0 : index
    %c0_3 = arith.constant 0 : index
    %9 = vector.load %arg1[%c0_2, %c0_3] : memref<96x10xbf16, #tpu.memory_space<vmem>>, vector<80x10xbf16>
    %c0_4 = arith.constant 0 : index
    %c0_5 = arith.constant 0 : index
    %c0_6 = arith.constant 0 : index
    %10 = vector.load %arg3[%c0_4, %c0_5, %c0_6] : memref<3x10x320xbf16, #tpu.memory_space<vmem>>, vector<1x10x320xbf16>
    %11 = vector.shape_cast %10 : vector<1x10x320xbf16> to vector<10x320xbf16>
    %cst_7 = arith.constant dense<0.000000e+00> : vector<80x320xf32>
    %12 = tpu.matmul %9, %11, %cst_7 {dimension_numbers = #tpu.dot_dimension_numbers<[1], [0], [0], [1], [0, 0, 1, 1], [], []>} : vector<80x10xbf16>, vector<10x320xbf16>, vector<80x320xf32> -> vector<80x320xf32>
    %13 = arith.addf %8, %12 : vector<80x320xf32>
    %c8 = arith.constant 8 : index
    %c0_8 = arith.constant 0 : index
    %14 = vector.load %arg1[%c8, %c0_8] : memref<96x10xbf16, #tpu.memory_space<vmem>>, vector<80x10xbf16>
    %c1 = arith.constant 1 : index
    %c0_9 = arith.constant 0 : index
    %c0_10 = arith.constant 0 : index
    %15 = vector.load %arg3[%c1, %c0_9, %c0_10] : memref<3x10x320xbf16, #tpu.memory_space<vmem>>, vector<1x10x320xbf16>
    %16 = vector.shape_cast %15 : vector<1x10x320xbf16> to vector<10x320xbf16>
    %cst_11 = arith.constant dense<0.000000e+00> : vector<80x320xf32>
    %17 = tpu.matmul %14, %16, %cst_11 {dimension_numbers = #tpu.dot_dimension_numbers<[1], [0], [0], [1], [0, 0, 1, 1], [], []>} : vector<80x10xbf16>, vector<10x320xbf16>, vector<80x320xf32> -> vector<80x320xf32>
    %18 = arith.addf %13, %17 : vector<80x320xf32>
    %c16 = arith.constant 16 : index
    %c0_12 = arith.constant 0 : index
    %19 = vector.load %arg1[%c16, %c0_12] : memref<96x10xbf16, #tpu.memory_space<vmem>>, vector<80x10xbf16>
    %c2 = arith.constant 2 : index
    %c0_13 = arith.constant 0 : index
    %c0_14 = arith.constant 0 : index
    %20 = vector.load %arg3[%c2, %c0_13, %c0_14] : memref<3x10x320xbf16, #tpu.memory_space<vmem>>, vector<1x10x320xbf16>
    %21 = vector.shape_cast %20 : vector<1x10x320xbf16> to vector<10x320xbf16>
    %cst_15 = arith.constant dense<0.000000e+00> : vector<80x320xf32>
    %22 = tpu.matmul %19, %21, %cst_15 {dimension_numbers = #tpu.dot_dimension_numbers<[1], [0], [0], [1], [0, 0, 1, 1], [], []>} : vector<80x10xbf16>, vector<10x320xbf16>, vector<80x320xf32> -> vector<80x320xf32>
    %23 = arith.addf %18, %22 : vector<80x320xf32>
    %c0_16 = arith.constant 0 : index
    %c0_17 = arith.constant 0 : index
    %24 = vector.load %arg4[%c0_16, %c0_17] : memref<1x320xf32, #tpu.memory_space<vmem>>, vector<1x320xf32>
    %25 = vector.broadcast %24 : vector<1x320xf32> to vector<80x320xf32>
    %26 = arith.addf %23, %25 : vector<80x320xf32>
    %cst_18 = arith.constant 0.000000e+00 : f32
    %27 = vector.broadcast %cst_18 : f32 to vector<80x320xf32>
    %28 = arith.maximumf %26, %27 : vector<80x320xf32>
    %c0_19 = arith.constant 0 : index
    %c0_20 = arith.constant 0 : index
    %29 = vector.load %arg2[%c0_19, %c0_20] : memref<80x320xf32, #tpu.memory_space<vmem>>, vector<80x320xf32>
    %30 = arith.mulf %28, %29 : vector<80x320xf32>
    %31 = arith.truncf %30 : vector<80x320xf32> to vector<80x320xbf16>
    %c8_21 = arith.constant 8 : index
    %c0_22 = arith.constant 0 : index
    %32 = vector.load %arg14[%c8_21, %c0_22] : memref<96x320xbf16, #tpu.memory_space<vmem>>, vector<80x320xbf16>
    tpu.vector_store %arg14[%c8_21, %c0_22], %31 {strides = array<i32>} : memref<96x320xbf16, #tpu.memory_space<vmem>>, vector<80x320xbf16>,
    %c0_i32_23 = arith.constant 0 : i32
    %33 = tpu.memref_slice %arg18[%c0_i32_23] : memref<3x!tpu.dma_semaphore, #tpu.memory_space<semaphore_mem>> -> memref<1x!tpu.dma_semaphore, #tpu.memory_space<semaphore_mem>>
    %34 = tpu.memref_squeeze %33 : memref<1x!tpu.dma_semaphore, #tpu.memory_space<semaphore_mem>> -> memref<!tpu.dma_semaphore, #tpu.memory_space<semaphore_mem>>
    tpu.wait_dma2 semaphore(%34 : memref<!tpu.dma_semaphore, #tpu.memory_space<semaphore_mem>>) src(%arg10 : memref<9x320x320xbf16, #tpu.memory_space<any>>) dst(%arg15 : memref<9x320x320xbf16, #tpu.memory_space<vmem>>)
    %cst_24 = arith.constant 0.000000e+00 : f32
    %35 = vector.broadcast %cst_24 : f32 to vector<80x320xf32>
    %c0_25 = arith.constant 0 : index
    %c0_26 = arith.constant 0 : index
    %36 = vector.load %arg14[%c0_25, %c0_26] : memref<96x320xbf16, #tpu.memory_space<vmem>>, vector<80x320xbf16>
    %c0_27 = arith.constant 0 : index
    %c0_28 = arith.constant 0 : index
    %c0_29 = arith.constant 0 : index
    %37 = vector.load %arg15[%c0_27, %c0_28, %c0_29] : memref<9x320x320xbf16, #tpu.memory_space<vmem>>, vector<1x320x320xbf16>
    %38 = vector.shape_cast %37 : vector<1x320x320xbf16> to vector<320x320xbf16>
    %cst_30 = arith.constant dense<0.000000e+00> : vector<80x320xf32>
    %39 = tpu.matmul %36, %38, %cst_30 {dimension_numbers = #tpu.dot_dimension_numbers<[1], [0], [0], [1], [0, 0, 1, 1], [], []>} : vector<80x320xbf16>, vector<320x320xbf16>, vector<80x320xf32> -> vector<80x320xf32>
    %40 = arith.addf %35, %39 : vector<80x320xf32>
    %c8_31 = arith.constant 8 : index
    %c0_32 = arith.constant 0 : index
    %41 = vector.load %arg14[%c8_31, %c0_32] : memref<96x320xbf16, #tpu.memory_space<vmem>>, vector<80x320xbf16>
    %c1_33 = arith.constant 1 : index
    %c0_34 = arith.constant 0 : index
    %c0_35 = arith.constant 0 : index
    %42 = vector.load %arg15[%c1_33, %c0_34, %c0_35] : memref<9x320x320xbf16, #tpu.memory_space<vmem>>, vector<1x320x320xbf16>
    %43 = vector.shape_cast %42 : vector<1x320x320xbf16> to vector<320x320xbf16>
    %cst_36 = arith.constant dense<0.000000e+00> : vector<80x320xf32>
    %44 = tpu.matmul %41, %43, %cst_36 {dimension_numbers = #tpu.dot_dimension_numbers<[1], [0], [0], [1], [0, 0, 1, 1], [], []>} : vector<80x320xbf16>, vector<320x320xbf16>, vector<80x320xf32> -> vector<80x320xf32>
    %45 = arith.addf %40, %44 : vector<80x320xf32>
    %c16_37 = arith.constant 16 : index
    %c0_38 = arith.constant 0 : index
    %46 = vector.load %arg14[%c16_37, %c0_38] : memref<96x320xbf16, #tpu.memory_space<vmem>>, vector<80x320xbf16>
    %c2_39 = arith.constant 2 : index
    %c0_40 = arith.constant 0 : index
    %c0_41 = arith.constant 0 : index
    %47 = vector.load %arg15[%c2_39, %c0_40, %c0_41] : memref<9x320x320xbf16, #tpu.memory_space<vmem>>, vector<1x320x320xbf16>
    %48 = vector.shape_cast %47 : vector<1x320x320xbf16> to vector<320x320xbf16>
    %cst_42 = arith.constant dense<0.000000e+00> : vector<80x320xf32>
    %49 = tpu.matmul %46, %48, %cst_42 {dimension_numbers = #tpu.dot_dimension_numbers<[1], [0], [0], [1], [0, 0, 1, 1], [], []>} : vector<80x320xbf16>, vector<320x320xbf16>, vector<80x320xf32> -> vector<80x320xf32>
    %50 = arith.addf %45, %49 : vector<80x320xf32>
    %c0_43 = arith.constant 0 : index
    %c0_44 = arith.constant 0 : index
    %c0_45 = arith.constant 0 : index
    %51 = vector.load %arg5[%c0_43, %c0_44, %c0_45] : memref<3x1x320xf32, #tpu.memory_space<vmem>>, vector<1x1x320xf32>
    %52 = vector.shape_cast %51 : vector<1x1x320xf32> to vector<1x320xf32>
    %53 = vector.broadcast %52 : vector<1x320xf32> to vector<80x320xf32>
    %54 = arith.addf %50, %53 : vector<80x320xf32>
    %cst_46 = arith.constant 0.000000e+00 : f32
    %55 = vector.broadcast %cst_46 : f32 to vector<80x320xf32>
    %56 = arith.maximumf %54, %55 : vector<80x320xf32>
    %57 = arith.truncf %56 : vector<80x320xf32> to vector<80x320xbf16>
    %c8_47 = arith.constant 8 : index
    %c0_48 = arith.constant 0 : index
    %58 = vector.load %arg14[%c8_47, %c0_48] : memref<96x320xbf16, #tpu.memory_space<vmem>>, vector<80x320xbf16>
    tpu.vector_store %arg14[%c8_47, %c0_48], %57 {strides = array<i32>} : memref<96x320xbf16, #tpu.memory_space<vmem>>, vector<80x320xbf16>,
    %cst_49 = arith.constant 0.000000e+00 : f32
    %59 = vector.broadcast %cst_49 : f32 to vector<80x320xf32>
    %c0_50 = arith.constant 0 : index
    %c0_51 = arith.constant 0 : index
    %60 = vector.load %arg14[%c0_50, %c0_51] : memref<96x320xbf16, #tpu.memory_space<vmem>>, vector<80x320xbf16>
    %c3 = arith.constant 3 : index
    %c0_52 = arith.constant 0 : index
    %c0_53 = arith.constant 0 : index
    %61 = vector.load %arg15[%c3, %c0_52, %c0_53] : memref<9x320x320xbf16, #tpu.memory_space<vmem>>, vector<1x320x320xbf16>
    %62 = vector.shape_cast %61 : vector<1x320x320xbf16> to vector<320x320xbf16>
    %cst_54 = arith.constant dense<0.000000e+00> : vector<80x320xf32>
    %63 = tpu.matmul %60, %62, %cst_54 {dimension_numbers = #tpu.dot_dimension_numbers<[1], [0], [0], [1], [0, 0, 1, 1], [], []>} : vector<80x320xbf16>, vector<320x320xbf16>, vector<80x320xf32> -> vector<80x320xf32>
    %64 = arith.addf %59, %63 : vector<80x320xf32>
    %c8_55 = arith.constant 8 : index
    %c0_56 = arith.constant 0 : index
    %65 = vector.load %arg14[%c8_55, %c0_56] : memref<96x320xbf16, #tpu.memory_space<vmem>>, vector<80x320xbf16>
    %c4 = arith.constant 4 : index
    %c0_57 = arith.constant 0 : index
    %c0_58 = arith.constant 0 : index
    %66 = vector.load %arg15[%c4, %c0_57, %c0_58] : memref<9x320x320xbf16, #tpu.memory_space<vmem>>, vector<1x320x320xbf16>
    %67 = vector.shape_cast %66 : vector<1x320x320xbf16> to vector<320x320xbf16>
    %cst_59 = arith.constant dense<0.000000e+00> : vector<80x320xf32>
    %68 = tpu.matmul %65, %67, %cst_59 {dimension_numbers = #tpu.dot_dimension_numbers<[1], [0], [0], [1], [0, 0, 1, 1], [], []>} : vector<80x320xbf16>, vector<320x320xbf16>, vector<80x320xf32> -> vector<80x320xf32>
    %69 = arith.addf %64, %68 : vector<80x320xf32>
    %c16_60 = arith.constant 16 : index
    %c0_61 = arith.constant 0 : index
    %70 = vector.load %arg14[%c16_60, %c0_61] : memref<96x320xbf16, #tpu.memory_space<vmem>>, vector<80x320xbf16>
    %c5 = arith.constant 5 : index
    %c0_62 = arith.constant 0 : index
    %c0_63 = arith.constant 0 : index
    %71 = vector.load %arg15[%c5, %c0_62, %c0_63] : memref<9x320x320xbf16, #tpu.memory_space<vmem>>, vector<1x320x320xbf16>
    %72 = vector.shape_cast %71 : vector<1x320x320xbf16> to vector<320x320xbf16>
    %cst_64 = arith.constant dense<0.000000e+00> : vector<80x320xf32>
    %73 = tpu.matmul %70, %72, %cst_64 {dimension_numbers = #tpu.dot_dimension_numbers<[1], [0], [0], [1], [0, 0, 1, 1], [], []>} : vector<80x320xbf16>, vector<320x320xbf16>, vector<80x320xf32> -> vector<80x320xf32>
    %74 = arith.addf %69, %73 : vector<80x320xf32>
    %c1_65 = arith.constant 1 : index
    %c0_66 = arith.constant 0 : index
    %c0_67 = arith.constant 0 : index
    %75 = vector.load %arg5[%c1_65, %c0_66, %c0_67] : memref<3x1x320xf32, #tpu.memory_space<vmem>>, vector<1x1x320xf32>
    %76 = vector.shape_cast %75 : vector<1x1x320xf32> to vector<1x320xf32>
    %77 = vector.broadcast %76 : vector<1x320xf32> to vector<80x320xf32>
    %78 = arith.addf %74, %77 : vector<80x320xf32>
    %cst_68 = arith.constant 0.000000e+00 : f32
    %79 = vector.broadcast %cst_68 : f32 to vector<80x320xf32>
    %80 = arith.maximumf %78, %79 : vector<80x320xf32>
    %81 = arith.truncf %80 : vector<80x320xf32> to vector<80x320xbf16>
    %c8_69 = arith.constant 8 : index
    %c0_70 = arith.constant 0 : index
    %82 = vector.load %arg14[%c8_69, %c0_70] : memref<96x320xbf16, #tpu.memory_space<vmem>>, vector<80x320xbf16>
    tpu.vector_store %arg14[%c8_69, %c0_70], %81 {strides = array<i32>} : memref<96x320xbf16, #tpu.memory_space<vmem>>, vector<80x320xbf16>,
    %cst_71 = arith.constant 0.000000e+00 : f32
    %83 = vector.broadcast %cst_71 : f32 to vector<80x320xf32>
    %c0_72 = arith.constant 0 : index
    %c0_73 = arith.constant 0 : index
    %84 = vector.load %arg14[%c0_72, %c0_73] : memref<96x320xbf16, #tpu.memory_space<vmem>>, vector<80x320xbf16>
    %c6 = arith.constant 6 : index
    %c0_74 = arith.constant 0 : index
    %c0_75 = arith.constant 0 : index
    %85 = vector.load %arg15[%c6, %c0_74, %c0_75] : memref<9x320x320xbf16, #tpu.memory_space<vmem>>, vector<1x320x320xbf16>
    %86 = vector.shape_cast %85 : vector<1x320x320xbf16> to vector<320x320xbf16>
    %cst_76 = arith.constant dense<0.000000e+00> : vector<80x320xf32>
    %87 = tpu.matmul %84, %86, %cst_76 {dimension_numbers = #tpu.dot_dimension_numbers<[1], [0], [0], [1], [0, 0, 1, 1], [], []>} : vector<80x320xbf16>, vector<320x320xbf16>, vector<80x320xf32> -> vector<80x320xf32>
    %88 = arith.addf %83, %87 : vector<80x320xf32>
    %c8_77 = arith.constant 8 : index
    %c0_78 = arith.constant 0 : index
    %89 = vector.load %arg14[%c8_77, %c0_78] : memref<96x320xbf16, #tpu.memory_space<vmem>>, vector<80x320xbf16>
    %c7 = arith.constant 7 : index
    %c0_79 = arith.constant 0 : index
    %c0_80 = arith.constant 0 : index
    %90 = vector.load %arg15[%c7, %c0_79, %c0_80] : memref<9x320x320xbf16, #tpu.memory_space<vmem>>, vector<1x320x320xbf16>
    %91 = vector.shape_cast %90 : vector<1x320x320xbf16> to vector<320x320xbf16>
    %cst_81 = arith.constant dense<0.000000e+00> : vector<80x320xf32>
    %92 = tpu.matmul %89, %91, %cst_81 {dimension_numbers = #tpu.dot_dimension_numbers<[1], [0], [0], [1], [0, 0, 1, 1], [], []>} : vector<80x320xbf16>, vector<320x320xbf16>, vector<80x320xf32> -> vector<80x320xf32>
    %93 = arith.addf %88, %92 : vector<80x320xf32>
    %c16_82 = arith.constant 16 : index
    %c0_83 = arith.constant 0 : index
    %94 = vector.load %arg14[%c16_82, %c0_83] : memref<96x320xbf16, #tpu.memory_space<vmem>>, vector<80x320xbf16>
    %c8_84 = arith.constant 8 : index
    %c0_85 = arith.constant 0 : index
    %c0_86 = arith.constant 0 : index
    %95 = vector.load %arg15[%c8_84, %c0_85, %c0_86] : memref<9x320x320xbf16, #tpu.memory_space<vmem>>, vector<1x320x320xbf16>
    %96 = vector.shape_cast %95 : vector<1x320x320xbf16> to vector<320x320xbf16>
    %cst_87 = arith.constant dense<0.000000e+00> : vector<80x320xf32>
    %97 = tpu.matmul %94, %96, %cst_87 {dimension_numbers = #tpu.dot_dimension_numbers<[1], [0], [0], [1], [0, 0, 1, 1], [], []>} : vector<80x320xbf16>, vector<320x320xbf16>, vector<80x320xf32> -> vector<80x320xf32>
    %98 = arith.addf %93, %97 : vector<80x320xf32>
    %c2_88 = arith.constant 2 : index
    %c0_89 = arith.constant 0 : index
    %c0_90 = arith.constant 0 : index
    %99 = vector.load %arg5[%c2_88, %c0_89, %c0_90] : memref<3x1x320xf32, #tpu.memory_space<vmem>>, vector<1x1x320xf32>
    %100 = vector.shape_cast %99 : vector<1x1x320xf32> to vector<1x320xf32>
    %101 = vector.broadcast %100 : vector<1x320xf32> to vector<80x320xf32>
    %102 = arith.addf %98, %101 : vector<80x320xf32>
    %cst_91 = arith.constant 0.000000e+00 : f32
    %103 = vector.broadcast %cst_91 : f32 to vector<80x320xf32>
    %104 = arith.maximumf %102, %103 : vector<80x320xf32>
    %105 = arith.truncf %104 : vector<80x320xf32> to vector<80x320xbf16>
    %c8_92 = arith.constant 8 : index
    %c0_93 = arith.constant 0 : index
    %106 = vector.load %arg14[%c8_92, %c0_93] : memref<96x320xbf16, #tpu.memory_space<vmem>>, vector<80x320xbf16>
    tpu.vector_store %arg14[%c8_92, %c0_93], %105 {strides = array<i32>} : memref<96x320xbf16, #tpu.memory_space<vmem>>, vector<80x320xbf16>,
    %c32 = arith.constant 32 : index
    %c0_94 = arith.constant 0 : index
    %107 = vector.load %arg14[%c32, %c0_94] : memref<96x320xbf16, #tpu.memory_space<vmem>>, vector<8x320xbf16>
    %108 = vector.extract_strided_slice %107 {offsets = [0, 96], sizes = [8, 128], strides = [1, 1]} : vector<8x320xbf16> to vector<8x128xbf16>
    %c40 = arith.constant 40 : index
    %c0_95 = arith.constant 0 : index
    %109 = vector.load %arg14[%c40, %c0_95] : memref<96x320xbf16, #tpu.memory_space<vmem>>, vector<8x320xbf16>
    %110 = vector.extract_strided_slice %109 {offsets = [0, 96], sizes = [8, 128], strides = [1, 1]} : vector<8x320xbf16> to vector<8x128xbf16>
    %c48 = arith.constant 48 : index
    %c0_96 = arith.constant 0 : index
    %111 = vector.load %arg14[%c48, %c0_96] : memref<96x320xbf16, #tpu.memory_space<vmem>>, vector<8x320xbf16>
    %112 = vector.extract_strided_slice %111 {offsets = [0, 96], sizes = [8, 128], strides = [1, 1]} : vector<8x320xbf16> to vector<8x128xbf16>
    %c56 = arith.constant 56 : index
    %c0_97 = arith.constant 0 : index
    %113 = vector.load %arg14[%c56, %c0_97] : memref<96x320xbf16, #tpu.memory_space<vmem>>, vector<8x320xbf16>
    %114 = vector.extract_strided_slice %113 {offsets = [0, 96], sizes = [8, 128], strides = [1, 1]} : vector<8x320xbf16> to vector<8x128xbf16>
    %115 = tpu.concatenate %108, %110, %112, %114 in 1 : vector<8x128xbf16>, vector<8x128xbf16>, vector<8x128xbf16>, vector<8x128xbf16> -> vector<8x512xbf16>
    %c1_i32_98 = arith.constant 1 : i32
    %116 = tpu.memref_slice %arg18[%c1_i32_98] : memref<3x!tpu.dma_semaphore, #tpu.memory_space<semaphore_mem>> -> memref<1x!tpu.dma_semaphore, #tpu.memory_space<semaphore_mem>>
    %117 = tpu.memref_squeeze %116 : memref<1x!tpu.dma_semaphore, #tpu.memory_space<semaphore_mem>> -> memref<!tpu.dma_semaphore, #tpu.memory_space<semaphore_mem>>
    tpu.wait_dma2 semaphore(%117 : memref<!tpu.dma_semaphore, #tpu.memory_space<semaphore_mem>>) src(%arg11 : memref<512x1024xbf16, #tpu.memory_space<any>>) dst(%arg16 : memref<512x1024xbf16, #tpu.memory_space<vmem>>)
    %c0_99 = arith.constant 0 : index
    %c0_100 = arith.constant 0 : index
    %118 = vector.load %arg16[%c0_99, %c0_100] : memref<512x1024xbf16, #tpu.memory_space<vmem>>, vector<512x1024xbf16>
    %cst_101 = arith.constant dense<0.000000e+00> : vector<8x1024xf32>
    %119 = tpu.matmul %115, %118, %cst_101 {dimension_numbers = #tpu.dot_dimension_numbers<[1], [0], [0], [1], [0, 0, 1, 1], [], []>} : vector<8x512xbf16>, vector<512x1024xbf16>, vector<8x1024xf32> -> vector<8x1024xf32>
    %c0_102 = arith.constant 0 : index
    %c0_103 = arith.constant 0 : index
    %120 = vector.load %arg6[%c0_102, %c0_103] : memref<1x1024xf32, #tpu.memory_space<vmem>>, vector<1x1024xf32>
    %121 = vector.broadcast %120 : vector<1x1024xf32> to vector<8x1024xf32>
    %122 = arith.addf %119, %121 : vector<8x1024xf32>
    %cst_104 = arith.constant 0.000000e+00 : f32
    %123 = vector.broadcast %cst_104 : f32 to vector<8x1024xf32>
    %124 = arith.maximumf %122, %123 : vector<8x1024xf32>
    %c2_i32_105 = arith.constant 2 : i32
    %125 = tpu.memref_slice %arg18[%c2_i32_105] : memref<3x!tpu.dma_semaphore, #tpu.memory_space<semaphore_mem>> -> memref<1x!tpu.dma_semaphore, #tpu.memory_space<semaphore_mem>>
    %126 = tpu.memref_squeeze %125 : memref<1x!tpu.dma_semaphore, #tpu.memory_space<semaphore_mem>> -> memref<!tpu.dma_semaphore, #tpu.memory_space<semaphore_mem>>
    tpu.wait_dma2 semaphore(%126 : memref<!tpu.dma_semaphore, #tpu.memory_space<semaphore_mem>>) src(%arg12 : memref<1024x512xbf16, #tpu.memory_space<any>>) dst(%arg17 : memref<1024x512xbf16, #tpu.memory_space<vmem>>)
    %127 = arith.truncf %124 : vector<8x1024xf32> to vector<8x1024xbf16>
    %c0_106 = arith.constant 0 : index
    %c0_107 = arith.constant 0 : index
    %128 = vector.load %arg17[%c0_106, %c0_107] : memref<1024x512xbf16, #tpu.memory_space<vmem>>, vector<1024x512xbf16>
    %cst_108 = arith.constant dense<0.000000e+00> : vector<8x512xf32>
    %129 = tpu.matmul %127, %128, %cst_108 {dimension_numbers = #tpu.dot_dimension_numbers<[1], [0], [0], [1], [0, 0, 1, 1], [], []>} : vector<8x1024xbf16>, vector<1024x512xbf16>, vector<8x512xf32> -> vector<8x512xf32>
    %c0_109 = arith.constant 0 : index
    %c0_110 = arith.constant 0 : index
    %130 = vector.load %arg7[%c0_109, %c0_110] : memref<1x512xf32, #tpu.memory_space<vmem>>, vector<1x512xf32>
    %131 = vector.broadcast %130 : vector<1x512xf32> to vector<8x512xf32>
    %132 = arith.addf %129, %131 : vector<8x512xf32>
    %cst_111 = arith.constant 0.000000e+00 : f32
    %133 = vector.broadcast %cst_111 : f32 to vector<8x512xf32>
    %134 = arith.maximumf %132, %133 : vector<8x512xf32>
    %135 = arith.truncf %134 : vector<8x512xf32> to vector<8x512xbf16>
    %c0_112 = arith.constant 0 : index
    %c0_113 = arith.constant 0 : index
    %136 = vector.load %arg8[%c0_112, %c0_113] : memref<512x128xbf16, #tpu.memory_space<vmem>>, vector<512x128xbf16>
    %cst_114 = arith.constant dense<0.000000e+00> : vector<8x128xf32>
    %137 = tpu.matmul %135, %136, %cst_114 {dimension_numbers = #tpu.dot_dimension_numbers<[1], [0], [0], [1], [0, 0, 1, 1], [], []>} : vector<8x512xbf16>, vector<512x128xbf16>, vector<8x128xf32> -> vector<8x128xf32>
    %c0_115 = arith.constant 0 : index
    %c0_116 = arith.constant 0 : index
    %138 = vector.load %arg9[%c0_115, %c0_116] : memref<1x128xf32, #tpu.memory_space<vmem>>, vector<1x128xf32>
    %139 = vector.broadcast %138 : vector<1x128xf32> to vector<8x128xf32>
    %140 = arith.addf %137, %139 : vector<8x128xf32>
    %141 = tpu.iota {dimensions = array<i32: 1>} : vector<8x128xi32>
    %c65_i32 = arith.constant 65 : i32
    %142 = vector.broadcast %c65_i32 : i32 to vector<8x128xi32>
    %143 = arith.cmpi slt, %141, %142 : vector<8x128xi32>
    %cst_117 = arith.constant 0xFF800000 : f32
    %144 = vector.broadcast %cst_117 : f32 to vector<8x128xf32>
    %145 = arith.select %143, %140, %144 : vector<8x128xi1>, vector<8x128xf32>
    %cst_118 = arith.constant dense<0xFF800000> : vector<8xf32>
    %146 = vector.multi_reduction <maximumf>, %145, %cst_118 [1] : vector<8x128xf32> to vector<8xf32>
    %147 = vector.shape_cast %146 : vector<8xf32> to vector<8x1xf32>
    %148 = vector.broadcast %147 : vector<8x1xf32> to vector<8x128xf32>
    %149 = arith.subf %140, %148 : vector<8x128xf32>
    %150 = math.exp %149 : vector<8x128xf32>
    %cst_119 = arith.constant 0.000000e+00 : f32
    %151 = vector.broadcast %cst_119 : f32 to vector<8x128xf32>
    %152 = arith.select %143, %150, %151 : vector<8x128xi1>, vector<8x128xf32>
    %cst_120 = arith.constant dense<0.000000e+00> : vector<8xf32>
    %153 = vector.multi_reduction <add>, %152, %cst_120 [1] : vector<8x128xf32> to vector<8xf32>
    %154 = vector.shape_cast %153 : vector<8xf32> to vector<8x1xf32>
    %155 = math.log %154 : vector<8x1xf32>
    %156 = arith.addf %155, %147 : vector<8x1xf32>
    %157 = vector.broadcast %156 : vector<8x1xf32> to vector<8x128xf32>
    %158 = arith.subf %140, %157 : vector<8x128xf32>
    %c65_i32_121 = arith.constant 65 : i32
    %159 = vector.broadcast %c65_i32_121 : i32 to vector<8x128xi32>
    %160 = arith.cmpi eq, %141, %159 : vector<8x128xi32>
    %161 = math.tanh %140 : vector<8x128xf32>
    %cst_122 = arith.constant 0.000000e+00 : f32
    %162 = vector.broadcast %cst_122 : f32 to vector<8x128xf32>
    %163 = arith.select %160, %161, %162 : vector<8x128xi1>, vector<8x128xf32>
    %164 = arith.select %143, %158, %163 : vector<8x128xi1>, vector<8x128xf32>
    %c0_123 = arith.constant 0 : index
    %c0_124 = arith.constant 0 : index
    %165 = vector.load %arg13[%c0_123, %c0_124] : memref<8x128xf32, #tpu.memory_space<vmem>>, vector<8x128xf32>
    tpu.vector_store %arg13[%c0_123, %c0_124], %164 {strides = array<i32>} : memref<8x128xf32, #tpu.memory_space<vmem>>, vector<8x128xf32>,
    return
  }
  func.func @transform_0(%arg0: i32) -> (i32, i32) {
    %c0_i32 = arith.constant 0 : i32
    %c0_i32_0 = arith.constant 0 : i32
    %c0_i32_1 = arith.constant 0 : i32
    return %c0_i32, %c0_i32_0 : i32, i32
  }
  func.func @transform_1(%arg0: i32) -> (i32, i32) {
    %c0_i32 = arith.constant 0 : i32
    %c0_i32_0 = arith.constant 0 : i32
    %c0_i32_1 = arith.constant 0 : i32
    return %c0_i32, %c0_i32_0 : i32, i32
  }
  func.func @transform_2(%arg0: i32) -> (i32, i32, i32) {
    %c0_i32 = arith.constant 0 : i32
    %c0_i32_0 = arith.constant 0 : i32
    %c0_i32_1 = arith.constant 0 : i32
    %c0_i32_2 = arith.constant 0 : i32
    return %c0_i32, %c0_i32_0, %c0_i32_1 : i32, i32, i32
  }
  func.func @transform_3(%arg0: i32) -> (i32, i32) {
    %c0_i32 = arith.constant 0 : i32
    %c0_i32_0 = arith.constant 0 : i32
    %c0_i32_1 = arith.constant 0 : i32
    return %c0_i32, %c0_i32_0 : i32, i32
  }
  func.func @transform_4(%arg0: i32) -> (i32, i32, i32) {
    %c0_i32 = arith.constant 0 : i32
    %c0_i32_0 = arith.constant 0 : i32
    %c0_i32_1 = arith.constant 0 : i32
    %c0_i32_2 = arith.constant 0 : i32
    return %c0_i32, %c0_i32_0, %c0_i32_1 : i32, i32, i32
  }
  func.func @transform_5(%arg0: i32) -> (i32, i32) {
    %c0_i32 = arith.constant 0 : i32
    %c0_i32_0 = arith.constant 0 : i32
    %c0_i32_1 = arith.constant 0 : i32
    return %c0_i32, %c0_i32_0 : i32, i32
  }
  func.func @transform_6(%arg0: i32) -> (i32, i32) {
    %c0_i32 = arith.constant 0 : i32
    %c0_i32_0 = arith.constant 0 : i32
    %c0_i32_1 = arith.constant 0 : i32
    return %c0_i32, %c0_i32_0 : i32, i32
  }
  func.func @transform_7(%arg0: i32) -> (i32, i32) {
    %c0_i32 = arith.constant 0 : i32
    %c0_i32_0 = arith.constant 0 : i32
    %c0_i32_1 = arith.constant 0 : i32
    return %c0_i32, %c0_i32_0 : i32, i32
  }
  func.func @transform_8(%arg0: i32) -> (i32, i32) {
    %c0_i32 = arith.constant 0 : i32
    %c0_i32_0 = arith.constant 0 : i32
    %c0_i32_1 = arith.constant 0 : i32
    return %c0_i32, %c0_i32_0 : i32, i32
  }
  func.func @transform_12(%arg0: i32) -> (i32, i32) {
    %c0_i32 = arith.constant 0 : i32
    %c0_i32_0 = arith.constant 0 : i32
    %c0_i32_1 = arith.constant 0 : i32
    return %c0_i32, %c0_i32_0 : i32, i32
  }
}

</mosaic_0001>

<bundles_post_ra>
// kernel: netvp_forward.1
= control target key start
LH: loop header
LB: loop body
LE: loop exit
PB: predicated region body
PF: predicated region fallthrough
CT: control target
= control target key end

     0   :  { %17 = vsyncpa [#allocation8], 0  ;;  %s10727_s0 = inlined_call_operand.vmem [shape: bf16[96,10], index: 0, kind: input, shape index: {}]   ;;  %s10728_s1 = inlined_call_operand.vmem [shape: f32[80,320], index: 1, kind: input, shape index: {}]   ;;  %s10729_s2 = inlined_call_operand.vmem [shape: bf16[3,10,320], index: 2, kind: input, shape index: {}]   ;;  %s10730_s3 = inlined_call_operand.hbm [shape: f32[1,320], index: 3, kind: input, shape index: {}]   ;;  %s10731_s4 = inlined_call_operand.hbm [shape: f32[3,1,320], index: 4, kind: input, shape index: {}]   ;;  %s10732_s5 = inlined_call_operand.hbm [shape: f32[1,1024], index: 5, kind: input, shape index: {}]   ;;  %s10733_s6 = inlined_call_operand.hbm [shape: f32[1,512], index: 6, kind: input, shape index: {}]   ;;  %s10734_s7 = inlined_call_operand.hbm [shape: bf16[512,128], index: 7, kind: input, shape index: {}]   ;;  %s10735_s8 = inlined_call_operand.hbm [shape: f32[1,128], index: 8, kind: input, shape index: {}]   ;;  %s10736_s9 = inlined_call_operand.hbm [shape: bf16[9,320,320], index: 9, kind: input, shape index: {}]   ;;  %s10737_s10 = inlined_call_operand.hbm [shape: bf16[512,1024], index: 10, kind: input, shape index: {}]   ;;  %s10738_s11 = inlined_call_operand.hbm [shape: bf16[1024,512], index: 11, kind: input, shape index: {}]   ;;  %s10739_s12 = inlined_call_operand.vmem [shape: f32[8,128], index: 12, kind: output, shape index: {}]  }
   0x1   :  { %18 = vsyncpa [#allocation10], 0 }
   0x2   :  { %19 = vsyncpa [#allocation13], 0 }
   0x3   :  { %20 = vsyncpa [#allocation16], 0  ;;  %s8894_s21 = smov [#allocation9]   ;;  %s8748_s25 = scalar_lea.hbm %s10731_s4, 144 }
   0x4   :  { %s42_s22 = sshll.u32 %s8894_s21, 4  ;;  %p8749_p0 = scmp.ne.s32.totalorder %s10731_s4, %s8748_s25  ;;  %s43_s22 = int_to_ptr.vmem [resolvable:$true] %s42_s22 }
   0x5   :  { %p8752_p1 = scmp.lt.u32.totalorder %s8748_s25, %s10731_s4 }
   0x7   :  { %p8754_p2 = pnand %p8752_p1, %p8749_p0 }
   0x9   :  { %8757 = shalt.err (!%p8754_p2)
}
   0xa   :  { %s8758_s30 = scalar_lea.vmem %s43_s22, 144  ;;  %s8762_s13 = scalar_lea.vmem %s43_s22, 160 }
   0xb   :  { %p8759_p3 = scmp.ne.s32.totalorder %s43_s22, %s8758_s30  ;;  %p8763_p4 = scmp.lt.s32.totalorder %s43_s22, %s43_s22 }
   0xc   :  { %p8764_p5 = scmp.lt.s32.totalorder %s8762_s13, %s8758_s30 }
   0xe   :  { %p8765_p6 = por %p8764_p5, %p8763_p4 }
  0x10   :  { %p8766_p7 = pnand %p8765_p6, %p8759_p3 }
  0x12   :  { %8769 = shalt.err (!%p8766_p7)
}
  0x13   :  { %s8895_s14 = smov 48   ;;  %s8896_s15 = smov 3  }
  0x14   :  { %48 = dma.hbm_to_vmem [thread:$0]  %s10731_s4, 144, %s43_s22, [#allocation10], %s8895_s14, %s8895_s14, %s8896_s15  }
  0x15   :  { %s8897_s18 = smov [#allocation12]   ;;  %s8898_s20 = smov [#allocation7]  }
  0x16   :  { %s65_s19 = sshll.u32 %s8897_s18, 4  ;;  %s33_s21 = sshll.u32 %s8898_s20, 4  ;;  %s66_s19 = int_to_ptr.vmem [resolvable:$true] %s65_s19  ;;  %s34_s21 = int_to_ptr.vmem [resolvable:$true] %s33_s21 }
  0x17   :  { %s8770_s25 = scalar_lea.hbm %s10733_s6, 64 }
  0x18   :  { %p8771_p8 = scmp.ne.s32.totalorder %s10733_s6, %s8770_s25  ;;  %p8774_p9 = scmp.lt.u32.totalorder %s8770_s25, %s10733_s6 }
  0x1a   :  { %p8776_p10 = pnand %p8774_p9, %p8771_p8 }
  0x1c   :  { %8779 = shalt.err (!%p8776_p10)
}
  0x1d   :  { %s8780_s4 = scalar_lea.vmem %s66_s19, 64  ;;  %p8785_p12 = scmp.lt.s32.totalorder %s66_s19, %s66_s19 }
  0x1e   :  { %p8781_p11 = scmp.ne.s32.totalorder %s66_s19, %s8780_s4  ;;  %p8786_p13 = scmp.lt.s32.totalorder %s8780_s4, %s8780_s4 }
  0x20   :  { %p8787_p0 = por %p8786_p13, %p8785_p12 }
  0x22   :  { %p8788_p1 = pnand %p8787_p0, %p8781_p11 }
  0x24   :  { %8791 = shalt.err (!%p8788_p1)
}
  0x25   :  { %68 = dma.hbm_to_vmem [thread:$0]  %s10733_s6, 64, %s66_s19, [#allocation13]  }
  0x26   :  { %s8792_s16 = scalar_lea.hbm %s10730_s3, 48 }
  0x27   :  { %p8793_p2 = scmp.ne.s32.totalorder %s10730_s3, %s8792_s16  ;;  %p8796_p3 = scmp.lt.u32.totalorder %s8792_s16, %s10730_s3 }
  0x29   :  { %p8798_p4 = pnand %p8796_p3, %p8793_p2 }
  0x2b   :  { %8801 = shalt.err (!%p8798_p4)
}
  0x2c   :  { %s8802_s24 = scalar_lea.vmem %s34_s21, 48  ;;  %s8806_s25 = scalar_lea.vmem %s34_s21, 64 }
  0x2d   :  { %p8803_p5 = scmp.ne.s32.totalorder %s34_s21, %s8802_s24  ;;  %p8807_p6 = scmp.lt.s32.totalorder %s34_s21, %s34_s21 }
  0x2e   :  { %p8808_p7 = scmp.lt.s32.totalorder %s8806_s25, %s8802_s24 }
  0x30   :  { %p8809_p8 = por %p8808_p7, %p8807_p6 }
  0x32   :  { %p8810_p9 = pnand %p8809_p8, %p8803_p5 }
  0x34   :  { %8813 = shalt.err (!%p8810_p9)
}
  0x35   :  { %36 = dma.hbm_to_vmem [thread:$0]  %s10730_s3, 48, %s34_s21, [#allocation8]  }
  0x36   :  { %s8899_s26 = smov [#allocation11]   ;;  %s8900_s28 = smov [#allocation14]  }
  0x37   :  { %s55_s27 = sshll.u32 %s8899_s26, 4  ;;  %s74_s29 = sshll.u32 %s8900_s28, 4  ;;  %s56_s27 = int_to_ptr.vmem [resolvable:$true] %s55_s27  ;;  %s75_s29 = int_to_ptr.vmem [resolvable:$true] %s74_s29 }
  0x38   :  { %s8814_s30 = scalar_lea.hbm %s10732_s5, 128 }
  0x39   :  { %p8815_p10 = scmp.ne.s32.totalorder %s10732_s5, %s8814_s30  ;;  %p8818_p11 = scmp.lt.u32.totalorder %s8814_s30, %s10732_s5 }
  0x3b   :  { %p8820_p12 = pnand %p8818_p11, %p8815_p10 }
  0x3d   :  { %8823 = shalt.err (!%p8820_p12)
}
  0x3e   :  { %s8824_s3 = scalar_lea.vmem %s56_s27, 128  ;;  %p8829_p0 = scmp.lt.s32.totalorder %s56_s27, %s56_s27 }
  0x3f   :  { %p8825_p13 = scmp.ne.s32.totalorder %s56_s27, %s8824_s3  ;;  %p8830_p1 = scmp.lt.s32.totalorder %s8824_s3, %s8824_s3 }
  0x41   :  { %p8831_p2 = por %p8830_p1, %p8829_p0 }
  0x43   :  { %p8832_p3 = pnand %p8831_p2, %p8825_p13 }
  0x45   :  { %8835 = shalt.err (!%p8832_p3)
}
  0x46   :  { %58 = dma.hbm_to_vmem [thread:$0]  %s10732_s5, 128, %s56_s27, [#allocation10]  }
  0x47   :  { %s8836_s24 = scalar_lea.hbm %s10734_s7, 4096 }
  0x48   :  { %p8837_p4 = scmp.ne.s32.totalorder %s10734_s7, %s8836_s24  ;;  %p8840_p5 = scmp.lt.u32.totalorder %s8836_s24, %s10734_s7 }
  0x4a   :  { %p8842_p6 = pnand %p8840_p5, %p8837_p4 }
  0x4c   :  { %8845 = shalt.err (!%p8842_p6)
}
  0x4d   :  { %s8846_s28 = scalar_lea.vmem %s75_s29, 4096  ;;  %p8851_p8 = scmp.lt.s32.totalorder %s75_s29, %s75_s29 }
  0x4e   :  { %p8847_p7 = scmp.ne.s32.totalorder %s75_s29, %s8846_s28  ;;  %p8852_p9 = scmp.lt.s32.totalorder %s8846_s28, %s8846_s28 }
  0x50   :  { %p8853_p10 = por %p8852_p9, %p8851_p8 }
  0x52   :  { %p8854_p11 = pnand %p8853_p10, %p8847_p7 }
  0x54   :  { %8857 = shalt.err (!%p8854_p11)
}
  0x55   :  { %s8901_s5 = smov 64   ;;  %s8902_s27 = smov 4  }
  0x56   :  { %80 = dma.hbm_to_vmem [thread:$0]  %s10734_s7, 4096, %s75_s29, [#allocation13], %s8901_s5, %s8901_s5, %s8902_s27  }
  0x57   :  { %s8903_s30 = smov [#allocation15]   ;;  %s8858_s17 = scalar_lea.hbm %s10735_s8, 16 }
  0x58   :  { %s87_s13 = sshll.u32 %s8903_s30, 4  ;;  %p8859_p12 = scmp.ne.s32.totalorder %s10735_s8, %s8858_s17  ;;  %s88_s13 = int_to_ptr.vmem [resolvable:$true] %s87_s13 }
  0x59   :  { %p8862_p13 = scmp.lt.u32.totalorder %s8858_s17, %s10735_s8 }
  0x5b   :  { %p8864_p0 = pnand %p8862_p13, %p8859_p12 }
  0x5d   :  { %8867 = shalt.err (!%p8864_p0)
}
  0x5e   :  { %s8868_s23 = scalar_lea.vmem %s88_s13, 16  ;;  %s8872_s7 = scalar_lea.vmem %s88_s13, 32 }
  0x5f   :  { %p8869_p1 = scmp.ne.s32.totalorder %s88_s13, %s8868_s23  ;;  %p8873_p2 = scmp.lt.s32.totalorder %s88_s13, %s88_s13 }
  0x60   :  { %p8874_p3 = scmp.lt.s32.totalorder %s8872_s7, %s8868_s23 }
  0x62   :  { %p8875_p4 = por %p8874_p3, %p8873_p2 }
  0x64   :  { %p8876_p5 = pnand %p8875_p4, %p8869_p1 }
  0x66   :  { %8879 = shalt.err (!%p8876_p5)
}
  0x67   :  { %90 = dma.hbm_to_vmem [thread:$0]  %s10735_s8, 16, %s88_s13, [#allocation16]  }
  0x68   :  { %8880 = dma.done.wait [#allocation8], 48  }
  0x69   :  { %8881 = vsyncadd [#allocation8], 4294967248 }
  0x6a   :  { %8882 = dma.done.wait [#allocation10], 272  }
  0x6b   :  { %8883 = vsyncadd [#allocation10], 4294967024 }
  0x6c   :  { %8884 = dma.done.wait [#allocation13], 4160  }
  0x6d   :  { %8885 = vsyncadd [#allocation13], 4294963136 }
  0x6e   :  { %8886 = dma.done.wait [#allocation16], 16  }
  0x6f   :  { %8887 = vsyncadd [#allocation16], 4294967280  ;;  %s114_s25 = sld [smem:[#allocation0]]   ;;  %s8904_s6 = smov 384   ;;  %v8905_v0 = vmov 0.0   ;;  %v8906_v1 = vmov 0  }
  0x70   :  { %126 = sst [smem:[#allocation18]] %s8904_s6  ;;  %7942 = vmatprep.subr.bf16.mxu1 %v8905_v0  ;;  %350 = vmatprep.mubr.bf16.mxu0 %v8906_v1  ;;  %vm8907_vm0 = vmmov 0   ;;  %s8908_s8 = smov [#allocation3]   ;;  %vm308_vm1 = vcmask 1044480   ;;  %vm292_vm2 = vcmask 80896   ;;  %vm217_vm3 = vcmask 523264  }
  0x71   :  { %128 = sst [smem:[#allocation18 + $0x1]] %s8904_s6  ;;  %7944 = vmatprep.mubr.msk.bf16.mxu1 %vm8907_vm0, %v8905_v0  ;;  %s122_s19 = sshll.u32 %s8908_s8, 4  ;;  %vm1152_vm4 = vcmask 523268   ;;  %vm1104_vm5 = vcmask 1043456   ;;  %vm1168_vm6 = vcmask 519168   ;;  %s123_s19 = int_to_ptr.vmem [resolvable:$true] %s122_s19 }
  0x72   :  { %130 = sst [smem:[#allocation18 + $0x2]] %s8896_s15  ;;  %s8909_s26 = smov 192  }
  0x73   :  { %132 = sst [smem:[#allocation18 + $0x3]] %s8901_s5  ;;  %s8910_s22 = smov 128  }
  0x74   :  { %138 = sst [smem:[#allocation18 + $0x6]] %s8909_s26  ;;  %s8911_s30 = smov 2  }
  0x75   :  { %140 = sst [smem:[#allocation18 + $0x7]] %s8901_s5  ;;  %s7188_s28 = sshll.u32 %s114_s25, 26 }
  0x76   :  { %142 = sst [smem:[#allocation18 + $0x8]] %s8902_s27  ;;  %s9074_s4 = sadd.s32 134217728, %s7188_s28 }
  0x77   :  { %134 = sst [smem:[#allocation18 + $0x4]] %s8910_s22  ;;  %s8912_s15 = smov [#allocation6]  }
  0x78   :  { %136 = sst [smem:[#allocation18 + $0x5]] %s8911_s30  ;;  %s8913_s13 = smov [#allocation17]  }
  0x79   :  { %144 = dma.general %s10736_s9, 69120, %s123_s19, %s8912_s15, %s8913_s13, [#allocation18], %s9074_s4, 0  }
  0x7a   :  { %s8914_s17 = smov 1024   ;;  %s8915_s3 = smov 8  }
  0x7b   :  { %161 = sst [smem:[#allocation20]] %s8914_s17  ;;  %s8916_s21 = smov [#allocation4]  }
  0x7c   :  { %163 = sst [smem:[#allocation20 + $0x1]] %s8914_s17  ;;  %s157_s18 = sshll.u32 %s8916_s21, 4  ;;  %s158_s18 = int_to_ptr.vmem [resolvable:$true] %s157_s18 }
  0x7d   :  { %165 = sst [smem:[#allocation20 + $0x2]] %s8915_s3  ;;  %s8917_s20 = smov 512  }
  0x7e   :  { %167 = sst [smem:[#allocation20 + $0x3]] %s8901_s5  ;;  %s8918_s9 = smov [#allocation6 + $0x1]  }
  0x7f   :  { %169 = sst [smem:[#allocation20 + $0x4]] %s8910_s22  ;;  %s8919_s23 = smov [#allocation19]  }
  0x80   :  { %171 = sst [smem:[#allocation20 + $0x5]] %s8911_s30  ;;  %s8920_s24 = smov [#allocation5]  }
  0x81   :  { %173 = sst [smem:[#allocation20 + $0x6]] %s8917_s20  ;;  %s192_s25 = sshll.u32 %s8920_s24, 4  ;;  %s193_s25 = int_to_ptr.vmem [resolvable:$true] %s192_s25 }
  0x82   :  { %175 = sst [smem:[#allocation20 + $0x7]] %s8901_s5  ;;  %s8921_s6 = smov 256  }
  0x83   :  { %177 = sst [smem:[#allocation20 + $0x8]] %s8902_s27  ;;  %s8923_s8 = smov [#allocation21]  }
  0x84   :  { %179 = dma.general %s10737_s10, 32768, %s158_s18, %s8918_s9, %s8919_s23, [#allocation20], %s9074_s4, 0  }
  0x85   :  { %196 = sst [smem:[#allocation22]] %s8917_s20  ;;  %s8922_s10 = smov [#allocation6 + $0x2]  }
  0x86   :  { %198 = sst [smem:[#allocation22 + $0x1]] %s8917_s20 }
  0x87   :  { %200 = sst [smem:[#allocation22 + $0x2]] %s8902_s27 }
  0x88   :  { %202 = sst [smem:[#allocation22 + $0x3]] %s8901_s5 }
  0x89   :  { %204 = sst [smem:[#allocation22 + $0x4]] %s8910_s22 }
  0x8a   :  { %206 = sst [smem:[#allocation22 + $0x5]] %s8911_s30 }
  0x8b   :  { %208 = sst [smem:[#allocation22 + $0x6]] %s8921_s6 }
  0x8c   :  { %210 = sst [smem:[#allocation22 + $0x7]] %s8901_s5 }
  0x8d   :  { %212 = sst [smem:[#allocation22 + $0x8]] %s8902_s27 }
  0x8e   :  { %214 = dma.general %s10738_s11, 32768, %s193_s25, %s8922_s10, %s8923_s8, [#allocation22], %s9074_s4, 0  }
  0x8f   :  { %215 = vst [vmem:[#allocation2] sm:$0xff] %v8906_v1  ;;  %216 = vst [vmem:[#allocation2 + $0x8] sm:$0xff] %v8906_v1  ;;  %v8683_v2 = vld [vmem:[%s10729_s2 + $0x1c] ss:$12 sps:$4 sm:$0x1f]   ;;  %v8706_v39 = vld [vmem:[%s10727_s0 + $0x10] sm:$0xff]  }
  0x90   :  { %231 = vst [vmem:[#allocation2 + $0x78] sm:$0xff] %v8906_v1  ;;  %232 = vst [vmem:[#allocation2 + $0x80] sm:$0xff] %v8906_v1  ;;  %v8685_v3 = vld [vmem:[%s10729_s2 + $0x18] ss:$12 sps:$4 sm:$0x1f]   ;;  %7206 = vmatprep.subr.msk.bf16.mxu0 %vm308_vm1, %v8683_v2  ;;  %v8705_v38 = vld [vmem:[%s10727_s0 + $0x8] sm:$0xff]  }
  0x91   :  { %v8686_v4 = vld [vmem:[%s10729_s2 + $0x20] ss:$12 sps:$4 sm:$0x1f]   ;;  %v310_v5 = vsel %vm308_vm1, %v8685_v3, 0  ;;  %v235_v6 = vld [vmem:[%s10727_s0 + $0x4] sm:$0xf] }
  0x92   :  { %319 = vmatpush1.bf16.msra.mxu0 %v310_v5  ;;  %v316_v7 = vsel %vm308_vm1, %v8686_v4, 0  ;;  %v236_v8 = vld [vmem:[%s10727_s0 + $0x8] sm:$0xf]  ;;  %v8689_v10 = vld [vmem:[%s10729_s2 + $0x4] ss:$12 sps:$4 sm:$0x1f]  }
  0x93   :  { %7943 = vmatpush3.bf16.msra.mxu1 %v316_v7  ;;  %v7198_v9 = vcombine.low %v235_v6, %v236_v8  ;;  %v8691_v11 = vld [vmem:[%s10729_s2 + $0x8] ss:$12 sps:$4 sm:$0x1f]   ;;  %7225 = vmatprep.subr.msk.bf16.mxu0 %vm308_vm1, %v8689_v10  ;;  %v8692_v12 = vld [vmem:[%s10729_s2] ss:$12 sps:$4 sm:$0x1f]  }
  0x94   :  { %7964 = vmatprep.subr.bf16.mxu1 %v8905_v0  ;;  %v516_v13 = vsel %vm308_vm1, %v8691_v11, 0  ;;  %v237_v14 = vld [vmem:[%s10727_s0 + $0xc] sm:$0xf]  ;;  %v238_v15 = vld [vmem:[%s10727_s0 + $0x10] sm:$0xf]  ;;  %v510_v16 = vsel %vm308_vm1, %v8692_v12, 0 }
  0x95   :  { %7207 = vmatmul.mubr.msk.bf16.vlgmr.msra.gmra.mrb[0].mxu0 %vm292_vm2, %v7198_v9  ;;  %v7199_v17 = vcombine.low %v237_v14, %v238_v15  ;;  %v8697_v18 = vld [vmem:[%s10729_s2 + $0x34] ss:$12 sps:$4 sm:$0x1f]   ;;  %v240_v20 = vld [vmem:[%s10727_s0 + $0x18] sm:$0xf]  ;;  %v7218_v34 = vcombine.low %v236_v8, %v237_v14  ;;  %v8709_v42 = vld [vmem:[%s10727_s0 + $0x28] sm:$0xff]  }
  0x96   :  { %7945 = vmatmul.mubr.msk.bf16.vlgmr.msra.gmra.mrb[0].mxu1 %vm292_vm2, %v7198_v9  ;;  %360 = vmatprep.mubr.bf16.mxu0 %v8906_v1  ;;  %v239_v19 = vld [vmem:[%s10727_s0 + $0x14] sm:$0xf]  ;;  %v241_v22 = vld [vmem:[%s10727_s0 + $0x1c] sm:$0xf]  ;;  %v242_v23 = vld [vmem:[%s10727_s0 + $0x20] sm:$0xf] }
  0x97   :  { %7965 = vmatpush3.bf16.msra.mxu1 %v516_v13  ;;  %7948 = vmatprep.mubr.msk.bf16.mxu1 %vm8907_vm0, %v8905_v0  ;;  %v7200_v21 = vcombine.low %v239_v19, %v240_v20  ;;  %v7201_v24 = vcombine.low %v241_v22, %v242_v23  ;;  %v243_v25 = vld [vmem:[%s10727_s0 + $0x24] sm:$0xf]  ;;  %v248_v26 = vld [vmem:[%s10727_s0 + $0x28] sm:$0xf]  ;;  %v234_v28 = vld [vmem:[%s10727_s0] sm:$0xf]  ;;  %v7219_v35 = vcombine.low %v238_v15, %v239_v19 }
  0x98   :  { %519 = vmatpush1.bf16.msra.mxu0 %v510_v16  ;;  %7986 = vmatprep.subr.bf16.mxu1 %v8905_v0  ;;  %v7202_v27 = vcombine.low %v243_v25, %v248_v26  ;;  %v8700_v29 = vld [vmem:[%s10729_s2 + $0x30] ss:$12 sps:$4 sm:$0x1f]   ;;  %v8699_v30 = vld [vmem:[%s10729_s2 + $0x38] ss:$12 sps:$4 sm:$0x1f]   ;;  %v7217_v31 = vcombine.low %v234_v28, %v235_v6  ;;  %v7220_v36 = vcombine.low %v240_v20, %v241_v22  ;;  %v939_v20 = vlaneseq }
  0x99   :  { %7248 = vmatprep.subr.msk.bf16.mxu0 %vm308_vm1, %v8697_v18  ;;  %v743_v32 = vsel %vm308_vm1, %v8700_v29, 0  ;;  %v749_v33 = vsel %vm308_vm1, %v8699_v30, 0  ;;  %v7221_v37 = vcombine.low %v242_v23, %v243_v25  ;;  %v8707_v40 = vld [vmem:[%s10727_s0 + $0x18] sm:$0xff]   ;;  %v8708_v41 = vld [vmem:[%s10727_s0 + $0x20] sm:$0xff]   ;;  %218 = vst.msk [vmem:[#allocation2 + $0x10] sm:$0xff] %vm217_vm3, %v8906_v1  ;;  %221 = vst.msk [vmem:[#allocation2 + $0x28] sm:$0xff] %vm217_vm3, %v8906_v1 }
  0x9a   :  { %224 = vst.msk [vmem:[#allocation2 + $0x40] sm:$0xff] %vm217_vm3, %v8906_v1  ;;  %227 = vst.msk [vmem:[#allocation2 + $0x58] sm:$0xff] %vm217_vm3, %v8906_v1  ;;  %v9288_v26 = vshrl.u32 %v939_v20, 7 }
  0x9b   :  { %230 = vst.msk [vmem:[#allocation2 + $0x70] sm:$0xff] %vm217_vm3, %v8906_v1  ;;  %233 = vst.msk [vmem:[#allocation2 + $0x88] sm:$0xff] %vm217_vm3, %v8906_v1 }
  0x9c   :  { %v9291_v28 = vsub.s32 0, %v9288_v26 }
  0x9d   :  { %7208 = vmatmul.mubr.msk.bf16.gmra.mrb[4].mxu0 %vm292_vm2, %v7199_v17 }
  0x9e   :  { %7949 = vmatmul.mubr.msk.bf16.gmra.mrb[4].mxu1 %vm292_vm2, %v7199_v17  ;;  %370 = vmatprep.mubr.bf16.mxu0 %v8906_v1 }
  0x9f   :  { %7952 = vmatprep.mubr.msk.bf16.mxu1 %vm8907_vm0, %v8905_v0 }
  0xa5   :  { %7209 = vmatmul.mubr.msk.bf16.gmra.mrb[8].mxu0 %vm292_vm2, %v7200_v21 }
  0xa6   :  { %7953 = vmatmul.mubr.msk.bf16.gmra.mrb[8].mxu1 %vm292_vm2, %v7200_v21  ;;  %380 = vmatprep.mubr.bf16.mxu0 %v8906_v1 }
  0xa7   :  { %7956 = vmatprep.mubr.msk.bf16.mxu1 %vm8907_vm0, %v8905_v0 }
  0xad   :  { %7210 = vmatmul.mubr.msk.bf16.gmra.mrb[12].mxu0 %vm292_vm2, %v7201_v24 }
  0xae   :  { %7957 = vmatmul.mubr.msk.bf16.gmra.mrb[12].mxu1 %vm292_vm2, %v7201_v24  ;;  %390 = vmatprep.mubr.bf16.mxu0 %v8906_v1 }
  0xaf   :  { %7960 = vmatprep.mubr.msk.bf16.mxu1 %vm8907_vm0, %v8905_v0 }
  0xb5   :  { %7211 = vmatmul.mubr.msk.bf16.gmra.mrb[16].mxu0 %vm292_vm2, %v7202_v27 }
  0xb6   :  { %7961 = vmatmul.mubr.msk.bf16.gmra.mrb[16].mxu1 %vm292_vm2, %v7202_v27  ;;  %550 = vmatprep.mubr.bf16.mxu0 %v8906_v1 }
  0xb7   :  { %7966 = vmatprep.mubr.msk.bf16.mxu1 %vm8907_vm0, %v8905_v0 }
  0xbd   :  { %7226 = vmatmul.mubr.msk.bf16.vlgmr.msra.gmra.mrb[0].mxu0 %vm292_vm2, %v7217_v31 }
  0xbe   :  { %7967 = vmatmul.mubr.msk.bf16.vlgmr.msra.gmra.mrb[20].mxu1 %vm292_vm2, %v7217_v31  ;;  %752 = vmatpush1.bf16.msra.mxu0 %v743_v32  ;;  %v937_v31 = vld [vmem:[#allocation7] sm:$0x7]  ;;  %v9296_v32 = vsub.s32 1, %v9288_v26 }
  0xbf   :  { %7987 = vmatpush3.bf16.msra.mxu1 %v749_v33  ;;  %560 = vmatprep.mubr.bf16.mxu0 %v8906_v1 }
  0xc0   :  { %7970 = vmatprep.mubr.msk.bf16.mxu1 %vm8907_vm0, %v8905_v0 }
  0xc5   :  { %7227 = vmatmul.mubr.msk.bf16.gmra.mrb[4].mxu0 %vm292_vm2, %v7218_v34 }
  0xc6   :  { %7971 = vmatmul.mubr.msk.bf16.gmra.mrb[24].mxu1 %vm292_vm2, %v7218_v34  ;;  %570 = vmatprep.mubr.bf16.mxu0 %v8906_v1 }
  0xc7   :  { %7974 = vmatprep.mubr.msk.bf16.mxu1 %vm8907_vm0, %v8905_v0 }
  0xcd   :  { %7228 = vmatmul.mubr.msk.bf16.gmra.mrb[8].mxu0 %vm292_vm2, %v7219_v35 }
  0xce   :  { %7975 = vmatmul.mubr.msk.bf16.gmra.mrb[28].mxu1 %vm292_vm2, %v7219_v35  ;;  %580 = vmatprep.mubr.bf16.mxu0 %v8906_v1 }
  0xcf   :  { %7978 = vmatprep.mubr.msk.bf16.mxu1 %vm8907_vm0, %v8905_v0 }
  0xd5   :  { %7229 = vmatmul.mubr.msk.bf16.gmra.mrb[12].mxu0 %vm292_vm2, %v7220_v36 }
  0xd6   :  { %7979 = vmatmul.mubr.msk.bf16.gmra.mrb[32].mxu1 %vm292_vm2, %v7220_v36  ;;  %590 = vmatprep.mubr.bf16.mxu0 %v8906_v1  ;;  %v9301_v36 = vsub.s32 2, %v9288_v26 }
  0xd7   :  { %7982 = vmatprep.mubr.msk.bf16.mxu1 %vm8907_vm0, %v8905_v0 }
  0xdd   :  { %7230 = vmatmul.mubr.msk.bf16.gmra.mrb[16].mxu0 %vm292_vm2, %v7221_v37 }
  0xde   :  { %7983 = vmatmul.mubr.msk.bf16.gmra.mrb[36].mxu1 %vm292_vm2, %v7221_v37  ;;  %783 = vmatprep.mubr.bf16.mxu0 %v8906_v1  ;;  %v9304_v37 = vrot.slane %v937_v31, %v9291_v28 }
  0xdf   :  { %7988 = vmatprep.mubr.msk.bf16.mxu1 %vm8907_vm0, %v8905_v0 }
  0xe5   :  { %7249 = vmatmul.mubr.msk.bf16.vlgmr.msra.gmra.mrb[0].mxu0 %vm292_vm2, %v8705_v38 }
  0xe6   :  { %7989 = vmatmul.mubr.msk.bf16.vlgmr.msra.gmra.mrb[40].mxu1 %vm292_vm2, %v8705_v38  ;;  %793 = vmatprep.mubr.bf16.mxu0 %v8906_v1  ;;  %v9307_v38 = vrot.slane %v937_v31, %v9296_v32 }
  0xe7   :  { %7992 = vmatprep.mubr.msk.bf16.mxu1 %vm8907_vm0, %v8905_v0 }
  0xed   :  { %7250 = vmatmul.mubr.msk.bf16.gmra.mrb[4].mxu0 %vm292_vm2, %v8706_v39 }
  0xee   :  { %7993 = vmatmul.mubr.msk.bf16.gmra.mrb[44].mxu1 %vm292_vm2, %v8706_v39  ;;  %803 = vmatprep.mubr.bf16.mxu0 %v8906_v1 }
  0xef   :  { %7996 = vmatprep.mubr.msk.bf16.mxu1 %vm8907_vm0, %v8905_v0 }
  0xf5   :  { %7251 = vmatmul.mubr.msk.bf16.gmra.mrb[8].mxu0 %vm292_vm2, %v8707_v40 }
  0xf6   :  { %7997 = vmatmul.mubr.msk.bf16.gmra.mrb[48].mxu1 %vm292_vm2, %v8707_v40  ;;  %813 = vmatprep.mubr.bf16.mxu0 %v8906_v1  ;;  %v9310_v40 = vrot.slane %v937_v31, %v9301_v36 }
  0xf7   :  { %8000 = vmatprep.mubr.msk.bf16.mxu1 %vm8907_vm0, %v8905_v0 }
  0xfd   :  { %7252 = vmatmul.mubr.msk.bf16.gmra.mrb[12].mxu0 %vm292_vm2, %v8708_v41 }
  0xfe   :  { %8001 = vmatmul.mubr.msk.bf16.gmra.mrb[52].mxu1 %vm292_vm2, %v8708_v41  ;;  %823 = vmatprep.mubr.bf16.mxu0 %v8906_v1 }
  0xff   :  { %8004 = vmatprep.mubr.msk.bf16.mxu1 %vm8907_vm0, %v8905_v0 }
 0x105   :  { %7253 = vmatmul.mubr.msk.bf16.gmra.mrb[16].mxu0 %vm292_vm2, %v8709_v42 }
 0x106   :  { %8005 = vmatmul.mubr.msk.bf16.gmra.mrb[56].mxu1 %vm292_vm2, %v8709_v42 }
 0x169   :  { %v435_v43 = vpop.f32.mrb[0].mxu1 }
 0x16a   :  { %v7946_v44 = vpop.f32.mrb[1].mxu1 }
 0x16b   :  { %v438_v45 = vpop.f32.mrb[2].mxu1 }
 0x16c   :  { %v7947_v46 = vpop.f32.mrb[3].mxu1 }
 0x171   :  { %v443_v47 = vpop.f32.mrb[4].mxu1 }
 0x172   :  { %v7950_v48 = vpop.f32.mrb[5].mxu1 }
 0x173   :  { %v446_v49 = vpop.f32.mrb[6].mxu1 }
 0x174   :  { %v7951_v50 = vpop.f32.mrb[7].mxu1 }
 0x179   :  { %v451_v51 = vpop.f32.mrb[8].mxu1 }
 0x17a   :  { %v7954_v52 = vpop.f32.mrb[9].mxu1 }
 0x17b   :  { %v454_v53 = vpop.f32.mrb[10].mxu1  ;;  %v1014_v52 = vld [vmem:[%s10728_s1] sm:$0xff] }
 0x17c   :  { %v7955_v54 = vpop.f32.mrb[11].mxu1 }
 0x181   :  { %v459_v55 = vpop.f32.mrb[12].mxu1 }
 0x182   :  { %v7958_v56 = vpop.f32.mrb[13].mxu1 }
 0x183   :  { %v462_v57 = vpop.f32.mrb[14].mxu1 }
 0x184   :  { %v7959_v58 = vpop.f32.mrb[15].mxu1 }
 0x189   :  { %v467_v59 = vpop.f32.mrb[16].mxu1 }
 0x18a   :  { %v7962_v60 = vpop.f32.mrb[17].mxu1 }
 0x18b   :  { %v470_v61 = vpop.f32.mrb[18].mxu1 }
 0x18c   :  { %v7963_v62 = vpop.f32.mrb[19].mxu1 }
 0x191   :  { %v635_v63 = vpop.f32.mrb[20].mxu1 }
 0x192   :  { %v636_v2 = vadd.f32 %v635_v63, %v435_v43  ;;  %v7968_v3 = vpop.f32.mrb[21].mxu1  ;;  %v1016_v63 = vld [vmem:[%s10728_s1 + $0x10] sm:$0xff] }
 0x193   :  { %v638_v4 = vpop.f32.mrb[22].mxu1 }
 0x194   :  { %v639_v5 = vadd.f32 %v638_v4, %v438_v45  ;;  %v7969_v6 = vpop.f32.mrb[23].mxu1 }
 0x195   :  { %v1019_v6 = vld [vmem:[%s10728_s1 + $0x28] sm:$0xff] }
 0x199   :  { %v643_v7 = vpop.f32.mrb[24].mxu1 }
 0x19a   :  { %v9275_v8 = vadd.f32 %v643_v7, %v443_v47  ;;  %v7972_v9 = vpop.f32.mrb[25].mxu1 }
 0x19b   :  { %v646_v10 = vpop.f32.mrb[26].mxu1 }
 0x19c   :  { %v9277_v11 = vadd.f32 %v646_v10, %v446_v49  ;;  %v7973_v12 = vpop.f32.mrb[27].mxu1 }
 0x1a1   :  { %v651_v13 = vpop.f32.mrb[28].mxu1 }
 0x1a2   :  { %v9279_v14 = vadd.f32 %v651_v13, %v451_v51  ;;  %v7976_v15 = vpop.f32.mrb[29].mxu1 }
 0x1a3   :  { %v654_v16 = vpop.f32.mrb[30].mxu1 }
 0x1a4   :  { %v9281_v17 = vadd.f32 %v654_v16, %v454_v53  ;;  %v7977_v18 = vpop.f32.mrb[31].mxu1 }
 0x1a9   :  { %v659_v19 = vpop.f32.mrb[32].mxu1 }
 0x1aa   :  { %v9283_v21 = vadd.f32 %v659_v19, %v459_v55  ;;  %v7980_v22 = vpop.f32.mrb[33].mxu1  ;;  %v1017_v55 = vld [vmem:[%s10728_s1 + $0x18] sm:$0xff] }
 0x1ab   :  { %v662_v23 = vpop.f32.mrb[34].mxu1 }
 0x1ac   :  { %v9285_v24 = vadd.f32 %v662_v23, %v462_v57  ;;  %v7981_v25 = vpop.f32.mrb[35].mxu1 }
 0x1b1   :  { %v667_v27 = vpop.f32.mrb[36].mxu1 }
 0x1b2   :  { %v9293_v29 = vadd.f32 %v667_v27, %v467_v59  ;;  %v7984_v30 = vpop.f32.mrb[37].mxu1  ;;  %v1015_v59 = vld [vmem:[%s10728_s1 + $0x8] sm:$0xff] }
 0x1b3   :  { %v670_v33 = vpop.f32.mrb[38].mxu1 }
 0x1b4   :  { %v9298_v34 = vadd.f32 %v670_v33, %v470_v61  ;;  %v7985_v35 = vpop.f32.mrb[39].mxu1  ;;  %v1018_v61 = vld [vmem:[%s10728_s1 + $0x20] sm:$0xff] }
 0x1b8   :  { %v785_v39 = vpop.f32.mrb[0].mxu0 }
 0x1b9   :  { %v954_v41 = vadd.f32 %v9304_v37, %v785_v39  ;;  %v868_v42 = vpop.f32.mrb[40].mxu1  ;;  %v787_v43 = vpop.f32.mrb[1].mxu0 }
 0x1ba   :  { %v909_v44 = vadd.f32 %v868_v42, %v636_v2  ;;  %v955_v45 = vadd.f32 %v9307_v38, %v787_v43  ;;  %v7990_v46 = vpop.f32.mrb[41].mxu1  ;;  %v789_v47 = vpop.f32.mrb[2].mxu0 }
 0x1bb   :  { %v984_v48 = vmax.f32 %v954_v41, 0.0  ;;  %v957_v49 = vadd.f32 %v9304_v37, %v789_v47  ;;  %v871_v50 = vpop.f32.mrb[42].mxu1  ;;  %v791_v51 = vpop.f32.mrb[3].mxu0 }
 0x1bc   :  { %v956_v53 = vadd.f32 %v9310_v40, %v909_v44  ;;  %v985_v54 = vmax.f32 %v955_v45, 0.0  ;;  %v912_v56 = vadd.f32 %v871_v50, %v639_v5  ;;  %v958_v57 = vadd.f32 %v9307_v38, %v791_v51  ;;  %v7991_v58 = vpop.f32.mrb[43].mxu1  ;;  %v1020_v45 = vld [vmem:[%s10728_s1 + $0x30] sm:$0xff] }
 0x1bd   :  { %v987_v60 = vmax.f32 %v957_v49, 0.0  ;;  %v1044_v4 = vmul.f32 %v1014_v52, %v984_v48  ;;  %v1021_v49 = vld [vmem:[%s10728_s1 + $0x38] sm:$0xff] }
 0x1be   :  { %v986_v62 = vmax.f32 %v956_v53, 0.0  ;;  %v959_v2 = vadd.f32 %v9310_v40, %v912_v56  ;;  %v988_v3 = vmax.f32 %v958_v57, 0.0  ;;  %v1045_v7 = vmul.f32 %v1015_v59, %v985_v54  ;;  %v1022_v57 = vld [vmem:[%s10728_s1 + $0x40] sm:$0xff] }
 0x1bf   :  { %v1047_v5 = vmul.f32 %v1017_v55, %v987_v60  ;;  %v1024_v55 = vld [vmem:[%s10728_s1 + $0x50] sm:$0xff] }
 0x1c0   :  { %v989_v9 = vmax.f32 %v959_v2, 0.0  ;;  %v1048_v10 = vmul.f32 %v1018_v61, %v988_v3  ;;  %v795_v12 = vpop.f32.mrb[4].mxu0  ;;  %v1046_v13 = vmul.f32 %v1016_v63, %v986_v62  ;;  %v1025_v61 = vld [vmem:[%s10728_s1 + $0x58] sm:$0xff] }
 0x1c1   :  { %v1074_v15 = vpack.c.bf16 %v1047_v5, %v1044_v4  ;;  %v960_v16 = vadd.f32 %v9304_v37, %v795_v12  ;;  %v876_v18 = vpop.f32.mrb[44].mxu1  ;;  %v797_v19 = vpop.f32.mrb[5].mxu0 }
 0x1c2   :  { %v1049_v22 = vmul.f32 %v1019_v6, %v989_v9  ;;  %v1075_v23 = vpack.c.bf16 %v1048_v10, %v1045_v7  ;;  %v915_v25 = vadd.f32 %v876_v18, %v9275_v8  ;;  %v961_v27 = vadd.f32 %v9307_v38, %v797_v19  ;;  %v7994_v30 = vpop.f32.mrb[45].mxu1  ;;  %v799_v31 = vpop.f32.mrb[6].mxu0  ;;  %v1023_v8 = vld [vmem:[%s10728_s1 + $0x48] sm:$0xff] }
 0x1c3   :  { %v1105_v33 = vrot.slane %v1074_v15, 4  ;;  %v990_v35 = vmax.f32 %v960_v16, 0.0  ;;  %v963_v39 = vadd.f32 %v9304_v37, %v799_v31  ;;  %v879_v41 = vpop.f32.mrb[46].mxu1  ;;  %v801_v42 = vpop.f32.mrb[7].mxu0 }
 0x1c4   :  { %v1076_v43 = vpack.c.bf16 %v1049_v22, %v1046_v13  ;;  %v1106_v44 = vrot.slane %v1075_v23, 4  ;;  %v962_v46 = vadd.f32 %v9310_v40, %v915_v25  ;;  %v991_v47 = vmax.f32 %v961_v27, 0.0  ;;  %v7995_v48 = vpop.f32.mrb[47].mxu1 }
 0x1c5   :  { %1150 = vst [vmem:[#allocation2] sm:$0xf0] %v1105_v33  ;;  %v993_v50 = vmax.f32 %v963_v39, 0.0  ;;  %v918_v51 = vadd.f32 %v879_v41, %v9277_v11  ;;  %v964_v52 = vadd.f32 %v9307_v38, %v801_v42  ;;  %v1050_v56 = vmul.f32 %v1020_v45, %v990_v35  ;;  %v1026_v41 = vld [vmem:[%s10728_s1 + $0x60] sm:$0xff]  ;;  %v1029_v42 = vld [vmem:[%s10728_s1 + $0x78] sm:$0xff]  ;;  %v1031_v48 = vld [vmem:[%s10728_s1 + $0x88] sm:$0xff] }
 0x1c6   :  { %v1107_v53 = vrot.slane %v1076_v43, 4  ;;  %1151 = vst [vmem:[#allocation2 + $0x8] sm:$0xf0] %v1106_v44  ;;  %v992_v54 = vmax.f32 %v962_v46, 0.0  ;;  %v1051_v11 = vmul.f32 %v1021_v49, %v991_v47 }
 0x1c7   :  { %v1053_v58 = vmul.f32 %v1023_v8, %v993_v50  ;;  %v965_v59 = vadd.f32 %v9310_v40, %v918_v51  ;;  %v994_v60 = vmax.f32 %v964_v52, 0.0  ;;  %v1027_v51 = vld [vmem:[%s10728_s1 + $0x68] sm:$0xff] }
 0x1c8   :  { %1153 = vst.msk [vmem:[#allocation2 + $0x10] sm:$0xf0] %vm1152_vm4, %v1107_v53  ;;  %v805_v62 = vpop.f32.mrb[8].mxu0  ;;  %v1052_v7 = vmul.f32 %v1022_v57, %v992_v54 }
 0x1c9   :  { %v1077_v63 = vpack.c.bf16 %v1053_v58, %v1050_v56  ;;  %v995_v2 = vmax.f32 %v965_v59, 0.0  ;;  %v1054_v3 = vmul.f32 %v1024_v55, %v994_v60  ;;  %v966_v4 = vadd.f32 %v9304_v37, %v805_v62  ;;  %v884_v5 = vpop.f32.mrb[48].mxu1  ;;  %v807_v6 = vpop.f32.mrb[9].mxu0  ;;  %v1030_v55 = vld [vmem:[%s10728_s1 + $0x80] sm:$0xff] }
 0x1ca   :  { %v921_v9 = vadd.f32 %v884_v5, %v9279_v14  ;;  %v7998_v10 = vpop.f32.mrb[49].mxu1  ;;  %v809_v12 = vpop.f32.mrb[10].mxu0  ;;  %v967_v18 = vadd.f32 %v9307_v38, %v807_v6 }
 0x1cb   :  { %v9365_v13 = vrot.slane %v1077_v63, 4  ;;  %v1055_v15 = vmul.f32 %v1025_v61, %v995_v2  ;;  %v1078_v16 = vpack.c.bf16 %v1054_v3, %v1051_v11  ;;  %v887_v19 = vpop.f32.mrb[50].mxu1  ;;  %v811_v22 = vpop.f32.mrb[11].mxu0  ;;  %v996_v23 = vmax.f32 %v966_v4, 0.0 }
 0x1cc   :  { %v968_v25 = vadd.f32 %v9310_v40, %v921_v9  ;;  %v969_v27 = vadd.f32 %v9304_v37, %v809_v12  ;;  %v924_v30 = vadd.f32 %v887_v19, %v9281_v17  ;;  %v7999_v31 = vpop.f32.mrb[51].mxu1  ;;  %v1028_v17 = vld [vmem:[%s10728_s1 + $0x70] sm:$0xff]  ;;  %v997_v8 = vmax.f32 %v967_v18, 0.0  ;;  %v1035_v19 = vld [vmem:[%s10728_s1 + $0xa8] sm:$0xff] }
 0x1cd   :  { %v1109_v14 = vsel %vm1104_vm5, %v1105_v33, %v9365_v13  ;;  %v1079_v35 = vpack.c.bf16 %v1055_v15, %v1052_v7  ;;  %v9373_v39 = vrot.slane %v1078_v16, 4  ;;  %v970_v49 = vadd.f32 %v9307_v38, %v811_v22 }
 0x1ce   :  { %1154 = vst [vmem:[#allocation2 + $0x18] sm:$0xff] %v1109_v14  ;;  %v998_v43 = vmax.f32 %v968_v25, 0.0  ;;  %v999_v45 = vmax.f32 %v969_v27, 0.0  ;;  %v971_v33 = vadd.f32 %v9310_v40, %v924_v30  ;;  %v1056_v50 = vmul.f32 %v1026_v41, %v996_v23  ;;  %v1033_v25 = vld [vmem:[%s10728_s1 + $0x98] sm:$0xff] }
 0x1cf   :  { %v1112_v46 = vrot.slane %v1079_v35, 4  ;;  %v1111_v47 = vsel %vm1104_vm5, %v1106_v44, %v9373_v39  ;;  %v1000_v58 = vmax.f32 %v970_v49, 0.0  ;;  %v1057_v5 = vmul.f32 %v1027_v51, %v997_v8  ;;  %v1036_v8 = vld [vmem:[%s10728_s1 + $0xb0] sm:$0xff] }
 0x1d0   :  { %1155 = vst [vmem:[#allocation2 + $0x20] sm:$0xff] %v1111_v47  ;;  %v1059_v52 = vmul.f32 %v1029_v42, %v999_v45  ;;  %v1001_v54 = vmax.f32 %v971_v33, 0.0  ;;  %v815_v44 = vpop.f32.mrb[12].mxu0  ;;  %v1058_v57 = vmul.f32 %v1028_v17, %v998_v43  ;;  %v1034_v43 = vld [vmem:[%s10728_s1 + $0xa0] sm:$0xff] }
 0x1d1   :  { %v1113_v56 = vsel %vm1104_vm5, %v1107_v53, %v1112_v46  ;;  %v972_v59 = vadd.f32 %v9304_v37, %v815_v44  ;;  %v892_v60 = vpop.f32.mrb[52].mxu1  ;;  %v817_v11 = vpop.f32.mrb[13].mxu0  ;;  %v1060_v6 = vmul.f32 %v1030_v55, %v1000_v58  ;;  %v1032_v53 = vld [vmem:[%s10728_s1 + $0x90] sm:$0xff] }
 0x1d2   :  { %1156 = vst.msk [vmem:[#allocation2 + $0x28] sm:$0xff] %vm217_vm3, %v1113_v56  ;;  %v1080_v61 = vpack.c.bf16 %v1059_v52, %v1056_v50  ;;  %v1061_v62 = vmul.f32 %v1031_v48, %v1001_v54  ;;  %v927_v63 = vadd.f32 %v892_v60, %v9283_v21  ;;  %v973_v2 = vadd.f32 %v9307_v38, %v817_v11  ;;  %v8002_v3 = vpop.f32.mrb[53].mxu1  ;;  %v819_v4 = vpop.f32.mrb[14].mxu0 }
 0x1d3   :  { %v1002_v7 = vmax.f32 %v972_v59, 0.0  ;;  %v975_v9 = vadd.f32 %v9304_v37, %v819_v4  ;;  %v895_v10 = vpop.f32.mrb[54].mxu1  ;;  %v821_v12 = vpop.f32.mrb[15].mxu0  ;;  %v1081_v23 = vpack.c.bf16 %v1060_v6, %v1057_v5 }
 0x1d4   :  { %v1114_v15 = vrot.slane %v1080_v61, 4  ;;  %v1082_v16 = vpack.c.bf16 %v1061_v62, %v1058_v57  ;;  %v974_v18 = vadd.f32 %v9310_v40, %v927_v63  ;;  %v1003_v21 = vmax.f32 %v973_v2, 0.0  ;;  %v8003_v22 = vpop.f32.mrb[55].mxu1 }
 0x1d5   :  { %v1005_v27 = vmax.f32 %v975_v9, 0.0  ;;  %v930_v30 = vadd.f32 %v895_v10, %v9285_v24  ;;  %v1062_v35 = vmul.f32 %v1032_v53, %v1002_v7  ;;  %v1116_v42 = vrot.slane %v1081_v23, 4  ;;  %v1040_v22 = vld [vmem:[%s10728_s1 + $0xd0] sm:$0xff] }
 0x1d6   :  { %v1115_v31 = vsel %vm1104_vm5, %v9365_v13, %v1114_v15  ;;  %v1118_v14 = vrot.slane %v1082_v16, 4  ;;  %v1004_v41 = vmax.f32 %v974_v18, 0.0  ;;  %v976_v33 = vadd.f32 %v9307_v38, %v821_v12  ;;  %v1037_v13 = vld [vmem:[%s10728_s1 + $0xb8] sm:$0xff] }
 0x1d7   :  { %1157 = vst [vmem:[#allocation2 + $0x30] sm:$0xff] %v1115_v31  ;;  %v1065_v17 = vmul.f32 %v1035_v19, %v1005_v27  ;;  %v977_v45 = vadd.f32 %v9310_v40, %v930_v30  ;;  %v1063_v24 = vmul.f32 %v1033_v25, %v1003_v21  ;;  %v1117_v49 = vsel %vm1104_vm5, %v9373_v39, %v1116_v42  ;;  %v1038_v39 = vld [vmem:[%s10728_s1 + $0xc0] sm:$0xff]  ;;  %v1039_v25 = vld [vmem:[%s10728_s1 + $0xc8] sm:$0xff] }
 0x1d8   :  { %v1119_v47 = vsel %vm1104_vm5, %v1112_v46, %v1118_v14  ;;  %v825_v48 = vpop.f32.mrb[16].mxu0  ;;  %v1006_v52 = vmax.f32 %v976_v33, 0.0  ;;  %1158 = vst [vmem:[#allocation2 + $0x38] sm:$0xff] %v1117_v49  ;;  %v1064_v55 = vmul.f32 %v1034_v43, %v1004_v41 }
 0x1d9   :  { %1159 = vst.msk [vmem:[#allocation2 + $0x40] sm:$0xff] %vm217_vm3, %v1119_v47  ;;  %v1083_v50 = vpack.c.bf16 %v1065_v17, %v1062_v35  ;;  %v1007_v51 = vmax.f32 %v977_v45, 0.0  ;;  %v900_v54 = vpop.f32.mrb[56].mxu1  ;;  %v827_v46 = vpop.f32.mrb[17].mxu0  ;;  %v978_v44 = vadd.f32 %v9304_v37, %v825_v48 }
 0x1da   :  { %v933_v56 = vadd.f32 %v900_v54, %v9293_v29  ;;  %v979_v57 = vadd.f32 %v9307_v38, %v827_v46  ;;  %v8006_v58 = vpop.f32.mrb[57].mxu1  ;;  %v829_v59 = vpop.f32.mrb[18].mxu0  ;;  %v1066_v61 = vmul.f32 %v1036_v8, %v1006_v52  ;;  %v1041_v29 = vld [vmem:[%s10728_s1 + $0xd8] sm:$0xff] }
 0x1db   :  { %v1120_v60 = vrot.slane %v1083_v50, 4  ;;  %v1067_v11 = vmul.f32 %v1037_v13, %v1007_v51  ;;  %v981_v62 = vadd.f32 %v9304_v37, %v829_v59  ;;  %v903_v63 = vpop.f32.mrb[58].mxu1  ;;  %v831_v2 = vpop.f32.mrb[19].mxu0  ;;  %v1008_v3 = vmax.f32 %v978_v44, 0.0 }
 0x1dc   :  { %v980_v4 = vadd.f32 %v9310_v40, %v933_v56  ;;  %v936_v5 = vadd.f32 %v903_v63, %v9298_v34  ;;  %v8007_v6 = vpop.f32.mrb[59].mxu1  ;;  %v1084_v9 = vpack.c.bf16 %v1066_v61, %v1063_v24  ;;  %v1009_v16 = vmax.f32 %v979_v57, 0.0  ;;  %v1043_v34 = vld [vmem:[%s10728_s1 + $0xe8] sm:$0xff] }
 0x1dd   :  { %v1121_v7 = vsel %vm1104_vm5, %v1114_v15, %v1120_v60  ;;  %v1085_v53 = vpack.c.bf16 %v1067_v11, %v1064_v55  ;;  %v1011_v10 = vmax.f32 %v981_v62, 0.0  ;;  %v1068_v12 = vmul.f32 %v1038_v39, %v1008_v3 }
 0x1de   :  { %1160 = vst [vmem:[#allocation2 + $0x48] sm:$0xff] %v1121_v7  ;;  %v1010_v37 = vmax.f32 %v980_v4, 0.0  ;;  %v983_v18 = vadd.f32 %v9310_v40, %v936_v5  ;;  %v1122_v19 = vrot.slane %v1084_v9, 4  ;;  %v982_v15 = vadd.f32 %v9307_v38, %v831_v2  ;;  %v1042_v40 = vld [vmem:[%s10728_s1 + $0xe0] sm:$0xff] }
 0x1df   :  { %v1124_v21 = vrot.slane %v1085_v53, 4  ;;  %v1071_v23 = vmul.f32 %v1041_v29, %v1011_v10  ;;  %v1069_v17 = vmul.f32 %v1039_v25, %v1009_v16 }
 0x1e0   :  { %v1013_v27 = vmax.f32 %v983_v18, 0.0  ;;  %v1123_v31 = vsel %vm1104_vm5, %v1116_v42, %v1122_v19  ;;  %v1012_v41 = vmax.f32 %v982_v15, 0.0  ;;  %v1070_v43 = vmul.f32 %v1040_v22, %v1010_v37 }
 0x1e1   :  { %v1125_v30 = vsel %vm1104_vm5, %v1118_v14, %v1124_v21  ;;  %v1086_v35 = vpack.c.bf16 %v1071_v23, %v1068_v12  ;;  %1161 = vst [vmem:[#allocation2 + $0x50] sm:$0xff] %v1123_v31 }
 0x1e2   :  { %1162 = vst.msk [vmem:[#allocation2 + $0x58] sm:$0xff] %vm217_vm3, %v1125_v30  ;;  %v1073_v38 = vmul.f32 %v1043_v34, %v1013_v27  ;;  %v1072_v33 = vmul.f32 %v1042_v40, %v1012_v41 }
 0x1e3   :  { %v1126_v45 = vrot.slane %v1086_v35, 4 }
 0x1e4   :  { %v1088_v47 = vpack.c.bf16 %v1073_v38, %v1070_v43  ;;  %v1087_v13 = vpack.c.bf16 %v1072_v33, %v1069_v17 }
 0x1e5   :  { %v1127_v24 = vsel %vm1104_vm5, %v1120_v60, %v1126_v45  ;;  %1166 = vst [vmem:[#allocation2 + $0x78] sm:$0xf] %v1126_v45 }
 0x1e6   :  { %1163 = vst [vmem:[#allocation2 + $0x60] sm:$0xff] %v1127_v24  ;;  %v1130_v14 = vrot.slane %v1088_v47, 4  ;;  %v1128_v8 = vrot.slane %v1087_v13, 4 }
 0x1e8   :  { %v1131_v42 = vsel %vm1104_vm5, %v1124_v21, %v1130_v14  ;;  %1169 = vst.msk [vmem:[#allocation2 + $0x88] sm:$0xf] %vm1168_vm6, %v1130_v14  ;;  %v1129_v48 = vsel %vm1104_vm5, %v1122_v19, %v1128_v8  ;;  %1167 = vst [vmem:[#allocation2 + $0x80] sm:$0xf] %v1128_v8 }
 0x1e9   :  { %1165 = vst.msk [vmem:[#allocation2 + $0x70] sm:$0xff] %vm217_vm3, %v1131_v42  ;;  %1164 = vst [vmem:[#allocation2 + $0x68] sm:$0xff] %v1129_v48 }
 0x1ea   :  { %8888 = dma.done.wait [#allocation6], 69120 }
 0x1eb   :  { %8889 = vsyncadd [#allocation6], 4294898176  ;;  %v1258_v49 = vld [vmem:[#allocation3 + $0x1e8] sm:$0xff]  ;;  %v1283_v50 = vld [vmem:[#allocation3 + $0x2b0] sm:$0xff]  ;;  %s8924_s1 = smov 32   ;;  %vm5501_vm7 = vcmask 261120  }
 0x1ec   :  { %v1257_v51 = vld [vmem:[#allocation3 + $0x1e0] sm:$0xff]  ;;  %1393 = vmatprep.subr.bf16.mxu0 %v1258_v49  ;;  %7403 = vmatprep.subr.bf16.mxu1 %v1283_v50  ;;  %v1259_v52 = vld [vmem:[#allocation3 + $0x1f0] sm:$0xff]  ;;  %v1286_v46 = vld [vmem:[#allocation3 + $0x2c8] sm:$0xff] }
 0x1ed   :  { %v1261_v54 = vld [vmem:[#allocation3 + $0x200] sm:$0xff]  ;;  %1394 = vmatpush1.bf16.msra.mxu0 %v1257_v51  ;;  %7404 = vmatpush3.bf16.msra.mxu1 %v1259_v52  ;;  %v1260_v55 = vld [vmem:[#allocation3 + $0x1f8] sm:$0xff]  ;;  %v1262_v44 = vld [vmem:[#allocation3 + $0x208] sm:$0xff] }
 0x1ee   :  { %1395 = vmatprep.subr.bf16.mxu0 %v1261_v54  ;;  %7405 = vmatprep.subr.bf16.mxu1 %v1286_v46  ;;  %v1264_v56 = vld [vmem:[#allocation3 + $0x218] sm:$0xff]  ;;  %v1289_v57 = vld [vmem:[#allocation3 + $0x2e0] sm:$0xff]  ;;  %v1263_v58 = vld [vmem:[#allocation3 + $0x210] sm:$0xff] }
 0x1ef   :  { %v1265_v59 = vld [vmem:[#allocation3 + $0x220] sm:$0xff]  ;;  %v1267_v60 = vld [vmem:[#allocation3 + $0x230] sm:$0xff]  ;;  %v1292_v11 = vld [vmem:[#allocation3 + $0x2f8] sm:$0xff] }
 0x1f0   :  { %v9466_v61 = vld [vmem:[#allocation2 + $0x20] sm:$0xff]  ;;  %v1266_v39 = vld [vmem:[#allocation3 + $0x228] sm:$0xff]  ;;  %v1268_v62 = vld [vmem:[#allocation3 + $0x238] sm:$0xff] }
 0x1f1   :  { %1396 = vmatpush1.bf16.msra.mxu0 %v1260_v55  ;;  %7406 = vmatpush3.bf16.msra.mxu1 %v1262_v44  ;;  %v1251_v63 = vld [vmem:[#allocation2 + $0x8] sm:$0xf0]  ;;  %v1339_v2 = vrot.slane %v9466_v61, 4  ;;  %v1270_v3 = vld [vmem:[#allocation3 + $0x248] sm:$0xff]  ;;  %v1295_v4 = vld [vmem:[#allocation3 + $0x310] sm:$0xff] }
 0x1f2   :  { %1397 = vmatprep.subr.bf16.mxu0 %v1264_v56  ;;  %7407 = vmatprep.subr.bf16.mxu1 %v1289_v57  ;;  %v1338_v29 = vrot.slane %v1251_v63, 4  ;;  %v1269_v6 = vld [vmem:[#allocation3 + $0x240] sm:$0xff]  ;;  %v1271_v7 = vld [vmem:[#allocation3 + $0x250] sm:$0xff]  ;;  %v1298_v9 = vld [vmem:[#allocation3 + $0x328] sm:$0xff] }
 0x1f3   :  { %v1273_v53 = vld [vmem:[#allocation3 + $0x260] sm:$0xff]  ;;  %v1272_v10 = vld [vmem:[#allocation3 + $0x258] sm:$0xff]  ;;  %v1274_v12 = vld [vmem:[#allocation3 + $0x268] sm:$0xff] }
 0x1f4   :  { %v1340_v5 = vsel %vm1104_vm5, %v1338_v29, %v1339_v2  ;;  %v1276_v37 = vld [vmem:[#allocation3 + $0x278] sm:$0xff]  ;;  %v1301_v16 = vld [vmem:[#allocation3 + $0x340] sm:$0xff]  ;;  %v1275_v18 = vld [vmem:[#allocation3 + $0x270] sm:$0xff] }
 0x1f5   :  { %1398 = vmatpush1.bf16.msra.mxu0 %v1263_v58  ;;  %7408 = vmatpush3.bf16.msra.mxu1 %v1265_v59  ;;  %v1277_v21 = vld [vmem:[#allocation3 + $0x280] sm:$0xff]  ;;  %v9470_v19 = vld [vmem:[#allocation2 + $0x18] sm:$0xff]  ;;  %v1250_v22 = vld [vmem:[#allocation2] sm:$0xf0] }
 0x1f6   :  { %1399 = vmatprep.subr.bf16.mxu0 %v1267_v60  ;;  %7409 = vmatprep.subr.bf16.mxu1 %v1292_v11  ;;  %v1279_v23 = vld [vmem:[#allocation3 + $0x290] sm:$0xff]  ;;  %v1304_v34 = vld [vmem:[#allocation3 + $0x358] sm:$0xff]  ;;  %v9472_v15 = vld [vmem:[#allocation2 + $0x38] sm:$0xff]  ;;  %v1335_v25 = vrot.slane %v1250_v22, 4  ;;  %v1336_v27 = vrot.slane %v9470_v19, 4 }
 0x1f7   :  { %1591 = vmatprep.mubr.bf16.mxu1 %v1340_v5  ;;  %1425 = vmatprep.mubr.bf16.mxu0 %v1340_v5  ;;  %v1278_v40 = vld [vmem:[#allocation3 + $0x288] sm:$0xff]  ;;  %v1280_v30 = vld [vmem:[#allocation3 + $0x298] sm:$0xff]  ;;  %v1346_v31 = vrot.slane %v9472_v15, 4  ;;  %v1281_v43 = vld [vmem:[#allocation3 + $0x2a0] sm:$0xff] }
 0x1f8   :  { %v1282_v35 = vld [vmem:[#allocation3 + $0x2a8] sm:$0xff]  ;;  %v9477_v41 = vsel %vm1104_vm5, %v1335_v25, %v1336_v27  ;;  %v9482_v17 = vld [vmem:[#allocation2 + $0x30] sm:$0xff]  ;;  %v1307_v47 = vld [vmem:[#allocation3 + $0x370] sm:$0xff] }
 0x1f9   :  { %1400 = vmatpush1.bf16.msra.mxu0 %v1266_v39  ;;  %7410 = vmatpush3.bf16.msra.mxu1 %v1268_v62  ;;  %v9480_v38 = vsel %vm1104_vm5, %v1339_v2, %v1346_v31  ;;  %v1285_v45 = vld [vmem:[#allocation3 + $0x2c0] sm:$0xff]  ;;  %v1344_v24 = vrot.slane %v9482_v17, 4  ;;  %v1284_v13 = vld [vmem:[#allocation3 + $0x2b8] sm:$0xff]  ;;  %v1310_v42 = vld [vmem:[#allocation3 + $0x388] sm:$0xff] }
 0x1fa   :  { %1401 = vmatprep.subr.bf16.mxu0 %v1270_v3  ;;  %7411 = vmatprep.subr.bf16.mxu1 %v1295_v4  ;;  %v9485_v33 = vld [vmem:[#allocation2 + $0x50] sm:$0xff]  ;;  %v1288_v8 = vld [vmem:[#allocation3 + $0x2d8] sm:$0xff]  ;;  %v1287_v49 = vld [vmem:[#allocation3 + $0x2d0] sm:$0xff] }
 0x1fb   :  { %v1352_v14 = vrot.slane %v9485_v33, 4  ;;  %v9493_v48 = vsel %vm1104_vm5, %v1336_v27, %v1344_v24  ;;  %v9498_v51 = vld [vmem:[#allocation2 + $0x48] sm:$0xff]  ;;  %v1291_v52 = vld [vmem:[#allocation3 + $0x2f0] sm:$0xff]  ;;  %v1313_v46 = vld [vmem:[#allocation3 + $0x3a0] sm:$0xff] }
 0x1fc   :  { %v9500_v54 = vld [vmem:[#allocation2 + $0x68] sm:$0xff]  ;;  %v1350_v55 = vrot.slane %v9498_v51, 4  ;;  %v1290_v44 = vld [vmem:[#allocation3 + $0x2e8] sm:$0xff]  ;;  %v1216_v59 = vld [vmem:[#allocation3 + $0xd0] sm:$0xff] }
 0x1fd   :  { %1402 = vmatpush1.bf16.msra.mxu0 %v1269_v6  ;;  %7412 = vmatpush3.bf16.msra.mxu1 %v1271_v7  ;;  %v9496_v50 = vsel %vm1104_vm5, %v1346_v31, %v1352_v14  ;;  %v1358_v56 = vrot.slane %v9500_v54, 4  ;;  %v1294_v57 = vld [vmem:[#allocation3 + $0x308] sm:$0xff]  ;;  %v1316_v58 = vld [vmem:[#allocation3 + $0x3b8] sm:$0xff]  ;;  %v1293_v11 = vld [vmem:[#allocation3 + $0x300] sm:$0xff] }
 0x1fe   :  { %1403 = vmatprep.subr.bf16.mxu0 %v1273_v53  ;;  %7413 = vmatprep.subr.bf16.mxu1 %v1298_v9  ;;  %v9509_v60 = vsel %vm1104_vm5, %v1344_v24, %v1350_v55  ;;  %v9514_v62 = vld [vmem:[#allocation2 + $0x60] sm:$0xff]  ;;  %v1297_v63 = vld [vmem:[#allocation3 + $0x320] sm:$0xff]  ;;  %v1296_v4 = vld [vmem:[#allocation3 + $0x318] sm:$0xff] }
 0x1ff   :  { %v9512_v39 = vsel %vm1104_vm5, %v1352_v14, %v1358_v56  ;;  %v1254_v2 = vld [vmem:[#allocation2 + $0x80] sm:$0xf]  ;;  %v1356_v3 = vrot.slane %v9514_v62, 4  ;;  %v1300_v5 = vld [vmem:[#allocation3 + $0x338] sm:$0xff]  ;;  %v1253_v9 = vld [vmem:[#allocation2 + $0x78] sm:$0xf] }
 0x200   :  { %v1364_v29 = vrot.slane %v1254_v2, 4  ;;  %v1299_v7 = vld [vmem:[#allocation3 + $0x330] sm:$0xff]  ;;  %v9530_v22 = vld [vmem:[#allocation2 + $0x28] sm:$0xff]  ;;  %v1195_v24 = vld [vmem:[#allocation3 + $0x28] sm:$0xff] }
 0x201   :  { %1404 = vmatpush1.bf16.msra.mxu0 %v1272_v10  ;;  %7414 = vmatpush3.bf16.msra.mxu1 %v1274_v12  ;;  %v9520_v6 = vsel %vm1104_vm5, %v1350_v55, %v1356_v3  ;;  %v1303_v10 = vld [vmem:[#allocation3 + $0x350] sm:$0xff]  ;;  %v1362_v12 = vrot.slane %v1253_v9, 4  ;;  %v1342_v27 = vrot.slane %v9530_v22, 4  ;;  %v1222_v14 = vld [vmem:[#allocation3 + $0x100] sm:$0xff]  ;;  %v1193_v9 = vld [vmem:[#allocation3 + $0x18] sm:$0xff] }
 0x202   :  { %1405 = vmatprep.subr.bf16.mxu0 %v1276_v37  ;;  %7415 = vmatprep.subr.bf16.mxu1 %v1301_v16  ;;  %v9523_v53 = vsel %vm1104_vm5, %v1358_v56, %v1364_v29  ;;  %v1302_v37 = vld [vmem:[#allocation3 + $0x348] sm:$0xff]  ;;  %v1228_v55 = vld [vmem:[#allocation3 + $0x130] sm:$0xff]  ;;  %v9565_v56 = vld [vmem:[#allocation2 + $0x70] sm:$0xff] }
 0x203   :  { %v1306_v16 = vld [vmem:[#allocation3 + $0x368] sm:$0xff]  ;;  %v1210_v2 = vld [vmem:[#allocation3 + $0xa0] sm:$0xff]  ;;  %v1213_v29 = vld [vmem:[#allocation3 + $0xb8] sm:$0xff] }
 0x205   :  { %1406 = vmatpush1.bf16.msra.mxu0 %v1275_v18  ;;  %7416 = vmatpush3.bf16.msra.mxu1 %v1277_v21  ;;  %v9528_v18 = vsel %vm1104_vm5, %v1356_v3, %v1362_v12  ;;  %v1305_v21 = vld [vmem:[#allocation3 + $0x360] sm:$0xff]  ;;  %v1237_v3 = vld [vmem:[#allocation3 + $0x178] sm:$0xff]  ;;  %v9595_v12 = vld [vmem:[#allocation2] sm:$0xff] }
 0x206   :  { %1407 = vmatprep.subr.bf16.mxu0 %v1279_v23  ;;  %7417 = vmatprep.subr.bf16.mxu1 %v1304_v34  ;;  %v1252_v23 = vld [vmem:[#allocation2 + $0x10] sm:$0xf0] }
 0x207   :  { %v1309_v34 = vld [vmem:[#allocation3 + $0x380] sm:$0xff]  ;;  %v1341_v25 = vrot.slane %v1252_v23, 4  ;;  %v1203_v23 = vld [vmem:[#allocation3 + $0x68] sm:$0xff] }
 0x209   :  { %1408 = vmatpush1.bf16.msra.mxu0 %v1278_v40  ;;  %7418 = vmatpush3.bf16.msra.mxu1 %v1280_v30  ;;  %v1308_v40 = vld [vmem:[#allocation3 + $0x378] sm:$0xff]  ;;  %v9539_v31 = vsel %vm1104_vm5, %v1341_v25, %v1342_v27  ;;  %v1202_v25 = vld [vmem:[#allocation3 + $0x60] sm:$0xff] }
 0x20a   :  { %1409 = vmatprep.subr.bf16.mxu0 %v1282_v35  ;;  %8008 = vmatprep.subr.bf16.mxu1 %v8905_v0  ;;  %v1312_v30 = vld [vmem:[#allocation3 + $0x398] sm:$0xff]  ;;  %v9541_v35 = vld [vmem:[#allocation2 + $0x40] sm:$0xff] }
 0x20c   :  { %1592 = vmatmul.mubr.bf16.vlgmr.msra.gmra.mrb[60].mxu1 %v9477_v41 }
 0x20d   :  { %1410 = vmatpush1.bf16.msra.mxu0 %v1281_v43  ;;  %1599 = vmatprep.mubr.bf16.mxu1 %v9480_v38  ;;  %v1311_v43 = vld [vmem:[#allocation3 + $0x390] sm:$0xff] }
 0x20e   :  { %1411 = vmatprep.subr.bf16.mxu0 %v1285_v45  ;;  %8009 = vmatpush3.bf16.msra.mxu1 %v1307_v47  ;;  %v1315_v45 = vld [vmem:[#allocation3 + $0x3b0] sm:$0xff]  ;;  %v1348_v47 = vrot.slane %v9541_v35, 4 }
 0x20f   :  { %8010 = vmatprep.subr.bf16.mxu1 %v8905_v0 }
 0x211   :  { %1412 = vmatpush1.bf16.msra.mxu0 %v1284_v13  ;;  %v1314_v13 = vld [vmem:[#allocation3 + $0x3a8] sm:$0xff] }
 0x212   :  { %1413 = vmatprep.subr.bf16.mxu0 %v1288_v8  ;;  %8011 = vmatpush3.bf16.msra.mxu1 %v1310_v42  ;;  %v1191_v8 = vld [vmem:[#allocation3 + $0x8] sm:$0xff]  ;;  %v9551_v42 = vsel %vm1104_vm5, %v1342_v27, %v1348_v47  ;;  %v1206_v27 = vld [vmem:[#allocation3 + $0x80] sm:$0xff] }
 0x213   :  { %8012 = vmatprep.subr.bf16.mxu1 %v8905_v0 }
 0x214   :  { %1600 = vmatmul.mubr.bf16.gmra.mrb[64].mxu1 %v9493_v48 }
 0x215   :  { %1414 = vmatpush1.bf16.msra.mxu0 %v1287_v49  ;;  %1607 = vmatprep.mubr.bf16.mxu1 %v9496_v50  ;;  %v1198_v49 = vld [vmem:[#allocation3 + $0x40] sm:$0xff] }
 0x216   :  { %1415 = vmatprep.subr.bf16.mxu0 %v1291_v52  ;;  %8013 = vmatpush3.bf16.msra.mxu1 %v1313_v46  ;;  %v1201_v46 = vld [vmem:[#allocation3 + $0x58] sm:$0xff] }
 0x217   :  { %8014 = vmatprep.subr.bf16.mxu1 %v8905_v0 }
 0x219   :  { %1416 = vmatpush1.bf16.msra.mxu0 %v1290_v44 }
 0x21a   :  { %1417 = vmatprep.subr.bf16.mxu0 %v1294_v57  ;;  %8015 = vmatpush3.bf16.msra.mxu1 %v1316_v58  ;;  %v1204_v57 = vld [vmem:[#allocation3 + $0x70] sm:$0xff]  ;;  %v1231_v58 = vld [vmem:[#allocation3 + $0x148] sm:$0xff] }
 0x21b   :  { %7458 = vmatprep.subr.bf16.mxu1 %v1216_v59  ;;  %v1360_v59 = vrot.slane %v9565_v56, 4 }
 0x21c   :  { %1608 = vmatmul.mubr.bf16.gmra.mrb[68].mxu1 %v9509_v60 }
 0x21d   :  { %1418 = vmatpush1.bf16.msra.mxu0 %v1293_v11  ;;  %1615 = vmatprep.mubr.bf16.mxu1 %v9512_v39  ;;  %v1234_v11 = vld [vmem:[#allocation3 + $0x160] sm:$0xff] }
 0x21e   :  { %1419 = vmatprep.subr.bf16.mxu0 %v1297_v63  ;;  %v1255_v63 = vld [vmem:[#allocation2 + $0x88] sm:$0xf] }
 0x221   :  { %1420 = vmatpush1.bf16.msra.mxu0 %v1296_v4  ;;  %v1366_v4 = vrot.slane %v1255_v63, 4  ;;  %v2068_v63 = vld [vmem:[#allocation3 + $0x4c0] sm:$0xff] }
 0x222   :  { %1421 = vmatprep.subr.bf16.mxu0 %v1300_v5 }
 0x223   :  { %v9584_v5 = vsel %vm1104_vm5, %v1360_v59, %v1366_v4  ;;  %v2044_v4 = vld [vmem:[#allocation3 + $0x400] sm:$0xff] }
 0x224   :  { %1616 = vmatmul.mubr.bf16.gmra.mrb[72].mxu1 %v9520_v6 }
 0x225   :  { %1422 = vmatpush1.bf16.msra.mxu0 %v1299_v7  ;;  %1623 = vmatprep.mubr.bf16.mxu1 %v9523_v53  ;;  %v9586_v7 = vld [vmem:[#allocation2 + $0x8] sm:$0xff] }
 0x226   :  { %1423 = vmatprep.subr.bf16.mxu0 %v1303_v10  ;;  %v1197_v10 = vld [vmem:[#allocation3 + $0x38] sm:$0xff] }
 0x229   :  { %1424 = vmatpush1.bf16.msra.mxu0 %v1302_v37  ;;  %v1196_v37 = vld [vmem:[#allocation3 + $0x30] sm:$0xff] }
 0x22a   :  { %1476 = vmatprep.subr.bf16.mxu0 %v1306_v16  ;;  %v1200_v16 = vld [vmem:[#allocation3 + $0x50] sm:$0xff] }
 0x22c   :  { %1426 = vmatmul.mubr.bf16.vlgmr.msra.gmra.mrb[20].mxu0 %v9477_v41  ;;  %1624 = vmatmul.mubr.bf16.gmra.mrb[76].mxu1 %v9528_v18  ;;  %v1192_v41 = vld [vmem:[#allocation3 + $0x10] sm:$0xff] }
 0x22d   :  { %1477 = vmatpush1.bf16.msra.mxu0 %v1305_v21  ;;  %1435 = vmatprep.mubr.bf16.mxu0 %v9480_v38  ;;  %v1219_v38 = vld [vmem:[#allocation3 + $0xe8] sm:$0xff] }
 0x22e   :  { %8016 = vmatprep.mubr.msk.bf16.mxu1 %vm8907_vm0, %v8905_v0  ;;  %1478 = vmatprep.subr.bf16.mxu0 %v1309_v34  ;;  %v1199_v21 = vld [vmem:[#allocation3 + $0x48] sm:$0xff] }
 0x22f   :  { %v1243_v34 = vld [vmem:[#allocation3 + $0x1a8] sm:$0xff] }
 0x231   :  { %1479 = vmatpush1.bf16.msra.mxu0 %v1308_v40  ;;  %v1246_v40 = vld [vmem:[#allocation3 + $0x1c0] sm:$0xff] }
 0x232   :  { %1480 = vmatprep.subr.bf16.mxu0 %v1312_v30  ;;  %v1205_v30 = vld [vmem:[#allocation3 + $0x78] sm:$0xff] }
 0x234   :  { %1436 = vmatmul.mubr.bf16.gmra.mrb[24].mxu0 %v9493_v48  ;;  %8017 = vmatmul.mubr.msk.bf16.vlgmr.msra.gmra.mrb[80].mxu1 %vm217_vm3, %v9539_v31  ;;  %v9553_v48 = vld [vmem:[#allocation2 + $0x58] sm:$0xff] }
 0x235   :  { %1445 = vmatprep.mubr.bf16.mxu0 %v9496_v50  ;;  %8020 = vmatprep.mubr.msk.bf16.mxu1 %vm8907_vm0, %v8905_v0  ;;  %v1225_v50 = vld [vmem:[#allocation3 + $0x118] sm:$0xff]  ;;  %v1354_v52 = vrot.slane %v9553_v48, 4 }
 0x236   :  { %7459 = vmatpush3.bf16.msra.mxu1 %v1192_v41  ;;  %1481 = vmatpush1.bf16.msra.mxu0 %v1311_v43  ;;  %v1249_v41 = vld [vmem:[#allocation3 + $0x1d8] sm:$0xff]  ;;  %v2062_v43 = vld [vmem:[#allocation3 + $0x490] sm:$0xff] }
 0x237   :  { %7460 = vmatprep.subr.bf16.mxu1 %v1219_v38  ;;  %1482 = vmatprep.subr.bf16.mxu0 %v1315_v45  ;;  %v9563_v44 = vsel %vm1104_vm5, %v1348_v47, %v1354_v52  ;;  %v1208_v38 = vld [vmem:[#allocation3 + $0x90] sm:$0xff]  ;;  %v1211_v47 = vld [vmem:[#allocation3 + $0xa8] sm:$0xff] }
 0x238   :  { %v1212_v45 = vld [vmem:[#allocation3 + $0xb0] sm:$0xff] }
 0x23a   :  { %7461 = vmatpush3.bf16.msra.mxu1 %v1195_v24  ;;  %1483 = vmatpush1.bf16.msra.mxu0 %v1314_v13  ;;  %v1215_v24 = vld [vmem:[#allocation3 + $0xc8] sm:$0xff]  ;;  %v1214_v13 = vld [vmem:[#allocation3 + $0xc0] sm:$0xff] }
 0x23b   :  { %7462 = vmatprep.subr.bf16.mxu1 %v1222_v14  ;;  %1720 = vmatprep.subr.bf16.mxu0 %v1191_v8  ;;  %v1218_v14 = vld [vmem:[#allocation3 + $0xe0] sm:$0xff]  ;;  %v1217_v8 = vld [vmem:[#allocation3 + $0xd8] sm:$0xff] }
 0x23c   :  { %1446 = vmatmul.mubr.bf16.gmra.mrb[28].mxu0 %v9509_v60  ;;  %8021 = vmatmul.mubr.msk.bf16.gmra.mrb[84].mxu1 %vm217_vm3, %v9551_v42  ;;  %v1207_v60 = vld [vmem:[#allocation3 + $0x88] sm:$0xff] }
 0x23d   :  { %1455 = vmatprep.mubr.bf16.mxu0 %v9512_v39  ;;  %8024 = vmatprep.mubr.msk.bf16.mxu1 %vm8907_vm0, %v8905_v0  ;;  %v9575_v39 = vsel %vm1104_vm5, %v1354_v52, %v1360_v59  ;;  %v1223_v52 = vld [vmem:[#allocation3 + $0x108] sm:$0xff] }
 0x23e   :  { %7463 = vmatpush3.bf16.msra.mxu1 %v1198_v49  ;;  %v1220_v49 = vld [vmem:[#allocation3 + $0xf0] sm:$0xff]  ;;  %v2065_v59 = vld [vmem:[#allocation3 + $0x4a8] sm:$0xff] }
 0x23f   :  { %7464 = vmatprep.subr.bf16.mxu1 %v1225_v50  ;;  %v1224_v50 = vld [vmem:[#allocation3 + $0x110] sm:$0xff] }
 0x242   :  { %7465 = vmatpush3.bf16.msra.mxu1 %v1201_v46  ;;  %v1227_v46 = vld [vmem:[#allocation3 + $0x128] sm:$0xff] }
 0x243   :  { %7466 = vmatprep.subr.bf16.mxu1 %v1228_v55  ;;  %v9623_v55 = vld [vmem:[#allocation2 + $0x10] sm:$0xff] }
 0x244   :  { %1456 = vmatmul.mubr.bf16.gmra.mrb[32].mxu0 %v9520_v6  ;;  %8025 = vmatmul.mubr.msk.bf16.gmra.mrb[88].mxu1 %vm217_vm3, %v9563_v44  ;;  %v1190_v6 = vld [vmem:[#allocation3] sm:$0xff] }
 0x245   :  { %1465 = vmatprep.mubr.bf16.mxu0 %v9523_v53  ;;  %8028 = vmatprep.mubr.msk.bf16.mxu1 %vm8907_vm0, %v8905_v0  ;;  %v1194_v53 = vld [vmem:[#allocation3 + $0x20] sm:$0xff] }
 0x246   :  { %7467 = vmatpush3.bf16.msra.mxu1 %v1204_v57  ;;  %v1230_v57 = vld [vmem:[#allocation3 + $0x140] sm:$0xff] }
 0x247   :  { %7468 = vmatprep.subr.bf16.mxu1 %v1231_v58  ;;  %v2038_v58 = vld [vmem:[#allocation3 + $0x3d0] sm:$0xff] }
 0x24a   :  { %7469 = vmatpush3.bf16.msra.mxu1 %v1207_v60  ;;  %v1229_v60 = vld [vmem:[#allocation3 + $0x138] sm:$0xff] }
 0x24b   :  { %7470 = vmatprep.subr.bf16.mxu1 %v1234_v11  ;;  %v1233_v11 = vld [vmem:[#allocation3 + $0x158] sm:$0xff] }
 0x24c   :  { %1466 = vmatmul.mubr.bf16.gmra.mrb[36].mxu0 %v9528_v18  ;;  %8029 = vmatmul.mubr.msk.bf16.gmra.mrb[92].mxu1 %vm217_vm3, %v9575_v39  ;;  %v1240_v18 = vld [vmem:[#allocation3 + $0x190] sm:$0xff] }
 0x24d   :  { %1508 = vmatprep.mubr.bf16.mxu0 %v8906_v1  ;;  %8032 = vmatprep.mubr.msk.bf16.mxu1 %vm8907_vm0, %v8905_v0 }
 0x24e   :  { %7471 = vmatpush3.bf16.msra.mxu1 %v1210_v2  ;;  %v1232_v2 = vld [vmem:[#allocation3 + $0x150] sm:$0xff] }
 0x24f   :  { %7472 = vmatprep.subr.bf16.mxu1 %v1237_v3  ;;  %v1236_v3 = vld [vmem:[#allocation3 + $0x170] sm:$0xff] }
 0x252   :  { %7473 = vmatpush3.bf16.msra.mxu1 %v1213_v29  ;;  %v2071_v29 = vld [vmem:[#allocation3 + $0x4d8] sm:$0xff] }
 0x253   :  { %8036 = vmatprep.subr.bf16.mxu1 %v8905_v0 }
 0x254   :  { %7259 = vmatmul.mubr.msk.bf16.vlgmr.msra.gmra.mrb[20].mxu0 %vm217_vm3, %v9539_v31  ;;  %8033 = vmatmul.mubr.msk.bf16.gmra.mrb[96].mxu1 %vm217_vm3, %v9584_v5  ;;  %v1209_v31 = vld [vmem:[#allocation3 + $0x98] sm:$0xff] }
 0x255   :  { %1721 = vmatpush1.bf16.msra.mxu0 %v1190_v6  ;;  %1918 = vmatprep.mubr.bf16.mxu1 %v9586_v7  ;;  %v1239_v6 = vld [vmem:[#allocation3 + $0x188] sm:$0xff] }
 0x256   :  { %1722 = vmatprep.subr.bf16.mxu0 %v1194_v53  ;;  %1518 = vmatprep.mubr.bf16.mxu0 %v8906_v1  ;;  %v2074_v53 = vld [vmem:[#allocation3 + $0x4f0] sm:$0xff] }
 0x259   :  { %1723 = vmatpush1.bf16.msra.mxu0 %v1193_v9  ;;  %v1238_v9 = vld [vmem:[#allocation3 + $0x180] sm:$0xff] }
 0x25a   :  { %1724 = vmatprep.subr.bf16.mxu0 %v1197_v10  ;;  %v1242_v10 = vld [vmem:[#allocation3 + $0x1a0] sm:$0xff] }
 0x25c   :  { %1919 = vmatmul.mubr.bf16.vlgmr.msra.gmra.mrb[100].mxu1 %v9595_v12  ;;  %7260 = vmatmul.mubr.msk.bf16.gmra.mrb[24].mxu0 %vm217_vm3, %v9551_v42  ;;  %v1221_v42 = vld [vmem:[#allocation3 + $0xf8] sm:$0xff] }
 0x25d   :  { %1725 = vmatpush1.bf16.msra.mxu0 %v1196_v37  ;;  %1926 = vmatprep.mubr.bf16.mxu1 %v9466_v61  ;;  %v2050_v37 = vld [vmem:[#allocation3 + $0x430] sm:$0xff] }
 0x25e   :  { %1726 = vmatprep.subr.bf16.mxu0 %v1200_v16  ;;  %8037 = vmatpush3.bf16.msra.mxu1 %v1240_v18  ;;  %v2077_v16 = vld [vmem:[#allocation3 + $0x508] sm:$0xff]  ;;  %v1241_v18 = vld [vmem:[#allocation3 + $0x198] sm:$0xff] }
 0x25f   :  { %8038 = vmatprep.subr.bf16.mxu1 %v8905_v0  ;;  %1528 = vmatprep.mubr.bf16.mxu0 %v8906_v1 }
 0x261   :  { %1727 = vmatpush1.bf16.msra.mxu0 %v1199_v21  ;;  %v1245_v21 = vld [vmem:[#allocation3 + $0x1b8] sm:$0xff] }
 0x262   :  { %1728 = vmatprep.subr.bf16.mxu0 %v1203_v23  ;;  %8039 = vmatpush3.bf16.msra.mxu1 %v1243_v34  ;;  %v2053_v23 = vld [vmem:[#allocation3 + $0x448] sm:$0xff]  ;;  %v1244_v34 = vld [vmem:[#allocation3 + $0x1b0] sm:$0xff] }
 0x263   :  { %8040 = vmatprep.subr.bf16.mxu1 %v8905_v0 }
 0x264   :  { %1927 = vmatmul.mubr.bf16.gmra.mrb[104].mxu1 %v9470_v19  ;;  %7261 = vmatmul.mubr.msk.bf16.gmra.mrb[28].mxu0 %vm217_vm3, %v9563_v44  ;;  %v1226_v44 = vld [vmem:[#allocation3 + $0x120] sm:$0xff] }
 0x265   :  { %1729 = vmatpush1.bf16.msra.mxu0 %v1202_v25  ;;  %1934 = vmatprep.mubr.bf16.mxu1 %v9472_v15  ;;  %v2056_v25 = vld [vmem:[#allocation3 + $0x460] sm:$0xff] }
 0x266   :  { %1730 = vmatprep.subr.bf16.mxu0 %v1206_v27  ;;  %8041 = vmatpush3.bf16.msra.mxu1 %v1246_v40  ;;  %v1248_v27 = vld [vmem:[#allocation3 + $0x1d0] sm:$0xff]  ;;  %v2083_v40 = vld [vmem:[#allocation3 + $0x538] sm:$0xff] }
 0x267   :  { %8042 = vmatprep.subr.bf16.mxu1 %v8905_v0  ;;  %1538 = vmatprep.mubr.bf16.mxu0 %v8906_v1 }
 0x269   :  { %1731 = vmatpush1.bf16.msra.mxu0 %v1205_v30  ;;  %v1247_v30 = vld [vmem:[#allocation3 + $0x1c8] sm:$0xff] }
 0x26a   :  { %1732 = vmatprep.subr.bf16.mxu0 %v1209_v31  ;;  %8043 = vmatpush3.bf16.msra.mxu1 %v1249_v41  ;;  %v2059_v31 = vld [vmem:[#allocation3 + $0x478] sm:$0xff]  ;;  %v2037_v41 = vld [vmem:[#allocation3 + $0x3c8] sm:$0xff] }
 0x26b   :  { %7513 = vmatprep.subr.bf16.mxu1 %v2062_v43  ;;  %v2086_v43 = vld [vmem:[#allocation3 + $0x550] sm:$0xff] }
 0x26c   :  { %1935 = vmatmul.mubr.bf16.gmra.mrb[108].mxu1 %v9482_v17  ;;  %7262 = vmatmul.mubr.msk.bf16.gmra.mrb[32].mxu0 %vm217_vm3, %v9575_v39  ;;  %v2041_v39 = vld [vmem:[#allocation3 + $0x3e8] sm:$0xff] }
 0x26d   :  { %1733 = vmatpush1.bf16.msra.mxu0 %v1208_v38  ;;  %1942 = vmatprep.mubr.bf16.mxu1 %v9485_v33  ;;  %v2089_v38 = vld [vmem:[#allocation3 + $0x568] sm:$0xff] }
 0x26e   :  { %1734 = vmatprep.subr.bf16.mxu0 %v1212_v45  ;;  %1548 = vmatprep.mubr.bf16.mxu0 %v8906_v1  ;;  %v2092_v45 = vld [vmem:[#allocation3 + $0x580] sm:$0xff] }
 0x271   :  { %1735 = vmatpush1.bf16.msra.mxu0 %v1211_v47  ;;  %v2095_v47 = vld [vmem:[#allocation3 + $0x598] sm:$0xff] }
 0x272   :  { %1736 = vmatprep.subr.bf16.mxu0 %v1215_v24  ;;  %v2036_v24 = vld [vmem:[#allocation3 + $0x3c0] sm:$0xff] }
 0x274   :  { %1943 = vmatmul.mubr.bf16.gmra.mrb[112].mxu1 %v9498_v51  ;;  %7263 = vmatmul.mubr.msk.bf16.gmra.mrb[36].mxu0 %vm217_vm3, %v9584_v5  ;;  %v1235_v5 = vld [vmem:[#allocation3 + $0x168] sm:$0xff] }
 0x275   :  { %1737 = vmatpush1.bf16.msra.mxu0 %v1214_v13  ;;  %1950 = vmatprep.mubr.bf16.mxu1 %v9500_v54  ;;  %v2040_v13 = vld [vmem:[#allocation3 + $0x3e0] sm:$0xff] }
 0x276   :  { %1738 = vmatprep.subr.bf16.mxu0 %v1218_v14  ;;  %1752 = vmatprep.mubr.bf16.mxu0 %v9586_v7  ;;  %v2047_v7 = vld [vmem:[#allocation3 + $0x418] sm:$0xff] }
 0x277   :  { %v2039_v14 = vld [vmem:[#allocation3 + $0x3d8] sm:$0xff] }
 0x279   :  { %1739 = vmatpush1.bf16.msra.mxu0 %v1217_v8  ;;  %v2043_v8 = vld [vmem:[#allocation3 + $0x3f8] sm:$0xff] }
 0x27a   :  { %1740 = vmatprep.subr.bf16.mxu0 %v1221_v42  ;;  %v2042_v42 = vld [vmem:[#allocation3 + $0x3f0] sm:$0xff] }
 0x27c   :  { %1951 = vmatmul.mubr.bf16.gmra.mrb[116].mxu1 %v9514_v62 }
 0x27d   :  { %1741 = vmatpush1.bf16.msra.mxu0 %v1220_v49  ;;  %8044 = vmatprep.mubr.msk.bf16.mxu1 %vm8907_vm0, %v8905_v0  ;;  %v9667_v49 = vld [vmem:[#allocation2 + $0x80] sm:$0xff] }
 0x27e   :  { %1742 = vmatprep.subr.bf16.mxu0 %v1224_v50  ;;  %v2046_v50 = vld [vmem:[#allocation3 + $0x410] sm:$0xff] }
 0x281   :  { %1743 = vmatpush1.bf16.msra.mxu0 %v1223_v52  ;;  %v2045_v52 = vld [vmem:[#allocation3 + $0x408] sm:$0xff] }
 0x282   :  { %1744 = vmatprep.subr.bf16.mxu0 %v1227_v46  ;;  %v2049_v46 = vld [vmem:[#allocation3 + $0x428] sm:$0xff] }
 0x284   :  { %8045 = vmatmul.mubr.msk.bf16.vlgmr.msra.gmra.mrb[120].mxu1 %vm217_vm3, %v9623_v55 }
 0x285   :  { %1745 = vmatpush1.bf16.msra.mxu0 %v1226_v44  ;;  %8048 = vmatprep.mubr.msk.bf16.mxu1 %vm8907_vm0, %v8905_v0  ;;  %v2048_v44 = vld [vmem:[#allocation3 + $0x420] sm:$0xff] }
 0x286   :  { %1746 = vmatprep.subr.bf16.mxu0 %v1230_v57  ;;  %7514 = vmatpush3.bf16.msra.mxu1 %v2038_v58  ;;  %v2052_v57 = vld [vmem:[#allocation3 + $0x440] sm:$0xff]  ;;  %v2051_v58 = vld [vmem:[#allocation3 + $0x438] sm:$0xff] }
 0x287   :  { %7515 = vmatprep.subr.bf16.mxu1 %v2065_v59  ;;  %v2055_v59 = vld [vmem:[#allocation3 + $0x458] sm:$0xff] }
 0x289   :  { %1747 = vmatpush1.bf16.msra.mxu0 %v1229_v60  ;;  %v2054_v60 = vld [vmem:[#allocation3 + $0x450] sm:$0xff] }
 0x28a   :  { %1748 = vmatprep.subr.bf16.mxu0 %v1233_v11  ;;  %7516 = vmatpush3.bf16.msra.mxu1 %v2041_v39  ;;  %v2058_v11 = vld [vmem:[#allocation3 + $0x470] sm:$0xff]  ;;  %v2057_v39 = vld [vmem:[#allocation3 + $0x468] sm:$0xff] }
 0x28b   :  { %7517 = vmatprep.subr.bf16.mxu1 %v2068_v63  ;;  %v2061_v63 = vld [vmem:[#allocation3 + $0x488] sm:$0xff] }
 0x28c   :  { %8049 = vmatmul.mubr.msk.bf16.gmra.mrb[124].mxu1 %vm217_vm3, %v9530_v22 }
 0x28d   :  { %1749 = vmatpush1.bf16.msra.mxu0 %v1232_v2  ;;  %8052 = vmatprep.mubr.msk.bf16.mxu1 %vm8907_vm0, %v8905_v0  ;;  %v2060_v2 = vld [vmem:[#allocation3 + $0x480] sm:$0xff] }
 0x28e   :  { %1750 = vmatprep.subr.bf16.mxu0 %v1236_v3  ;;  %7518 = vmatpush3.bf16.msra.mxu1 %v2044_v4  ;;  %v2064_v3 = vld [vmem:[#allocation3 + $0x4a0] sm:$0xff]  ;;  %v2063_v4 = vld [vmem:[#allocation3 + $0x498] sm:$0xff] }
 0x28f   :  { %7519 = vmatprep.subr.bf16.mxu1 %v2071_v29  ;;  %v2067_v29 = vld [vmem:[#allocation3 + $0x4b8] sm:$0xff] }
 0x291   :  { %1751 = vmatpush1.bf16.msra.mxu0 %v1235_v5 }
 0x292   :  { %1803 = vmatprep.subr.bf16.mxu0 %v1239_v6  ;;  %7520 = vmatpush3.bf16.msra.mxu1 %v2047_v7 }
 0x293   :  { %7521 = vmatprep.subr.bf16.mxu1 %v2074_v53 }
 0x294   :  { %1753 = vmatmul.mubr.bf16.vlgmr.msra.gmra.mrb[20].mxu0 %v9595_v12  ;;  %8053 = vmatmul.mubr.msk.bf16.gmra.mrb[128].mxu1 %vm217_vm3, %v9541_v35  ;;  %v2080_v12 = vld [vmem:[#allocation3 + $0x520] sm:$0xff] }
 0x295   :  { %1804 = vmatpush1.bf16.msra.mxu0 %v1238_v9  ;;  %1762 = vmatprep.mubr.bf16.mxu0 %v9466_v61  ;;  %v2066_v9 = vld [vmem:[#allocation3 + $0x4b0] sm:$0xff] }
 0x296   :  { %8056 = vmatprep.mubr.msk.bf16.mxu1 %vm8907_vm0, %v8905_v0  ;;  %1805 = vmatprep.subr.bf16.mxu0 %v1242_v10 }
 0x297   :  { %7522 = vmatpush3.bf16.msra.mxu1 %v2050_v37  ;;  %v2070_v37 = vld [vmem:[#allocation3 + $0x4d0] sm:$0xff] }
 0x298   :  { %7523 = vmatprep.subr.bf16.mxu1 %v2077_v16 }
 0x299   :  { %1806 = vmatpush1.bf16.msra.mxu0 %v1241_v18  ;;  %v2073_v18 = vld [vmem:[#allocation3 + $0x4e8] sm:$0xff] }
 0x29a   :  { %1807 = vmatprep.subr.bf16.mxu0 %v1245_v21 }
 0x29b   :  { %7524 = vmatpush3.bf16.msra.mxu1 %v2053_v23 }
 0x29c   :  { %1763 = vmatmul.mubr.bf16.gmra.mrb[24].mxu0 %v9470_v19  ;;  %8057 = vmatmul.mubr.msk.bf16.gmra.mrb[132].mxu1 %vm217_vm3, %v9553_v48 }
 0x29d   :  { %1772 = vmatprep.mubr.bf16.mxu0 %v9472_v15  ;;  %8060 = vmatprep.mubr.msk.bf16.mxu1 %vm8907_vm0, %v8905_v0 }
 0x29e   :  { %7525 = vmatprep.subr.bf16.mxu1 %v2080_v12  ;;  %1808 = vmatpush1.bf16.msra.mxu0 %v1244_v34 }
 0x29f   :  { %7526 = vmatpush3.bf16.msra.mxu1 %v2056_v25  ;;  %1809 = vmatprep.subr.bf16.mxu0 %v1248_v27  ;;  %v2072_v25 = vld [vmem:[#allocation3 + $0x4e0] sm:$0xff] }
 0x2a0   :  { %7527 = vmatprep.subr.bf16.mxu1 %v2083_v40  ;;  %v2076_v40 = vld [vmem:[#allocation3 + $0x500] sm:$0xff] }
 0x2a2   :  { %1810 = vmatpush1.bf16.msra.mxu0 %v1247_v30 }
 0x2a3   :  { %7528 = vmatpush3.bf16.msra.mxu1 %v2059_v31  ;;  %2099 = vmatprep.subr.bf16.mxu0 %v2037_v41  ;;  %v2075_v31 = vld [vmem:[#allocation3 + $0x4f8] sm:$0xff] }
 0x2a4   :  { %1773 = vmatmul.mubr.bf16.gmra.mrb[28].mxu0 %v9482_v17  ;;  %8061 = vmatmul.mubr.msk.bf16.gmra.mrb[136].mxu1 %vm217_vm3, %v9565_v56  ;;  %v2079_v41 = vld [vmem:[#allocation3 + $0x518] sm:$0xff] }
 0x2a5   :  { %1782 = vmatprep.mubr.bf16.mxu0 %v9485_v33  ;;  %2297 = vmatprep.mubr.bf16.mxu1 %v9466_v61 }
 0x2a6   :  { %8064 = vmatprep.subr.bf16.mxu1 %v8905_v0 }
 0x2ac   :  { %1783 = vmatmul.mubr.bf16.gmra.mrb[32].mxu0 %v9498_v51  ;;  %2298 = vmatmul.mubr.bf16.vlgmr.msra.gmra.mrb[140].mxu1 %v9470_v19 }
 0x2ad   :  { %1792 = vmatprep.mubr.bf16.mxu0 %v9500_v54  ;;  %2305 = vmatprep.mubr.bf16.mxu1 %v9472_v15 }
 0x2ae   :  { %8065 = vmatpush3.bf16.msra.mxu1 %v2086_v43 }
 0x2af   :  { %8066 = vmatprep.subr.bf16.mxu1 %v8905_v0 }
 0x2b2   :  { %8067 = vmatpush3.bf16.msra.mxu1 %v2089_v38 }
 0x2b3   :  { %8068 = vmatprep.subr.bf16.mxu1 %v8905_v0 }
 0x2b4   :  { %1793 = vmatmul.mubr.bf16.gmra.mrb[36].mxu0 %v9514_v62  ;;  %2306 = vmatmul.mubr.bf16.gmra.mrb[144].mxu1 %v9482_v17 }
 0x2b5   :  { %1835 = vmatprep.mubr.bf16.mxu0 %v8906_v1  ;;  %2313 = vmatprep.mubr.bf16.mxu1 %v9485_v33 }
 0x2b6   :  { %8069 = vmatpush3.bf16.msra.mxu1 %v2092_v45  ;;  %v9712_v45 = vld [vmem:[#allocation2 + $0x88] sm:$0xff] }
 0x2b7   :  { %8070 = vmatprep.subr.bf16.mxu1 %v8905_v0 }
 0x2ba   :  { %8071 = vmatpush3.bf16.msra.mxu1 %v2095_v47 }
 0x2bc   :  { %7269 = vmatmul.mubr.msk.bf16.vlgmr.msra.gmra.mrb[20].mxu0 %vm217_vm3, %v9623_v55  ;;  %2314 = vmatmul.mubr.bf16.gmra.mrb[148].mxu1 %v9498_v51  ;;  %v9674_v55 = vld [vmem:[#allocation2 + $0x78] sm:$0xff] }
 0x2bd   :  { %2100 = vmatpush1.bf16.msra.mxu0 %v2036_v24  ;;  %2321 = vmatprep.mubr.bf16.mxu1 %v9500_v54 }
 0x2be   :  { %2101 = vmatprep.subr.bf16.mxu0 %v2040_v13  ;;  %1845 = vmatprep.mubr.bf16.mxu0 %v8906_v1  ;;  %v2078_v13 = vld [vmem:[#allocation3 + $0x510] sm:$0xff] }
 0x2c1   :  { %2102 = vmatpush1.bf16.msra.mxu0 %v2039_v14 }
 0x2c2   :  { %2103 = vmatprep.subr.bf16.mxu0 %v2043_v8  ;;  %v2082_v8 = vld [vmem:[#allocation3 + $0x530] sm:$0xff] }
 0x2c4   :  { %2322 = vmatmul.mubr.bf16.gmra.mrb[152].mxu1 %v9514_v62  ;;  %7270 = vmatmul.mubr.msk.bf16.gmra.mrb[24].mxu0 %vm217_vm3, %v9530_v22 }
 0x2c5   :  { %2104 = vmatpush1.bf16.msra.mxu0 %v2042_v42  ;;  %2329 = vmatprep.mubr.bf16.mxu1 %v9667_v49 }
 0x2c6   :  { %2105 = vmatprep.subr.bf16.mxu0 %v2046_v50  ;;  %1855 = vmatprep.mubr.bf16.mxu0 %v8906_v1  ;;  %v2081_v50 = vld [vmem:[#allocation3 + $0x528] sm:$0xff] }
 0x2c9   :  { %2106 = vmatpush1.bf16.msra.mxu0 %v2045_v52  ;;  %v2085_v52 = vld [vmem:[#allocation3 + $0x548] sm:$0xff] }
 0x2ca   :  { %2107 = vmatprep.subr.bf16.mxu0 %v2049_v46 }
 0x2cc   :  { %2330 = vmatmul.mubr.bf16.gmra.mrb[156].mxu1 %v9674_v55  ;;  %7271 = vmatmul.mubr.msk.bf16.gmra.mrb[28].mxu0 %vm217_vm3, %v9541_v35 }
 0x2cd   :  { %2108 = vmatpush1.bf16.msra.mxu0 %v2048_v44  ;;  %8072 = vmatprep.mubr.msk.bf16.mxu1 %vm8907_vm0, %v8905_v0 }
 0x2ce   :  { %2109 = vmatprep.subr.bf16.mxu0 %v2052_v57  ;;  %1865 = vmatprep.mubr.bf16.mxu0 %v8906_v1 }
 0x2d1   :  { %2110 = vmatpush1.bf16.msra.mxu0 %v2051_v58 }
 0x2d2   :  { %2111 = vmatprep.subr.bf16.mxu0 %v2055_v59  ;;  %v2084_v59 = vld [vmem:[#allocation3 + $0x540] sm:$0xff] }
 0x2d4   :  { %8073 = vmatmul.mubr.msk.bf16.vlgmr.msra.gmra.mrb[160].mxu1 %vm217_vm3, %v9530_v22  ;;  %7272 = vmatmul.mubr.msk.bf16.gmra.mrb[32].mxu0 %vm217_vm3, %v9553_v48 }
 0x2d5   :  { %2112 = vmatpush1.bf16.msra.mxu0 %v2054_v60  ;;  %8076 = vmatprep.mubr.msk.bf16.mxu1 %vm8907_vm0, %v8905_v0 }
 0x2d6   :  { %2113 = vmatprep.subr.bf16.mxu0 %v2058_v11  ;;  %1875 = vmatprep.mubr.bf16.mxu0 %v8906_v1  ;;  %v2088_v11 = vld [vmem:[#allocation3 + $0x560] sm:$0xff] }
 0x2d9   :  { %2114 = vmatpush1.bf16.msra.mxu0 %v2057_v39 }
 0x2da   :  { %2115 = vmatprep.subr.bf16.mxu0 %v2061_v63  ;;  %v2087_v63 = vld [vmem:[#allocation3 + $0x558] sm:$0xff] }
 0x2dc   :  { %8077 = vmatmul.mubr.msk.bf16.gmra.mrb[164].mxu1 %vm217_vm3, %v9541_v35  ;;  %7273 = vmatmul.mubr.msk.bf16.gmra.mrb[36].mxu0 %vm217_vm3, %v9565_v56 }
 0x2dd   :  { %2116 = vmatpush1.bf16.msra.mxu0 %v2060_v2  ;;  %8080 = vmatprep.mubr.msk.bf16.mxu1 %vm8907_vm0, %v8905_v0  ;;  %v2091_v2 = vld [vmem:[#allocation3 + $0x578] sm:$0xff] }
 0x2de   :  { %2117 = vmatprep.subr.bf16.mxu0 %v2064_v3  ;;  %2131 = vmatprep.mubr.bf16.mxu0 %v9466_v61  ;;  %v2069_v61 = vld [vmem:[#allocation3 + $0x4c8] sm:$0xff] }
 0x2df   :  { %v7419_v5 = vpop.f32.mrb[60].mxu1 }
 0x2e0   :  { %v7420_v6 = vpop.f32.mrb[61].mxu1 }
 0x2e1   :  { %2118 = vmatpush1.bf16.msra.mxu0 %v2063_v4  ;;  %v7422_v7 = vpop.f32.mrb[62].mxu1  ;;  %v9696_v53 = vadd.f32 %v7420_v6, %v7419_v5  ;;  %v2090_v6 = vld [vmem:[#allocation3 + $0x570] sm:$0xff] }
 0x2e2   :  { %2119 = vmatprep.subr.bf16.mxu0 %v2067_v29  ;;  %v7423_v10 = vpop.f32.mrb[63].mxu1 }
 0x2e3   :  { %v9698_v16 = vadd.f32 %v7423_v10, %v7422_v7 }
 0x2e4   :  { %8081 = vmatmul.mubr.msk.bf16.gmra.mrb[168].mxu1 %vm217_vm3, %v9553_v48 }
 0x2e5   :  { %2120 = vmatpush1.bf16.msra.mxu0 %v2066_v9  ;;  %8084 = vmatprep.mubr.msk.bf16.mxu1 %vm8907_vm0, %v8905_v0  ;;  %v2094_v9 = vld [vmem:[#allocation3 + $0x590] sm:$0xff] }
 0x2e6   :  { %2121 = vmatprep.subr.bf16.mxu0 %v2070_v37 }
 0x2e7   :  { %v7425_v21 = vpop.f32.mrb[64].mxu1 }
 0x2e8   :  { %v7426_v23 = vpop.f32.mrb[65].mxu1 }
 0x2e9   :  { %2122 = vmatpush1.bf16.msra.mxu0 %v2069_v61  ;;  %v9704_v12 = vadd.f32 %v7426_v23, %v7425_v21  ;;  %v7428_v34 = vpop.f32.mrb[66].mxu1 }
 0x2ea   :  { %2123 = vmatprep.subr.bf16.mxu0 %v2073_v18  ;;  %v7429_v27 = vpop.f32.mrb[67].mxu1 }
 0x2eb   :  { %v9706_v30 = vadd.f32 %v7429_v27, %v7428_v34 }
 0x2ec   :  { %8085 = vmatmul.mubr.msk.bf16.gmra.mrb[172].mxu1 %vm217_vm3, %v9565_v56 }
 0x2ed   :  { %2124 = vmatpush1.bf16.msra.mxu0 %v2072_v25  ;;  %8088 = vmatprep.mubr.msk.bf16.mxu1 %vm8907_vm0, %v8905_v0 }
 0x2ee   :  { %2125 = vmatprep.subr.bf16.mxu0 %v2076_v40 }
 0x2ef   :  { %v7431_v43 = vpop.f32.mrb[68].mxu1 }
 0x2f0   :  { %v7432_v38 = vpop.f32.mrb[69].mxu1 }
 0x2f1   :  { %2126 = vmatpush1.bf16.msra.mxu0 %v2075_v31  ;;  %v7433_v47 = vadd.f32 %v7432_v38, %v7431_v43  ;;  %v7434_v24 = vpop.f32.mrb[70].mxu1 }
 0x2f2   :  { %2127 = vmatprep.subr.bf16.mxu0 %v2079_v41  ;;  %v7435_v14 = vpop.f32.mrb[71].mxu1 }
 0x2f3   :  { %v7436_v42 = vadd.f32 %v7435_v14, %v7434_v24 }
 0x2f4   :  { %8089 = vmatmul.mubr.msk.bf16.gmra.mrb[176].mxu1 %vm217_vm3, %v9712_v45 }
 0x2f5   :  { %2128 = vmatpush1.bf16.msra.mxu0 %v2078_v13 }
 0x2f6   :  { %2129 = vmatprep.subr.bf16.mxu0 %v2082_v8 }
 0x2f7   :  { %v7437_v46 = vpop.f32.mrb[72].mxu1 }
 0x2f8   :  { %v7438_v44 = vpop.f32.mrb[73].mxu1 }
 0x2f9   :  { %2130 = vmatpush1.bf16.msra.mxu0 %v2081_v50  ;;  %v7439_v57 = vadd.f32 %v7438_v44, %v7437_v46  ;;  %v7440_v58 = vpop.f32.mrb[74].mxu1 }
 0x2fa   :  { %2182 = vmatprep.subr.bf16.mxu0 %v2085_v52  ;;  %v7441_v60 = vpop.f32.mrb[75].mxu1 }
 0x2fb   :  { %v7442_v39 = vadd.f32 %v7441_v60, %v7440_v58 }
 0x2fc   :  { %2132 = vmatmul.mubr.bf16.vlgmr.msra.gmra.mrb[20].mxu0 %v9470_v19  ;;  %v2093_v19 = vld [vmem:[#allocation3 + $0x588] sm:$0xff] }
 0x2fd   :  { %2183 = vmatpush1.bf16.msra.mxu0 %v2084_v59  ;;  %2141 = vmatprep.mubr.bf16.mxu0 %v9472_v15 }
 0x2fe   :  { %2184 = vmatprep.subr.bf16.mxu0 %v2088_v11 }
 0x2ff   :  { %v7443_v3 = vpop.f32.mrb[76].mxu1 }
 0x300   :  { %v7444_v4 = vpop.f32.mrb[77].mxu1 }
 0x301   :  { %2185 = vmatpush1.bf16.msra.mxu0 %v2087_v63  ;;  %v7445_v29 = vadd.f32 %v7444_v4, %v7443_v3  ;;  %v7446_v5 = vpop.f32.mrb[78].mxu1 }
 0x302   :  { %2186 = vmatprep.subr.bf16.mxu0 %v2091_v2  ;;  %v7447_v7 = vpop.f32.mrb[79].mxu1 }
 0x303   :  { %v7448_v10 = vadd.f32 %v7447_v7, %v7446_v5 }
 0x304   :  { %2142 = vmatmul.mubr.bf16.gmra.mrb[24].mxu0 %v9482_v17 }
 0x305   :  { %2151 = vmatprep.mubr.bf16.mxu0 %v9485_v33  ;;  %2187 = vmatpush1.bf16.msra.mxu0 %v2090_v6 }
 0x306   :  { %2188 = vmatprep.subr.bf16.mxu0 %v2094_v9 }
 0x307   :  { %v1666_v15 = vpop.f32.mrb[80].mxu1 }
 0x308   :  { %v1667_v37 = vadd.f32 %v9696_v53, %v1666_v15  ;;  %v8018_v61 = vpop.f32.mrb[81].mxu1 }
 0x309   :  { %2189 = vmatpush1.bf16.msra.mxu0 %v2093_v19  ;;  %v1669_v18 = vpop.f32.mrb[82].mxu1 }
 0x30a   :  { %v1670_v21 = vadd.f32 %v9698_v16, %v1669_v18  ;;  %v8019_v23 = vpop.f32.mrb[83].mxu1 }
 0x30c   :  { %2152 = vmatmul.mubr.bf16.gmra.mrb[28].mxu0 %v9498_v51 }
 0x30d   :  { %2161 = vmatprep.mubr.bf16.mxu0 %v9500_v54 }
 0x30f   :  { %v1674_v34 = vpop.f32.mrb[84].mxu1 }
 0x310   :  { %v1675_v17 = vadd.f32 %v9704_v12, %v1674_v34  ;;  %v8022_v33 = vpop.f32.mrb[85].mxu1 }
 0x311   :  { %v1677_v25 = vpop.f32.mrb[86].mxu1 }
 0x312   :  { %v1678_v27 = vadd.f32 %v9706_v30, %v1677_v25  ;;  %v8023_v40 = vpop.f32.mrb[87].mxu1  ;;  %v2694_v25 = vld [vmem:[#allocation3 + $0x780] sm:$0xff] }
 0x314   :  { %2162 = vmatmul.mubr.bf16.gmra.mrb[32].mxu0 %v9514_v62 }
 0x315   :  { %2171 = vmatprep.mubr.bf16.mxu0 %v9667_v49 }
 0x317   :  { %v1682_v53 = vpop.f32.mrb[88].mxu1 }
 0x318   :  { %v1683_v31 = vadd.f32 %v7433_v47, %v1682_v53  ;;  %v8026_v16 = vpop.f32.mrb[89].mxu1 }
 0x319   :  { %v1685_v41 = vpop.f32.mrb[90].mxu1  ;;  %v2698_v16 = vld [vmem:[#allocation3 + $0x7a0] sm:$0xff] }
 0x31a   :  { %v1686_v43 = vadd.f32 %v7436_v42, %v1685_v41  ;;  %v8027_v51 = vpop.f32.mrb[91].mxu1  ;;  %v2697_v41 = vld [vmem:[#allocation3 + $0x798] sm:$0xff] }
 0x31c   :  { %2172 = vmatmul.mubr.bf16.gmra.mrb[36].mxu0 %v9674_v55 }
 0x31d   :  { %2214 = vmatprep.mubr.bf16.mxu0 %v8906_v1 }
 0x31f   :  { %v1690_v54 = vpop.f32.mrb[92].mxu1 }
 0x320   :  { %v1691_v12 = vadd.f32 %v7439_v57, %v1690_v54  ;;  %v8030_v38 = vpop.f32.mrb[93].mxu1  ;;  %v2701_v54 = vld [vmem:[#allocation3 + $0x7b8] sm:$0xff] }
 0x321   :  { %v1693_v24 = vpop.f32.mrb[94].mxu1  ;;  %v2704_v38 = vld [vmem:[#allocation3 + $0x7d0] sm:$0xff] }
 0x322   :  { %v1694_v30 = vadd.f32 %v7442_v39, %v1693_v24  ;;  %v8031_v13 = vpop.f32.mrb[95].mxu1 }
 0x324   :  { %7279 = vmatmul.mubr.msk.bf16.vlgmr.msra.gmra.mrb[20].mxu0 %vm217_vm3, %v9530_v22 }
 0x325   :  { %2224 = vmatprep.mubr.bf16.mxu0 %v8906_v1 }
 0x327   :  { %v1698_v62 = vpop.f32.mrb[96].mxu1 }
 0x328   :  { %v1699_v49 = vadd.f32 %v7445_v29, %v1698_v62  ;;  %v8034_v47 = vpop.f32.mrb[97].mxu1 }
 0x329   :  { %v1701_v14 = vpop.f32.mrb[98].mxu1  ;;  %v2703_v47 = vld [vmem:[#allocation3 + $0x7c8] sm:$0xff] }
 0x32a   :  { %v1702_v8 = vadd.f32 %v7448_v10, %v1701_v14  ;;  %v8035_v42 = vpop.f32.mrb[99].mxu1  ;;  %v2707_v14 = vld [vmem:[#allocation3 + $0x7e8] sm:$0xff] }
 0x32c   :  { %7280 = vmatmul.mubr.msk.bf16.gmra.mrb[24].mxu0 %vm217_vm3, %v9541_v35 }
 0x32d   :  { %2234 = vmatprep.mubr.bf16.mxu0 %v8906_v1 }
 0x32f   :  { %v7474_v55 = vpop.f32.mrb[100].mxu1 }
 0x330   :  { %v7475_v50 = vpop.f32.mrb[101].mxu1 }
 0x331   :  { %v7476_v52 = vadd.f32 %v7475_v50, %v7474_v55  ;;  %v7477_v46 = vpop.f32.mrb[102].mxu1  ;;  %v2710_v55 = vld [vmem:[#allocation3 + $0x800] sm:$0xff] }
 0x332   :  { %v7478_v44 = vpop.f32.mrb[103].mxu1 }
 0x333   :  { %v7479_v57 = vadd.f32 %v7478_v44, %v7477_v46  ;;  %v1921_v22 = vadd.f32 %v7476_v52, %v1667_v37 }
 0x334   :  { %7281 = vmatmul.mubr.msk.bf16.gmra.mrb[28].mxu0 %vm217_vm3, %v9553_v48 }
 0x335   :  { %2244 = vmatprep.mubr.bf16.mxu0 %v8906_v1  ;;  %v1924_v58 = vadd.f32 %v7479_v57, %v1670_v21 }
 0x337   :  { %v7480_v59 = vpop.f32.mrb[104].mxu1 }
 0x338   :  { %v7481_v60 = vpop.f32.mrb[105].mxu1 }
 0x339   :  { %v7482_v11 = vadd.f32 %v7481_v60, %v7480_v59  ;;  %v7483_v39 = vpop.f32.mrb[106].mxu1  ;;  %v2712_v59 = vld [vmem:[#allocation3 + $0x810] sm:$0xff] }
 0x33a   :  { %v7484_v35 = vpop.f32.mrb[107].mxu1 }
 0x33b   :  { %v7485_v63 = vadd.f32 %v7484_v35, %v7483_v39  ;;  %v1929_v2 = vadd.f32 %v7482_v11, %v1675_v17  ;;  %v2695_v17 = vld [vmem:[#allocation3 + $0x788] sm:$0xff]  ;;  %v2716_v11 = vld [vmem:[#allocation3 + $0x830] sm:$0xff] }
 0x33c   :  { %7282 = vmatmul.mubr.msk.bf16.gmra.mrb[32].mxu0 %vm217_vm3, %v9565_v56  ;;  %2830 = vmatprep.subr.bf16.mxu1 %v2695_v17  ;;  %v2725_v17 = vld [vmem:[#allocation3 + $0x878] sm:$0xff] }
 0x33d   :  { %2254 = vmatprep.mubr.bf16.mxu0 %v8906_v1  ;;  %v1932_v3 = vadd.f32 %v7485_v63, %v1678_v27  ;;  %2831 = vmatpush1.bf16.msra.mxu1 %v2694_v25 }
 0x33e   :  { %2832 = vmatprep.subr.bf16.mxu1 %v2698_v16 }
 0x33f   :  { %v7486_v4 = vpop.f32.mrb[108].mxu1 }
 0x340   :  { %v7487_v29 = vpop.f32.mrb[109].mxu1 }
 0x341   :  { %v7488_v5 = vadd.f32 %v7487_v29, %v7486_v4  ;;  %v7489_v48 = vpop.f32.mrb[110].mxu1  ;;  %2833 = vmatpush1.bf16.msra.mxu1 %v2697_v41  ;;  %v2728_v41 = vld [vmem:[#allocation3 + $0x890] sm:$0xff] }
 0x342   :  { %v7490_v6 = vpop.f32.mrb[111].mxu1  ;;  %2834 = vmatprep.subr.bf16.mxu1 %v2701_v54  ;;  %v2727_v54 = vld [vmem:[#allocation3 + $0x888] sm:$0xff] }
 0x343   :  { %v7491_v7 = vadd.f32 %v7490_v6, %v7489_v48  ;;  %v1937_v9 = vadd.f32 %v7488_v5, %v1683_v31  ;;  %v2719_v5 = vld [vmem:[#allocation3 + $0x848] sm:$0xff]  ;;  %v2720_v48 = vld [vmem:[#allocation3 + $0x850] sm:$0xff] }
 0x344   :  { %7283 = vmatmul.mubr.msk.bf16.gmra.mrb[36].mxu0 %vm217_vm3, %v9712_v45  ;;  %7568 = vmatprep.subr.bf16.mxu0 %v2720_v48  ;;  %v2741_v48 = vld [vmem:[#allocation3 + $0x8f8] sm:$0xff] }
 0x345   :  { %v1940_v10 = vadd.f32 %v7491_v7, %v1686_v43 }
 0x347   :  { %v7492_v19 = vpop.f32.mrb[112].mxu1 }
 0x348   :  { %v7493_v15 = vpop.f32.mrb[113].mxu1 }
 0x349   :  { %v7494_v37 = vadd.f32 %v7493_v15, %v7492_v19  ;;  %v7495_v61 = vpop.f32.mrb[114].mxu1  ;;  %v2696_v19 = vld [vmem:[#allocation3 + $0x790] sm:$0xff] }
 0x34a   :  { %v7496_v18 = vpop.f32.mrb[115].mxu1  ;;  %7569 = vmatpush3.bf16.msra.mxu0 %v2696_v19 }
 0x34b   :  { %v7497_v56 = vadd.f32 %v7496_v18, %v7495_v61  ;;  %v9744_v21 = vadd.f32 %v7494_v37, %v1691_v12  ;;  %v2700_v12 = vld [vmem:[#allocation3 + $0x7b0] sm:$0xff]  ;;  %v2722_v61 = vld [vmem:[#allocation3 + $0x860] sm:$0xff]  ;;  %v2723_v18 = vld [vmem:[#allocation3 + $0x868] sm:$0xff] }
 0x34c   :  { %2835 = vmatpush1.bf16.msra.mxu1 %v2700_v12  ;;  %7570 = vmatprep.subr.bf16.mxu0 %v2723_v18  ;;  %v2705_v12 = vld [vmem:[#allocation3 + $0x7d8] sm:$0xff] }
 0x34d   :  { %v9746_v23 = vadd.f32 %v7497_v56, %v1694_v30  ;;  %2836 = vmatprep.subr.bf16.mxu1 %v2704_v38  ;;  %v2721_v56 = vld [vmem:[#allocation3 + $0x858] sm:$0xff]  ;;  %v2731_v38 = vld [vmem:[#allocation3 + $0x8a8] sm:$0xff] }
 0x34f   :  { %v7498_v34 = vpop.f32.mrb[116].mxu1 }
 0x350   :  { %v7499_v33 = vpop.f32.mrb[117].mxu1  ;;  %2837 = vmatpush1.bf16.msra.mxu1 %v2703_v47  ;;  %v2708_v47 = vld [vmem:[#allocation3 + $0x7f0] sm:$0xff] }
 0x351   :  { %v7500_v27 = vadd.f32 %v7499_v33, %v7498_v34  ;;  %v7501_v40 = vpop.f32.mrb[118].mxu1  ;;  %2838 = vmatprep.subr.bf16.mxu1 %v2707_v14  ;;  %v2699_v34 = vld [vmem:[#allocation3 + $0x7a8] sm:$0xff]  ;;  %v2726_v33 = vld [vmem:[#allocation3 + $0x880] sm:$0xff] }
 0x352   :  { %v7502_v45 = vpop.f32.mrb[119].mxu1  ;;  %7571 = vmatpush3.bf16.msra.mxu0 %v2699_v34 }
 0x353   :  { %v7503_v53 = vadd.f32 %v7502_v45, %v7501_v40  ;;  %v9748_v31 = vadd.f32 %v7500_v27, %v1699_v49  ;;  %7572 = vmatprep.subr.bf16.mxu0 %v2726_v33  ;;  %v2702_v40 = vld [vmem:[#allocation3 + $0x7c0] sm:$0xff] }
 0x355   :  { %v9750_v43 = vadd.f32 %v7503_v53, %v1702_v8  ;;  %v2706_v8 = vld [vmem:[#allocation3 + $0x7e0] sm:$0xff] }
 0x356   :  { %2839 = vmatpush1.bf16.msra.mxu1 %v2706_v8  ;;  %7573 = vmatpush3.bf16.msra.mxu0 %v2702_v40 }
 0x357   :  { %v1993_v51 = vpop.f32.mrb[120].mxu1  ;;  %2840 = vmatprep.subr.bf16.mxu1 %v2710_v55  ;;  %v2734_v55 = vld [vmem:[#allocation3 + $0x8c0] sm:$0xff] }
 0x358   :  { %v9752_v24 = vadd.f32 %v1993_v51, %v1921_v22  ;;  %v8046_v30 = vpop.f32.mrb[121].mxu1  ;;  %v2709_v22 = vld [vmem:[#allocation3 + $0x7f8] sm:$0xff] }
 0x359   :  { %v1996_v13 = vpop.f32.mrb[122].mxu1  ;;  %v2729_v51 = vld [vmem:[#allocation3 + $0x898] sm:$0xff]  ;;  %v2732_v30 = vld [vmem:[#allocation3 + $0x8b0] sm:$0xff] }
 0x35a   :  { %v9754_v62 = vadd.f32 %v1996_v13, %v1924_v58  ;;  %v8047_v49 = vpop.f32.mrb[123].mxu1  ;;  %v2713_v58 = vld [vmem:[#allocation3 + $0x818] sm:$0xff]  ;;  %2841 = vmatpush1.bf16.msra.mxu1 %v2709_v22  ;;  %7574 = vmatprep.subr.bf16.mxu0 %v2729_v51 }
 0x35b   :  { %2842 = vmatprep.subr.bf16.mxu1 %v2713_v58  ;;  %7575 = vmatpush3.bf16.msra.mxu0 %v2705_v12  ;;  %v2730_v49 = vld [vmem:[#allocation3 + $0x8a0] sm:$0xff]  ;;  %v2737_v58 = vld [vmem:[#allocation3 + $0x8d8] sm:$0xff] }
 0x35c   :  { %7576 = vmatprep.subr.bf16.mxu0 %v2732_v30 }
 0x35e   :  { %2843 = vmatpush1.bf16.msra.mxu1 %v2712_v59  ;;  %v2738_v59 = vld [vmem:[#allocation3 + $0x8e0] sm:$0xff] }
 0x35f   :  { %v2001_v42 = vpop.f32.mrb[124].mxu1  ;;  %2844 = vmatprep.subr.bf16.mxu1 %v2716_v11  ;;  %7577 = vmatpush3.bf16.msra.mxu0 %v2708_v47  ;;  %v2736_v11 = vld [vmem:[#allocation3 + $0x8d0] sm:$0xff] }
 0x360   :  { %v9756_v50 = vadd.f32 %v2001_v42, %v1929_v2  ;;  %v8050_v52 = vpop.f32.mrb[125].mxu1 }
 0x361   :  { %v2004_v46 = vpop.f32.mrb[126].mxu1  ;;  %v2735_v52 = vld [vmem:[#allocation3 + $0x8c8] sm:$0xff] }
 0x362   :  { %v9758_v44 = vadd.f32 %v2004_v46, %v1932_v3  ;;  %v8051_v57 = vpop.f32.mrb[127].mxu1  ;;  %v2715_v3 = vld [vmem:[#allocation3 + $0x828] sm:$0xff]  ;;  %7578 = vmatprep.subr.bf16.mxu0 %v2735_v52  ;;  %v2733_v46 = vld [vmem:[#allocation3 + $0x8b8] sm:$0xff] }
 0x363   :  { %2845 = vmatpush1.bf16.msra.mxu1 %v2715_v3  ;;  %v2711_v57 = vld [vmem:[#allocation3 + $0x808] sm:$0xff] }
 0x364   :  { %2846 = vmatprep.subr.bf16.mxu1 %v2719_v5  ;;  %7579 = vmatpush3.bf16.msra.mxu0 %v2711_v57  ;;  %v2740_v5 = vld [vmem:[#allocation3 + $0x8f0] sm:$0xff] }
 0x365   :  { %7580 = vmatprep.subr.bf16.mxu0 %v2738_v59 }
 0x367   :  { %v2009_v60 = vpop.f32.mrb[128].mxu1 }
 0x368   :  { %v9760_v39 = vadd.f32 %v2009_v60, %v1937_v9  ;;  %v8054_v35 = vpop.f32.mrb[129].mxu1  ;;  %v2718_v9 = vld [vmem:[#allocation3 + $0x840] sm:$0xff] }
 0x369   :  { %v2012_v63 = vpop.f32.mrb[130].mxu1  ;;  %2847 = vmatpush1.bf16.msra.mxu1 %v2718_v9  ;;  %v2714_v35 = vld [vmem:[#allocation3 + $0x820] sm:$0xff]  ;;  %v2717_v9 = vld [vmem:[#allocation3 + $0x838] sm:$0xff] }
 0x36a   :  { %v9762_v2 = vadd.f32 %v2012_v63, %v1940_v10  ;;  %v8055_v4 = vpop.f32.mrb[131].mxu1  ;;  %2848 = vmatprep.subr.bf16.mxu1 %v2722_v61  ;;  %7581 = vmatpush3.bf16.msra.mxu0 %v2714_v35 }
 0x36b   :  { %7582 = vmatprep.subr.bf16.mxu0 %v2741_v48 }
 0x36d   :  { %2849 = vmatpush1.bf16.msra.mxu1 %v2721_v56 }
 0x36e   :  { %2850 = vmatprep.subr.bf16.mxu1 %v2725_v17  ;;  %7583 = vmatpush3.bf16.msra.mxu0 %v2717_v9  ;;  %v2653_v17 = vld [vmem:[#allocation3 + $0x670] sm:$0xff] }
 0x36f   :  { %v2017_v29 = vpop.f32.mrb[132].mxu1  ;;  %7623 = vmatprep.subr.bf16.mxu0 %v2653_v17 }
 0x370   :  { %v9765_v6 = vadd.f32 %v2017_v29, %v9744_v21  ;;  %v8058_v7 = vpop.f32.mrb[133].mxu1 }
 0x371   :  { %v2020_v15 = vpop.f32.mrb[134].mxu1  ;;  %v2739_v7 = vld [vmem:[#allocation3 + $0x8e8] sm:$0xff] }
 0x372   :  { %v9768_v10 = vadd.f32 %v2020_v15, %v9746_v23  ;;  %v8059_v37 = vpop.f32.mrb[135].mxu1  ;;  %v2724_v23 = vld [vmem:[#allocation3 + $0x870] sm:$0xff] }
 0x373   :  { %2851 = vmatpush1.bf16.msra.mxu1 %v2724_v23 }
 0x374   :  { %2852 = vmatprep.subr.bf16.mxu1 %v2728_v41 }
 0x377   :  { %v2025_v21 = vpop.f32.mrb[136].mxu1  ;;  %2853 = vmatpush1.bf16.msra.mxu1 %v2727_v54 }
 0x378   :  { %v9771_v25 = vadd.f32 %v2025_v21, %v9748_v31  ;;  %v8062_v27 = vpop.f32.mrb[137].mxu1  ;;  %2854 = vmatprep.subr.bf16.mxu1 %v2731_v38  ;;  %v9780_v38 = vld [vmem:[#allocation9] sm:$0x7] }
 0x379   :  { %v2028_v45 = vpop.f32.mrb[138].mxu1 }
 0x37a   :  { %v9774_v53 = vadd.f32 %v2028_v45, %v9750_v43  ;;  %v8063_v16 = vpop.f32.mrb[139].mxu1  ;;  %v2743_v45 = vld [vmem:[#allocation3 + $0x908] sm:$0xff] }
 0x37b   :  { %2855 = vmatpush1.bf16.msra.mxu1 %v2730_v49  ;;  %v9784_v49 = vrot.slane %v9780_v38, %v9301_v36 }
 0x37c   :  { %2856 = vmatprep.subr.bf16.mxu1 %v2734_v55 }
 0x37f   :  { %v7529_v31 = vpop.f32.mrb[140].mxu1  ;;  %2857 = vmatpush1.bf16.msra.mxu1 %v2733_v46 }
 0x380   :  { %v7530_v13 = vpop.f32.mrb[141].mxu1  ;;  %2858 = vmatprep.subr.bf16.mxu1 %v2737_v58 }
 0x381   :  { %v7531_v14 = vadd.f32 %v7530_v13, %v7529_v31  ;;  %v7532_v43 = vpop.f32.mrb[142].mxu1 }
 0x382   :  { %v7533_v8 = vpop.f32.mrb[143].mxu1 }
 0x383   :  { %v7534_v42 = vadd.f32 %v7533_v8, %v7532_v43  ;;  %2859 = vmatpush1.bf16.msra.mxu1 %v2736_v11 }
 0x384   :  { %2860 = vmatprep.subr.bf16.mxu1 %v2740_v5 }
 0x387   :  { %v7535_v22 = vpop.f32.mrb[144].mxu1  ;;  %2861 = vmatpush1.bf16.msra.mxu1 %v2739_v7 }
 0x388   :  { %v7536_v60 = vpop.f32.mrb[145].mxu1  ;;  %2913 = vmatprep.subr.bf16.mxu1 %v2743_v45 }
 0x389   :  { %v7537_v63 = vadd.f32 %v7536_v60, %v7535_v22  ;;  %v7538_v4 = vpop.f32.mrb[146].mxu1 }
 0x38a   :  { %v7539_v3 = vpop.f32.mrb[147].mxu1 }
 0x38b   :  { %v7540_v29 = vadd.f32 %v7539_v3, %v7538_v4 }
 0x38f   :  { %v7541_v19 = vpop.f32.mrb[148].mxu1 }
 0x390   :  { %v7542_v15 = vpop.f32.mrb[149].mxu1 }
 0x391   :  { %v7543_v37 = vadd.f32 %v7542_v15, %v7541_v19  ;;  %v7544_v61 = vpop.f32.mrb[150].mxu1 }
 0x392   :  { %v7545_v18 = vpop.f32.mrb[151].mxu1 }
 0x393   :  { %v7546_v56 = vadd.f32 %v7545_v18, %v7544_v61 }
 0x397   :  { %v7547_v34 = vpop.f32.mrb[152].mxu1 }
 0x398   :  { %v7548_v21 = vpop.f32.mrb[153].mxu1 }
 0x399   :  { %v7549_v33 = vadd.f32 %v7548_v21, %v7547_v34  ;;  %v7550_v27 = vpop.f32.mrb[154].mxu1 }
 0x39a   :  { %v7551_v23 = vpop.f32.mrb[155].mxu1 }
 0x39b   :  { %v7552_v40 = vadd.f32 %v7551_v23, %v7550_v27 }
 0x39f   :  { %v7553_v16 = vpop.f32.mrb[156].mxu1 }
 0x3a0   :  { %v7554_v41 = vpop.f32.mrb[157].mxu1 }
 0x3a1   :  { %v9776_v51 = vadd.f32 %v7554_v41, %v7553_v16  ;;  %v7556_v54 = vpop.f32.mrb[158].mxu1 }
 0x3a2   :  { %v7557_v12 = vpop.f32.mrb[159].mxu1 }
 0x3a3   :  { %v9778_v31 = vadd.f32 %v7557_v12, %v7556_v54 }
 0x3a7   :  { %v2372_v30 = vpop.f32.mrb[160].mxu1 }
 0x3a8   :  { %v2373_v13 = vadd.f32 %v7531_v14, %v2372_v30  ;;  %v8074_v47 = vpop.f32.mrb[161].mxu1 }
 0x3a9   :  { %v2375_v43 = vpop.f32.mrb[162].mxu1 }
 0x3aa   :  { %v2413_v8 = vadd.f32 %v2373_v13, %v9752_v24  ;;  %v2376_v55 = vadd.f32 %v7534_v42, %v2375_v43  ;;  %v8075_v52 = vpop.f32.mrb[163].mxu1 }
 0x3ac   :  { %v2460_v46 = vadd.f32 %v9784_v49, %v2413_v8  ;;  %v2416_v57 = vadd.f32 %v2376_v55, %v9754_v62 }
 0x3ae   :  { %v2463_v22 = vadd.f32 %v9784_v49, %v2416_v57  ;;  %v2490_v59 = vmax.f32 %v2460_v46, 0.0 }
 0x3af   :  { %v2380_v58 = vpop.f32.mrb[164].mxu1 }
 0x3b0   :  { %v2493_v60 = vmax.f32 %v2463_v22, 0.0  ;;  %v2381_v14 = vadd.f32 %v7537_v63, %v2380_v58  ;;  %v8078_v11 = vpop.f32.mrb[165].mxu1 }
 0x3b1   :  { %v2383_v35 = vpop.f32.mrb[166].mxu1 }
 0x3b2   :  { %v2520_v4 = vpack.c.bf16 %v2493_v60, %v2490_v59  ;;  %v2419_v3 = vadd.f32 %v2381_v14, %v9756_v50  ;;  %v2384_v5 = vadd.f32 %v7540_v29, %v2383_v35  ;;  %v8079_v48 = vpop.f32.mrb[167].mxu1 }
 0x3b4   :  { %v2550_v24 = vrot.slane %v2520_v4, 4  ;;  %v2466_v42 = vadd.f32 %v9784_v49, %v2419_v3  ;;  %v2422_v7 = vadd.f32 %v2384_v5, %v9758_v44 }
 0x3b6   :  { %2595 = vst.msk [vmem:[#allocation2 + $0x10] sm:$0xf0] %vm1152_vm4, %v2550_v24  ;;  %v2469_v62 = vadd.f32 %v9784_v49, %v2422_v7  ;;  %v2496_v19 = vmax.f32 %v2466_v42, 0.0 }
 0x3b7   :  { %v2388_v9 = vpop.f32.mrb[168].mxu1 }
 0x3b8   :  { %v2499_v15 = vmax.f32 %v2469_v62, 0.0  ;;  %v2389_v63 = vadd.f32 %v7543_v37, %v2388_v9  ;;  %v8082_v61 = vpop.f32.mrb[169].mxu1 }
 0x3b9   :  { %v2391_v18 = vpop.f32.mrb[170].mxu1 }
 0x3ba   :  { %v2523_v34 = vpack.c.bf16 %v2499_v15, %v2496_v19  ;;  %v2425_v50 = vadd.f32 %v2389_v63, %v9760_v39  ;;  %v2392_v29 = vadd.f32 %v7546_v56, %v2391_v18  ;;  %v8083_v21 = vpop.f32.mrb[171].mxu1 }
 0x3bc   :  { %v2555_v17 = vrot.slane %v2523_v34, 4  ;;  %v2472_v27 = vadd.f32 %v9784_v49, %v2425_v50  ;;  %v2428_v44 = vadd.f32 %v2392_v29, %v9762_v2 }
 0x3be   :  { %v2556_v23 = vsel %vm1104_vm5, %v2550_v24, %v2555_v17  ;;  %v2475_v45 = vadd.f32 %v9784_v49, %v2428_v44  ;;  %v2502_v37 = vmax.f32 %v2472_v27, 0.0 }
 0x3bf   :  { %2598 = vst.msk [vmem:[#allocation2 + $0x28] sm:$0xff] %vm217_vm3, %v2556_v23  ;;  %v2396_v16 = vpop.f32.mrb[172].mxu1 }
 0x3c0   :  { %v2505_v41 = vmax.f32 %v2475_v45, 0.0  ;;  %v2397_v54 = vadd.f32 %v7549_v33, %v2396_v16  ;;  %v8086_v12 = vpop.f32.mrb[173].mxu1 }
 0x3c1   :  { %v2399_v30 = vpop.f32.mrb[174].mxu1 }
 0x3c2   :  { %v2526_v39 = vpack.c.bf16 %v2505_v41, %v2502_v37  ;;  %v2431_v56 = vadd.f32 %v2397_v54, %v9765_v6  ;;  %v2400_v13 = vadd.f32 %v7552_v40, %v2399_v30  ;;  %v8087_v47 = vpop.f32.mrb[175].mxu1 }
 0x3c4   :  { %v2561_v43 = vrot.slane %v2526_v39, 4  ;;  %v2478_v2 = vadd.f32 %v9784_v49, %v2431_v56  ;;  %v2434_v8 = vadd.f32 %v2400_v13, %v9768_v10 }
 0x3c6   :  { %v2562_v55 = vsel %vm1104_vm5, %v2555_v17, %v2561_v43  ;;  %v2481_v52 = vadd.f32 %v9784_v49, %v2434_v8  ;;  %v2508_v33 = vmax.f32 %v2478_v2, 0.0 }
 0x3c7   :  { %2601 = vst.msk [vmem:[#allocation2 + $0x40] sm:$0xff] %vm217_vm3, %v2562_v55  ;;  %v2404_v46 = vpop.f32.mrb[176].mxu1 }
 0x3c8   :  { %v2511_v57 = vmax.f32 %v2481_v52, 0.0  ;;  %v2405_v22 = vadd.f32 %v9776_v51, %v2404_v46  ;;  %v8090_v58 = vpop.f32.mrb[177].mxu1 }
 0x3c9   :  { %v2407_v6 = vpop.f32.mrb[178].mxu1 }
 0x3ca   :  { %v2529_v40 = vpack.c.bf16 %v2511_v57, %v2508_v33  ;;  %v2437_v59 = vadd.f32 %v2405_v22, %v9771_v25  ;;  %v2408_v60 = vadd.f32 %v9778_v31, %v2407_v6  ;;  %v8091_v14 = vpop.f32.mrb[179].mxu1  ;;  %v9820_v31 = vrot.slane %v9780_v38, %v9291_v28 }
 0x3cc   :  { %v2567_v10 = vrot.slane %v2529_v40, 4  ;;  %v2484_v11 = vadd.f32 %v9784_v49, %v2437_v59  ;;  %v2440_v35 = vadd.f32 %v2408_v60, %v9774_v53  ;;  %v9824_v53 = vrot.slane %v9780_v38, %v9296_v32 }
 0x3ce   :  { %v2568_v4 = vsel %vm1104_vm5, %v2561_v43, %v2567_v10  ;;  %v2487_v3 = vadd.f32 %v9784_v49, %v2440_v35  ;;  %v2514_v51 = vmax.f32 %v2484_v11, 0.0 }
 0x3cf   :  { %2604 = vst.msk [vmem:[#allocation2 + $0x58] sm:$0xff] %vm217_vm3, %v2568_v4 }
 0x3d0   :  { %v2517_v5 = vmax.f32 %v2487_v3, 0.0 }
 0x3d2   :  { %v2532_v48 = vpack.c.bf16 %v2517_v5, %v2514_v51 }
 0x3d4   :  { %v2573_v24 = vrot.slane %v2532_v48, 4 }
 0x3d6   :  { %v2574_v25 = vsel %vm1104_vm5, %v2567_v10, %v2573_v24  ;;  %2610 = vst.msk [vmem:[#allocation2 + $0x88] sm:$0xf] %vm1168_vm6, %v2573_v24 }
 0x3d7   :  { %2607 = vst.msk [vmem:[#allocation2 + $0x70] sm:$0xff] %vm217_vm3, %v2574_v25  ;;  %v2742_v25 = vld [vmem:[#allocation3 + $0x900] sm:$0xff] }
 0x3f7   :  { %v2216_v49 = vpop.f32.mrb[20].mxu0 }
 0x3f8   :  { %v2458_v42 = vadd.f32 %v9820_v31, %v2216_v49  ;;  %v2218_v7 = vpop.f32.mrb[21].mxu0  ;;  %v2629_v49 = vld [vmem:[#allocation3 + $0x5b0] sm:$0xff] }
 0x3f9   :  { %v2459_v62 = vadd.f32 %v9824_v53, %v2218_v7  ;;  %v2220_v9 = vpop.f32.mrb[22].mxu0 }
 0x3fa   :  { %v2461_v19 = vadd.f32 %v9820_v31, %v2220_v9  ;;  %v2222_v15 = vpop.f32.mrb[23].mxu0  ;;  %v2488_v61 = vmax.f32 %v2458_v42, 0.0  ;;  %v2746_v9 = vld [vmem:[#allocation3 + $0x920] sm:$0xff] }
 0x3fb   :  { %v2462_v63 = vadd.f32 %v9824_v53, %v2222_v15  ;;  %v2489_v34 = vmax.f32 %v2459_v62, 0.0 }
 0x3fc   :  { %v2491_v18 = vmax.f32 %v2461_v19, 0.0  ;;  %v2656_v19 = vld [vmem:[#allocation3 + $0x688] sm:$0xff] }
 0x3fd   :  { %v2492_v50 = vmax.f32 %v2462_v63, 0.0 }
 0x3fe   :  { %v2518_v29 = vpack.c.bf16 %v2491_v18, %v2488_v61 }
 0x3ff   :  { %v2519_v21 = vpack.c.bf16 %v2492_v50, %v2489_v34  ;;  %v2226_v38 = vpop.f32.mrb[24].mxu0 }
 0x400   :  { %v2548_v17 = vrot.slane %v2518_v29, 4  ;;  %v2464_v27 = vadd.f32 %v9820_v31, %v2226_v38  ;;  %v2228_v44 = vpop.f32.mrb[25].mxu0 }
 0x401   :  { %v2549_v23 = vrot.slane %v2519_v21, 4  ;;  %v2465_v45 = vadd.f32 %v9824_v53, %v2228_v44  ;;  %v2230_v16 = vpop.f32.mrb[26].mxu0 }
 0x402   :  { %2593 = vst [vmem:[#allocation2] sm:$0xf0] %v2548_v17  ;;  %v2467_v37 = vadd.f32 %v9820_v31, %v2230_v16  ;;  %v2232_v41 = vpop.f32.mrb[27].mxu0  ;;  %v2494_v12 = vmax.f32 %v2464_v27, 0.0  ;;  %v2632_v27 = vld [vmem:[#allocation3 + $0x5c8] sm:$0xff]  ;;  %v2659_v16 = vld [vmem:[#allocation3 + $0x6a0] sm:$0xff] }
 0x403   :  { %2594 = vst [vmem:[#allocation2 + $0x8] sm:$0xf0] %v2549_v23  ;;  %v2468_v54 = vadd.f32 %v9824_v53, %v2232_v41  ;;  %v2495_v39 = vmax.f32 %v2465_v45, 0.0 }
 0x404   :  { %v2497_v30 = vmax.f32 %v2467_v37, 0.0  ;;  %v2749_v37 = vld [vmem:[#allocation3 + $0x938] sm:$0xff] }
 0x405   :  { %v2498_v56 = vmax.f32 %v2468_v54, 0.0 }
 0x406   :  { %v2521_v13 = vpack.c.bf16 %v2497_v30, %v2494_v12 }
 0x407   :  { %v2522_v47 = vpack.c.bf16 %v2498_v56, %v2495_v39  ;;  %v2236_v43 = vpop.f32.mrb[28].mxu0 }
 0x408   :  { %v2551_v2 = vrot.slane %v2521_v13, 4  ;;  %v2470_v8 = vadd.f32 %v9820_v31, %v2236_v43  ;;  %v2238_v55 = vpop.f32.mrb[29].mxu0  ;;  %v2748_v43 = vld [vmem:[#allocation3 + $0x930] sm:$0xff] }
 0x409   :  { %v2553_v52 = vrot.slane %v2522_v47, 4  ;;  %v2471_v46 = vadd.f32 %v9824_v53, %v2238_v55  ;;  %v2240_v33 = vpop.f32.mrb[30].mxu0  ;;  %v2687_v57 = vld [vmem:[#allocation2] sm:$0xf0]  ;;  %v2635_v47 = vld [vmem:[#allocation3 + $0x5e0] sm:$0xff] }
 0x40a   :  { %v9837_v22 = vsel %vm1104_vm5, %v2548_v17, %v2551_v2  ;;  %v2473_v58 = vadd.f32 %v9820_v31, %v2240_v33  ;;  %v2242_v6 = vpop.f32.mrb[31].mxu0  ;;  %v2688_v40 = vld [vmem:[#allocation2 + $0x8] sm:$0xf0]  ;;  %v2772_v10 = vrot.slane %v2687_v57, 4  ;;  %v2500_v11 = vmax.f32 %v2470_v8, 0.0 }
 0x40b   :  { %v9841_v59 = vsel %vm1104_vm5, %v2549_v23, %v2553_v52  ;;  %v2474_v60 = vadd.f32 %v9824_v53, %v2242_v6  ;;  %v2775_v14 = vrot.slane %v2688_v40, 4  ;;  %v2773_v3 = vrot.slane %v9837_v22, 4  ;;  %v2745_v17 = vld [vmem:[#allocation3 + $0x918] sm:$0xff] }
 0x40c   :  { %v2503_v35 = vmax.f32 %v2473_v58, 0.0  ;;  %v2776_v4 = vrot.slane %v9841_v59, 4  ;;  %v2501_v51 = vmax.f32 %v2471_v46, 0.0  ;;  %v2752_v46 = vld [vmem:[#allocation3 + $0x950] sm:$0xff] }
 0x40d   :  { %v2504_v5 = vmax.f32 %v2474_v60, 0.0  ;;  %v2774_v62 = vsel %vm1104_vm5, %v2772_v10, %v2773_v3 }
 0x40e   :  { %v9846_v48 = vpack.c.bf16 %v2503_v35, %v2500_v11  ;;  %v2777_v24 = vsel %vm1104_vm5, %v2775_v14, %v2776_v4  ;;  %v2638_v35 = vld [vmem:[#allocation3 + $0x5f8] sm:$0xff] }
 0x40f   :  { %v9849_v42 = vpack.c.bf16 %v2504_v5, %v2501_v51  ;;  %v2246_v7 = vpop.f32.mrb[32].mxu0  ;;  %2862 = vmatprep.mubr.bf16.mxu1 %v2777_v24  ;;  %3028 = vmatprep.mubr.bf16.mxu0 %v2777_v24 }
 0x410   :  { %v2557_v15 = vrot.slane %v9846_v48, 4  ;;  %v2476_v63 = vadd.f32 %v9820_v31, %v2246_v7  ;;  %v2248_v61 = vpop.f32.mrb[33].mxu0  ;;  %2863 = vmatmul.mubr.bf16.vlgmr.msra.gmra.mrb[180].mxu1 %v2774_v62  ;;  %3029 = vmatmul.mubr.bf16.vlgmr.msra.gmra.mrb[40].mxu0 %v2774_v62  ;;  %v2665_v48 = vld [vmem:[#allocation3 + $0x6d0] sm:$0xff] }
 0x411   :  { %v2559_v18 = vrot.slane %v9849_v42, 4  ;;  %v2477_v34 = vadd.f32 %v9824_v53, %v2248_v61  ;;  %v2250_v50 = vpop.f32.mrb[34].mxu0  ;;  %2914 = vmatpush1.bf16.msra.mxu1 %v2742_v25  ;;  %7624 = vmatpush3.bf16.msra.mxu0 %v2629_v49 }
 0x412   :  { %v9857_v29 = vsel %vm1104_vm5, %v2551_v2, %v2557_v15  ;;  %v2479_v21 = vadd.f32 %v9820_v31, %v2250_v50  ;;  %v2252_v38 = vpop.f32.mrb[35].mxu0  ;;  %2915 = vmatprep.subr.bf16.mxu1 %v2746_v9  ;;  %7625 = vmatprep.subr.bf16.mxu0 %v2656_v19  ;;  %v2506_v41 = vmax.f32 %v2476_v63, 0.0  ;;  %v2641_v9 = vld [vmem:[#allocation3 + $0x610] sm:$0xff] }
 0x413   :  { %v9861_v44 = vsel %vm1104_vm5, %v2553_v52, %v2559_v18  ;;  %v2480_v23 = vadd.f32 %v9824_v53, %v2252_v38  ;;  %v2781_v45 = vrot.slane %v9857_v29, 4  ;;  %v2507_v30 = vmax.f32 %v2477_v34, 0.0  ;;  %v2662_v52 = vld [vmem:[#allocation3 + $0x6b8] sm:$0xff]  ;;  %v2644_v34 = vld [vmem:[#allocation3 + $0x628] sm:$0xff]  ;;  %v2671_v38 = vld [vmem:[#allocation3 + $0x700] sm:$0xff] }
 0x414   :  { %v2509_v54 = vmax.f32 %v2479_v21, 0.0  ;;  %v2783_v12 = vrot.slane %v9861_v44, 4 }
 0x415   :  { %v2510_v39 = vmax.f32 %v2480_v23, 0.0  ;;  %2916 = vmatpush1.bf16.msra.mxu1 %v2745_v17  ;;  %7626 = vmatpush3.bf16.msra.mxu0 %v2632_v27  ;;  %v2782_v55 = vsel %vm1104_vm5, %v2773_v3, %v2781_v45  ;;  %v2647_v23 = vld [vmem:[#allocation3 + $0x640] sm:$0xff] }
 0x416   :  { %v2527_v56 = vpack.c.bf16 %v2509_v54, %v2506_v41  ;;  %v2784_v13 = vsel %vm1104_vm5, %v2776_v4, %v2783_v12  ;;  %7627 = vmatprep.subr.bf16.mxu0 %v2659_v16  ;;  %2917 = vmatprep.subr.bf16.mxu1 %v2749_v37  ;;  %v2751_v4 = vld [vmem:[#allocation3 + $0x948] sm:$0xff]  ;;  %v2674_v16 = vld [vmem:[#allocation3 + $0x718] sm:$0xff] }
 0x417   :  { %v2528_v2 = vpack.c.bf16 %v2510_v39, %v2507_v30  ;;  %v2256_v8 = vpop.f32.mrb[36].mxu0  ;;  %2872 = vmatprep.mubr.bf16.mxu1 %v2784_v13  ;;  %3036 = vmatprep.mubr.bf16.mxu0 %v2784_v13  ;;  %v2650_v54 = vld [vmem:[#allocation3 + $0x658] sm:$0xff] }
 0x418   :  { %v2563_v33 = vrot.slane %v2527_v56, 4  ;;  %v2482_v57 = vadd.f32 %v9820_v31, %v2256_v8  ;;  %v2258_v58 = vpop.f32.mrb[37].mxu0  ;;  %2873 = vmatmul.mubr.bf16.gmra.mrb[184].mxu1 %v2782_v55  ;;  %3037 = vmatmul.mubr.bf16.gmra.mrb[44].mxu0 %v2782_v55  ;;  %v9896_v13 = vld [vmem:[#allocation2 + $0x8] sm:$0xff]  ;;  %v2744_v55 = vld [vmem:[#allocation3 + $0x910] sm:$0xff] }
 0x419   :  { %v2565_v6 = vrot.slane %v2528_v2, 4  ;;  %v2483_v40 = vadd.f32 %v9824_v53, %v2258_v58  ;;  %v2260_v60 = vpop.f32.mrb[38].mxu0  ;;  %7628 = vmatpush3.bf16.msra.mxu0 %v2635_v47  ;;  %2918 = vmatpush1.bf16.msra.mxu1 %v2748_v43  ;;  %v9898_v47 = vld [vmem:[#allocation2 + $0x28] sm:$0xff]  ;;  %v2689_v43 = vld [vmem:[#allocation2 + $0x10] sm:$0xf0]  ;;  %v2747_v58 = vld [vmem:[#allocation3 + $0x928] sm:$0xff] }
 0x41a   :  { %v9871_v14 = vsel %vm1104_vm5, %v2557_v15, %v2563_v33  ;;  %v2485_v10 = vadd.f32 %v9820_v31, %v2260_v60  ;;  %v2262_v11 = vpop.f32.mrb[39].mxu0  ;;  %7629 = vmatprep.subr.bf16.mxu0 %v2662_v52  ;;  %2919 = vmatprep.subr.bf16.mxu1 %v2752_v46  ;;  %v2512_v24 = vmax.f32 %v2482_v57, 0.0  ;;  %v2668_v15 = vld [vmem:[#allocation3 + $0x6e8] sm:$0xff]  ;;  %v2779_v2 = vrot.slane %v9898_v47, 4  ;;  %v9904_v46 = vld [vmem:[#allocation2] sm:$0xff] }
 0x41b   :  { %v9875_v3 = vsel %vm1104_vm5, %v2559_v18, %v2565_v6  ;;  %v2486_v51 = vadd.f32 %v9824_v53, %v2262_v11  ;;  %v2787_v5 = vrot.slane %v9871_v14, 4  ;;  %v2513_v42 = vmax.f32 %v2483_v40, 0.0  ;;  %v2677_v57 = vld [vmem:[#allocation3 + $0x730] sm:$0xff]  ;;  %v2680_v40 = vld [vmem:[#allocation3 + $0x748] sm:$0xff] }
 0x41c   :  { %v2515_v25 = vmax.f32 %v2485_v10, 0.0  ;;  %v2789_v49 = vrot.slane %v9875_v3, 4  ;;  %v2778_v8 = vrot.slane %v2689_v43, 4  ;;  %v2750_v10 = vld [vmem:[#allocation3 + $0x940] sm:$0xff]  ;;  %v9922_v11 = vld [vmem:[#allocation2 + $0x58] sm:$0xff]  ;;  %v3487_v43 = vld [vmem:[#allocation3 + $0x9d0] sm:$0xff] }
 0x41d   :  { %v2516_v7 = vmax.f32 %v2486_v51, 0.0  ;;  %7630 = vmatpush3.bf16.msra.mxu0 %v2638_v35  ;;  %2920 = vmatpush1.bf16.msra.mxu1 %v2751_v4  ;;  %v2788_v53 = vsel %vm1104_vm5, %v2781_v45, %v2787_v5  ;;  %v2683_v35 = vld [vmem:[#allocation3 + $0x760] sm:$0xff]  ;;  %v2791_v4 = vrot.slane %v9922_v11, 4  ;;  %v2753_v51 = vld [vmem:[#allocation3 + $0x958] sm:$0xff] }
 0x41e   :  { %v2530_v31 = vpack.c.bf16 %v2515_v25, %v2512_v24  ;;  %v2790_v62 = vsel %vm1104_vm5, %v2783_v12, %v2789_v49  ;;  %7631 = vmatprep.subr.bf16.mxu0 %v2665_v48  ;;  %8092 = vmatprep.subr.bf16.mxu1 %v8905_v0  ;;  %v2780_v52 = vsel %vm1104_vm5, %v2778_v8, %v2779_v2  ;;  %v2628_v48 = vld [vmem:[#allocation3 + $0x5a8] sm:$0xff]  ;;  %v3499_v25 = vld [vmem:[#allocation3 + $0xa30] sm:$0xff] }
 0x41f   :  { %v2531_v19 = vpack.c.bf16 %v2516_v7, %v2513_v42  ;;  %2882 = vmatprep.mubr.bf16.mxu1 %v2790_v62  ;;  %3044 = vmatprep.mubr.bf16.mxu0 %v2790_v62  ;;  %v3514_v8 = vld [vmem:[#allocation3 + $0xaa8] sm:$0xff] }
 0x420   :  { %v2569_v63 = vrot.slane %v2530_v31, 4  ;;  %2883 = vmatmul.mubr.bf16.gmra.mrb[188].mxu1 %v2788_v53  ;;  %3045 = vmatmul.mubr.bf16.gmra.mrb[48].mxu0 %v2788_v53  ;;  %v2692_v31 = vld [vmem:[#allocation2 + $0x88] sm:$0xf]  ;;  %v9959_v53 = vld [vmem:[#allocation2 + $0x10] sm:$0xff] }
 0x421   :  { %v2571_v61 = vrot.slane %v2531_v19, 4  ;;  %7632 = vmatpush3.bf16.msra.mxu0 %v2641_v9  ;;  %v2803_v62 = vrot.slane %v2692_v31, 4  ;;  %v2627_v19 = vld [vmem:[#allocation3 + $0x5a0] sm:$0xff]  ;;  %v3526_v31 = vld [vmem:[#allocation3 + $0xb08] sm:$0xff] }
 0x422   :  { %v9884_v18 = vsel %vm1104_vm5, %v2563_v33, %v2569_v63  ;;  %2608 = vst [vmem:[#allocation2 + $0x78] sm:$0xf] %v2569_v63  ;;  %7633 = vmatprep.subr.bf16.mxu0 %v2668_v15  ;;  %v9908_v33 = vld [vmem:[#allocation2 + $0x40] sm:$0xff]  ;;  %v2631_v15 = vld [vmem:[#allocation3 + $0x5c0] sm:$0xff] }
 0x423   :  { %v9887_v50 = vsel %vm1104_vm5, %v2565_v6, %v2571_v61  ;;  %2609 = vst [vmem:[#allocation2 + $0x80] sm:$0xf] %v2571_v61  ;;  %v2793_v21 = vrot.slane %v9884_v18, 4  ;;  %v2785_v6 = vrot.slane %v9908_v33, 4  ;;  %v3475_v63 = vld [vmem:[#allocation3 + $0x970] sm:$0xff]  ;;  %v3502_v61 = vld [vmem:[#allocation3 + $0xa48] sm:$0xff] }
 0x424   :  { %v2795_v17 = vrot.slane %v9887_v50, 4 }
 0x425   :  { %7634 = vmatpush3.bf16.msra.mxu0 %v2644_v34  ;;  %v2794_v45 = vsel %vm1104_vm5, %v2787_v5, %v2793_v21  ;;  %v9917_v60 = vsel %vm1104_vm5, %v2779_v2, %v2785_v6  ;;  %v2686_v5 = vld [vmem:[#allocation3 + $0x778] sm:$0xff]  ;;  %v9931_v24 = vsel %vm1104_vm5, %v2785_v6, %v2791_v4  ;;  %v2648_v6 = vld [vmem:[#allocation3 + $0x648] sm:$0xff] }
 0x426   :  { %v2796_v27 = vsel %vm1104_vm5, %v2789_v49, %v2795_v17  ;;  %7635 = vmatprep.subr.bf16.mxu0 %v2671_v38  ;;  %v9936_v49 = vld [vmem:[#allocation2 + $0x70] sm:$0xff]  ;;  %v2630_v34 = vld [vmem:[#allocation3 + $0x5b8] sm:$0xff]  ;;  %v3478_v38 = vld [vmem:[#allocation3 + $0x988] sm:$0xff] }
 0x427   :  { %2892 = vmatprep.mubr.bf16.mxu1 %v2796_v27  ;;  %3052 = vmatprep.mubr.bf16.mxu0 %v2796_v27  ;;  %v2797_v42 = vrot.slane %v9936_v49, 4  ;;  %v2637_v27 = vld [vmem:[#allocation3 + $0x5f0] sm:$0xff]  ;;  %v2646_v2 = vld [vmem:[#allocation3 + $0x638] sm:$0xff] }
 0x428   :  { %2893 = vmatmul.mubr.bf16.gmra.mrb[192].mxu1 %v2794_v45  ;;  %3053 = vmatmul.mubr.bf16.gmra.mrb[52].mxu0 %v2794_v45  ;;  %v3481_v45 = vld [vmem:[#allocation3 + $0x9a0] sm:$0xff] }
 0x429   :  { %v2690_v37 = vld [vmem:[#allocation2 + $0x78] sm:$0xf]  ;;  %7636 = vmatpush3.bf16.msra.mxu0 %v2647_v23  ;;  %v9942_v7 = vsel %vm1104_vm5, %v2791_v4, %v2797_v42  ;;  %v9950_v9 = vsel %vm1104_vm5, %v2797_v42, %v2803_v62  ;;  %v3505_v23 = vld [vmem:[#allocation3 + $0xa60] sm:$0xff]  ;;  %v3523_v42 = vld [vmem:[#allocation3 + $0xaf0] sm:$0xff] }
 0x42a   :  { %v2691_v41 = vld [vmem:[#allocation2 + $0x80] sm:$0xf]  ;;  %7637 = vmatprep.subr.bf16.mxu0 %v2674_v16  ;;  %v2799_v30 = vrot.slane %v2690_v37, 4  ;;  %v2636_v16 = vld [vmem:[#allocation3 + $0x5e8] sm:$0xff]  ;;  %v3508_v37 = vld [vmem:[#allocation3 + $0xa78] sm:$0xff] }
 0x42b   :  { %v2801_v12 = vrot.slane %v2691_v41, 4  ;;  %v2640_v41 = vld [vmem:[#allocation3 + $0x608] sm:$0xff]  ;;  %v2655_v4 = vld [vmem:[#allocation3 + $0x680] sm:$0xff] }
 0x42c   :  { %v2800_v56 = vsel %vm1104_vm5, %v2793_v21, %v2799_v30  ;;  %v2634_v21 = vld [vmem:[#allocation3 + $0x5d8] sm:$0xff]  ;;  %v2643_v30 = vld [vmem:[#allocation3 + $0x620] sm:$0xff] }
 0x42d   :  { %v2802_v39 = vsel %vm1104_vm5, %v2795_v17, %v2801_v12  ;;  %7638 = vmatpush3.bf16.msra.mxu0 %v2650_v54  ;;  %v2633_v17 = vld [vmem:[#allocation3 + $0x5d0] sm:$0xff]  ;;  %v2639_v54 = vld [vmem:[#allocation3 + $0x600] sm:$0xff]  ;;  %v3484_v12 = vld [vmem:[#allocation3 + $0x9b8] sm:$0xff] }
 0x42e   :  { %2902 = vmatprep.mubr.bf16.mxu1 %v2802_v39  ;;  %3060 = vmatprep.mubr.bf16.mxu0 %v2802_v39  ;;  %v3511_v39 = vld [vmem:[#allocation3 + $0xa90] sm:$0xff]  ;;  %v2663_v62 = vld [vmem:[#allocation3 + $0x6c0] sm:$0xff] }
 0x42f   :  { %8120 = vmatprep.subr.bf16.mxu0 %v8905_v0 }
 0x430   :  { %2903 = vmatmul.mubr.bf16.gmra.mrb[196].mxu1 %v2800_v56  ;;  %3061 = vmatmul.mubr.bf16.gmra.mrb[56].mxu0 %v2800_v56  ;;  %v2642_v56 = vld [vmem:[#allocation3 + $0x618] sm:$0xff] }
 0x431   :  { %3355 = vmatprep.mubr.bf16.mxu0 %v9896_v13  ;;  %2945 = vmatprep.mubr.bf16.mxu1 %v8906_v1 }
 0x438   :  { %7289 = vmatmul.mubr.msk.bf16.vlgmr.msra.gmra.mrb[180].mxu1 %vm217_vm3, %v2780_v52  ;;  %3356 = vmatmul.mubr.bf16.vlgmr.msra.gmra.mrb[60].mxu0 %v9904_v46 }
 0x439   :  { %8093 = vmatpush3.bf16.msra.mxu1 %v2744_v55  ;;  %3363 = vmatprep.mubr.bf16.mxu0 %v9841_v59  ;;  %v2645_v55 = vld [vmem:[#allocation3 + $0x630] sm:$0xff] }
 0x43a   :  { %2955 = vmatprep.mubr.bf16.mxu1 %v8906_v1  ;;  %8094 = vmatprep.subr.bf16.mxu1 %v8905_v0 }
 0x43b   :  { %8121 = vmatpush3.bf16.msra.mxu0 %v2677_v57  ;;  %v2649_v57 = vld [vmem:[#allocation3 + $0x650] sm:$0xff] }
 0x43c   :  { %8122 = vmatprep.subr.bf16.mxu0 %v8905_v0 }
 0x43d   :  { %8095 = vmatpush3.bf16.msra.mxu1 %v2747_v58  ;;  %v3517_v58 = vld [vmem:[#allocation3 + $0xac0] sm:$0xff] }
 0x43e   :  { %8096 = vmatprep.subr.bf16.mxu1 %v8905_v0 }
 0x43f   :  { %8123 = vmatpush3.bf16.msra.mxu0 %v2680_v40  ;;  %v3493_v40 = vld [vmem:[#allocation3 + $0xa00] sm:$0xff] }
 0x440   :  { %7290 = vmatmul.mubr.msk.bf16.gmra.mrb[184].mxu1 %vm217_vm3, %v9917_v60  ;;  %3364 = vmatmul.mubr.bf16.gmra.mrb[64].mxu0 %v9837_v22 }
 0x441   :  { %3371 = vmatprep.mubr.bf16.mxu0 %v9861_v44  ;;  %2965 = vmatprep.mubr.bf16.mxu1 %v8906_v1 }
 0x442   :  { %8097 = vmatpush3.bf16.msra.mxu1 %v2750_v10  ;;  %8124 = vmatprep.subr.bf16.mxu0 %v8905_v0  ;;  %v3520_v10 = vld [vmem:[#allocation3 + $0xad8] sm:$0xff] }
 0x443   :  { %8098 = vmatprep.subr.bf16.mxu1 %v8905_v0  ;;  %8125 = vmatpush3.bf16.msra.mxu0 %v2683_v35  ;;  %v2651_v35 = vld [vmem:[#allocation3 + $0x660] sm:$0xff] }
 0x444   :  { %8126 = vmatprep.subr.bf16.mxu0 %v8905_v0 }
 0x446   :  { %8099 = vmatpush3.bf16.msra.mxu1 %v2753_v51  ;;  %v3496_v51 = vld [vmem:[#allocation3 + $0xa18] sm:$0xff] }
 0x447   :  { %8127 = vmatpush3.bf16.msra.mxu0 %v2686_v5  ;;  %3157 = vmatprep.subr.bf16.mxu1 %v2628_v48  ;;  %v2654_v5 = vld [vmem:[#allocation3 + $0x678] sm:$0xff] }
 0x448   :  { %7291 = vmatmul.mubr.msk.bf16.gmra.mrb[188].mxu1 %vm217_vm3, %v9931_v24  ;;  %3372 = vmatmul.mubr.bf16.gmra.mrb[68].mxu0 %v9857_v29  ;;  %v2658_v48 = vld [vmem:[#allocation3 + $0x698] sm:$0xff] }
 0x449   :  { %3379 = vmatprep.mubr.bf16.mxu0 %v9875_v3  ;;  %2975 = vmatprep.mubr.bf16.mxu1 %v8906_v1 }
 0x44a   :  { %7678 = vmatprep.subr.bf16.mxu0 %v3499_v25  ;;  %v2661_v25 = vld [vmem:[#allocation3 + $0x6b0] sm:$0xff] }
 0x450   :  { %7292 = vmatmul.mubr.msk.bf16.gmra.mrb[192].mxu1 %vm217_vm3, %v9942_v7  ;;  %3380 = vmatmul.mubr.bf16.gmra.mrb[72].mxu0 %v9871_v14 }
 0x451   :  { %3387 = vmatprep.mubr.bf16.mxu0 %v9887_v50  ;;  %2985 = vmatprep.mubr.bf16.mxu1 %v8906_v1 }
 0x458   :  { %7293 = vmatmul.mubr.msk.bf16.gmra.mrb[196].mxu1 %vm217_vm3, %v9950_v9  ;;  %3388 = vmatmul.mubr.bf16.gmra.mrb[76].mxu0 %v9884_v18 }
 0x459   :  { %8100 = vmatprep.mubr.msk.bf16.mxu1 %vm8907_vm0, %v8905_v0  ;;  %8128 = vmatprep.mubr.msk.bf16.mxu0 %vm8907_vm0, %v8905_v0 }
 0x460   :  { %8101 = vmatmul.mubr.msk.bf16.vlgmr.msra.gmra.mrb[200].mxu1 %vm217_vm3, %v2780_v52  ;;  %8129 = vmatmul.mubr.msk.bf16.vlgmr.msra.gmra.mrb[80].mxu0 %vm217_vm3, %v9959_v53  ;;  %v3490_v52 = vld [vmem:[#allocation3 + $0x9e8] sm:$0xff] }
 0x461   :  { %3158 = vmatpush1.bf16.msra.mxu1 %v2627_v19  ;;  %8104 = vmatprep.mubr.msk.bf16.mxu1 %vm8907_vm0, %v8905_v0  ;;  %v3529_v19 = vld [vmem:[#allocation3 + $0xb20] sm:$0xff] }
 0x462   :  { %3159 = vmatprep.subr.bf16.mxu1 %v2631_v15  ;;  %8132 = vmatprep.mubr.msk.bf16.mxu0 %vm8907_vm0, %v8905_v0  ;;  %v2666_v15 = vld [vmem:[#allocation3 + $0x6d8] sm:$0xff] }
 0x463   :  { %7679 = vmatpush3.bf16.msra.mxu0 %v3475_v63  ;;  %v2670_v63 = vld [vmem:[#allocation3 + $0x6f8] sm:$0xff] }
 0x464   :  { %7680 = vmatprep.subr.bf16.mxu0 %v3502_v61  ;;  %v3532_v61 = vld [vmem:[#allocation3 + $0xb38] sm:$0xff] }
 0x465   :  { %3160 = vmatpush1.bf16.msra.mxu1 %v2630_v34  ;;  %v2669_v34 = vld [vmem:[#allocation3 + $0x6f0] sm:$0xff] }
 0x466   :  { %3161 = vmatprep.subr.bf16.mxu1 %v2634_v21  ;;  %v2673_v21 = vld [vmem:[#allocation3 + $0x710] sm:$0xff] }
 0x467   :  { %7681 = vmatpush3.bf16.msra.mxu0 %v3478_v38  ;;  %v2672_v38 = vld [vmem:[#allocation3 + $0x708] sm:$0xff] }
 0x468   :  { %8105 = vmatmul.mubr.msk.bf16.gmra.mrb[204].mxu1 %vm217_vm3, %v9917_v60  ;;  %8133 = vmatmul.mubr.msk.bf16.gmra.mrb[84].mxu0 %vm217_vm3, %v9898_v47  ;;  %v2652_v60 = vld [vmem:[#allocation3 + $0x668] sm:$0xff] }
 0x469   :  { %3162 = vmatpush1.bf16.msra.mxu1 %v2633_v17  ;;  %8108 = vmatprep.mubr.msk.bf16.mxu1 %vm8907_vm0, %v8905_v0  ;;  %v2676_v17 = vld [vmem:[#allocation3 + $0x728] sm:$0xff] }
 0x46a   :  { %3163 = vmatprep.subr.bf16.mxu1 %v2637_v27  ;;  %8136 = vmatprep.mubr.msk.bf16.mxu0 %vm8907_vm0, %v8905_v0  ;;  %v2675_v27 = vld [vmem:[#allocation3 + $0x720] sm:$0xff] }
 0x46b   :  { %7682 = vmatprep.subr.bf16.mxu0 %v3505_v23  ;;  %v2679_v23 = vld [vmem:[#allocation3 + $0x740] sm:$0xff] }
 0x46c   :  { %7683 = vmatpush3.bf16.msra.mxu0 %v3481_v45  ;;  %v10011_v45 = vld [vmem:[#allocation2 + $0x80] sm:$0xff] }
 0x46d   :  { %3164 = vmatpush1.bf16.msra.mxu1 %v2636_v16  ;;  %7684 = vmatprep.subr.bf16.mxu0 %v3508_v37  ;;  %v2678_v16 = vld [vmem:[#allocation3 + $0x738] sm:$0xff] }
 0x46e   :  { %3165 = vmatprep.subr.bf16.mxu1 %v2640_v41  ;;  %v2682_v37 = vld [vmem:[#allocation3 + $0x758] sm:$0xff]  ;;  %v10014_v41 = vld [vmem:[#allocation2 + $0x78] sm:$0xff] }
 0x470   :  { %8109 = vmatmul.mubr.msk.bf16.gmra.mrb[208].mxu1 %vm217_vm3, %v9931_v24  ;;  %8137 = vmatmul.mubr.msk.bf16.gmra.mrb[88].mxu0 %vm217_vm3, %v9908_v33  ;;  %v2657_v24 = vld [vmem:[#allocation3 + $0x690] sm:$0xff] }
 0x471   :  { %3166 = vmatpush1.bf16.msra.mxu1 %v2639_v54  ;;  %7685 = vmatpush3.bf16.msra.mxu0 %v3484_v12  ;;  %v2681_v54 = vld [vmem:[#allocation3 + $0x750] sm:$0xff]  ;;  %v2684_v12 = vld [vmem:[#allocation3 + $0x768] sm:$0xff] }
 0x472   :  { %3167 = vmatprep.subr.bf16.mxu1 %v2643_v30  ;;  %8112 = vmatprep.mubr.msk.bf16.mxu1 %vm8907_vm0, %v8905_v0  ;;  %v3474_v30 = vld [vmem:[#allocation3 + $0x968] sm:$0xff] }
 0x473   :  { %8140 = vmatprep.mubr.msk.bf16.mxu0 %vm8907_vm0, %v8905_v0  ;;  %7686 = vmatprep.subr.bf16.mxu0 %v3511_v39  ;;  %v3473_v39 = vld [vmem:[#allocation3 + $0x960] sm:$0xff] }
 0x475   :  { %3168 = vmatpush1.bf16.msra.mxu1 %v2642_v56  ;;  %7687 = vmatpush3.bf16.msra.mxu0 %v3487_v43  ;;  %v3477_v56 = vld [vmem:[#allocation3 + $0x980] sm:$0xff]  ;;  %v3476_v43 = vld [vmem:[#allocation3 + $0x978] sm:$0xff] }
 0x476   :  { %3169 = vmatprep.subr.bf16.mxu1 %v2646_v2  ;;  %7688 = vmatprep.subr.bf16.mxu0 %v3514_v8  ;;  %v3480_v2 = vld [vmem:[#allocation3 + $0x998] sm:$0xff]  ;;  %v3479_v8 = vld [vmem:[#allocation3 + $0x990] sm:$0xff] }
 0x478   :  { %8113 = vmatmul.mubr.msk.bf16.gmra.mrb[212].mxu1 %vm217_vm3, %v9942_v7  ;;  %8141 = vmatmul.mubr.msk.bf16.gmra.mrb[92].mxu0 %vm217_vm3, %v9922_v11  ;;  %v2664_v7 = vld [vmem:[#allocation3 + $0x6c8] sm:$0xff] }
 0x479   :  { %3170 = vmatpush1.bf16.msra.mxu1 %v2645_v55  ;;  %7689 = vmatpush3.bf16.msra.mxu0 %v3490_v52  ;;  %v10046_v55 = vld [vmem:[#allocation2 + $0x88] sm:$0xff]  ;;  %v3483_v52 = vld [vmem:[#allocation3 + $0x9b0] sm:$0xff] }
 0x47a   :  { %3171 = vmatprep.subr.bf16.mxu1 %v2649_v57  ;;  %8116 = vmatprep.mubr.msk.bf16.mxu1 %vm8907_vm0, %v8905_v0  ;;  %v3486_v57 = vld [vmem:[#allocation3 + $0x9c8] sm:$0xff] }
 0x47b   :  { %8144 = vmatprep.mubr.msk.bf16.mxu0 %vm8907_vm0, %v8905_v0  ;;  %7690 = vmatprep.subr.bf16.mxu0 %v3517_v58  ;;  %v3485_v58 = vld [vmem:[#allocation3 + $0x9c0] sm:$0xff] }
 0x47d   :  { %3172 = vmatpush1.bf16.msra.mxu1 %v2648_v6  ;;  %7691 = vmatpush3.bf16.msra.mxu0 %v3493_v40  ;;  %v3489_v6 = vld [vmem:[#allocation3 + $0x9e0] sm:$0xff]  ;;  %v3488_v40 = vld [vmem:[#allocation3 + $0x9d8] sm:$0xff] }
 0x47e   :  { %3173 = vmatprep.subr.bf16.mxu1 %v2652_v60  ;;  %7692 = vmatprep.subr.bf16.mxu0 %v3520_v10  ;;  %v3492_v60 = vld [vmem:[#allocation3 + $0x9f8] sm:$0xff]  ;;  %v3491_v10 = vld [vmem:[#allocation3 + $0x9f0] sm:$0xff] }
 0x480   :  { %8117 = vmatmul.mubr.msk.bf16.gmra.mrb[216].mxu1 %vm217_vm3, %v9950_v9  ;;  %8145 = vmatmul.mubr.msk.bf16.gmra.mrb[96].mxu0 %vm217_vm3, %v9936_v49  ;;  %v2667_v9 = vld [vmem:[#allocation3 + $0x6e0] sm:$0xff] }
 0x481   :  { %3174 = vmatpush1.bf16.msra.mxu1 %v2651_v35  ;;  %3189 = vmatprep.mubr.bf16.mxu1 %v9896_v13  ;;  %v2660_v13 = vld [vmem:[#allocation3 + $0x6a8] sm:$0xff]  ;;  %v3495_v35 = vld [vmem:[#allocation3 + $0xa10] sm:$0xff] }
 0x482   :  { %3734 = vmatprep.mubr.bf16.mxu0 %v9841_v59  ;;  %3175 = vmatprep.subr.bf16.mxu1 %v2655_v4  ;;  %v3494_v4 = vld [vmem:[#allocation3 + $0xa08] sm:$0xff] }
 0x483   :  { %7693 = vmatpush3.bf16.msra.mxu0 %v3496_v51 }
 0x484   :  { %8148 = vmatprep.subr.bf16.mxu0 %v8905_v0 }
 0x485   :  { %3176 = vmatpush1.bf16.msra.mxu1 %v2654_v5  ;;  %v3498_v5 = vld [vmem:[#allocation3 + $0xa28] sm:$0xff] }
 0x486   :  { %3177 = vmatprep.subr.bf16.mxu1 %v2658_v48 }
 0x488   :  { %3735 = vmatmul.mubr.bf16.vlgmr.msra.gmra.mrb[100].mxu0 %v9837_v22 }
 0x489   :  { %3178 = vmatpush1.bf16.msra.mxu1 %v2657_v24  ;;  %3742 = vmatprep.mubr.bf16.mxu0 %v9861_v44 }
 0x48a   :  { %3179 = vmatprep.subr.bf16.mxu1 %v2661_v25  ;;  %8149 = vmatpush3.bf16.msra.mxu0 %v3523_v42 }
 0x48b   :  { %8150 = vmatprep.subr.bf16.mxu0 %v8905_v0 }
 0x48d   :  { %3180 = vmatpush1.bf16.msra.mxu1 %v2660_v13  ;;  %v3497_v13 = vld [vmem:[#allocation3 + $0xa20] sm:$0xff] }
 0x48e   :  { %3181 = vmatprep.subr.bf16.mxu1 %v2664_v7  ;;  %8151 = vmatpush3.bf16.msra.mxu0 %v3526_v31  ;;  %v3501_v31 = vld [vmem:[#allocation3 + $0xa40] sm:$0xff] }
 0x48f   :  { %8152 = vmatprep.subr.bf16.mxu0 %v8905_v0 }
 0x490   :  { %3743 = vmatmul.mubr.bf16.gmra.mrb[104].mxu0 %v9857_v29 }
 0x491   :  { %3182 = vmatpush1.bf16.msra.mxu1 %v2663_v62  ;;  %3750 = vmatprep.mubr.bf16.mxu0 %v9875_v3  ;;  %v3500_v62 = vld [vmem:[#allocation3 + $0xa38] sm:$0xff] }
 0x492   :  { %3183 = vmatprep.subr.bf16.mxu1 %v2667_v9  ;;  %8153 = vmatpush3.bf16.msra.mxu0 %v3529_v19  ;;  %v3504_v19 = vld [vmem:[#allocation3 + $0xa58] sm:$0xff] }
 0x493   :  { %8154 = vmatprep.subr.bf16.mxu0 %v8905_v0 }
 0x495   :  { %3184 = vmatpush1.bf16.msra.mxu1 %v2666_v15 }
 0x496   :  { %3185 = vmatprep.subr.bf16.mxu1 %v2670_v63  ;;  %8155 = vmatpush3.bf16.msra.mxu0 %v3532_v61 }
 0x498   :  { %3751 = vmatmul.mubr.bf16.gmra.mrb[108].mxu0 %v9871_v14 }
 0x499   :  { %3186 = vmatpush1.bf16.msra.mxu1 %v2669_v34  ;;  %3758 = vmatprep.mubr.bf16.mxu0 %v9887_v50 }
 0x49a   :  { %3187 = vmatprep.subr.bf16.mxu1 %v2673_v21  ;;  %v3503_v21 = vld [vmem:[#allocation3 + $0xa50] sm:$0xff] }
 0x49d   :  { %3188 = vmatpush1.bf16.msra.mxu1 %v2672_v38 }
 0x49e   :  { %3240 = vmatprep.subr.bf16.mxu1 %v2676_v17  ;;  %v3507_v17 = vld [vmem:[#allocation3 + $0xa70] sm:$0xff] }
 0x4a0   :  { %3190 = vmatmul.mubr.bf16.vlgmr.msra.gmra.mrb[180].mxu1 %v9904_v46  ;;  %3759 = vmatmul.mubr.bf16.gmra.mrb[112].mxu0 %v9884_v18  ;;  %v2685_v46 = vld [vmem:[#allocation3 + $0x770] sm:$0xff] }
 0x4a1   :  { %3199 = vmatprep.mubr.bf16.mxu1 %v9841_v59  ;;  %3241 = vmatpush1.bf16.msra.mxu1 %v2675_v27  ;;  %v3506_v27 = vld [vmem:[#allocation3 + $0xa68] sm:$0xff] }
 0x4a2   :  { %3766 = vmatprep.mubr.bf16.mxu0 %v10011_v45  ;;  %3242 = vmatprep.subr.bf16.mxu1 %v2679_v23 }
 0x4a5   :  { %3243 = vmatpush1.bf16.msra.mxu1 %v2678_v16 }
 0x4a6   :  { %3244 = vmatprep.subr.bf16.mxu1 %v2682_v37 }
 0x4a8   :  { %3200 = vmatmul.mubr.bf16.gmra.mrb[184].mxu1 %v9837_v22  ;;  %3767 = vmatmul.mubr.bf16.gmra.mrb[116].mxu0 %v10014_v41 }
 0x4a9   :  { %3209 = vmatprep.mubr.bf16.mxu1 %v9861_v44  ;;  %8156 = vmatprep.mubr.msk.bf16.mxu0 %vm8907_vm0, %v8905_v0 }
 0x4aa   :  { %3245 = vmatpush1.bf16.msra.mxu1 %v2681_v54 }
 0x4ab   :  { %3246 = vmatprep.subr.bf16.mxu1 %v2685_v46 }
 0x4ae   :  { %3247 = vmatpush1.bf16.msra.mxu1 %v2684_v12  ;;  %v3509_v12 = vld [vmem:[#allocation3 + $0xa80] sm:$0xff] }
 0x4af   :  { %3536 = vmatprep.subr.bf16.mxu1 %v3474_v30 }
 0x4b0   :  { %3210 = vmatmul.mubr.bf16.gmra.mrb[188].mxu1 %v9857_v29  ;;  %8157 = vmatmul.mubr.msk.bf16.vlgmr.msra.gmra.mrb[120].mxu0 %vm217_vm3, %v9898_v47 }
 0x4b1   :  { %3219 = vmatprep.mubr.bf16.mxu1 %v9875_v3  ;;  %8160 = vmatprep.mubr.msk.bf16.mxu0 %vm8907_vm0, %v8905_v0 }
 0x4b8   :  { %3220 = vmatmul.mubr.bf16.gmra.mrb[192].mxu1 %v9871_v14  ;;  %8161 = vmatmul.mubr.msk.bf16.gmra.mrb[124].mxu0 %vm217_vm3, %v9908_v33 }
 0x4b9   :  { %3229 = vmatprep.mubr.bf16.mxu1 %v9887_v50  ;;  %8164 = vmatprep.mubr.msk.bf16.mxu0 %vm8907_vm0, %v8905_v0 }
 0x4c0   :  { %3230 = vmatmul.mubr.bf16.gmra.mrb[196].mxu1 %v9884_v18  ;;  %8165 = vmatmul.mubr.msk.bf16.gmra.mrb[128].mxu0 %vm217_vm3, %v9922_v11 }
 0x4c1   :  { %3272 = vmatprep.mubr.bf16.mxu1 %v8906_v1  ;;  %8168 = vmatprep.mubr.msk.bf16.mxu0 %vm8907_vm0, %v8905_v0 }
 0x4c8   :  { %7299 = vmatmul.mubr.msk.bf16.vlgmr.msra.gmra.mrb[180].mxu1 %vm217_vm3, %v9959_v53  ;;  %8169 = vmatmul.mubr.msk.bf16.gmra.mrb[132].mxu0 %vm217_vm3, %v9936_v49  ;;  %v3482_v53 = vld [vmem:[#allocation3 + $0x9a8] sm:$0xff] }
 0x4c9   :  { %3537 = vmatpush1.bf16.msra.mxu1 %v3473_v39  ;;  %3282 = vmatprep.mubr.bf16.mxu1 %v8906_v1  ;;  %v3513_v39 = vld [vmem:[#allocation3 + $0xaa0] sm:$0xff] }
 0x4ca   :  { %3538 = vmatprep.subr.bf16.mxu1 %v3477_v56  ;;  %8172 = vmatprep.mubr.msk.bf16.mxu0 %vm8907_vm0, %v8905_v0  ;;  %v3512_v56 = vld [vmem:[#allocation3 + $0xa98] sm:$0xff] }
 0x4cd   :  { %3539 = vmatpush1.bf16.msra.mxu1 %v3476_v43 }
 0x4ce   :  { %3540 = vmatprep.subr.bf16.mxu1 %v3480_v2  ;;  %v3516_v2 = vld [vmem:[#allocation3 + $0xab8] sm:$0xff] }
 0x4d0   :  { %7300 = vmatmul.mubr.msk.bf16.gmra.mrb[184].mxu1 %vm217_vm3, %v9898_v47  ;;  %8173 = vmatmul.mubr.msk.bf16.gmra.mrb[136].mxu0 %vm217_vm3, %v10046_v55 }
 0x4d1   :  { %3541 = vmatpush1.bf16.msra.mxu1 %v3479_v8  ;;  %3292 = vmatprep.mubr.bf16.mxu1 %v8906_v1 }
 0x4d2   :  { %3542 = vmatprep.subr.bf16.mxu1 %v3483_v52 }
 0x4d5   :  { %3543 = vmatpush1.bf16.msra.mxu1 %v3482_v53 }
 0x4d6   :  { %3544 = vmatprep.subr.bf16.mxu1 %v3486_v57 }
 0x4d8   :  { %7301 = vmatmul.mubr.msk.bf16.gmra.mrb[188].mxu1 %vm217_vm3, %v9908_v33 }
 0x4d9   :  { %3545 = vmatpush1.bf16.msra.mxu1 %v3485_v58  ;;  %3302 = vmatprep.mubr.bf16.mxu1 %v8906_v1  ;;  %v3515_v58 = vld [vmem:[#allocation3 + $0xab0] sm:$0xff] }
 0x4da   :  { %3546 = vmatprep.subr.bf16.mxu1 %v3489_v6 }
 0x4dd   :  { %3547 = vmatpush1.bf16.msra.mxu1 %v3488_v40  ;;  %v3519_v40 = vld [vmem:[#allocation3 + $0xad0] sm:$0xff] }
 0x4de   :  { %3548 = vmatprep.subr.bf16.mxu1 %v3492_v60  ;;  %v3518_v60 = vld [vmem:[#allocation3 + $0xac8] sm:$0xff] }
 0x4e0   :  { %7302 = vmatmul.mubr.msk.bf16.gmra.mrb[192].mxu1 %vm217_vm3, %v9922_v11 }
 0x4e1   :  { %3549 = vmatpush1.bf16.msra.mxu1 %v3491_v10  ;;  %3312 = vmatprep.mubr.bf16.mxu1 %v8906_v1 }
 0x4e2   :  { %3550 = vmatprep.subr.bf16.mxu1 %v3495_v35  ;;  %v3522_v35 = vld [vmem:[#allocation3 + $0xae8] sm:$0xff] }
 0x4e3   :  { %v7584_v51 = vpop.f32.mrb[40].mxu0 }
 0x4e4   :  { %v7585_v48 = vpop.f32.mrb[41].mxu0 }
 0x4e5   :  { %3551 = vmatpush1.bf16.msra.mxu1 %v3494_v4  ;;  %v10059_v24 = vadd.f32 %v7585_v48, %v7584_v51  ;;  %v7587_v25 = vpop.f32.mrb[42].mxu0 }
 0x4e6   :  { %v7588_v42 = vpop.f32.mrb[43].mxu0  ;;  %3552 = vmatprep.subr.bf16.mxu1 %v3498_v5 }
 0x4e7   :  { %v10061_v7 = vadd.f32 %v7588_v42, %v7587_v25  ;;  %v3521_v25 = vld [vmem:[#allocation3 + $0xae0] sm:$0xff] }
 0x4e8   :  { %7303 = vmatmul.mubr.msk.bf16.gmra.mrb[196].mxu1 %vm217_vm3, %v9936_v49 }
 0x4e9   :  { %3553 = vmatpush1.bf16.msra.mxu1 %v3497_v13  ;;  %3568 = vmatprep.mubr.bf16.mxu1 %v9841_v59  ;;  %v3510_v59 = vld [vmem:[#allocation3 + $0xa88] sm:$0xff]  ;;  %v3525_v13 = vld [vmem:[#allocation3 + $0xb00] sm:$0xff] }
 0x4ea   :  { %3554 = vmatprep.subr.bf16.mxu1 %v3501_v31  ;;  %v3524_v31 = vld [vmem:[#allocation3 + $0xaf8] sm:$0xff] }
 0x4eb   :  { %v7590_v9 = vpop.f32.mrb[44].mxu0 }
 0x4ec   :  { %v7591_v15 = vpop.f32.mrb[45].mxu0 }
 0x4ed   :  { %3555 = vmatpush1.bf16.msra.mxu1 %v3500_v62  ;;  %v10066_v63 = vadd.f32 %v7591_v15, %v7590_v9  ;;  %v7593_v61 = vpop.f32.mrb[46].mxu0  ;;  %v3528_v9 = vld [vmem:[#allocation3 + $0xb18] sm:$0xff] }
 0x4ee   :  { %v7594_v34 = vpop.f32.mrb[47].mxu0  ;;  %3556 = vmatprep.subr.bf16.mxu1 %v3504_v19 }
 0x4ef   :  { %v10068_v38 = vadd.f32 %v7594_v34, %v7593_v61 }
 0x4f1   :  { %3557 = vmatpush1.bf16.msra.mxu1 %v3503_v21  ;;  %v3527_v21 = vld [vmem:[#allocation3 + $0xb10] sm:$0xff] }
 0x4f2   :  { %3558 = vmatprep.subr.bf16.mxu1 %v3507_v17 }
 0x4f3   :  { %v7596_v23 = vpop.f32.mrb[48].mxu0 }
 0x4f4   :  { %v7597_v16 = vpop.f32.mrb[49].mxu0 }
 0x4f5   :  { %3559 = vmatpush1.bf16.msra.mxu1 %v3506_v27  ;;  %v10070_v37 = vadd.f32 %v7597_v16, %v7596_v23  ;;  %v7599_v54 = vpop.f32.mrb[50].mxu0  ;;  %v3531_v27 = vld [vmem:[#allocation3 + $0xb30] sm:$0xff] }
 0x4f6   :  { %v7600_v46 = vpop.f32.mrb[51].mxu0  ;;  %3560 = vmatprep.subr.bf16.mxu1 %v3510_v59 }
 0x4f7   :  { %v10072_v30 = vadd.f32 %v7600_v46, %v7599_v54 }
 0x4f9   :  { %3561 = vmatpush1.bf16.msra.mxu1 %v3509_v12 }
 0x4fa   :  { %3562 = vmatprep.subr.bf16.mxu1 %v3513_v39 }
 0x4fb   :  { %v7602_v43 = vpop.f32.mrb[52].mxu0 }
 0x4fc   :  { %v7603_v8 = vpop.f32.mrb[53].mxu0 }
 0x4fd   :  { %3563 = vmatpush1.bf16.msra.mxu1 %v3512_v56  ;;  %v10074_v52 = vadd.f32 %v7603_v8, %v7602_v43  ;;  %v7605_v53 = vpop.f32.mrb[54].mxu0 }
 0x4fe   :  { %v7606_v57 = vpop.f32.mrb[55].mxu0  ;;  %3564 = vmatprep.subr.bf16.mxu1 %v3516_v2 }
 0x4ff   :  { %v10076_v6 = vadd.f32 %v7606_v57, %v7605_v53 }
 0x501   :  { %3565 = vmatpush1.bf16.msra.mxu1 %v3515_v58 }
 0x502   :  { %3566 = vmatprep.subr.bf16.mxu1 %v3519_v40 }
 0x503   :  { %v7608_v10 = vpop.f32.mrb[56].mxu0 }
 0x504   :  { %v7609_v4 = vpop.f32.mrb[57].mxu0 }
 0x505   :  { %3567 = vmatpush1.bf16.msra.mxu1 %v3518_v60  ;;  %v10078_v51 = vadd.f32 %v7609_v4, %v7608_v10  ;;  %v7611_v5 = vpop.f32.mrb[58].mxu0 }
 0x506   :  { %v7612_v48 = vpop.f32.mrb[59].mxu0  ;;  %3619 = vmatprep.subr.bf16.mxu1 %v3522_v35 }
 0x507   :  { %v10080_v42 = vadd.f32 %v7612_v48, %v7611_v5  ;;  %v4133_v5 = vld [vmem:[#allocation3 + $0xd28] sm:$0xff]  ;;  %v4132_v48 = vld [vmem:[#allocation3 + $0xd20] sm:$0xff] }
 0x508   :  { %3569 = vmatmul.mubr.bf16.vlgmr.msra.gmra.mrb[180].mxu1 %v9837_v22  ;;  %v3530_v22 = vld [vmem:[#allocation3 + $0xb28] sm:$0xff]  ;;  %4268 = vmatprep.subr.bf16.mxu0 %v4133_v5 }
 0x509   :  { %3578 = vmatprep.mubr.bf16.mxu1 %v9861_v44  ;;  %3620 = vmatpush1.bf16.msra.mxu1 %v3521_v25 }
 0x50a   :  { %3621 = vmatprep.subr.bf16.mxu1 %v3525_v13  ;;  %4269 = vmatpush1.bf16.msra.mxu0 %v4132_v48 }
 0x50b   :  { %v7639_v62 = vpop.f32.mrb[60].mxu0 }
 0x50c   :  { %v7640_v19 = vpop.f32.mrb[61].mxu0 }
 0x50d   :  { %v7641_v15 = vadd.f32 %v7640_v19, %v7639_v62  ;;  %v7642_v61 = vpop.f32.mrb[62].mxu0  ;;  %3622 = vmatpush1.bf16.msra.mxu1 %v3524_v31 }
 0x50e   :  { %v7643_v34 = vpop.f32.mrb[63].mxu0  ;;  %3623 = vmatprep.subr.bf16.mxu1 %v3528_v9 }
 0x50f   :  { %v7644_v17 = vadd.f32 %v7643_v34, %v7642_v61 }
 0x510   :  { %3579 = vmatmul.mubr.bf16.gmra.mrb[184].mxu1 %v9857_v29 }
 0x511   :  { %3588 = vmatprep.mubr.bf16.mxu1 %v9875_v3  ;;  %3624 = vmatpush1.bf16.msra.mxu1 %v3527_v21  ;;  %v4135_v21 = vld [vmem:[#allocation3 + $0xd38] sm:$0xff] }
 0x512   :  { %3625 = vmatprep.subr.bf16.mxu1 %v3531_v27  ;;  %v4139_v27 = vld [vmem:[#allocation3 + $0xd58] sm:$0xff] }
 0x513   :  { %v7645_v44 = vpop.f32.mrb[64].mxu0 }
 0x514   :  { %v7646_v23 = vpop.f32.mrb[65].mxu0 }
 0x515   :  { %v10086_v59 = vadd.f32 %v7646_v23, %v7645_v44  ;;  %v7648_v16 = vpop.f32.mrb[66].mxu0  ;;  %3626 = vmatpush1.bf16.msra.mxu1 %v3530_v22 }
 0x516   :  { %v7649_v54 = vpop.f32.mrb[67].mxu0 }
 0x517   :  { %v10088_v46 = vadd.f32 %v7649_v54, %v7648_v16  ;;  %v4142_v16 = vld [vmem:[#allocation3 + $0xd70] sm:$0xff] }
 0x518   :  { %3589 = vmatmul.mubr.bf16.gmra.mrb[188].mxu1 %v9871_v14 }
 0x519   :  { %3598 = vmatprep.mubr.bf16.mxu1 %v9887_v50 }
 0x51b   :  { %v7651_v12 = vpop.f32.mrb[68].mxu0 }
 0x51c   :  { %v7652_v29 = vpop.f32.mrb[69].mxu0 }
 0x51d   :  { %v10092_v39 = vadd.f32 %v7652_v29, %v7651_v12  ;;  %v7654_v3 = vpop.f32.mrb[70].mxu0 }
 0x51e   :  { %v7655_v56 = vpop.f32.mrb[71].mxu0 }
 0x51f   :  { %v10094_v43 = vadd.f32 %v7655_v56, %v7654_v3 }
 0x520   :  { %3599 = vmatmul.mubr.bf16.gmra.mrb[192].mxu1 %v9884_v18 }
 0x521   :  { %3608 = vmatprep.mubr.bf16.mxu1 %v10011_v45 }
 0x523   :  { %v7657_v2 = vpop.f32.mrb[72].mxu0 }
 0x524   :  { %v7658_v8 = vpop.f32.mrb[73].mxu0 }
 0x525   :  { %v10098_v53 = vadd.f32 %v7658_v8, %v7657_v2  ;;  %v7660_v57 = vpop.f32.mrb[74].mxu0 }
 0x526   :  { %v7661_v14 = vpop.f32.mrb[75].mxu0 }
 0x527   :  { %v10100_v58 = vadd.f32 %v7661_v14, %v7660_v57  ;;  %v4141_v57 = vld [vmem:[#allocation3 + $0xd68] sm:$0xff] }
 0x528   :  { %3609 = vmatmul.mubr.bf16.gmra.mrb[196].mxu1 %v10014_v41  ;;  %v4136_v41 = vld [vmem:[#allocation3 + $0xd40] sm:$0xff]  ;;  %v4145_v14 = vld [vmem:[#allocation3 + $0xd88] sm:$0xff] }
 0x529   :  { %3651 = vmatprep.mubr.bf16.mxu1 %v8906_v1  ;;  %4270 = vmatprep.subr.bf16.mxu0 %v4136_v41 }
 0x52a   :  { %4271 = vmatpush1.bf16.msra.mxu0 %v4135_v21 }
 0x52b   :  { %v7663_v50 = vpop.f32.mrb[76].mxu0  ;;  %4272 = vmatprep.subr.bf16.mxu0 %v4139_v27 }
 0x52c   :  { %v7664_v40 = vpop.f32.mrb[77].mxu0 }
 0x52d   :  { %v10104_v60 = vadd.f32 %v7664_v40, %v7663_v50  ;;  %v7666_v10 = vpop.f32.mrb[78].mxu0 }
 0x52e   :  { %v7667_v18 = vpop.f32.mrb[79].mxu0 }
 0x52f   :  { %v10106_v35 = vadd.f32 %v7667_v18, %v7666_v10  ;;  %v4148_v18 = vld [vmem:[#allocation3 + $0xda0] sm:$0xff] }
 0x530   :  { %7309 = vmatmul.mubr.msk.bf16.vlgmr.msra.gmra.mrb[180].mxu1 %vm217_vm3, %v9898_v47 }
 0x531   :  { %3661 = vmatprep.mubr.bf16.mxu1 %v8906_v1 }
 0x533   :  { %v3103_v45 = vpop.f32.mrb[200].mxu1  ;;  %v3430_v4 = vpop.f32.mrb[80].mxu0 }
 0x534   :  { %v3104_v25 = vadd.f32 %v10059_v24, %v3103_v45  ;;  %v8102_v13 = vpop.f32.mrb[201].mxu1  ;;  %v8130_v31 = vpop.f32.mrb[81].mxu0 }
 0x535   :  { %v3106_v62 = vpop.f32.mrb[202].mxu1  ;;  %v3433_v9 = vpop.f32.mrb[82].mxu0  ;;  %v4147_v31 = vld [vmem:[#allocation3 + $0xd98] sm:$0xff] }
 0x536   :  { %v3358_v19 = vadd.f32 %v7641_v15, %v3104_v25  ;;  %v3107_v61 = vadd.f32 %v10061_v7, %v3106_v62  ;;  %v8103_v34 = vpop.f32.mrb[203].mxu1  ;;  %v8131_v47 = vpop.f32.mrb[83].mxu0  ;;  %v4138_v15 = vld [vmem:[#allocation3 + $0xd50] sm:$0xff]  ;;  %v4151_v62 = vld [vmem:[#allocation3 + $0xdb8] sm:$0xff] }
 0x537   :  { %4273 = vmatpush1.bf16.msra.mxu0 %v4138_v15  ;;  %v4154_v34 = vld [vmem:[#allocation3 + $0xdd0] sm:$0xff] }
 0x538   :  { %v10113_v22 = vadd.f32 %v3430_v4, %v3358_v19  ;;  %v3361_v44 = vadd.f32 %v7644_v17, %v3107_v61  ;;  %7310 = vmatmul.mubr.msk.bf16.gmra.mrb[184].mxu1 %vm217_vm3, %v9908_v33  ;;  %4274 = vmatprep.subr.bf16.mxu0 %v4142_v16  ;;  %v4153_v16 = vld [vmem:[#allocation3 + $0xdc8] sm:$0xff] }
 0x539   :  { %3671 = vmatprep.mubr.bf16.mxu1 %v8906_v1 }
 0x53a   :  { %v10118_v24 = vadd.f32 %v3433_v9, %v3361_v44 }
 0x53b   :  { %v3111_v23 = vpop.f32.mrb[204].mxu1  ;;  %v3438_v7 = vpop.f32.mrb[84].mxu0  ;;  %4275 = vmatpush1.bf16.msra.mxu0 %v4141_v57 }
 0x53c   :  { %v3112_v54 = vadd.f32 %v10066_v63, %v3111_v23  ;;  %v8106_v12 = vpop.f32.mrb[205].mxu1  ;;  %v8134_v29 = vpop.f32.mrb[85].mxu0  ;;  %4276 = vmatprep.subr.bf16.mxu0 %v4145_v14 }
 0x53d   :  { %v3114_v3 = vpop.f32.mrb[206].mxu1  ;;  %v3441_v56 = vpop.f32.mrb[86].mxu0 }
 0x53e   :  { %v3366_v17 = vadd.f32 %v10086_v59, %v3112_v54  ;;  %v3115_v33 = vadd.f32 %v10068_v38, %v3114_v3  ;;  %v8107_v2 = vpop.f32.mrb[207].mxu1  ;;  %v8135_v8 = vpop.f32.mrb[87].mxu0  ;;  %v4144_v59 = vld [vmem:[#allocation3 + $0xd80] sm:$0xff] }
 0x53f   :  { %4277 = vmatpush1.bf16.msra.mxu0 %v4144_v59 }
 0x540   :  { %v10123_v50 = vadd.f32 %v3438_v7, %v3366_v17  ;;  %v3369_v40 = vadd.f32 %v10088_v46, %v3115_v33  ;;  %7311 = vmatmul.mubr.msk.bf16.gmra.mrb[188].mxu1 %vm217_vm3, %v9922_v11  ;;  %4278 = vmatprep.subr.bf16.mxu0 %v4148_v18 }
 0x541   :  { %3681 = vmatprep.mubr.bf16.mxu1 %v8906_v1 }
 0x542   :  { %v10129_v63 = vadd.f32 %v3441_v56, %v3369_v40 }
 0x543   :  { %v3119_v38 = vpop.f32.mrb[208].mxu1  ;;  %v3446_v10 = vpop.f32.mrb[88].mxu0  ;;  %4279 = vmatpush1.bf16.msra.mxu0 %v4147_v31 }
 0x544   :  { %v3120_v45 = vadd.f32 %v10070_v37, %v3119_v38  ;;  %v8110_v4 = vpop.f32.mrb[209].mxu1  ;;  %v8138_v5 = vpop.f32.mrb[89].mxu0  ;;  %4280 = vmatprep.subr.bf16.mxu0 %v4151_v62 }
 0x545   :  { %v3122_v48 = vpop.f32.mrb[210].mxu1  ;;  %v3449_v41 = vpop.f32.mrb[90].mxu0 }
 0x546   :  { %v3374_v46 = vadd.f32 %v10092_v39, %v3120_v45  ;;  %v3123_v11 = vadd.f32 %v10072_v30, %v3122_v48  ;;  %v8111_v25 = vpop.f32.mrb[211].mxu1  ;;  %v8139_v13 = vpop.f32.mrb[91].mxu0  ;;  %v4150_v39 = vld [vmem:[#allocation3 + $0xdb0] sm:$0xff] }
 0x547   :  { %4281 = vmatpush1.bf16.msra.mxu0 %v4150_v39 }
 0x548   :  { %v10134_v9 = vadd.f32 %v3446_v10, %v3374_v46  ;;  %v3377_v19 = vadd.f32 %v10094_v43, %v3123_v11  ;;  %7312 = vmatmul.mubr.msk.bf16.gmra.mrb[192].mxu1 %vm217_vm3, %v9936_v49  ;;  %4282 = vmatprep.subr.bf16.mxu0 %v4154_v34 }
 0x549   :  { %3691 = vmatprep.mubr.bf16.mxu1 %v8906_v1 }
 0x54a   :  { %v10140_v37 = vadd.f32 %v3449_v41, %v3377_v19 }
 0x54b   :  { %v3127_v30 = vpop.f32.mrb[212].mxu1  ;;  %v3454_v61 = vpop.f32.mrb[92].mxu0  ;;  %4283 = vmatpush1.bf16.msra.mxu0 %v4153_v16 }
 0x54c   :  { %v3128_v47 = vadd.f32 %v10074_v52, %v3127_v30  ;;  %v8114_v21 = vpop.f32.mrb[213].mxu1  ;;  %v8142_v27 = vpop.f32.mrb[93].mxu0 }
 0x54d   :  { %v3130_v44 = vpop.f32.mrb[214].mxu1  ;;  %v3457_v15 = vpop.f32.mrb[94].mxu0  ;;  %v4157_v21 = vld [vmem:[#allocation3 + $0xde8] sm:$0xff]  ;;  %v4158_v27 = vld [vmem:[#allocation3 + $0xdf0] sm:$0xff] }
 0x54e   :  { %v3382_v43 = vadd.f32 %v10098_v53, %v3128_v47  ;;  %v3131_v49 = vadd.f32 %v10076_v6, %v3130_v44  ;;  %v8115_v23 = vpop.f32.mrb[215].mxu1  ;;  %v8143_v7 = vpop.f32.mrb[95].mxu0  ;;  %4284 = vmatprep.subr.bf16.mxu0 %v4157_v21  ;;  %7733 = vmatprep.subr.bf16.mxu1 %v4158_v27 }
 0x550   :  { %v10145_v54 = vadd.f32 %v3454_v61, %v3382_v43  ;;  %v3385_v12 = vadd.f32 %v10100_v58, %v3131_v49  ;;  %7313 = vmatmul.mubr.msk.bf16.gmra.mrb[196].mxu1 %vm217_vm3, %v10046_v55  ;;  %v4134_v43 = vld [vmem:[#allocation3 + $0xd30] sm:$0xff] }
 0x551   :  { %7734 = vmatpush3.bf16.msra.mxu1 %v4134_v43  ;;  %v4172_v43 = vld [vmem:[#allocation3 + $0xe60] sm:$0xff] }
 0x552   :  { %v10150_v52 = vadd.f32 %v3457_v15, %v3385_v12  ;;  %v4156_v15 = vld [vmem:[#allocation3 + $0xde0] sm:$0xff] }
 0x553   :  { %v3135_v29 = vpop.f32.mrb[216].mxu1  ;;  %v3462_v3 = vpop.f32.mrb[96].mxu0  ;;  %4285 = vmatpush1.bf16.msra.mxu0 %v4156_v15  ;;  %v4160_v12 = vld [vmem:[#allocation3 + $0xe00] sm:$0xff] }
 0x554   :  { %v3136_v53 = vadd.f32 %v10078_v51, %v3135_v29  ;;  %v8118_v56 = vpop.f32.mrb[217].mxu1  ;;  %v8146_v6 = vpop.f32.mrb[97].mxu0  ;;  %v4161_v29 = vld [vmem:[#allocation3 + $0xe08] sm:$0xff]  ;;  %4286 = vmatprep.subr.bf16.mxu0 %v4160_v12 }
 0x555   :  { %v3138_v17 = vpop.f32.mrb[218].mxu1  ;;  %v3465_v33 = vpop.f32.mrb[98].mxu0  ;;  %7735 = vmatprep.subr.bf16.mxu1 %v4161_v29  ;;  %v10176_v56 = vld [vmem:[#allocation9 + $0x3] sm:$0x7]  ;;  %v4171_v29 = vld [vmem:[#allocation3 + $0xe58] sm:$0xff] }
 0x556   :  { %v3390_v2 = vadd.f32 %v10104_v60, %v3136_v53  ;;  %v3139_v8 = vadd.f32 %v10080_v42, %v3138_v17  ;;  %v8119_v57 = vpop.f32.mrb[219].mxu1  ;;  %v8147_v58 = vpop.f32.mrb[99].mxu0  ;;  %v4137_v53 = vld [vmem:[#allocation3 + $0xd48] sm:$0xff]  ;;  %v4163_v17 = vld [vmem:[#allocation3 + $0xe18] sm:$0xff] }
 0x557   :  { %7736 = vmatpush3.bf16.msra.mxu1 %v4137_v53  ;;  %v4162_v58 = vld [vmem:[#allocation3 + $0xe10] sm:$0xff] }
 0x558   :  { %v10155_v14 = vadd.f32 %v3462_v3, %v3390_v2  ;;  %v3393_v55 = vadd.f32 %v10106_v35, %v3139_v8  ;;  %v4159_v3 = vld [vmem:[#allocation3 + $0xdf8] sm:$0xff]  ;;  %v10180_v8 = vrot.slane %v10176_v56, %v9301_v36 }
 0x559   :  { %4287 = vmatpush1.bf16.msra.mxu0 %v4159_v3  ;;  %v4149_v3 = vld [vmem:[#allocation3 + $0xda8] sm:$0xff] }
 0x55a   :  { %v10158_v40 = vadd.f32 %v3465_v33, %v3393_v55  ;;  %v4164_v33 = vld [vmem:[#allocation3 + $0xe20] sm:$0xff]  ;;  %4288 = vmatprep.subr.bf16.mxu0 %v4163_v17 }
 0x55b   :  { %v7694_v59 = vpop.f32.mrb[100].mxu0  ;;  %7737 = vmatprep.subr.bf16.mxu1 %v4164_v33  ;;  %v4140_v55 = vld [vmem:[#allocation3 + $0xd60] sm:$0xff] }
 0x55c   :  { %v7695_v38 = vpop.f32.mrb[101].mxu0  ;;  %7738 = vmatpush3.bf16.msra.mxu1 %v4140_v55 }
 0x55d   :  { %v7696_v10 = vadd.f32 %v7695_v38, %v7694_v59  ;;  %v7697_v51 = vpop.f32.mrb[102].mxu0  ;;  %4289 = vmatpush1.bf16.msra.mxu0 %v4162_v58  ;;  %v4152_v58 = vld [vmem:[#allocation3 + $0xdc0] sm:$0xff] }
 0x55e   :  { %v7698_v18 = vpop.f32.mrb[103].mxu0 }
 0x55f   :  { %v7699_v45 = vadd.f32 %v7698_v18, %v7697_v51 }
 0x563   :  { %v7700_v4 = vpop.f32.mrb[104].mxu0 }
 0x564   :  { %v7701_v5 = vpop.f32.mrb[105].mxu0 }
 0x565   :  { %v10160_v48 = vadd.f32 %v7701_v5, %v7700_v4  ;;  %v7703_v60 = vpop.f32.mrb[106].mxu0  ;;  %v4166_v4 = vld [vmem:[#allocation3 + $0xe30] sm:$0xff]  ;;  %v4167_v5 = vld [vmem:[#allocation3 + $0xe38] sm:$0xff] }
 0x566   :  { %v7704_v42 = vpop.f32.mrb[107].mxu0  ;;  %4290 = vmatprep.subr.bf16.mxu0 %v4166_v4  ;;  %7739 = vmatprep.subr.bf16.mxu1 %v4167_v5  ;;  %v4178_v4 = vld [vmem:[#allocation3 + $0xe90] sm:$0xff]  ;;  %v4179_v5 = vld [vmem:[#allocation3 + $0xe98] sm:$0xff] }
 0x567   :  { %v10162_v41 = vadd.f32 %v7704_v42, %v7703_v60  ;;  %v4165_v42 = vld [vmem:[#allocation3 + $0xe28] sm:$0xff] }
 0x568   :  { %4291 = vmatpush1.bf16.msra.mxu0 %v4165_v42  ;;  %v4177_v42 = vld [vmem:[#allocation3 + $0xe88] sm:$0xff] }
 0x56b   :  { %v7706_v46 = vpop.f32.mrb[108].mxu0 }
 0x56c   :  { %v7707_v11 = vpop.f32.mrb[109].mxu0 }
 0x56d   :  { %v10164_v25 = vadd.f32 %v7707_v11, %v7706_v46  ;;  %v7709_v35 = vpop.f32.mrb[110].mxu0  ;;  %v4143_v46 = vld [vmem:[#allocation3 + $0xd78] sm:$0xff] }
 0x56e   :  { %v7710_v13 = vpop.f32.mrb[111].mxu0  ;;  %7740 = vmatpush3.bf16.msra.mxu1 %v4143_v46  ;;  %v4155_v46 = vld [vmem:[#allocation3 + $0xdd8] sm:$0xff] }
 0x56f   :  { %v10166_v31 = vadd.f32 %v7710_v13, %v7709_v35  ;;  %v4169_v13 = vld [vmem:[#allocation3 + $0xe48] sm:$0xff] }
 0x570   :  { %4292 = vmatprep.subr.bf16.mxu0 %v4169_v13 }
 0x573   :  { %v7712_v62 = vpop.f32.mrb[112].mxu0 }
 0x574   :  { %v7713_v19 = vpop.f32.mrb[113].mxu0 }
 0x575   :  { %v10168_v39 = vadd.f32 %v7713_v19, %v7712_v62  ;;  %v7715_v30 = vpop.f32.mrb[114].mxu0  ;;  %v4170_v62 = vld [vmem:[#allocation3 + $0xe50] sm:$0xff] }
 0x576   :  { %v7716_v61 = vpop.f32.mrb[115].mxu0  ;;  %7741 = vmatprep.subr.bf16.mxu1 %v4170_v62 }
 0x577   :  { %v10170_v34 = vadd.f32 %v7716_v61, %v7715_v30  ;;  %v4168_v61 = vld [vmem:[#allocation3 + $0xe40] sm:$0xff] }
 0x578   :  { %4293 = vmatpush1.bf16.msra.mxu0 %v4168_v61 }
 0x579   :  { %4294 = vmatprep.subr.bf16.mxu0 %v4172_v43 }
 0x57b   :  { %v7718_v47 = vpop.f32.mrb[116].mxu0 }
 0x57c   :  { %v7719_v44 = vpop.f32.mrb[117].mxu0  ;;  %4295 = vmatpush1.bf16.msra.mxu0 %v4171_v29 }
 0x57d   :  { %v10172_v49 = vadd.f32 %v7719_v44, %v7718_v47  ;;  %v7721_v23 = vpop.f32.mrb[118].mxu0 }
 0x57e   :  { %v7722_v7 = vpop.f32.mrb[119].mxu0 }
 0x57f   :  { %v10174_v16 = vadd.f32 %v7722_v7, %v7721_v23  ;;  %v4173_v23 = vld [vmem:[#allocation3 + $0xe68] sm:$0xff] }
 0x583   :  { %v3809_v6 = vpop.f32.mrb[120].mxu0 }
 0x584   :  { %v3810_v2 = vadd.f32 %v7696_v10, %v3809_v6  ;;  %v8158_v57 = vpop.f32.mrb[121].mxu0  ;;  %v4176_v6 = vld [vmem:[#allocation3 + $0xe80] sm:$0xff] }
 0x585   :  { %v3812_v59 = vpop.f32.mrb[122].mxu0 }
 0x586   :  { %v3850_v38 = vadd.f32 %v3810_v2, %v10113_v22  ;;  %v3813_v51 = vadd.f32 %v7699_v45, %v3812_v59  ;;  %v8159_v18 = vpop.f32.mrb[123].mxu0 }
 0x588   :  { %v3898_v10 = vadd.f32 %v10180_v8, %v3850_v38  ;;  %v3853_v60 = vadd.f32 %v3813_v51, %v10118_v24  ;;  %v4146_v24 = vld [vmem:[#allocation3 + $0xd90] sm:$0xff] }
 0x589   :  { %7742 = vmatpush3.bf16.msra.mxu1 %v4146_v24 }
 0x58a   :  { %v3901_v11 = vadd.f32 %v10180_v8, %v3853_v60  ;;  %v3928_v22 = vmax.f32 %v3898_v10, 0.0  ;;  %7743 = vmatprep.subr.bf16.mxu1 %v4173_v23 }
 0x58b   :  { %v3817_v35 = vpop.f32.mrb[124].mxu0 }
 0x58c   :  { %v3931_v45 = vmax.f32 %v3901_v11, 0.0  ;;  %v3818_v19 = vadd.f32 %v10160_v48, %v3817_v35  ;;  %v8162_v30 = vpop.f32.mrb[125].mxu0 }
 0x58d   :  { %v3820_v47 = vpop.f32.mrb[126].mxu0  ;;  %7744 = vmatpush3.bf16.msra.mxu1 %v4149_v3  ;;  %v4181_v3 = vld [vmem:[#allocation3 + $0xea8] sm:$0xff] }
 0x58e   :  { %v3958_v21 = vpack.c.bf16 %v3931_v45, %v3928_v22  ;;  %v3856_v27 = vadd.f32 %v3818_v19, %v10123_v50  ;;  %v3821_v44 = vadd.f32 %v10162_v41, %v3820_v47  ;;  %v8163_v15 = vpop.f32.mrb[127].mxu0  ;;  %v4175_v41 = vld [vmem:[#allocation3 + $0xe78] sm:$0xff]  ;;  %7745 = vmatprep.subr.bf16.mxu1 %v4176_v6 }
 0x58f   :  { %4296 = vmatprep.subr.bf16.mxu0 %v4175_v41 }
 0x590   :  { %v3988_v7 = vrot.slane %v3958_v21, 4  ;;  %v3904_v12 = vadd.f32 %v10180_v8, %v3856_v27  ;;  %v3859_v48 = vadd.f32 %v3821_v44, %v10129_v63  ;;  %v4174_v63 = vld [vmem:[#allocation3 + $0xe70] sm:$0xff] }
 0x591   :  { %4297 = vmatpush1.bf16.msra.mxu0 %v4174_v63  ;;  %7746 = vmatpush3.bf16.msra.mxu1 %v4152_v58 }
 0x592   :  { %4033 = vst.msk [vmem:[#allocation2 + $0x10] sm:$0xf0] %vm1152_vm4, %v3988_v7  ;;  %v3907_v50 = vadd.f32 %v10180_v8, %v3859_v48  ;;  %v3934_v17 = vmax.f32 %v3904_v12, 0.0  ;;  %4298 = vmatprep.subr.bf16.mxu0 %v4178_v4  ;;  %7747 = vmatprep.subr.bf16.mxu1 %v4179_v5 }
 0x593   :  { %v3825_v53 = vpop.f32.mrb[128].mxu0 }
 0x594   :  { %v3937_v33 = vmax.f32 %v3907_v50, 0.0  ;;  %v3826_v2 = vadd.f32 %v10164_v25, %v3825_v53  ;;  %v8166_v57 = vpop.f32.mrb[129].mxu0 }
 0x595   :  { %v3828_v55 = vpop.f32.mrb[130].mxu0  ;;  %4299 = vmatpush1.bf16.msra.mxu0 %v4177_v42  ;;  %7748 = vmatpush3.bf16.msra.mxu1 %v4155_v46  ;;  %v10226_v57 = vrot.slane %v10176_v56, %v9296_v32 }
 0x596   :  { %v3961_v59 = vpack.c.bf16 %v3937_v33, %v3934_v17  ;;  %v3862_v38 = vadd.f32 %v3826_v2, %v10134_v9  ;;  %v3829_v51 = vadd.f32 %v10166_v31, %v3828_v55  ;;  %v8167_v18 = vpop.f32.mrb[131].mxu0  ;;  %4351 = vmatprep.subr.bf16.mxu0 %v4181_v3 }
 0x598   :  { %v3993_v10 = vrot.slane %v3961_v59, 4  ;;  %v3910_v60 = vadd.f32 %v10180_v8, %v3862_v38  ;;  %v3865_v25 = vadd.f32 %v3829_v51, %v10140_v37 }
 0x59a   :  { %v3994_v11 = vsel %vm1104_vm5, %v3988_v7, %v3993_v10  ;;  %v3913_v9 = vadd.f32 %v10180_v8, %v3865_v25  ;;  %v3940_v35 = vmax.f32 %v3910_v60, 0.0  ;;  %v4091_v7 = vld [vmem:[#allocation3 + $0xc10] sm:$0xff] }
 0x59b   :  { %4036 = vst.msk [vmem:[#allocation2 + $0x28] sm:$0xff] %vm217_vm3, %v3994_v11  ;;  %v3833_v31 = vpop.f32.mrb[132].mxu0  ;;  %7788 = vmatprep.subr.bf16.mxu1 %v4091_v7 }
 0x59c   :  { %v3943_v13 = vmax.f32 %v3913_v9, 0.0  ;;  %v3834_v62 = vadd.f32 %v10168_v39, %v3833_v31  ;;  %v8170_v22 = vpop.f32.mrb[133].mxu0 }
 0x59d   :  { %v3836_v45 = vpop.f32.mrb[134].mxu0 }
 0x59e   :  { %v3964_v37 = vpack.c.bf16 %v3943_v13, %v3940_v35  ;;  %v3868_v19 = vadd.f32 %v3834_v62, %v10145_v54  ;;  %v3837_v30 = vadd.f32 %v10170_v34, %v3836_v45  ;;  %v8171_v61 = vpop.f32.mrb[135].mxu0 }
 0x5a0   :  { %v3999_v24 = vrot.slane %v3964_v37, 4  ;;  %v3916_v47 = vadd.f32 %v10180_v8, %v3868_v19  ;;  %v3871_v21 = vadd.f32 %v3837_v30, %v10150_v52 }
 0x5a2   :  { %v4000_v27 = vsel %vm1104_vm5, %v3993_v10, %v3999_v24  ;;  %v3919_v44 = vadd.f32 %v10180_v8, %v3871_v21  ;;  %v3946_v15 = vmax.f32 %v3916_v47, 0.0 }
 0x5a3   :  { %4039 = vst.msk [vmem:[#allocation2 + $0x40] sm:$0xff] %vm217_vm3, %v4000_v27  ;;  %v3841_v39 = vpop.f32.mrb[136].mxu0 }
 0x5a4   :  { %v3949_v43 = vmax.f32 %v3919_v44, 0.0  ;;  %v3842_v23 = vadd.f32 %v10172_v49, %v3841_v39  ;;  %v8174_v54 = vpop.f32.mrb[137].mxu0 }
 0x5a5   :  { %v3844_v34 = vpop.f32.mrb[138].mxu0 }
 0x5a6   :  { %v3967_v12 = vpack.c.bf16 %v3949_v43, %v3946_v15  ;;  %v3874_v48 = vadd.f32 %v3842_v23, %v10155_v14  ;;  %v3845_v52 = vadd.f32 %v10174_v16, %v3844_v34  ;;  %v8175_v29 = vpop.f32.mrb[139].mxu0 }
 0x5a8   :  { %v4005_v50 = vrot.slane %v3967_v12, 4  ;;  %v3922_v53 = vadd.f32 %v10180_v8, %v3874_v48  ;;  %v3877_v41 = vadd.f32 %v3845_v52, %v10158_v40  ;;  %v10222_v40 = vrot.slane %v10176_v56, %v9291_v28 }
 0x5aa   :  { %v4006_v6 = vsel %vm1104_vm5, %v3999_v24, %v4005_v50  ;;  %v3925_v49 = vadd.f32 %v10180_v8, %v3877_v41  ;;  %v3952_v17 = vmax.f32 %v3922_v53, 0.0 }
 0x5ab   :  { %4042 = vst.msk [vmem:[#allocation2 + $0x58] sm:$0xff] %vm217_vm3, %v4006_v6 }
 0x5ac   :  { %v3955_v33 = vmax.f32 %v3925_v49, 0.0 }
 0x5ae   :  { %v3970_v2 = vpack.c.bf16 %v3955_v33, %v3952_v17 }
 0x5b0   :  { %v4011_v14 = vrot.slane %v3970_v2, 4 }
 0x5b2   :  { %v4012_v16 = vsel %vm1104_vm5, %v4005_v50, %v4011_v14  ;;  %4048 = vst.msk [vmem:[#allocation2 + $0x88] sm:$0xf] %vm1168_vm6, %v4011_v14 }
 0x5b3   :  { %4045 = vst.msk [vmem:[#allocation2 + $0x70] sm:$0xff] %vm217_vm3, %v4012_v16  ;;  %v4180_v16 = vld [vmem:[#allocation3 + $0xea0] sm:$0xff] }
 0x603   :  { %v3653_v8 = vpop.f32.mrb[180].mxu1 }
 0x604   :  { %v3896_v63 = vadd.f32 %v10222_v40, %v3653_v8  ;;  %v3655_v58 = vpop.f32.mrb[181].mxu1  ;;  %v4067_v8 = vld [vmem:[#allocation3 + $0xb50] sm:$0xff] }
 0x605   :  { %v3897_v55 = vadd.f32 %v10226_v57, %v3655_v58  ;;  %v3657_v59 = vpop.f32.mrb[182].mxu1 }
 0x606   :  { %v3899_v38 = vadd.f32 %v10222_v40, %v3657_v59  ;;  %v3659_v51 = vpop.f32.mrb[183].mxu1  ;;  %v3926_v4 = vmax.f32 %v3896_v63, 0.0  ;;  %v4184_v59 = vld [vmem:[#allocation3 + $0xec0] sm:$0xff] }
 0x607   :  { %v3900_v18 = vadd.f32 %v10226_v57, %v3659_v51  ;;  %v3927_v10 = vmax.f32 %v3897_v55, 0.0 }
 0x608   :  { %v3929_v5 = vmax.f32 %v3899_v38, 0.0  ;;  %v4094_v38 = vld [vmem:[#allocation3 + $0xc28] sm:$0xff] }
 0x609   :  { %v3930_v60 = vmax.f32 %v3900_v18, 0.0 }
 0x60a   :  { %v3956_v25 = vpack.c.bf16 %v3929_v5, %v3926_v4 }
 0x60b   :  { %v3957_v42 = vpack.c.bf16 %v3930_v60, %v3927_v10  ;;  %v3663_v56 = vpop.f32.mrb[184].mxu1 }
 0x60c   :  { %v3986_v46 = vrot.slane %v3956_v25, 4  ;;  %v3902_v11 = vadd.f32 %v10222_v40, %v3663_v56  ;;  %v3665_v9 = vpop.f32.mrb[185].mxu1 }
 0x60d   :  { %v3987_v31 = vrot.slane %v3957_v42, 4  ;;  %v3903_v35 = vadd.f32 %v10226_v57, %v3665_v9  ;;  %v3667_v13 = vpop.f32.mrb[186].mxu1 }
 0x60e   :  { %4031 = vst [vmem:[#allocation2] sm:$0xf0] %v3986_v46  ;;  %v3905_v62 = vadd.f32 %v10222_v40, %v3667_v13  ;;  %v3669_v22 = vpop.f32.mrb[187].mxu1  ;;  %v3932_v37 = vmax.f32 %v3902_v11, 0.0  ;;  %v4070_v11 = vld [vmem:[#allocation3 + $0xb68] sm:$0xff]  ;;  %v4097_v13 = vld [vmem:[#allocation3 + $0xc40] sm:$0xff] }
 0x60f   :  { %4032 = vst [vmem:[#allocation2 + $0x8] sm:$0xf0] %v3987_v31  ;;  %v3906_v45 = vadd.f32 %v10226_v57, %v3669_v22  ;;  %v3933_v30 = vmax.f32 %v3903_v35, 0.0 }
 0x610   :  { %v3935_v19 = vmax.f32 %v3905_v62, 0.0  ;;  %v4187_v62 = vld [vmem:[#allocation3 + $0xed8] sm:$0xff] }
 0x611   :  { %v3936_v61 = vmax.f32 %v3906_v45, 0.0 }
 0x612   :  { %v3959_v24 = vpack.c.bf16 %v3935_v19, %v3932_v37 }
 0x613   :  { %v3960_v47 = vpack.c.bf16 %v3936_v61, %v3933_v30  ;;  %v3673_v21 = vpop.f32.mrb[188].mxu1 }
 0x614   :  { %v3989_v27 = vrot.slane %v3959_v24, 4  ;;  %v3908_v44 = vadd.f32 %v10222_v40, %v3673_v21  ;;  %v3675_v39 = vpop.f32.mrb[189].mxu1  ;;  %v4186_v21 = vld [vmem:[#allocation3 + $0xed0] sm:$0xff] }
 0x615   :  { %v3991_v15 = vrot.slane %v3960_v47, 4  ;;  %v3909_v43 = vadd.f32 %v10226_v57, %v3675_v39  ;;  %v3677_v23 = vpop.f32.mrb[190].mxu1  ;;  %v4125_v54 = vld [vmem:[#allocation2] sm:$0xf0]  ;;  %v4073_v47 = vld [vmem:[#allocation3 + $0xb80] sm:$0xff] }
 0x616   :  { %v10239_v7 = vsel %vm1104_vm5, %v3986_v46, %v3989_v27  ;;  %v3911_v34 = vadd.f32 %v10222_v40, %v3677_v23  ;;  %v3679_v12 = vpop.f32.mrb[191].mxu1  ;;  %v4126_v48 = vld [vmem:[#allocation2 + $0x8] sm:$0xf0]  ;;  %v4210_v50 = vrot.slane %v4125_v54, 4  ;;  %v3938_v53 = vmax.f32 %v3908_v44, 0.0 }
 0x617   :  { %v10243_v52 = vsel %vm1104_vm5, %v3987_v31, %v3991_v15  ;;  %v3912_v29 = vadd.f32 %v10226_v57, %v3679_v12  ;;  %v4213_v3 = vrot.slane %v4126_v48, 4  ;;  %v4211_v49 = vrot.slane %v10239_v7, 4  ;;  %v4183_v46 = vld [vmem:[#allocation3 + $0xeb8] sm:$0xff] }
 0x618   :  { %v3941_v41 = vmax.f32 %v3911_v34, 0.0  ;;  %v4214_v6 = vrot.slane %v10243_v52, 4  ;;  %v3939_v17 = vmax.f32 %v3909_v43, 0.0  ;;  %v4190_v43 = vld [vmem:[#allocation3 + $0xef0] sm:$0xff] }
 0x619   :  { %v3942_v33 = vmax.f32 %v3912_v29, 0.0  ;;  %v4212_v55 = vsel %vm1104_vm5, %v4210_v50, %v4211_v49 }
 0x61a   :  { %v10248_v2 = vpack.c.bf16 %v3941_v41, %v3938_v53  ;;  %v4215_v14 = vsel %vm1104_vm5, %v4213_v3, %v4214_v6  ;;  %v4076_v41 = vld [vmem:[#allocation3 + $0xb98] sm:$0xff] }
 0x61b   :  { %v10251_v63 = vpack.c.bf16 %v3942_v33, %v3939_v17  ;;  %v3683_v58 = vpop.f32.mrb[192].mxu1  ;;  %4300 = vmatprep.mubr.bf16.mxu0 %v4215_v14  ;;  %4466 = vmatprep.mubr.bf16.mxu1 %v4215_v14 }
 0x61c   :  { %v3995_v51 = vrot.slane %v10248_v2, 4  ;;  %v3914_v18 = vadd.f32 %v10222_v40, %v3683_v58  ;;  %v3685_v4 = vpop.f32.mrb[193].mxu1  ;;  %4301 = vmatmul.mubr.bf16.vlgmr.msra.gmra.mrb[140].mxu0 %v4212_v55  ;;  %4467 = vmatmul.mubr.bf16.vlgmr.msra.gmra.mrb[220].mxu1 %v4212_v55  ;;  %v4103_v2 = vld [vmem:[#allocation3 + $0xc70] sm:$0xff] }
 0x61d   :  { %v3997_v5 = vrot.slane %v10251_v63, 4  ;;  %v3915_v10 = vadd.f32 %v10226_v57, %v3685_v4  ;;  %v3687_v60 = vpop.f32.mrb[194].mxu1  ;;  %4352 = vmatpush1.bf16.msra.mxu0 %v4180_v16  ;;  %7789 = vmatpush3.bf16.msra.mxu1 %v4067_v8 }
 0x61e   :  { %v10259_v25 = vsel %vm1104_vm5, %v3989_v27, %v3995_v51  ;;  %v3917_v42 = vadd.f32 %v10222_v40, %v3687_v60  ;;  %v3689_v56 = vpop.f32.mrb[195].mxu1  ;;  %4353 = vmatprep.subr.bf16.mxu0 %v4184_v59  ;;  %7790 = vmatprep.subr.bf16.mxu1 %v4094_v38  ;;  %v3944_v22 = vmax.f32 %v3914_v18, 0.0  ;;  %v4079_v59 = vld [vmem:[#allocation3 + $0xbb0] sm:$0xff] }
 0x61f   :  { %v10263_v9 = vsel %vm1104_vm5, %v3991_v15, %v3997_v5  ;;  %v3918_v31 = vadd.f32 %v10226_v57, %v3689_v56  ;;  %v4219_v35 = vrot.slane %v10259_v25, 4  ;;  %v3945_v19 = vmax.f32 %v3915_v10, 0.0  ;;  %v4100_v15 = vld [vmem:[#allocation3 + $0xc58] sm:$0xff]  ;;  %v4082_v10 = vld [vmem:[#allocation3 + $0xbc8] sm:$0xff]  ;;  %v4109_v56 = vld [vmem:[#allocation3 + $0xca0] sm:$0xff] }
 0x620   :  { %v3947_v45 = vmax.f32 %v3917_v42, 0.0  ;;  %v4221_v37 = vrot.slane %v10263_v9, 4 }
 0x621   :  { %v3948_v30 = vmax.f32 %v3918_v31, 0.0  ;;  %4354 = vmatpush1.bf16.msra.mxu0 %v4183_v46  ;;  %7791 = vmatpush3.bf16.msra.mxu1 %v4070_v11  ;;  %v4220_v39 = vsel %vm1104_vm5, %v4211_v49, %v4219_v35  ;;  %v4085_v31 = vld [vmem:[#allocation3 + $0xbe0] sm:$0xff] }
 0x622   :  { %v3965_v61 = vpack.c.bf16 %v3947_v45, %v3944_v22  ;;  %v4222_v24 = vsel %vm1104_vm5, %v4214_v6, %v4221_v37  ;;  %7792 = vmatprep.subr.bf16.mxu1 %v4097_v13  ;;  %4355 = vmatprep.subr.bf16.mxu0 %v4187_v62  ;;  %v4189_v6 = vld [vmem:[#allocation3 + $0xee8] sm:$0xff]  ;;  %v4112_v13 = vld [vmem:[#allocation3 + $0xcb8] sm:$0xff] }
 0x623   :  { %v3966_v27 = vpack.c.bf16 %v3948_v30, %v3945_v19  ;;  %v3693_v44 = vpop.f32.mrb[196].mxu1  ;;  %4310 = vmatprep.mubr.bf16.mxu0 %v4222_v24  ;;  %4474 = vmatprep.mubr.bf16.mxu1 %v4222_v24  ;;  %v4088_v45 = vld [vmem:[#allocation3 + $0xbf8] sm:$0xff] }
 0x624   :  { %v4001_v23 = vrot.slane %v3965_v61, 4  ;;  %v3920_v54 = vadd.f32 %v10222_v40, %v3693_v44  ;;  %v3695_v34 = vpop.f32.mrb[197].mxu1  ;;  %4311 = vmatmul.mubr.bf16.gmra.mrb[144].mxu0 %v4220_v39  ;;  %4475 = vmatmul.mubr.bf16.gmra.mrb[224].mxu1 %v4220_v39  ;;  %v10298_v24 = vld [vmem:[#allocation2 + $0x8] sm:$0xff]  ;;  %v4182_v39 = vld [vmem:[#allocation3 + $0xeb0] sm:$0xff] }
 0x625   :  { %v4003_v12 = vrot.slane %v3966_v27, 4  ;;  %v3921_v48 = vadd.f32 %v10226_v57, %v3695_v34  ;;  %v3697_v29 = vpop.f32.mrb[198].mxu1  ;;  %7793 = vmatpush3.bf16.msra.mxu1 %v4073_v47  ;;  %4356 = vmatpush1.bf16.msra.mxu0 %v4186_v21  ;;  %v10300_v47 = vld [vmem:[#allocation2 + $0x28] sm:$0xff]  ;;  %v4127_v21 = vld [vmem:[#allocation2 + $0x10] sm:$0xf0]  ;;  %v4185_v34 = vld [vmem:[#allocation3 + $0xec8] sm:$0xff] }
 0x626   :  { %v10273_v3 = vsel %vm1104_vm5, %v3995_v51, %v4001_v23  ;;  %v3923_v50 = vadd.f32 %v10222_v40, %v3697_v29  ;;  %v3699_v53 = vpop.f32.mrb[199].mxu1  ;;  %7794 = vmatprep.subr.bf16.mxu1 %v4100_v15  ;;  %4357 = vmatprep.subr.bf16.mxu0 %v4190_v43  ;;  %v3950_v14 = vmax.f32 %v3920_v54, 0.0  ;;  %v4106_v51 = vld [vmem:[#allocation3 + $0xc88] sm:$0xff]  ;;  %v4217_v27 = vrot.slane %v10300_v47, 4  ;;  %v10306_v43 = vld [vmem:[#allocation2] sm:$0xff] }
 0x627   :  { %v10277_v49 = vsel %vm1104_vm5, %v3997_v5, %v4003_v12  ;;  %v3924_v17 = vadd.f32 %v10226_v57, %v3699_v53  ;;  %v4225_v33 = vrot.slane %v10273_v3, 4  ;;  %v3951_v63 = vmax.f32 %v3921_v48, 0.0  ;;  %v4115_v54 = vld [vmem:[#allocation3 + $0xcd0] sm:$0xff]  ;;  %v4118_v48 = vld [vmem:[#allocation3 + $0xce8] sm:$0xff] }
 0x628   :  { %v3953_v16 = vmax.f32 %v3923_v50, 0.0  ;;  %v4227_v8 = vrot.slane %v10277_v49, 4  ;;  %v4216_v44 = vrot.slane %v4127_v21, 4  ;;  %v4188_v50 = vld [vmem:[#allocation3 + $0xee0] sm:$0xff]  ;;  %v10324_v53 = vld [vmem:[#allocation2 + $0x58] sm:$0xff]  ;;  %v4925_v21 = vld [vmem:[#allocation3 + $0xf70] sm:$0xff] }
 0x629   :  { %v3954_v58 = vmax.f32 %v3924_v17, 0.0  ;;  %7795 = vmatpush3.bf16.msra.mxu1 %v4076_v41  ;;  %4358 = vmatpush1.bf16.msra.mxu0 %v4189_v6  ;;  %v4226_v57 = vsel %vm1104_vm5, %v4219_v35, %v4225_v33  ;;  %v4121_v41 = vld [vmem:[#allocation3 + $0xd00] sm:$0xff]  ;;  %v4229_v6 = vrot.slane %v10324_v53, 4  ;;  %v4191_v17 = vld [vmem:[#allocation3 + $0xef8] sm:$0xff] }
 0x62a   :  { %v3968_v40 = vpack.c.bf16 %v3953_v16, %v3950_v14  ;;  %v4228_v55 = vsel %vm1104_vm5, %v4221_v37, %v4227_v8  ;;  %7796 = vmatprep.subr.bf16.mxu1 %v4103_v2  ;;  %8176 = vmatprep.subr.bf16.mxu0 %v8905_v0  ;;  %v4218_v15 = vsel %vm1104_vm5, %v4216_v44, %v4217_v27  ;;  %v4066_v2 = vld [vmem:[#allocation3 + $0xb48] sm:$0xff]  ;;  %v4937_v16 = vld [vmem:[#allocation3 + $0xfd0] sm:$0xff] }
 0x62b   :  { %v3969_v38 = vpack.c.bf16 %v3954_v58, %v3951_v63  ;;  %4320 = vmatprep.mubr.bf16.mxu0 %v4228_v55  ;;  %4482 = vmatprep.mubr.bf16.mxu1 %v4228_v55  ;;  %v4952_v44 = vld [vmem:[#allocation3 + $0x1048] sm:$0xff] }
 0x62c   :  { %v4007_v18 = vrot.slane %v3968_v40, 4  ;;  %4321 = vmatmul.mubr.bf16.gmra.mrb[148].mxu0 %v4226_v57  ;;  %4483 = vmatmul.mubr.bf16.gmra.mrb[228].mxu1 %v4226_v57  ;;  %v4130_v40 = vld [vmem:[#allocation2 + $0x88] sm:$0xf]  ;;  %v10361_v57 = vld [vmem:[#allocation2 + $0x10] sm:$0xff] }
 0x62d   :  { %v4009_v4 = vrot.slane %v3969_v38, 4  ;;  %7797 = vmatpush3.bf16.msra.mxu1 %v4079_v59  ;;  %v4241_v55 = vrot.slane %v4130_v40, 4  ;;  %v4065_v38 = vld [vmem:[#allocation3 + $0xb40] sm:$0xff]  ;;  %v4964_v40 = vld [vmem:[#allocation3 + $0x10a8] sm:$0xff] }
 0x62e   :  { %v10286_v5 = vsel %vm1104_vm5, %v4001_v23, %v4007_v18  ;;  %4046 = vst [vmem:[#allocation2 + $0x78] sm:$0xf] %v4007_v18  ;;  %7798 = vmatprep.subr.bf16.mxu1 %v4106_v51  ;;  %v10310_v23 = vld [vmem:[#allocation2 + $0x40] sm:$0xff]  ;;  %v4069_v51 = vld [vmem:[#allocation3 + $0xb60] sm:$0xff] }
 0x62f   :  { %v10289_v60 = vsel %vm1104_vm5, %v4003_v12, %v4009_v4  ;;  %4047 = vst [vmem:[#allocation2 + $0x80] sm:$0xf] %v4009_v4  ;;  %v4231_v42 = vrot.slane %v10286_v5, 4  ;;  %v4223_v12 = vrot.slane %v10310_v23, 4  ;;  %v4913_v18 = vld [vmem:[#allocation3 + $0xf10] sm:$0xff]  ;;  %v4940_v4 = vld [vmem:[#allocation3 + $0xfe8] sm:$0xff] }
 0x630   :  { %v4233_v46 = vrot.slane %v10289_v60, 4 }
 0x631   :  { %7799 = vmatpush3.bf16.msra.mxu1 %v4082_v10  ;;  %v4232_v35 = vsel %vm1104_vm5, %v4225_v33, %v4231_v42  ;;  %v10319_v29 = vsel %vm1104_vm5, %v4217_v27, %v4223_v12  ;;  %v4124_v33 = vld [vmem:[#allocation3 + $0xd18] sm:$0xff]  ;;  %v10333_v14 = vsel %vm1104_vm5, %v4223_v12, %v4229_v6  ;;  %v4086_v12 = vld [vmem:[#allocation3 + $0xbe8] sm:$0xff] }
 0x632   :  { %v4234_v11 = vsel %vm1104_vm5, %v4227_v8, %v4233_v46  ;;  %7800 = vmatprep.subr.bf16.mxu1 %v4109_v56  ;;  %v10338_v8 = vld [vmem:[#allocation2 + $0x70] sm:$0xff]  ;;  %v4068_v10 = vld [vmem:[#allocation3 + $0xb58] sm:$0xff]  ;;  %v4916_v56 = vld [vmem:[#allocation3 + $0xf28] sm:$0xff] }
 0x633   :  { %4330 = vmatprep.mubr.bf16.mxu0 %v4234_v11  ;;  %4490 = vmatprep.mubr.bf16.mxu1 %v4234_v11  ;;  %v4235_v63 = vrot.slane %v10338_v8, 4  ;;  %v4075_v11 = vld [vmem:[#allocation3 + $0xb90] sm:$0xff]  ;;  %v4084_v27 = vld [vmem:[#allocation3 + $0xbd8] sm:$0xff] }
 0x634   :  { %4331 = vmatmul.mubr.bf16.gmra.mrb[152].mxu0 %v4232_v35  ;;  %4491 = vmatmul.mubr.bf16.gmra.mrb[232].mxu1 %v4232_v35  ;;  %v4919_v35 = vld [vmem:[#allocation3 + $0xf40] sm:$0xff] }
 0x635   :  { %v4128_v62 = vld [vmem:[#allocation2 + $0x78] sm:$0xf]  ;;  %7801 = vmatpush3.bf16.msra.mxu1 %v4085_v31  ;;  %v10344_v58 = vsel %vm1104_vm5, %v4229_v6, %v4235_v63  ;;  %v10352_v59 = vsel %vm1104_vm5, %v4235_v63, %v4241_v55  ;;  %v4943_v31 = vld [vmem:[#allocation3 + $0x1000] sm:$0xff]  ;;  %v4961_v63 = vld [vmem:[#allocation3 + $0x1090] sm:$0xff] }
 0x636   :  { %v4129_v22 = vld [vmem:[#allocation2 + $0x80] sm:$0xf]  ;;  %7802 = vmatprep.subr.bf16.mxu1 %v4112_v13  ;;  %v4237_v19 = vrot.slane %v4128_v62, 4  ;;  %v4074_v13 = vld [vmem:[#allocation3 + $0xb88] sm:$0xff]  ;;  %v4946_v62 = vld [vmem:[#allocation3 + $0x1018] sm:$0xff] }
 0x637   :  { %v4239_v37 = vrot.slane %v4129_v22, 4  ;;  %v4078_v22 = vld [vmem:[#allocation3 + $0xba8] sm:$0xff]  ;;  %v4093_v6 = vld [vmem:[#allocation3 + $0xc20] sm:$0xff] }
 0x638   :  { %v4238_v61 = vsel %vm1104_vm5, %v4231_v42, %v4237_v19  ;;  %v4072_v42 = vld [vmem:[#allocation3 + $0xb78] sm:$0xff]  ;;  %v4081_v19 = vld [vmem:[#allocation3 + $0xbc0] sm:$0xff] }
 0x639   :  { %v4240_v30 = vsel %vm1104_vm5, %v4233_v46, %v4239_v37  ;;  %7803 = vmatpush3.bf16.msra.mxu1 %v4088_v45  ;;  %v4071_v46 = vld [vmem:[#allocation3 + $0xb70] sm:$0xff]  ;;  %v4077_v45 = vld [vmem:[#allocation3 + $0xba0] sm:$0xff]  ;;  %v4922_v37 = vld [vmem:[#allocation3 + $0xf58] sm:$0xff] }
 0x63a   :  { %4340 = vmatprep.mubr.bf16.mxu0 %v4240_v30  ;;  %4498 = vmatprep.mubr.bf16.mxu1 %v4240_v30  ;;  %v4949_v30 = vld [vmem:[#allocation3 + $0x1030] sm:$0xff]  ;;  %v4101_v55 = vld [vmem:[#allocation3 + $0xc60] sm:$0xff] }
 0x63b   :  { %8204 = vmatprep.subr.bf16.mxu1 %v8905_v0 }
 0x63c   :  { %4341 = vmatmul.mubr.bf16.gmra.mrb[156].mxu0 %v4238_v61  ;;  %4499 = vmatmul.mubr.bf16.gmra.mrb[236].mxu1 %v4238_v61  ;;  %v4080_v61 = vld [vmem:[#allocation3 + $0xbb8] sm:$0xff] }
 0x63d   :  { %4793 = vmatprep.mubr.bf16.mxu1 %v10298_v24  ;;  %4383 = vmatprep.mubr.bf16.mxu0 %v8906_v1 }
 0x644   :  { %7319 = vmatmul.mubr.msk.bf16.vlgmr.msra.gmra.mrb[140].mxu0 %vm217_vm3, %v4218_v15  ;;  %4794 = vmatmul.mubr.bf16.vlgmr.msra.gmra.mrb[240].mxu1 %v10306_v43 }
 0x645   :  { %8177 = vmatpush3.bf16.msra.mxu0 %v4182_v39  ;;  %4801 = vmatprep.mubr.bf16.mxu1 %v10243_v52  ;;  %v4083_v39 = vld [vmem:[#allocation3 + $0xbd0] sm:$0xff] }
 0x646   :  { %4393 = vmatprep.mubr.bf16.mxu0 %v8906_v1  ;;  %8178 = vmatprep.subr.bf16.mxu0 %v8905_v0 }
 0x647   :  { %8205 = vmatpush3.bf16.msra.mxu1 %v4115_v54  ;;  %v4087_v54 = vld [vmem:[#allocation3 + $0xbf0] sm:$0xff] }
 0x648   :  { %8206 = vmatprep.subr.bf16.mxu1 %v8905_v0 }
 0x649   :  { %8179 = vmatpush3.bf16.msra.mxu0 %v4185_v34  ;;  %v4955_v34 = vld [vmem:[#allocation3 + $0x1060] sm:$0xff] }
 0x64a   :  { %8180 = vmatprep.subr.bf16.mxu0 %v8905_v0 }
 0x64b   :  { %8207 = vmatpush3.bf16.msra.mxu1 %v4118_v48  ;;  %v4931_v48 = vld [vmem:[#allocation3 + $0xfa0] sm:$0xff] }
 0x64c   :  { %7320 = vmatmul.mubr.msk.bf16.gmra.mrb[144].mxu0 %vm217_vm3, %v10319_v29  ;;  %4802 = vmatmul.mubr.bf16.gmra.mrb[244].mxu1 %v10239_v7 }
 0x64d   :  { %4809 = vmatprep.mubr.bf16.mxu1 %v10263_v9  ;;  %4403 = vmatprep.mubr.bf16.mxu0 %v8906_v1 }
 0x64e   :  { %8181 = vmatpush3.bf16.msra.mxu0 %v4188_v50  ;;  %8208 = vmatprep.subr.bf16.mxu1 %v8905_v0  ;;  %v4958_v50 = vld [vmem:[#allocation3 + $0x1078] sm:$0xff] }
 0x64f   :  { %8182 = vmatprep.subr.bf16.mxu0 %v8905_v0  ;;  %8209 = vmatpush3.bf16.msra.mxu1 %v4121_v41  ;;  %v4089_v41 = vld [vmem:[#allocation3 + $0xc00] sm:$0xff] }
 0x650   :  { %8210 = vmatprep.subr.bf16.mxu1 %v8905_v0 }
 0x652   :  { %8183 = vmatpush3.bf16.msra.mxu0 %v4191_v17  ;;  %v4934_v17 = vld [vmem:[#allocation3 + $0xfb8] sm:$0xff] }
 0x653   :  { %8211 = vmatpush3.bf16.msra.mxu1 %v4124_v33  ;;  %4595 = vmatprep.subr.bf16.mxu0 %v4066_v2  ;;  %v4092_v33 = vld [vmem:[#allocation3 + $0xc18] sm:$0xff] }
 0x654   :  { %7321 = vmatmul.mubr.msk.bf16.gmra.mrb[148].mxu0 %vm217_vm3, %v10333_v14  ;;  %4810 = vmatmul.mubr.bf16.gmra.mrb[248].mxu1 %v10259_v25  ;;  %v4096_v2 = vld [vmem:[#allocation3 + $0xc38] sm:$0xff] }
 0x655   :  { %4817 = vmatprep.mubr.bf16.mxu1 %v10277_v49  ;;  %4413 = vmatprep.mubr.bf16.mxu0 %v8906_v1 }
 0x656   :  { %7843 = vmatprep.subr.bf16.mxu1 %v4937_v16  ;;  %v4099_v16 = vld [vmem:[#allocation3 + $0xc50] sm:$0xff] }
 0x65c   :  { %7322 = vmatmul.mubr.msk.bf16.gmra.mrb[152].mxu0 %vm217_vm3, %v10344_v58  ;;  %4818 = vmatmul.mubr.bf16.gmra.mrb[252].mxu1 %v10273_v3 }
 0x65d   :  { %4825 = vmatprep.mubr.bf16.mxu1 %v10289_v60  ;;  %4423 = vmatprep.mubr.bf16.mxu0 %v8906_v1 }
 0x664   :  { %7323 = vmatmul.mubr.msk.bf16.gmra.mrb[156].mxu0 %vm217_vm3, %v10352_v59  ;;  %4826 = vmatmul.mubr.bf16.gmra.mrb[0].mxu1 %v10286_v5 }
 0x665   :  { %8184 = vmatprep.mubr.msk.bf16.mxu0 %vm8907_vm0, %v8905_v0  ;;  %8212 = vmatprep.mubr.msk.bf16.mxu1 %vm8907_vm0, %v8905_v0 }
 0x66c   :  { %8185 = vmatmul.mubr.msk.bf16.vlgmr.msra.gmra.mrb[160].mxu0 %vm217_vm3, %v4218_v15  ;;  %8213 = vmatmul.mubr.msk.bf16.vlgmr.msra.gmra.mrb[4].mxu1 %vm217_vm3, %v10361_v57  ;;  %v4928_v15 = vld [vmem:[#allocation3 + $0xf88] sm:$0xff] }
 0x66d   :  { %4596 = vmatpush1.bf16.msra.mxu0 %v4065_v38  ;;  %8188 = vmatprep.mubr.msk.bf16.mxu0 %vm8907_vm0, %v8905_v0  ;;  %v4967_v38 = vld [vmem:[#allocation3 + $0x10c0] sm:$0xff] }
 0x66e   :  { %4597 = vmatprep.subr.bf16.mxu0 %v4069_v51  ;;  %8216 = vmatprep.mubr.msk.bf16.mxu1 %vm8907_vm0, %v8905_v0  ;;  %v4104_v51 = vld [vmem:[#allocation3 + $0xc78] sm:$0xff] }
 0x66f   :  { %7844 = vmatpush3.bf16.msra.mxu1 %v4913_v18  ;;  %v4108_v18 = vld [vmem:[#allocation3 + $0xc98] sm:$0xff] }
 0x670   :  { %7845 = vmatprep.subr.bf16.mxu1 %v4940_v4  ;;  %v4970_v4 = vld [vmem:[#allocation3 + $0x10d8] sm:$0xff] }
 0x671   :  { %4598 = vmatpush1.bf16.msra.mxu0 %v4068_v10  ;;  %v4107_v10 = vld [vmem:[#allocation3 + $0xc90] sm:$0xff] }
 0x672   :  { %4599 = vmatprep.subr.bf16.mxu0 %v4072_v42  ;;  %v4111_v42 = vld [vmem:[#allocation3 + $0xcb0] sm:$0xff] }
 0x673   :  { %7846 = vmatpush3.bf16.msra.mxu1 %v4916_v56  ;;  %v4110_v56 = vld [vmem:[#allocation3 + $0xca8] sm:$0xff] }
 0x674   :  { %8189 = vmatmul.mubr.msk.bf16.gmra.mrb[164].mxu0 %vm217_vm3, %v10319_v29  ;;  %8217 = vmatmul.mubr.msk.bf16.gmra.mrb[8].mxu1 %vm217_vm3, %v10300_v47  ;;  %v4090_v29 = vld [vmem:[#allocation3 + $0xc08] sm:$0xff] }
 0x675   :  { %4600 = vmatpush1.bf16.msra.mxu0 %v4071_v46  ;;  %8192 = vmatprep.mubr.msk.bf16.mxu0 %vm8907_vm0, %v8905_v0  ;;  %v4114_v46 = vld [vmem:[#allocation3 + $0xcc8] sm:$0xff] }
 0x676   :  { %4601 = vmatprep.subr.bf16.mxu0 %v4075_v11  ;;  %8220 = vmatprep.mubr.msk.bf16.mxu1 %vm8907_vm0, %v8905_v0  ;;  %v4113_v11 = vld [vmem:[#allocation3 + $0xcc0] sm:$0xff] }
 0x677   :  { %7847 = vmatprep.subr.bf16.mxu1 %v4943_v31  ;;  %v4117_v31 = vld [vmem:[#allocation3 + $0xce0] sm:$0xff] }
 0x678   :  { %7848 = vmatpush3.bf16.msra.mxu1 %v4919_v35  ;;  %v10413_v35 = vld [vmem:[#allocation2 + $0x80] sm:$0xff] }
 0x679   :  { %4602 = vmatpush1.bf16.msra.mxu0 %v4074_v13  ;;  %7849 = vmatprep.subr.bf16.mxu1 %v4946_v62  ;;  %v4116_v13 = vld [vmem:[#allocation3 + $0xcd8] sm:$0xff] }
 0x67a   :  { %4603 = vmatprep.subr.bf16.mxu0 %v4078_v22  ;;  %v4120_v62 = vld [vmem:[#allocation3 + $0xcf8] sm:$0xff]  ;;  %v10416_v22 = vld [vmem:[#allocation2 + $0x78] sm:$0xff] }
 0x67c   :  { %8193 = vmatmul.mubr.msk.bf16.gmra.mrb[168].mxu0 %vm217_vm3, %v10333_v14  ;;  %8221 = vmatmul.mubr.msk.bf16.gmra.mrb[12].mxu1 %vm217_vm3, %v10310_v23  ;;  %v4095_v14 = vld [vmem:[#allocation3 + $0xc30] sm:$0xff] }
 0x67d   :  { %4604 = vmatpush1.bf16.msra.mxu0 %v4077_v45  ;;  %7850 = vmatpush3.bf16.msra.mxu1 %v4922_v37  ;;  %v4119_v45 = vld [vmem:[#allocation3 + $0xcf0] sm:$0xff]  ;;  %v4122_v37 = vld [vmem:[#allocation3 + $0xd08] sm:$0xff] }
 0x67e   :  { %4605 = vmatprep.subr.bf16.mxu0 %v4081_v19  ;;  %8196 = vmatprep.mubr.msk.bf16.mxu0 %vm8907_vm0, %v8905_v0  ;;  %v4912_v19 = vld [vmem:[#allocation3 + $0xf08] sm:$0xff] }
 0x67f   :  { %8224 = vmatprep.mubr.msk.bf16.mxu1 %vm8907_vm0, %v8905_v0  ;;  %7851 = vmatprep.subr.bf16.mxu1 %v4949_v30  ;;  %v4911_v30 = vld [vmem:[#allocation3 + $0xf00] sm:$0xff] }
 0x681   :  { %4606 = vmatpush1.bf16.msra.mxu0 %v4080_v61  ;;  %7852 = vmatpush3.bf16.msra.mxu1 %v4925_v21  ;;  %v4915_v61 = vld [vmem:[#allocation3 + $0xf20] sm:$0xff]  ;;  %v4914_v21 = vld [vmem:[#allocation3 + $0xf18] sm:$0xff] }
 0x682   :  { %4607 = vmatprep.subr.bf16.mxu0 %v4084_v27  ;;  %7853 = vmatprep.subr.bf16.mxu1 %v4952_v44  ;;  %v4918_v27 = vld [vmem:[#allocation3 + $0xf38] sm:$0xff]  ;;  %v4917_v44 = vld [vmem:[#allocation3 + $0xf30] sm:$0xff] }
 0x684   :  { %8197 = vmatmul.mubr.msk.bf16.gmra.mrb[172].mxu0 %vm217_vm3, %v10344_v58  ;;  %8225 = vmatmul.mubr.msk.bf16.gmra.mrb[16].mxu1 %vm217_vm3, %v10324_v53  ;;  %v4102_v58 = vld [vmem:[#allocation3 + $0xc68] sm:$0xff] }
 0x685   :  { %4608 = vmatpush1.bf16.msra.mxu0 %v4083_v39  ;;  %7854 = vmatpush3.bf16.msra.mxu1 %v4928_v15  ;;  %v10448_v39 = vld [vmem:[#allocation2 + $0x88] sm:$0xff]  ;;  %v4921_v15 = vld [vmem:[#allocation3 + $0xf50] sm:$0xff] }
 0x686   :  { %4609 = vmatprep.subr.bf16.mxu0 %v4087_v54  ;;  %8200 = vmatprep.mubr.msk.bf16.mxu0 %vm8907_vm0, %v8905_v0  ;;  %v4924_v54 = vld [vmem:[#allocation3 + $0xf68] sm:$0xff] }
 0x687   :  { %8228 = vmatprep.mubr.msk.bf16.mxu1 %vm8907_vm0, %v8905_v0  ;;  %7855 = vmatprep.subr.bf16.mxu1 %v4955_v34  ;;  %v4927_v34 = vld [vmem:[#allocation3 + $0xf80] sm:$0xff] }
 0x689   :  { %4610 = vmatpush1.bf16.msra.mxu0 %v4086_v12  ;;  %7856 = vmatpush3.bf16.msra.mxu1 %v4931_v48  ;;  %v4926_v12 = vld [vmem:[#allocation3 + $0xf78] sm:$0xff] }
 0x68a   :  { %4611 = vmatprep.subr.bf16.mxu0 %v4090_v29  ;;  %7857 = vmatprep.subr.bf16.mxu1 %v4958_v50  ;;  %v4930_v48 = vld [vmem:[#allocation3 + $0xf98] sm:$0xff]  ;;  %v4929_v29 = vld [vmem:[#allocation3 + $0xf90] sm:$0xff] }
 0x68b   :  { %v4933_v50 = vld [vmem:[#allocation3 + $0xfb0] sm:$0xff] }
 0x68c   :  { %8201 = vmatmul.mubr.msk.bf16.gmra.mrb[176].mxu0 %vm217_vm3, %v10352_v59  ;;  %8229 = vmatmul.mubr.msk.bf16.gmra.mrb[20].mxu1 %vm217_vm3, %v10338_v8  ;;  %v4105_v59 = vld [vmem:[#allocation3 + $0xc80] sm:$0xff] }
 0x68d   :  { %4612 = vmatpush1.bf16.msra.mxu0 %v4089_v41  ;;  %4627 = vmatprep.mubr.bf16.mxu0 %v10298_v24  ;;  %v4098_v24 = vld [vmem:[#allocation3 + $0xc48] sm:$0xff] }
 0x68e   :  { %5172 = vmatprep.mubr.bf16.mxu1 %v10243_v52  ;;  %4613 = vmatprep.subr.bf16.mxu0 %v4093_v6  ;;  %v4932_v41 = vld [vmem:[#allocation3 + $0xfa8] sm:$0xff] }
 0x68f   :  { %7858 = vmatpush3.bf16.msra.mxu1 %v4934_v17  ;;  %v4936_v17 = vld [vmem:[#allocation3 + $0xfc8] sm:$0xff] }
 0x690   :  { %8232 = vmatprep.subr.bf16.mxu1 %v8905_v0 }
 0x691   :  { %4614 = vmatpush1.bf16.msra.mxu0 %v4092_v33 }
 0x692   :  { %4615 = vmatprep.subr.bf16.mxu0 %v4096_v2 }
 0x694   :  { %5173 = vmatmul.mubr.bf16.vlgmr.msra.gmra.mrb[24].mxu1 %v10239_v7 }
 0x695   :  { %4616 = vmatpush1.bf16.msra.mxu0 %v4095_v14  ;;  %5180 = vmatprep.mubr.bf16.mxu1 %v10263_v9 }
 0x696   :  { %4617 = vmatprep.subr.bf16.mxu0 %v4099_v16  ;;  %8233 = vmatpush3.bf16.msra.mxu1 %v4961_v63  ;;  %v4935_v63 = vld [vmem:[#allocation3 + $0xfc0] sm:$0xff] }
 0x697   :  { %8234 = vmatprep.subr.bf16.mxu1 %v8905_v0 }
 0x699   :  { %4618 = vmatpush1.bf16.msra.mxu0 %v4098_v24 }
 0x69a   :  { %4619 = vmatprep.subr.bf16.mxu0 %v4102_v58  ;;  %8235 = vmatpush3.bf16.msra.mxu1 %v4964_v40  ;;  %v4939_v58 = vld [vmem:[#allocation3 + $0xfe0] sm:$0xff]  ;;  %v4938_v40 = vld [vmem:[#allocation3 + $0xfd8] sm:$0xff] }
 0x69b   :  { %8236 = vmatprep.subr.bf16.mxu1 %v8905_v0 }
 0x69c   :  { %5181 = vmatmul.mubr.bf16.gmra.mrb[28].mxu1 %v10259_v25 }
 0x69d   :  { %4620 = vmatpush1.bf16.msra.mxu0 %v4101_v55  ;;  %5188 = vmatprep.mubr.bf16.mxu1 %v10277_v49 }
 0x69e   :  { %4621 = vmatprep.subr.bf16.mxu0 %v4105_v59  ;;  %8237 = vmatpush3.bf16.msra.mxu1 %v4967_v38  ;;  %v4942_v59 = vld [vmem:[#allocation3 + $0xff8] sm:$0xff] }
 0x69f   :  { %8238 = vmatprep.subr.bf16.mxu1 %v8905_v0 }
 0x6a1   :  { %4622 = vmatpush1.bf16.msra.mxu0 %v4104_v51 }
 0x6a2   :  { %4623 = vmatprep.subr.bf16.mxu0 %v4108_v18  ;;  %8239 = vmatpush3.bf16.msra.mxu1 %v4970_v4 }
 0x6a4   :  { %5189 = vmatmul.mubr.bf16.gmra.mrb[32].mxu1 %v10273_v3 }
 0x6a5   :  { %4624 = vmatpush1.bf16.msra.mxu0 %v4107_v10  ;;  %5196 = vmatprep.mubr.bf16.mxu1 %v10289_v60  ;;  %v4941_v10 = vld [vmem:[#allocation3 + $0xff0] sm:$0xff] }
 0x6a6   :  { %4625 = vmatprep.subr.bf16.mxu0 %v4111_v42 }
 0x6a9   :  { %4626 = vmatpush1.bf16.msra.mxu0 %v4110_v56  ;;  %v4945_v56 = vld [vmem:[#allocation3 + $0x1010] sm:$0xff] }
 0x6aa   :  { %4678 = vmatprep.subr.bf16.mxu0 %v4114_v46  ;;  %v4944_v46 = vld [vmem:[#allocation3 + $0x1008] sm:$0xff] }
 0x6ac   :  { %4628 = vmatmul.mubr.bf16.vlgmr.msra.gmra.mrb[140].mxu0 %v10306_v43  ;;  %5197 = vmatmul.mubr.bf16.gmra.mrb[36].mxu1 %v10286_v5  ;;  %v4123_v43 = vld [vmem:[#allocation3 + $0xd10] sm:$0xff] }
 0x6ad   :  { %4637 = vmatprep.mubr.bf16.mxu0 %v10243_v52  ;;  %4679 = vmatpush1.bf16.msra.mxu0 %v4113_v11 }
 0x6ae   :  { %5204 = vmatprep.mubr.bf16.mxu1 %v10413_v35  ;;  %4680 = vmatprep.subr.bf16.mxu0 %v4117_v31 }
 0x6b1   :  { %4681 = vmatpush1.bf16.msra.mxu0 %v4116_v13 }
 0x6b2   :  { %4682 = vmatprep.subr.bf16.mxu0 %v4120_v62 }
 0x6b4   :  { %4638 = vmatmul.mubr.bf16.gmra.mrb[144].mxu0 %v10239_v7  ;;  %5205 = vmatmul.mubr.bf16.gmra.mrb[40].mxu1 %v10416_v22 }
 0x6b5   :  { %4647 = vmatprep.mubr.bf16.mxu0 %v10263_v9  ;;  %8240 = vmatprep.mubr.msk.bf16.mxu1 %vm8907_vm0, %v8905_v0 }
 0x6b6   :  { %4683 = vmatpush1.bf16.msra.mxu0 %v4119_v45 }
 0x6b7   :  { %4684 = vmatprep.subr.bf16.mxu0 %v4123_v43  ;;  %v4947_v43 = vld [vmem:[#allocation3 + $0x1020] sm:$0xff] }
 0x6ba   :  { %4685 = vmatpush1.bf16.msra.mxu0 %v4122_v37 }
 0x6bb   :  { %4974 = vmatprep.subr.bf16.mxu0 %v4912_v19  ;;  %v4951_v19 = vld [vmem:[#allocation3 + $0x1040] sm:$0xff] }
 0x6bc   :  { %4648 = vmatmul.mubr.bf16.gmra.mrb[148].mxu0 %v10259_v25  ;;  %8241 = vmatmul.mubr.msk.bf16.vlgmr.msra.gmra.mrb[44].mxu1 %vm217_vm3, %v10300_v47 }
 0x6bd   :  { %4657 = vmatprep.mubr.bf16.mxu0 %v10277_v49  ;;  %8244 = vmatprep.mubr.msk.bf16.mxu1 %vm8907_vm0, %v8905_v0 }
 0x6c4   :  { %4658 = vmatmul.mubr.bf16.gmra.mrb[152].mxu0 %v10273_v3  ;;  %8245 = vmatmul.mubr.msk.bf16.gmra.mrb[48].mxu1 %vm217_vm3, %v10310_v23 }
 0x6c5   :  { %4667 = vmatprep.mubr.bf16.mxu0 %v10289_v60  ;;  %8248 = vmatprep.mubr.msk.bf16.mxu1 %vm8907_vm0, %v8905_v0 }
 0x6cc   :  { %4668 = vmatmul.mubr.bf16.gmra.mrb[156].mxu0 %v10286_v5  ;;  %8249 = vmatmul.mubr.msk.bf16.gmra.mrb[52].mxu1 %vm217_vm3, %v10324_v53 }
 0x6cd   :  { %4710 = vmatprep.mubr.bf16.mxu0 %v8906_v1  ;;  %8252 = vmatprep.mubr.msk.bf16.mxu1 %vm8907_vm0, %v8905_v0 }
 0x6d4   :  { %7329 = vmatmul.mubr.msk.bf16.vlgmr.msra.gmra.mrb[140].mxu0 %vm217_vm3, %v10361_v57  ;;  %8253 = vmatmul.mubr.msk.bf16.gmra.mrb[56].mxu1 %vm217_vm3, %v10338_v8  ;;  %v4920_v57 = vld [vmem:[#allocation3 + $0xf48] sm:$0xff] }
 0x6d5   :  { %4975 = vmatpush1.bf16.msra.mxu0 %v4911_v30  ;;  %4720 = vmatprep.mubr.bf16.mxu0 %v8906_v1  ;;  %v4950_v30 = vld [vmem:[#allocation3 + $0x1038] sm:$0xff] }
 0x6d6   :  { %4976 = vmatprep.subr.bf16.mxu0 %v4915_v61  ;;  %8256 = vmatprep.mubr.msk.bf16.mxu1 %vm8907_vm0, %v8905_v0  ;;  %v4923_v0 = vld [vmem:[#allocation3 + $0xf60] sm:$0xff] }
 0x6d9   :  { %4977 = vmatpush1.bf16.msra.mxu0 %v4914_v21  ;;  %v4954_v21 = vld [vmem:[#allocation3 + $0x1058] sm:$0xff] }
 0x6da   :  { %4978 = vmatprep.subr.bf16.mxu0 %v4918_v27 }
 0x6dc   :  { %7330 = vmatmul.mubr.msk.bf16.gmra.mrb[144].mxu0 %vm217_vm3, %v10300_v47  ;;  %8257 = vmatmul.mubr.msk.bf16.gmra.mrb[60].mxu1 %vm217_vm3, %v10448_v39 }
 0x6dd   :  { %4979 = vmatpush1.bf16.msra.mxu0 %v4917_v44  ;;  %4730 = vmatprep.mubr.bf16.mxu0 %v8906_v1 }
 0x6de   :  { %4980 = vmatprep.subr.bf16.mxu0 %v4921_v15 }
 0x6e1   :  { %4981 = vmatpush1.bf16.msra.mxu0 %v4920_v57 }
 0x6e2   :  { %4982 = vmatprep.subr.bf16.mxu0 %v4924_v54  ;;  %v4953_v54 = vld [vmem:[#allocation3 + $0x1050] sm:$0xff] }
 0x6e4   :  { %7331 = vmatmul.mubr.msk.bf16.gmra.mrb[148].mxu0 %vm217_vm3, %v10310_v23 }
 0x6e5   :  { %4983 = vmatpush1.bf16.msra.mxu0 %v4923_v0  ;;  %4740 = vmatprep.mubr.bf16.mxu0 %v8906_v1 }
 0x6e6   :  { %4984 = vmatprep.subr.bf16.mxu0 %v4927_v34  ;;  %v4957_v34 = vld [vmem:[#allocation3 + $0x1070] sm:$0xff] }
 0x6e9   :  { %4985 = vmatpush1.bf16.msra.mxu0 %v4926_v12  ;;  %v4956_v12 = vld [vmem:[#allocation3 + $0x1068] sm:$0xff] }
 0x6ea   :  { %4986 = vmatprep.subr.bf16.mxu0 %v4930_v48 }
 0x6ec   :  { %7332 = vmatmul.mubr.msk.bf16.gmra.mrb[152].mxu0 %vm217_vm3, %v10324_v53 }
 0x6ed   :  { %4987 = vmatpush1.bf16.msra.mxu0 %v4929_v29  ;;  %4750 = vmatprep.mubr.bf16.mxu0 %v8906_v1  ;;  %v4960_v29 = vld [vmem:[#allocation3 + $0x1088] sm:$0xff] }
 0x6ee   :  { %4988 = vmatprep.subr.bf16.mxu0 %v4933_v50 }
 0x6ef   :  { %v7749_v6 = vpop.f32.mrb[220].mxu1 }
 0x6f0   :  { %v7750_v33 = vpop.f32.mrb[221].mxu1 }
 0x6f1   :  { %4989 = vmatpush1.bf16.msra.mxu0 %v4932_v41  ;;  %v10461_v2 = vadd.f32 %v7750_v33, %v7749_v6  ;;  %v7752_v14 = vpop.f32.mrb[222].mxu1  ;;  %v4959_v33 = vld [vmem:[#allocation3 + $0x1080] sm:$0xff] }
 0x6f2   :  { %v7753_v16 = vpop.f32.mrb[223].mxu1  ;;  %4990 = vmatprep.subr.bf16.mxu0 %v4936_v17 }
 0x6f3   :  { %v10463_v24 = vadd.f32 %v7753_v16, %v7752_v14  ;;  %v4963_v16 = vld [vmem:[#allocation3 + $0x10a0] sm:$0xff] }
 0x6f4   :  { %7333 = vmatmul.mubr.msk.bf16.gmra.mrb[156].mxu0 %vm217_vm3, %v10338_v8 }
 0x6f5   :  { %4991 = vmatpush1.bf16.msra.mxu0 %v4935_v63  ;;  %5006 = vmatprep.mubr.bf16.mxu0 %v10243_v52  ;;  %v4948_v52 = vld [vmem:[#allocation3 + $0x1028] sm:$0xff]  ;;  %v4962_v63 = vld [vmem:[#allocation3 + $0x1098] sm:$0xff] }
 0x6f6   :  { %4992 = vmatprep.subr.bf16.mxu0 %v4939_v58 }
 0x6f7   :  { %v7755_v55 = vpop.f32.mrb[224].mxu1 }
 0x6f8   :  { %v7756_v38 = vpop.f32.mrb[225].mxu1 }
 0x6f9   :  { %4993 = vmatpush1.bf16.msra.mxu0 %v4938_v40  ;;  %v10468_v51 = vadd.f32 %v7756_v38, %v7755_v55  ;;  %v7758_v18 = vpop.f32.mrb[226].mxu1  ;;  %v4966_v40 = vld [vmem:[#allocation3 + $0x10b8] sm:$0xff] }
 0x6fa   :  { %v7759_v4 = vpop.f32.mrb[227].mxu1  ;;  %4994 = vmatprep.subr.bf16.mxu0 %v4942_v59 }
 0x6fb   :  { %v10470_v42 = vadd.f32 %v7759_v4, %v7758_v18  ;;  %v4965_v4 = vld [vmem:[#allocation3 + $0x10b0] sm:$0xff] }
 0x6fd   :  { %4995 = vmatpush1.bf16.msra.mxu0 %v4941_v10 }
 0x6fe   :  { %4996 = vmatprep.subr.bf16.mxu0 %v4945_v56  ;;  %v4969_v56 = vld [vmem:[#allocation3 + $0x10d0] sm:$0xff] }
 0x6ff   :  { %v7761_v11 = vpop.f32.mrb[228].mxu1 }
 0x700   :  { %v7762_v31 = vpop.f32.mrb[229].mxu1 }
 0x701   :  { %4997 = vmatpush1.bf16.msra.mxu0 %v4944_v46  ;;  %v10472_v13 = vadd.f32 %v7762_v31, %v7761_v11  ;;  %v7764_v62 = vpop.f32.mrb[230].mxu1 }
 0x702   :  { %v7765_v45 = vpop.f32.mrb[231].mxu1  ;;  %4998 = vmatprep.subr.bf16.mxu0 %v4948_v52 }
 0x703   :  { %v10474_v37 = vadd.f32 %v7765_v45, %v7764_v62 }
 0x705   :  { %4999 = vmatpush1.bf16.msra.mxu0 %v4947_v43 }
 0x706   :  { %5000 = vmatprep.subr.bf16.mxu0 %v4951_v19 }
 0x707   :  { %v7767_v61 = vpop.f32.mrb[232].mxu1 }
 0x708   :  { %v7768_v27 = vpop.f32.mrb[233].mxu1 }
 0x709   :  { %5001 = vmatpush1.bf16.msra.mxu0 %v4950_v30  ;;  %v10476_v44 = vadd.f32 %v7768_v27, %v7767_v61  ;;  %v7770_v15 = vpop.f32.mrb[234].mxu1 }
 0x70a   :  { %v7771_v57 = vpop.f32.mrb[235].mxu1  ;;  %5002 = vmatprep.subr.bf16.mxu0 %v4954_v21 }
 0x70b   :  { %v10478_v0 = vadd.f32 %v7771_v57, %v7770_v15 }
 0x70d   :  { %5003 = vmatpush1.bf16.msra.mxu0 %v4953_v54 }
 0x70e   :  { %5004 = vmatprep.subr.bf16.mxu0 %v4957_v34 }
 0x70f   :  { %v7773_v48 = vpop.f32.mrb[236].mxu1 }
 0x710   :  { %v7774_v50 = vpop.f32.mrb[237].mxu1 }
 0x711   :  { %5005 = vmatpush1.bf16.msra.mxu0 %v4956_v12  ;;  %v10480_v41 = vadd.f32 %v7774_v50, %v7773_v48  ;;  %v7776_v6 = vpop.f32.mrb[238].mxu1 }
 0x712   :  { %v7777_v17 = vpop.f32.mrb[239].mxu1  ;;  %5057 = vmatprep.subr.bf16.mxu0 %v4960_v29 }
 0x713   :  { %v10482_v14 = vadd.f32 %v7777_v17, %v7776_v6 }
 0x714   :  { %5007 = vmatmul.mubr.bf16.vlgmr.msra.gmra.mrb[140].mxu0 %v10239_v7  ;;  %v4968_v7 = vld [vmem:[#allocation3 + $0x10c8] sm:$0xff] }
 0x715   :  { %5016 = vmatprep.mubr.bf16.mxu0 %v10263_v9  ;;  %5058 = vmatpush1.bf16.msra.mxu0 %v4959_v33 }
 0x716   :  { %5059 = vmatprep.subr.bf16.mxu0 %v4963_v16 }
 0x717   :  { %v7804_v58 = vpop.f32.mrb[240].mxu1 }
 0x718   :  { %v7805_v55 = vpop.f32.mrb[241].mxu1 }
 0x719   :  { %v7806_v59 = vadd.f32 %v7805_v55, %v7804_v58  ;;  %v7807_v38 = vpop.f32.mrb[242].mxu1  ;;  %5060 = vmatpush1.bf16.msra.mxu0 %v4962_v63 }
 0x71a   :  { %v7808_v18 = vpop.f32.mrb[243].mxu1  ;;  %5061 = vmatprep.subr.bf16.mxu0 %v4966_v40 }
 0x71b   :  { %v7809_v10 = vadd.f32 %v7808_v18, %v7807_v38 }
 0x71c   :  { %5017 = vmatmul.mubr.bf16.gmra.mrb[144].mxu0 %v10259_v25 }
 0x71d   :  { %5026 = vmatprep.mubr.bf16.mxu0 %v10277_v49  ;;  %5062 = vmatpush1.bf16.msra.mxu0 %v4965_v4 }
 0x71e   :  { %5063 = vmatprep.subr.bf16.mxu0 %v4969_v56 }
 0x71f   :  { %v7810_v9 = vpop.f32.mrb[244].mxu1 }
 0x720   :  { %v7811_v46 = vpop.f32.mrb[245].mxu1 }
 0x721   :  { %v7812_v11 = vadd.f32 %v7811_v46, %v7810_v9  ;;  %v7813_v52 = vpop.f32.mrb[246].mxu1  ;;  %5064 = vmatpush1.bf16.msra.mxu0 %v4968_v7 }
 0x722   :  { %v7814_v31 = vpop.f32.mrb[247].mxu1 }
 0x723   :  { %v7815_v62 = vadd.f32 %v7814_v31, %v7813_v52 }
 0x724   :  { %5027 = vmatmul.mubr.bf16.gmra.mrb[148].mxu0 %v10273_v3 }
 0x725   :  { %5036 = vmatprep.mubr.bf16.mxu0 %v10289_v60 }
 0x727   :  { %v7816_v45 = vpop.f32.mrb[248].mxu1 }
 0x728   :  { %v7817_v43 = vpop.f32.mrb[249].mxu1 }
 0x729   :  { %v7818_v19 = vadd.f32 %v7817_v43, %v7816_v45  ;;  %v7819_v25 = vpop.f32.mrb[250].mxu1 }
 0x72a   :  { %v7820_v30 = vpop.f32.mrb[251].mxu1 }
 0x72b   :  { %v10490_v49 = vadd.f32 %v7820_v30, %v7819_v25 }
 0x72c   :  { %5037 = vmatmul.mubr.bf16.gmra.mrb[152].mxu0 %v10286_v5 }
 0x72d   :  { %5046 = vmatprep.mubr.bf16.mxu0 %v10413_v35 }
 0x72f   :  { %v7822_v61 = vpop.f32.mrb[252].mxu1 }
 0x730   :  { %v7823_v21 = vpop.f32.mrb[253].mxu1 }
 0x731   :  { %v10494_v27 = vadd.f32 %v7823_v21, %v7822_v61  ;;  %v7825_v15 = vpop.f32.mrb[254].mxu1 }
 0x732   :  { %v7826_v57 = vpop.f32.mrb[255].mxu1 }
 0x733   :  { %v10496_v3 = vadd.f32 %v7826_v57, %v7825_v15 }
 0x734   :  { %5047 = vmatmul.mubr.bf16.gmra.mrb[156].mxu0 %v10416_v22 }
 0x735   :  { %5089 = vmatprep.mubr.bf16.mxu0 %v8906_v1 }
 0x737   :  { %v7828_v60 = vpop.f32.mrb[0].mxu1 }
 0x738   :  { %v7829_v54 = vpop.f32.mrb[1].mxu1 }
 0x739   :  { %v10500_v34 = vadd.f32 %v7829_v54, %v7828_v60  ;;  %v7831_v12 = vpop.f32.mrb[2].mxu1 }
 0x73a   :  { %v7832_v5 = vpop.f32.mrb[3].mxu1 }
 0x73b   :  { %v10502_v48 = vadd.f32 %v7832_v5, %v7831_v12 }
 0x73c   :  { %7339 = vmatmul.mubr.msk.bf16.vlgmr.msra.gmra.mrb[140].mxu0 %vm217_vm3, %v10300_v47 }
 0x73d   :  { %5099 = vmatprep.mubr.bf16.mxu0 %v8906_v1 }
 0x73f   :  { %v4541_v35 = vpop.f32.mrb[160].mxu0  ;;  %v4868_v29 = vpop.f32.mrb[4].mxu1 }
 0x740   :  { %v4542_v50 = vadd.f32 %v10461_v2, %v4541_v35  ;;  %v8186_v22 = vpop.f32.mrb[161].mxu0  ;;  %v8214_v6 = vpop.f32.mrb[5].mxu1 }
 0x741   :  { %v4544_v17 = vpop.f32.mrb[162].mxu0  ;;  %v4871_v33 = vpop.f32.mrb[6].mxu1 }
 0x742   :  { %v4796_v16 = vadd.f32 %v7806_v59, %v4542_v50  ;;  %v4545_v63 = vadd.f32 %v10463_v24, %v4544_v17  ;;  %v8187_v58 = vpop.f32.mrb[163].mxu0  ;;  %v8215_v40 = vpop.f32.mrb[7].mxu1 }
 0x744   :  { %v10509_v55 = vadd.f32 %v4868_v29, %v4796_v16  ;;  %v4799_v38 = vadd.f32 %v7809_v10, %v4545_v63  ;;  %7340 = vmatmul.mubr.msk.bf16.gmra.mrb[144].mxu0 %vm217_vm3, %v10310_v23 }
 0x745   :  { %5109 = vmatprep.mubr.bf16.mxu0 %v8906_v1 }
 0x746   :  { %v10514_v47 = vadd.f32 %v4871_v33, %v4799_v38 }
 0x747   :  { %v4549_v2 = vpop.f32.mrb[164].mxu0  ;;  %v4876_v18 = vpop.f32.mrb[8].mxu1 }
 0x748   :  { %v4550_v4 = vadd.f32 %v10468_v51, %v4549_v2  ;;  %v8190_v56 = vpop.f32.mrb[165].mxu0  ;;  %v8218_v59 = vpop.f32.mrb[9].mxu1 }
 0x749   :  { %v4552_v7 = vpop.f32.mrb[166].mxu0  ;;  %v4879_v24 = vpop.f32.mrb[10].mxu1 }
 0x74a   :  { %v4804_v9 = vadd.f32 %v7812_v11, %v4550_v4  ;;  %v4553_v46 = vadd.f32 %v10470_v42, %v4552_v7  ;;  %v8191_v52 = vpop.f32.mrb[167].mxu0  ;;  %v8219_v10 = vpop.f32.mrb[11].mxu1 }
 0x74c   :  { %v10518_v31 = vadd.f32 %v4876_v18, %v4804_v9  ;;  %v4807_v23 = vadd.f32 %v7815_v62, %v4553_v46  ;;  %7341 = vmatmul.mubr.msk.bf16.gmra.mrb[148].mxu0 %vm217_vm3, %v10324_v53 }
 0x74d   :  { %5119 = vmatprep.mubr.bf16.mxu0 %v8906_v1 }
 0x74e   :  { %v10523_v45 = vadd.f32 %v4879_v24, %v4807_v23 }
 0x74f   :  { %v4557_v51 = vpop.f32.mrb[168].mxu0  ;;  %v4884_v43 = vpop.f32.mrb[12].mxu1 }
 0x750   :  { %v4558_v25 = vadd.f32 %v10472_v13, %v4557_v51  ;;  %v8194_v30 = vpop.f32.mrb[169].mxu0  ;;  %v8222_v11 = vpop.f32.mrb[13].mxu1 }
 0x751   :  { %v4560_v61 = vpop.f32.mrb[170].mxu0  ;;  %v4887_v42 = vpop.f32.mrb[14].mxu1 }
 0x752   :  { %v4812_v21 = vadd.f32 %v7818_v19, %v4558_v25  ;;  %v4561_v15 = vadd.f32 %v10474_v37, %v4560_v61  ;;  %v8195_v57 = vpop.f32.mrb[171].mxu0  ;;  %v8223_v62 = vpop.f32.mrb[15].mxu1 }
 0x754   :  { %v10527_v60 = vadd.f32 %v4884_v43, %v4812_v21  ;;  %v4815_v53 = vadd.f32 %v10490_v49, %v4561_v15  ;;  %7342 = vmatmul.mubr.msk.bf16.gmra.mrb[152].mxu0 %vm217_vm3, %v10338_v8 }
 0x755   :  { %5129 = vmatprep.mubr.bf16.mxu0 %v8906_v1 }
 0x756   :  { %v10533_v54 = vadd.f32 %v4887_v42, %v4815_v53 }
 0x757   :  { %v4565_v13 = vpop.f32.mrb[172].mxu0  ;;  %v4892_v12 = vpop.f32.mrb[16].mxu1 }
 0x758   :  { %v4566_v5 = vadd.f32 %v10476_v44, %v4565_v13  ;;  %v8198_v19 = vpop.f32.mrb[173].mxu0  ;;  %v8226_v35 = vpop.f32.mrb[17].mxu1 }
 0x759   :  { %v4568_v37 = vpop.f32.mrb[174].mxu0  ;;  %v4895_v29 = vpop.f32.mrb[18].mxu1 }
 0x75a   :  { %v4820_v50 = vadd.f32 %v10494_v27, %v4566_v5  ;;  %v4569_v22 = vadd.f32 %v10478_v0, %v4568_v37  ;;  %v8199_v49 = vpop.f32.mrb[175].mxu0  ;;  %v8227_v6 = vpop.f32.mrb[19].mxu1  ;;  %v10557_v37 = vld [vmem:[#allocation9 + $0x6] sm:$0x7] }
 0x75c   :  { %v10538_v17 = vadd.f32 %v4892_v12, %v4820_v50  ;;  %v4823_v1 = vadd.f32 %v10496_v3, %v4569_v22  ;;  %7343 = vmatmul.mubr.msk.bf16.gmra.mrb[156].mxu0 %vm217_vm3, %v10448_v39  ;;  %v10561_v22 = vrot.slane %v10557_v37, %v9301_v36 }
 0x75e   :  { %v10543_v8 = vadd.f32 %v4895_v29, %v4823_v1 }
 0x75f   :  { %v4573_v44 = vpop.f32.mrb[176].mxu0  ;;  %v4900_v33 = vpop.f32.mrb[20].mxu1 }
 0x760   :  { %v4574_v16 = vadd.f32 %v10480_v41, %v4573_v44  ;;  %v8202_v63 = vpop.f32.mrb[177].mxu0  ;;  %v8230_v58 = vpop.f32.mrb[21].mxu1 }
 0x761   :  { %v4576_v27 = vpop.f32.mrb[178].mxu0  ;;  %v4903_v40 = vpop.f32.mrb[22].mxu1 }
 0x762   :  { %v4828_v0 = vadd.f32 %v10500_v34, %v4574_v16  ;;  %v4577_v38 = vadd.f32 %v10482_v14, %v4576_v27  ;;  %v8203_v2 = vpop.f32.mrb[179].mxu0  ;;  %v8231_v18 = vpop.f32.mrb[23].mxu1 }
 0x764   :  { %v10548_v3 = vadd.f32 %v4900_v33, %v4828_v0  ;;  %v4831_v39 = vadd.f32 %v10502_v48, %v4577_v38 }
 0x766   :  { %v10551_v4 = vadd.f32 %v4903_v40, %v4831_v39 }
 0x767   :  { %v7859_v56 = vpop.f32.mrb[24].mxu1 }
 0x768   :  { %v7860_v59 = vpop.f32.mrb[25].mxu1 }
 0x769   :  { %v7861_v7 = vadd.f32 %v7860_v59, %v7859_v56  ;;  %v7862_v41 = vpop.f32.mrb[26].mxu1 }
 0x76a   :  { %v7863_v24 = vpop.f32.mrb[27].mxu1 }
 0x76b   :  { %v7864_v9 = vadd.f32 %v7863_v24, %v7862_v41 }
 0x76f   :  { %v7865_v46 = vpop.f32.mrb[28].mxu1 }
 0x770   :  { %v7866_v52 = vpop.f32.mrb[29].mxu1 }
 0x771   :  { %v7867_v10 = vadd.f32 %v7866_v52, %v7865_v46  ;;  %v7868_v34 = vpop.f32.mrb[30].mxu1 }
 0x772   :  { %v7869_v23 = vpop.f32.mrb[31].mxu1 }
 0x773   :  { %v7870_v14 = vadd.f32 %v7869_v23, %v7868_v34 }
 0x777   :  { %v7871_v51 = vpop.f32.mrb[32].mxu1 }
 0x778   :  { %v7872_v43 = vpop.f32.mrb[33].mxu1 }
 0x779   :  { %v7873_v25 = vadd.f32 %v7872_v43, %v7871_v51  ;;  %v7874_v30 = vpop.f32.mrb[34].mxu1 }
 0x77a   :  { %v7875_v11 = vpop.f32.mrb[35].mxu1 }
 0x77b   :  { %v7876_v48 = vadd.f32 %v7875_v11, %v7874_v30 }
 0x77f   :  { %v7877_v61 = vpop.f32.mrb[36].mxu1 }
 0x780   :  { %v7878_v42 = vpop.f32.mrb[37].mxu1 }
 0x781   :  { %v7879_v21 = vadd.f32 %v7878_v42, %v7877_v61  ;;  %v7880_v15 = vpop.f32.mrb[38].mxu1 }
 0x782   :  { %v7881_v57 = vpop.f32.mrb[39].mxu1 }
 0x783   :  { %v7882_v62 = vadd.f32 %v7881_v57, %v7880_v15 }
 0x787   :  { %v7883_v53 = vpop.f32.mrb[40].mxu1 }
 0x788   :  { %v7884_v13 = vpop.f32.mrb[41].mxu1 }
 0x789   :  { %v10553_v12 = vadd.f32 %v7884_v13, %v7883_v53  ;;  %v7886_v5 = vpop.f32.mrb[42].mxu1 }
 0x78a   :  { %v7887_v19 = vpop.f32.mrb[43].mxu1 }
 0x78b   :  { %v10555_v35 = vadd.f32 %v7887_v19, %v7886_v5 }
 0x78f   :  { %v5247_v29 = vpop.f32.mrb[44].mxu1 }
 0x790   :  { %v5248_v50 = vadd.f32 %v7861_v7, %v5247_v29  ;;  %v8242_v49 = vpop.f32.mrb[45].mxu1 }
 0x791   :  { %v5250_v6 = vpop.f32.mrb[46].mxu1 }
 0x792   :  { %v5288_v1 = vadd.f32 %v5248_v50, %v10509_v55  ;;  %v5251_v44 = vadd.f32 %v7864_v9, %v5250_v6  ;;  %v8243_v33 = vpop.f32.mrb[47].mxu1 }
 0x794   :  { %v5336_v16 = vadd.f32 %v10561_v22, %v5288_v1  ;;  %v5291_v63 = vadd.f32 %v5251_v44, %v10514_v47 }
 0x796   :  { %v5339_v58 = vadd.f32 %v10561_v22, %v5291_v63  ;;  %v5366_v40 = vmax.f32 %v5336_v16, 0.0 }
 0x797   :  { %v5255_v27 = vpop.f32.mrb[48].mxu1 }
 0x798   :  { %v5369_v0 = vmax.f32 %v5339_v58, 0.0  ;;  %v5256_v38 = vadd.f32 %v7867_v10, %v5255_v27  ;;  %v8246_v2 = vpop.f32.mrb[49].mxu1 }
 0x799   :  { %v5258_v18 = vpop.f32.mrb[50].mxu1 }
 0x79a   :  { %v5396_v39 = vpack.c.bf16 %v5369_v0, %v5366_v40  ;;  %v5294_v56 = vadd.f32 %v5256_v38, %v10518_v31  ;;  %v5259_v59 = vadd.f32 %v7870_v14, %v5258_v18  ;;  %v8247_v7 = vpop.f32.mrb[51].mxu1 }
 0x79c   :  { %v5426_v55 = vrot.slane %v5396_v39, 4  ;;  %v5342_v41 = vadd.f32 %v10561_v22, %v5294_v56  ;;  %v5297_v24 = vadd.f32 %v5259_v59, %v10523_v45 }
 0x79e   :  { %5471 = vst.msk [vmem:[#allocation2 + $0x10] sm:$0xf0] %vm1152_vm4, %v5426_v55  ;;  %v5345_v47 = vadd.f32 %v10561_v22, %v5297_v24  ;;  %v5372_v46 = vmax.f32 %v5342_v41, 0.0 }
 0x79f   :  { %v5263_v9 = vpop.f32.mrb[52].mxu1 }
 0x7a0   :  { %v5375_v52 = vmax.f32 %v5345_v47, 0.0  ;;  %v5264_v10 = vadd.f32 %v7873_v25, %v5263_v9  ;;  %v8250_v34 = vpop.f32.mrb[53].mxu1 }
 0x7a1   :  { %v5266_v23 = vpop.f32.mrb[54].mxu1 }
 0x7a2   :  { %v5399_v51 = vpack.c.bf16 %v5375_v52, %v5372_v46  ;;  %v5300_v31 = vadd.f32 %v5264_v10, %v10527_v60  ;;  %v5267_v14 = vadd.f32 %v7876_v48, %v5266_v23  ;;  %v8251_v43 = vpop.f32.mrb[55].mxu1 }
 0x7a4   :  { %v5431_v30 = vrot.slane %v5399_v51, 4  ;;  %v5348_v11 = vadd.f32 %v10561_v22, %v5300_v31  ;;  %v5303_v45 = vadd.f32 %v5267_v14, %v10533_v54 }
 0x7a6   :  { %v5432_v61 = vsel %vm1104_vm5, %v5426_v55, %v5431_v30  ;;  %v5351_v42 = vadd.f32 %v10561_v22, %v5303_v45  ;;  %v5378_v25 = vmax.f32 %v5348_v11, 0.0 }
 0x7a7   :  { %5474 = vst.msk [vmem:[#allocation2 + $0x28] sm:$0xff] %vm217_vm3, %v5432_v61  ;;  %v5271_v15 = vpop.f32.mrb[56].mxu1 }
 0x7a8   :  { %v5381_v57 = vmax.f32 %v5351_v42, 0.0  ;;  %v5272_v53 = vadd.f32 %v7879_v21, %v5271_v15  ;;  %v8254_v13 = vpop.f32.mrb[57].mxu1 }
 0x7a9   :  { %v5274_v5 = vpop.f32.mrb[58].mxu1 }
 0x7aa   :  { %v5402_v60 = vpack.c.bf16 %v5381_v57, %v5378_v25  ;;  %v5306_v48 = vadd.f32 %v5272_v53, %v10538_v17  ;;  %v5275_v19 = vadd.f32 %v7882_v62, %v5274_v5  ;;  %v8255_v29 = vpop.f32.mrb[59].mxu1 }
 0x7ac   :  { %v5437_v50 = vrot.slane %v5402_v60, 4  ;;  %v5354_v54 = vadd.f32 %v10561_v22, %v5306_v48  ;;  %v5309_v49 = vadd.f32 %v5275_v19, %v10543_v8 }
 0x7ae   :  { %v5438_v6 = vsel %vm1104_vm5, %v5431_v30, %v5437_v50  ;;  %v5357_v1 = vadd.f32 %v10561_v22, %v5309_v49  ;;  %v5384_v21 = vmax.f32 %v5354_v54, 0.0 }
 0x7af   :  { %5477 = vst.msk [vmem:[#allocation2 + $0x40] sm:$0xff] %vm217_vm3, %v5438_v6  ;;  %v5279_v44 = vpop.f32.mrb[60].mxu1 }
 0x7b0   :  { %v5387_v33 = vmax.f32 %v5357_v1, 0.0  ;;  %v5280_v16 = vadd.f32 %v10553_v12, %v5279_v44  ;;  %v8258_v63 = vpop.f32.mrb[61].mxu1 }
 0x7b1   :  { %v5282_v17 = vpop.f32.mrb[62].mxu1 }
 0x7b2   :  { %v5405_v62 = vpack.c.bf16 %v5387_v33, %v5384_v21  ;;  %v5312_v58 = vadd.f32 %v5280_v16, %v10548_v3  ;;  %v5283_v27 = vadd.f32 %v10555_v35, %v5282_v17  ;;  %v8259_v40 = vpop.f32.mrb[63].mxu1  ;;  %v10597_v35 = vrot.slane %v10557_v37, %v9291_v28 }
 0x7b4   :  { %v5443_v8 = vrot.slane %v5405_v62, 4  ;;  %v5360_v0 = vadd.f32 %v10561_v22, %v5312_v58  ;;  %v5315_v38 = vadd.f32 %v5283_v27, %v10551_v4  ;;  %v10601_v4 = vrot.slane %v10557_v37, %v9296_v32 }
 0x7b6   :  { %v5444_v2 = vsel %vm1104_vm5, %v5437_v50, %v5443_v8  ;;  %v5363_v18 = vadd.f32 %v10561_v22, %v5315_v38  ;;  %v5390_v12 = vmax.f32 %v5360_v0, 0.0 }
 0x7b7   :  { %5480 = vst.msk [vmem:[#allocation2 + $0x58] sm:$0xff] %vm217_vm3, %v5444_v2 }
 0x7b8   :  { %v5393_v39 = vmax.f32 %v5363_v18, 0.0 }
 0x7ba   :  { %v5408_v56 = vpack.c.bf16 %v5393_v39, %v5390_v12 }
 0x7bc   :  { %v5449_v59 = vrot.slane %v5408_v56, 4 }
 0x7be   :  { %v5450_v3 = vsel %vm1104_vm5, %v5443_v8, %v5449_v59  ;;  %5486 = vst.msk [vmem:[#allocation2 + $0x88] sm:$0xf] %vm1168_vm6, %v5449_v59 }
 0x7bf   :  { %5483 = vst.msk [vmem:[#allocation2 + $0x70] sm:$0xff] %vm217_vm3, %v5450_v3 }
 0x80f   :  { %v5091_v22 = vpop.f32.mrb[140].mxu0 }
 0x810   :  { %v5334_v7 = vadd.f32 %v10597_v35, %v5091_v22  ;;  %v5093_v55 = vpop.f32.mrb[141].mxu0 }
 0x811   :  { %v5335_v41 = vadd.f32 %v10601_v4, %v5093_v55  ;;  %v5095_v24 = vpop.f32.mrb[142].mxu0 }
 0x812   :  { %v5337_v47 = vadd.f32 %v10597_v35, %v5095_v24  ;;  %v5097_v9 = vpop.f32.mrb[143].mxu0  ;;  %v5364_v52 = vmax.f32 %v5334_v7, 0.0 }
 0x813   :  { %v5338_v46 = vadd.f32 %v10601_v4, %v5097_v9  ;;  %v5365_v34 = vmax.f32 %v5335_v41, 0.0 }
 0x814   :  { %v5367_v10 = vmax.f32 %v5337_v47, 0.0 }
 0x815   :  { %v5368_v23 = vmax.f32 %v5338_v46, 0.0 }
 0x816   :  { %v5394_v51 = vpack.c.bf16 %v5367_v10, %v5364_v52 }
 0x817   :  { %v5395_v31 = vpack.c.bf16 %v5368_v23, %v5365_v34  ;;  %v5101_v37 = vpop.f32.mrb[144].mxu0 }
 0x818   :  { %v5424_v14 = vrot.slane %v5394_v51, 4  ;;  %v5340_v43 = vadd.f32 %v10597_v35, %v5101_v37  ;;  %v5103_v30 = vpop.f32.mrb[145].mxu0 }
 0x819   :  { %v5425_v11 = vrot.slane %v5395_v31, 4  ;;  %v5341_v45 = vadd.f32 %v10601_v4, %v5103_v30  ;;  %v5105_v61 = vpop.f32.mrb[146].mxu0 }
 0x81a   :  { %5469 = vst [vmem:[#allocation2] sm:$0xf0] %v5424_v14  ;;  %v5343_v42 = vadd.f32 %v10597_v35, %v5105_v61  ;;  %v5107_v15 = vpop.f32.mrb[147].mxu0  ;;  %v5370_v57 = vmax.f32 %v5340_v43, 0.0 }
 0x81b   :  { %5470 = vst [vmem:[#allocation2 + $0x8] sm:$0xf0] %v5425_v11  ;;  %v5344_v25 = vadd.f32 %v10601_v4, %v5107_v15  ;;  %v5371_v13 = vmax.f32 %v5341_v45, 0.0 }
 0x81c   :  { %v5373_v53 = vmax.f32 %v5343_v42, 0.0 }
 0x81d   :  { %v5374_v5 = vmax.f32 %v5344_v25, 0.0 }
 0x81e   :  { %v5397_v60 = vpack.c.bf16 %v5373_v53, %v5370_v57 }
 0x81f   :  { %v5398_v48 = vpack.c.bf16 %v5374_v5, %v5371_v13  ;;  %v5111_v19 = vpop.f32.mrb[148].mxu0 }
 0x820   :  { %v5427_v29 = vrot.slane %v5397_v60, 4  ;;  %v5346_v50 = vadd.f32 %v10597_v35, %v5111_v19  ;;  %v5113_v54 = vpop.f32.mrb[149].mxu0 }
 0x821   :  { %v5429_v49 = vrot.slane %v5398_v48, 4  ;;  %v5347_v6 = vadd.f32 %v10601_v4, %v5113_v54  ;;  %v5115_v1 = vpop.f32.mrb[150].mxu0 }
 0x822   :  { %v5428_v44 = vsel %vm1104_vm5, %v5424_v14, %v5427_v29  ;;  %v5349_v21 = vadd.f32 %v10597_v35, %v5115_v1  ;;  %v5117_v33 = vpop.f32.mrb[151].mxu0  ;;  %v5376_v17 = vmax.f32 %v5346_v50, 0.0 }
 0x823   :  { %5472 = vst [vmem:[#allocation2 + $0x18] sm:$0xff] %v5428_v44  ;;  %v5430_v16 = vsel %vm1104_vm5, %v5425_v11, %v5429_v49  ;;  %v5350_v63 = vadd.f32 %v10601_v4, %v5117_v33  ;;  %v5377_v58 = vmax.f32 %v5347_v6, 0.0 }
 0x824   :  { %5473 = vst [vmem:[#allocation2 + $0x20] sm:$0xff] %v5430_v16  ;;  %v5379_v62 = vmax.f32 %v5349_v21, 0.0 }
 0x825   :  { %v5380_v27 = vmax.f32 %v5350_v63, 0.0 }
 0x826   :  { %v5400_v40 = vpack.c.bf16 %v5379_v62, %v5376_v17 }
 0x827   :  { %v5401_v8 = vpack.c.bf16 %v5380_v27, %v5377_v58  ;;  %v5121_v0 = vpop.f32.mrb[152].mxu0 }
 0x828   :  { %v5433_v38 = vrot.slane %v5400_v40, 4  ;;  %v5352_v2 = vadd.f32 %v10597_v35, %v5121_v0  ;;  %v5123_v18 = vpop.f32.mrb[153].mxu0 }
 0x829   :  { %v5435_v12 = vrot.slane %v5401_v8, 4  ;;  %v5353_v39 = vadd.f32 %v10601_v4, %v5123_v18  ;;  %v5125_v56 = vpop.f32.mrb[154].mxu0 }
 0x82a   :  { %v5434_v59 = vsel %vm1104_vm5, %v5427_v29, %v5433_v38  ;;  %v5355_v3 = vadd.f32 %v10597_v35, %v5125_v56  ;;  %v5127_v22 = vpop.f32.mrb[155].mxu0  ;;  %v5382_v41 = vmax.f32 %v5352_v2, 0.0 }
 0x82b   :  { %5475 = vst [vmem:[#allocation2 + $0x30] sm:$0xff] %v5434_v59  ;;  %v5436_v7 = vsel %vm1104_vm5, %v5429_v49, %v5435_v12  ;;  %v5356_v55 = vadd.f32 %v10601_v4, %v5127_v22  ;;  %v5383_v47 = vmax.f32 %v5353_v39, 0.0 }
 0x82c   :  { %5476 = vst [vmem:[#allocation2 + $0x38] sm:$0xff] %v5436_v7  ;;  %v5385_v24 = vmax.f32 %v5355_v3, 0.0 }
 0x82d   :  { %v5386_v9 = vmax.f32 %v5356_v55, 0.0 }
 0x82e   :  { %v5403_v46 = vpack.c.bf16 %v5385_v24, %v5382_v41 }
 0x82f   :  { %v5404_v52 = vpack.c.bf16 %v5386_v9, %v5383_v47  ;;  %v5131_v10 = vpop.f32.mrb[156].mxu0 }
 0x830   :  { %v5439_v34 = vrot.slane %v5403_v46, 4  ;;  %v5358_v23 = vadd.f32 %v10597_v35, %v5131_v10  ;;  %v5133_v51 = vpop.f32.mrb[157].mxu0 }
 0x831   :  { %v5441_v31 = vrot.slane %v5404_v52, 4  ;;  %v5359_v37 = vadd.f32 %v10601_v4, %v5133_v51  ;;  %v5135_v14 = vpop.f32.mrb[158].mxu0 }
 0x832   :  { %v5440_v43 = vsel %vm1104_vm5, %v5433_v38, %v5439_v34  ;;  %v5361_v30 = vadd.f32 %v10597_v35, %v5135_v14  ;;  %v5137_v11 = vpop.f32.mrb[159].mxu0  ;;  %v5487_v45 = vld [vmem:[#allocation2 + $0x30] sm:$0xf]  ;;  %v5489_v61 = vld [vmem:[#allocation2 + $0x30] sm:$0xf0]  ;;  %v5388_v57 = vmax.f32 %v5358_v23, 0.0 }
 0x833   :  { %5478 = vst [vmem:[#allocation2 + $0x48] sm:$0xff] %v5440_v43  ;;  %v5442_v42 = vsel %vm1104_vm5, %v5435_v12, %v5441_v31  ;;  %v5362_v15 = vadd.f32 %v10601_v4, %v5137_v11  ;;  %5497 = vrot.lane.b32.xlu0 %v5487_v45, %s8924_s1  ;;  %v5506_v25 = vrot.slane %v5489_v61, 4  ;;  %v5490_v13 = vld [vmem:[#allocation2 + $0x38] sm:$0xf0]  ;;  %v5389_v5 = vmax.f32 %v5359_v37, 0.0 }
 0x834   :  { %5479 = vst [vmem:[#allocation2 + $0x50] sm:$0xff] %v5442_v42  ;;  %v5391_v53 = vmax.f32 %v5361_v30, 0.0  ;;  %v5488_v48 = vld [vmem:[#allocation2 + $0x38] sm:$0xf]  ;;  %v5507_v29 = vrot.slane %v5490_v13, 4 }
 0x835   :  { %v5392_v60 = vmax.f32 %v5362_v15, 0.0  ;;  %5508 = vrot.lane.b32.xlu1 %v5506_v25, %s8924_s1 }
 0x836   :  { %v5406_v35 = vpack.c.bf16 %v5391_v53, %v5388_v57 }
 0x837   :  { %v5407_v19 = vpack.c.bf16 %v5392_v60, %v5389_v5  ;;  %5499 = vrot.lane.b32.xlu0 %v5488_v48, %s8924_s1 }
 0x838   :  { %v5445_v50 = vrot.slane %v5406_v35, 4 }
 0x839   :  { %v5447_v4 = vrot.slane %v5407_v19, 4  ;;  %5510 = vrot.lane.b32.xlu1 %v5507_v29, %s8924_s1 }
 0x83a   :  { %v5446_v54 = vsel %vm1104_vm5, %v5439_v34, %v5445_v50  ;;  %5484 = vst [vmem:[#allocation2 + $0x78] sm:$0xf] %v5445_v50  ;;  %v5491_v49 = vld [vmem:[#allocation2 + $0x48] sm:$0xf]  ;;  %v5493_v6 = vld [vmem:[#allocation2 + $0x48] sm:$0xf0] }
 0x83b   :  { %5481 = vst [vmem:[#allocation2 + $0x60] sm:$0xff] %v5446_v54  ;;  %v5448_v1 = vsel %vm1104_vm5, %v5441_v31, %v5447_v4  ;;  %5485 = vst [vmem:[#allocation2 + $0x80] sm:$0xf] %v5447_v4  ;;  %5516 = vrot.lane.b32.xlu0 %v5491_v49, %s8924_s1  ;;  %v5492_v44 = vld [vmem:[#allocation2 + $0x50] sm:$0xf]  ;;  %v5524_v33 = vrot.slane %v5493_v6, 4 }
 0x83c   :  { %5482 = vst [vmem:[#allocation2 + $0x68] sm:$0xff] %v5448_v1  ;;  %v5494_v21 = vld [vmem:[#allocation2 + $0x50] sm:$0xf0] }
 0x83d   :  { %5518 = vrot.lane.b32.xlu1 %v5492_v44, %s8924_s1  ;;  %v5525_v16 = vrot.slane %v5494_v21, 4 }
 0x83f   :  { %5526 = vrot.lane.b32.xlu0 %v5524_v33, %s8924_s1 }
 0x841   :  { %5528 = vrot.lane.b32.xlu1 %v5525_v16, %s8924_s1 }
 0x8a5   :  { %v5498_v63 = vpop.permute.xlu0 %5497 }
 0x8a7   :  { %v5509_v17 = vpop.permute.xlu1 %5508 }
 0x8a9   :  { %v5500_v62 = vpop.permute.xlu0 %5499 }
 0x8aa   :  { %v10639_v58 = vsel %vm5501_vm7, %v5498_v63, %v5500_v62 }
 0x8ab   :  { %v5511_v27 = vpop.permute.xlu1 %5510 }
 0x8ac   :  { %v10641_v40 = vsel %vm5501_vm7, %v5509_v17, %v5511_v27 }
 0x8ad   :  { %v5517_v8 = vpop.permute.xlu0 %5516 }
 0x8af   :  { %v5519_v0 = vpop.permute.xlu1 %5518 }
 0x8b0   :  { %v10643_v38 = vsel %vm5501_vm7, %v5517_v8, %v5519_v0 }
 0x8b1   :  { %v5527_v2 = vpop.permute.xlu0 %5526 }
 0x8b3   :  { %v5529_v18 = vpop.permute.xlu1 %5528 }
 0x8b4   :  { %v10645_v12 = vsel %vm5501_vm7, %v5527_v2, %v5529_v18 }
 0x8b5   :  { %8890 = dma.done.wait [#allocation6 + $0x1], 32768 }
 0x8b6   :  { %8891 = vsyncadd [#allocation6 + $0x1], 4294934528  ;;  %5866 = vmatprep.mubr.bf16.mxu1 %v10641_v40  ;;  %5948 = vmatprep.mubr.bf16.mxu0 %v10641_v40  ;;  %v5537_v39 = vld [vmem:[#allocation4 + $0x8] sm:$0xff]  ;;  %v5539_v56 = vld [vmem:[#allocation4 + $0x18] sm:$0xff] }
 0x8b7   :  { %v5536_v59 = vld [vmem:[#allocation4] sm:$0xff]  ;;  %5834 = vmatprep.subr.bf16.mxu1 %v5537_v39  ;;  %5916 = vmatprep.subr.bf16.mxu0 %v5539_v56  ;;  %v5538_v3 = vld [vmem:[#allocation4 + $0x10] sm:$0xff]  ;;  %v5545_v22 = vld [vmem:[#allocation4 + $0x48] sm:$0xff] }
 0x8b8   :  { %v5547_v7 = vld [vmem:[#allocation4 + $0x58] sm:$0xff]  ;;  %5835 = vmatpush1.bf16.msra.mxu1 %v5536_v59  ;;  %5917 = vmatpush1.bf16.msra.mxu0 %v5538_v3  ;;  %v5544_v55 = vld [vmem:[#allocation4 + $0x40] sm:$0xff]  ;;  %v5546_v41 = vld [vmem:[#allocation4 + $0x50] sm:$0xff] }
 0x8b9   :  { %5836 = vmatprep.subr.bf16.mxu1 %v5545_v22  ;;  %5918 = vmatprep.subr.bf16.mxu0 %v5547_v7  ;;  %v5553_v24 = vld [vmem:[#allocation4 + $0x88] sm:$0xff]  ;;  %v5555_v47 = vld [vmem:[#allocation4 + $0x98] sm:$0xff]  ;;  %v5552_v9 = vld [vmem:[#allocation4 + $0x80] sm:$0xff] }
 0x8ba   :  { %v5554_v46 = vld [vmem:[#allocation4 + $0x90] sm:$0xff]  ;;  %v5561_v52 = vld [vmem:[#allocation4 + $0xc8] sm:$0xff]  ;;  %v5563_v10 = vld [vmem:[#allocation4 + $0xd8] sm:$0xff] }
 0x8bb   :  { %v5560_v34 = vld [vmem:[#allocation4 + $0xc0] sm:$0xff]  ;;  %v5562_v23 = vld [vmem:[#allocation4 + $0xd0] sm:$0xff]  ;;  %v5569_v51 = vld [vmem:[#allocation4 + $0x108] sm:$0xff] }
 0x8bc   :  { %5837 = vmatpush1.bf16.msra.mxu1 %v5544_v55  ;;  %5919 = vmatpush1.bf16.msra.mxu0 %v5546_v41  ;;  %v5571_v31 = vld [vmem:[#allocation4 + $0x118] sm:$0xff]  ;;  %v5568_v37 = vld [vmem:[#allocation4 + $0x100] sm:$0xff]  ;;  %v5570_v14 = vld [vmem:[#allocation4 + $0x110] sm:$0xff] }
 0x8bd   :  { %5838 = vmatprep.subr.bf16.mxu1 %v5553_v24  ;;  %5920 = vmatprep.subr.bf16.mxu0 %v5555_v47  ;;  %v5577_v43 = vld [vmem:[#allocation4 + $0x148] sm:$0xff]  ;;  %v5579_v30 = vld [vmem:[#allocation4 + $0x158] sm:$0xff]  ;;  %v5576_v11 = vld [vmem:[#allocation4 + $0x140] sm:$0xff] }
 0x8be   :  { %v5578_v45 = vld [vmem:[#allocation4 + $0x150] sm:$0xff]  ;;  %v5585_v61 = vld [vmem:[#allocation4 + $0x188] sm:$0xff]  ;;  %v5587_v42 = vld [vmem:[#allocation4 + $0x198] sm:$0xff] }
 0x8bf   :  { %v5584_v15 = vld [vmem:[#allocation4 + $0x180] sm:$0xff]  ;;  %v5586_v25 = vld [vmem:[#allocation4 + $0x190] sm:$0xff]  ;;  %v5593_v57 = vld [vmem:[#allocation4 + $0x1c8] sm:$0xff] }
 0x8c0   :  { %5839 = vmatpush1.bf16.msra.mxu1 %v5552_v9  ;;  %5921 = vmatpush1.bf16.msra.mxu0 %v5554_v46  ;;  %v5595_v53 = vld [vmem:[#allocation4 + $0x1d8] sm:$0xff]  ;;  %v5592_v13 = vld [vmem:[#allocation4 + $0x1c0] sm:$0xff]  ;;  %v5594_v5 = vld [vmem:[#allocation4 + $0x1d0] sm:$0xff] }
 0x8c1   :  { %5840 = vmatprep.subr.bf16.mxu1 %v5561_v52  ;;  %5922 = vmatprep.subr.bf16.mxu0 %v5563_v10  ;;  %v5601_v60 = vld [vmem:[#allocation4 + $0x208] sm:$0xff]  ;;  %v5603_v35 = vld [vmem:[#allocation4 + $0x218] sm:$0xff]  ;;  %v5600_v48 = vld [vmem:[#allocation4 + $0x200] sm:$0xff] }
 0x8c2   :  { %v5602_v19 = vld [vmem:[#allocation4 + $0x210] sm:$0xff]  ;;  %v5609_v29 = vld [vmem:[#allocation4 + $0x248] sm:$0xff]  ;;  %v5611_v50 = vld [vmem:[#allocation4 + $0x258] sm:$0xff] }
 0x8c3   :  { %v5608_v4 = vld [vmem:[#allocation4 + $0x240] sm:$0xff]  ;;  %v5610_v54 = vld [vmem:[#allocation4 + $0x250] sm:$0xff]  ;;  %v5617_v49 = vld [vmem:[#allocation4 + $0x288] sm:$0xff] }
 0x8c4   :  { %5841 = vmatpush1.bf16.msra.mxu1 %v5560_v34  ;;  %5923 = vmatpush1.bf16.msra.mxu0 %v5562_v23  ;;  %v5619_v6 = vld [vmem:[#allocation4 + $0x298] sm:$0xff]  ;;  %v5616_v1 = vld [vmem:[#allocation4 + $0x280] sm:$0xff]  ;;  %v5618_v44 = vld [vmem:[#allocation4 + $0x290] sm:$0xff] }
 0x8c5   :  { %5842 = vmatprep.subr.bf16.mxu1 %v5569_v51  ;;  %5924 = vmatprep.subr.bf16.mxu0 %v5571_v31  ;;  %v5625_v21 = vld [vmem:[#allocation4 + $0x2c8] sm:$0xff]  ;;  %v5627_v33 = vld [vmem:[#allocation4 + $0x2d8] sm:$0xff]  ;;  %v5624_v16 = vld [vmem:[#allocation4 + $0x2c0] sm:$0xff] }
 0x8c6   :  { %v5626_v63 = vld [vmem:[#allocation4 + $0x2d0] sm:$0xff]  ;;  %v5633_v17 = vld [vmem:[#allocation4 + $0x308] sm:$0xff]  ;;  %v5635_v62 = vld [vmem:[#allocation4 + $0x318] sm:$0xff] }
 0x8c7   :  { %v5632_v27 = vld [vmem:[#allocation4 + $0x300] sm:$0xff]  ;;  %v5634_v8 = vld [vmem:[#allocation4 + $0x310] sm:$0xff]  ;;  %v5641_v0 = vld [vmem:[#allocation4 + $0x348] sm:$0xff] }
 0x8c8   :  { %5843 = vmatpush1.bf16.msra.mxu1 %v5568_v37  ;;  %5925 = vmatpush1.bf16.msra.mxu0 %v5570_v14  ;;  %v5643_v2 = vld [vmem:[#allocation4 + $0x358] sm:$0xff]  ;;  %v5640_v18 = vld [vmem:[#allocation4 + $0x340] sm:$0xff]  ;;  %v5642_v39 = vld [vmem:[#allocation4 + $0x350] sm:$0xff] }
 0x8c9   :  { %5844 = vmatprep.subr.bf16.mxu1 %v5577_v43  ;;  %5926 = vmatprep.subr.bf16.mxu0 %v5579_v30  ;;  %v5649_v56 = vld [vmem:[#allocation4 + $0x388] sm:$0xff]  ;;  %v5651_v59 = vld [vmem:[#allocation4 + $0x398] sm:$0xff]  ;;  %v5648_v3 = vld [vmem:[#allocation4 + $0x380] sm:$0xff] }
 0x8ca   :  { %v5650_v22 = vld [vmem:[#allocation4 + $0x390] sm:$0xff]  ;;  %v5657_v7 = vld [vmem:[#allocation4 + $0x3c8] sm:$0xff]  ;;  %v5659_v55 = vld [vmem:[#allocation4 + $0x3d8] sm:$0xff] }
 0x8cb   :  { %v5656_v41 = vld [vmem:[#allocation4 + $0x3c0] sm:$0xff]  ;;  %v5658_v24 = vld [vmem:[#allocation4 + $0x3d0] sm:$0xff]  ;;  %v5665_v47 = vld [vmem:[#allocation4 + $0x408] sm:$0xff] }
 0x8cc   :  { %5845 = vmatpush1.bf16.msra.mxu1 %v5576_v11  ;;  %5927 = vmatpush1.bf16.msra.mxu0 %v5578_v45  ;;  %v5667_v9 = vld [vmem:[#allocation4 + $0x418] sm:$0xff]  ;;  %v5664_v46 = vld [vmem:[#allocation4 + $0x400] sm:$0xff]  ;;  %v5666_v52 = vld [vmem:[#allocation4 + $0x410] sm:$0xff] }
 0x8cd   :  { %5846 = vmatprep.subr.bf16.mxu1 %v5585_v61  ;;  %5928 = vmatprep.subr.bf16.mxu0 %v5587_v42  ;;  %v5673_v10 = vld [vmem:[#allocation4 + $0x448] sm:$0xff]  ;;  %v5675_v34 = vld [vmem:[#allocation4 + $0x458] sm:$0xff]  ;;  %v5672_v23 = vld [vmem:[#allocation4 + $0x440] sm:$0xff] }
 0x8ce   :  { %v5674_v51 = vld [vmem:[#allocation4 + $0x450] sm:$0xff]  ;;  %v5681_v31 = vld [vmem:[#allocation4 + $0x488] sm:$0xff]  ;;  %v5683_v37 = vld [vmem:[#allocation4 + $0x498] sm:$0xff] }
 0x8cf   :  { %v5680_v14 = vld [vmem:[#allocation4 + $0x480] sm:$0xff]  ;;  %v5682_v43 = vld [vmem:[#allocation4 + $0x490] sm:$0xff]  ;;  %v5689_v30 = vld [vmem:[#allocation4 + $0x4c8] sm:$0xff] }
 0x8d0   :  { %5847 = vmatpush1.bf16.msra.mxu1 %v5584_v15  ;;  %5929 = vmatpush1.bf16.msra.mxu0 %v5586_v25  ;;  %v5691_v11 = vld [vmem:[#allocation4 + $0x4d8] sm:$0xff]  ;;  %v5688_v45 = vld [vmem:[#allocation4 + $0x4c0] sm:$0xff]  ;;  %v5690_v61 = vld [vmem:[#allocation4 + $0x4d0] sm:$0xff] }
 0x8d1   :  { %5848 = vmatprep.subr.bf16.mxu1 %v5593_v57  ;;  %5930 = vmatprep.subr.bf16.mxu0 %v5595_v53  ;;  %v5697_v42 = vld [vmem:[#allocation4 + $0x508] sm:$0xff]  ;;  %v5699_v15 = vld [vmem:[#allocation4 + $0x518] sm:$0xff]  ;;  %v5696_v25 = vld [vmem:[#allocation4 + $0x500] sm:$0xff] }
 0x8d2   :  { %v5698_v57 = vld [vmem:[#allocation4 + $0x510] sm:$0xff]  ;;  %v5705_v53 = vld [vmem:[#allocation4 + $0x548] sm:$0xff] }
 0x8d4   :  { %5849 = vmatpush1.bf16.msra.mxu1 %v5592_v13  ;;  %5931 = vmatpush1.bf16.msra.mxu0 %v5594_v5  ;;  %v5707_v13 = vld [vmem:[#allocation4 + $0x558] sm:$0xff]  ;;  %v5704_v5 = vld [vmem:[#allocation4 + $0x540] sm:$0xff] }
 0x8d5   :  { %5850 = vmatprep.subr.bf16.mxu1 %v5601_v60  ;;  %5932 = vmatprep.subr.bf16.mxu0 %v5603_v35  ;;  %v5706_v60 = vld [vmem:[#allocation4 + $0x550] sm:$0xff]  ;;  %v5713_v35 = vld [vmem:[#allocation4 + $0x588] sm:$0xff] }
 0x8d8   :  { %5851 = vmatpush1.bf16.msra.mxu1 %v5600_v48  ;;  %5933 = vmatpush1.bf16.msra.mxu0 %v5602_v19  ;;  %v5715_v48 = vld [vmem:[#allocation4 + $0x598] sm:$0xff]  ;;  %v5712_v19 = vld [vmem:[#allocation4 + $0x580] sm:$0xff] }
 0x8d9   :  { %5852 = vmatprep.subr.bf16.mxu1 %v5609_v29  ;;  %5934 = vmatprep.subr.bf16.mxu0 %v5611_v50  ;;  %v5714_v29 = vld [vmem:[#allocation4 + $0x590] sm:$0xff]  ;;  %v5721_v50 = vld [vmem:[#allocation4 + $0x5c8] sm:$0xff] }
 0x8dc   :  { %5853 = vmatpush1.bf16.msra.mxu1 %v5608_v4  ;;  %5935 = vmatpush1.bf16.msra.mxu0 %v5610_v54  ;;  %v5723_v4 = vld [vmem:[#allocation4 + $0x5d8] sm:$0xff]  ;;  %v5720_v54 = vld [vmem:[#allocation4 + $0x5c0] sm:$0xff] }
 0x8dd   :  { %5854 = vmatprep.subr.bf16.mxu1 %v5617_v49  ;;  %5936 = vmatprep.subr.bf16.mxu0 %v5619_v6  ;;  %v5722_v49 = vld [vmem:[#allocation4 + $0x5d0] sm:$0xff]  ;;  %v5729_v6 = vld [vmem:[#allocation4 + $0x608] sm:$0xff] }
 0x8e0   :  { %5855 = vmatpush1.bf16.msra.mxu1 %v5616_v1  ;;  %5937 = vmatpush1.bf16.msra.mxu0 %v5618_v44  ;;  %v5731_v1 = vld [vmem:[#allocation4 + $0x618] sm:$0xff]  ;;  %v5728_v44 = vld [vmem:[#allocation4 + $0x600] sm:$0xff] }
 0x8e1   :  { %5856 = vmatprep.subr.bf16.mxu1 %v5625_v21  ;;  %5938 = vmatprep.subr.bf16.mxu0 %v5627_v33  ;;  %v5730_v21 = vld [vmem:[#allocation4 + $0x610] sm:$0xff]  ;;  %v5737_v33 = vld [vmem:[#allocation4 + $0x648] sm:$0xff] }
 0x8e4   :  { %5857 = vmatpush1.bf16.msra.mxu1 %v5624_v16  ;;  %5939 = vmatpush1.bf16.msra.mxu0 %v5626_v63  ;;  %v5739_v16 = vld [vmem:[#allocation4 + $0x658] sm:$0xff]  ;;  %v5736_v63 = vld [vmem:[#allocation4 + $0x640] sm:$0xff] }
 0x8e5   :  { %5858 = vmatprep.subr.bf16.mxu1 %v5633_v17  ;;  %5940 = vmatprep.subr.bf16.mxu0 %v5635_v62  ;;  %v5738_v17 = vld [vmem:[#allocation4 + $0x650] sm:$0xff]  ;;  %v5745_v62 = vld [vmem:[#allocation4 + $0x688] sm:$0xff] }
 0x8e8   :  { %5859 = vmatpush1.bf16.msra.mxu1 %v5632_v27  ;;  %5941 = vmatpush1.bf16.msra.mxu0 %v5634_v8  ;;  %v5747_v27 = vld [vmem:[#allocation4 + $0x698] sm:$0xff]  ;;  %v5744_v8 = vld [vmem:[#allocation4 + $0x680] sm:$0xff] }
 0x8e9   :  { %5860 = vmatprep.subr.bf16.mxu1 %v5641_v0  ;;  %5942 = vmatprep.subr.bf16.mxu0 %v5643_v2  ;;  %v5746_v0 = vld [vmem:[#allocation4 + $0x690] sm:$0xff]  ;;  %v5753_v2 = vld [vmem:[#allocation4 + $0x6c8] sm:$0xff] }
 0x8ec   :  { %5861 = vmatpush1.bf16.msra.mxu1 %v5640_v18  ;;  %5943 = vmatpush1.bf16.msra.mxu0 %v5642_v39  ;;  %v5755_v18 = vld [vmem:[#allocation4 + $0x6d8] sm:$0xff]  ;;  %v5752_v39 = vld [vmem:[#allocation4 + $0x6c0] sm:$0xff] }
 0x8ed   :  { %5862 = vmatprep.subr.bf16.mxu1 %v5649_v56  ;;  %5944 = vmatprep.subr.bf16.mxu0 %v5651_v59  ;;  %v5754_v56 = vld [vmem:[#allocation4 + $0x6d0] sm:$0xff]  ;;  %v5761_v59 = vld [vmem:[#allocation4 + $0x708] sm:$0xff] }
 0x8f0   :  { %5863 = vmatpush1.bf16.msra.mxu1 %v5648_v3  ;;  %5945 = vmatpush1.bf16.msra.mxu0 %v5650_v22  ;;  %v5763_v3 = vld [vmem:[#allocation4 + $0x718] sm:$0xff]  ;;  %v5760_v22 = vld [vmem:[#allocation4 + $0x700] sm:$0xff] }
 0x8f1   :  { %5864 = vmatprep.subr.bf16.mxu1 %v5657_v7  ;;  %5946 = vmatprep.subr.bf16.mxu0 %v5659_v55  ;;  %v5762_v7 = vld [vmem:[#allocation4 + $0x710] sm:$0xff]  ;;  %v5769_v55 = vld [vmem:[#allocation4 + $0x748] sm:$0xff] }
 0x8f4   :  { %5865 = vmatpush1.bf16.msra.mxu1 %v5656_v41  ;;  %5947 = vmatpush1.bf16.msra.mxu0 %v5658_v24  ;;  %v5771_v41 = vld [vmem:[#allocation4 + $0x758] sm:$0xff]  ;;  %v5768_v24 = vld [vmem:[#allocation4 + $0x740] sm:$0xff] }
 0x8f5   :  { %5875 = vmatprep.subr.bf16.mxu1 %v5665_v47  ;;  %5957 = vmatprep.subr.bf16.mxu0 %v5667_v9  ;;  %v5770_v47 = vld [vmem:[#allocation4 + $0x750] sm:$0xff]  ;;  %v5777_v9 = vld [vmem:[#allocation4 + $0x788] sm:$0xff] }
 0x8f7   :  { %5867 = vmatmul.mubr.bf16.vlgmr.msra.gmra.mrb[64].mxu1 %v10639_v58  ;;  %5949 = vmatmul.mubr.bf16.vlgmr.msra.gmra.mrb[180].mxu0 %v10639_v58 }
 0x8f8   :  { %5876 = vmatpush1.bf16.msra.mxu1 %v5664_v46  ;;  %5958 = vmatpush1.bf16.msra.mxu0 %v5666_v52  ;;  %v5779_v46 = vld [vmem:[#allocation4 + $0x798] sm:$0xff]  ;;  %v5776_v52 = vld [vmem:[#allocation4 + $0x780] sm:$0xff] }
 0x8f9   :  { %5877 = vmatprep.subr.bf16.mxu1 %v5673_v10  ;;  %5959 = vmatprep.subr.bf16.mxu0 %v5675_v34  ;;  %v5778_v10 = vld [vmem:[#allocation4 + $0x790] sm:$0xff]  ;;  %v5785_v34 = vld [vmem:[#allocation4 + $0x7c8] sm:$0xff] }
 0x8fa   :  { %5907 = vmatprep.mubr.bf16.mxu1 %v10645_v12  ;;  %5989 = vmatprep.mubr.bf16.mxu0 %v10645_v12 }
 0x8fc   :  { %5878 = vmatpush1.bf16.msra.mxu1 %v5672_v23  ;;  %5960 = vmatpush1.bf16.msra.mxu0 %v5674_v51  ;;  %v5787_v23 = vld [vmem:[#allocation4 + $0x7d8] sm:$0xff]  ;;  %v5784_v51 = vld [vmem:[#allocation4 + $0x7c0] sm:$0xff] }
 0x8fd   :  { %5879 = vmatprep.subr.bf16.mxu1 %v5681_v31  ;;  %5961 = vmatprep.subr.bf16.mxu0 %v5683_v37  ;;  %v5786_v31 = vld [vmem:[#allocation4 + $0x7d0] sm:$0xff]  ;;  %v5541_v37 = vld [vmem:[#allocation4 + $0x28] sm:$0xff] }
 0x900   :  { %5880 = vmatpush1.bf16.msra.mxu1 %v5680_v14  ;;  %5962 = vmatpush1.bf16.msra.mxu0 %v5682_v43  ;;  %v5543_v14 = vld [vmem:[#allocation4 + $0x38] sm:$0xff]  ;;  %v5540_v43 = vld [vmem:[#allocation4 + $0x20] sm:$0xff] }
 0x901   :  { %5881 = vmatprep.subr.bf16.mxu1 %v5689_v30  ;;  %5963 = vmatprep.subr.bf16.mxu0 %v5691_v11  ;;  %v5542_v30 = vld [vmem:[#allocation4 + $0x30] sm:$0xff]  ;;  %v5549_v11 = vld [vmem:[#allocation4 + $0x68] sm:$0xff] }
 0x904   :  { %5882 = vmatpush1.bf16.msra.mxu1 %v5688_v45  ;;  %5964 = vmatpush1.bf16.msra.mxu0 %v5690_v61  ;;  %v5551_v45 = vld [vmem:[#allocation4 + $0x78] sm:$0xff]  ;;  %v5548_v61 = vld [vmem:[#allocation4 + $0x60] sm:$0xff] }
 0x905   :  { %5883 = vmatprep.subr.bf16.mxu1 %v5697_v42  ;;  %5965 = vmatprep.subr.bf16.mxu0 %v5699_v15  ;;  %v5550_v42 = vld [vmem:[#allocation4 + $0x70] sm:$0xff]  ;;  %v5557_v15 = vld [vmem:[#allocation4 + $0xa8] sm:$0xff] }
 0x908   :  { %5884 = vmatpush1.bf16.msra.mxu1 %v5696_v25  ;;  %5966 = vmatpush1.bf16.msra.mxu0 %v5698_v57  ;;  %v5559_v25 = vld [vmem:[#allocation4 + $0xb8] sm:$0xff]  ;;  %v5556_v57 = vld [vmem:[#allocation4 + $0xa0] sm:$0xff] }
 0x909   :  { %5885 = vmatprep.subr.bf16.mxu1 %v5705_v53  ;;  %5967 = vmatprep.subr.bf16.mxu0 %v5707_v13  ;;  %v5558_v53 = vld [vmem:[#allocation4 + $0xb0] sm:$0xff]  ;;  %v5565_v13 = vld [vmem:[#allocation4 + $0xe8] sm:$0xff] }
 0x90c   :  { %5886 = vmatpush1.bf16.msra.mxu1 %v5704_v5  ;;  %5968 = vmatpush1.bf16.msra.mxu0 %v5706_v60  ;;  %v5567_v5 = vld [vmem:[#allocation4 + $0xf8] sm:$0xff]  ;;  %v5564_v60 = vld [vmem:[#allocation4 + $0xe0] sm:$0xff] }
 0x90d   :  { %5887 = vmatprep.subr.bf16.mxu1 %v5713_v35  ;;  %5969 = vmatprep.subr.bf16.mxu0 %v5715_v48  ;;  %v5566_v35 = vld [vmem:[#allocation4 + $0xf0] sm:$0xff]  ;;  %v5573_v48 = vld [vmem:[#allocation4 + $0x128] sm:$0xff] }
 0x910   :  { %5888 = vmatpush1.bf16.msra.mxu1 %v5712_v19  ;;  %5970 = vmatpush1.bf16.msra.mxu0 %v5714_v29  ;;  %v5575_v19 = vld [vmem:[#allocation4 + $0x138] sm:$0xff]  ;;  %v5574_v29 = vld [vmem:[#allocation4 + $0x130] sm:$0xff] }
 0x911   :  { %5889 = vmatprep.subr.bf16.mxu1 %v5721_v50  ;;  %5971 = vmatprep.subr.bf16.mxu0 %v5723_v4  ;;  %v5581_v50 = vld [vmem:[#allocation4 + $0x168] sm:$0xff]  ;;  %v5583_v4 = vld [vmem:[#allocation4 + $0x178] sm:$0xff] }
 0x914   :  { %5890 = vmatpush1.bf16.msra.mxu1 %v5720_v54  ;;  %5972 = vmatpush1.bf16.msra.mxu0 %v5722_v49  ;;  %v5580_v54 = vld [vmem:[#allocation4 + $0x160] sm:$0xff]  ;;  %v5582_v49 = vld [vmem:[#allocation4 + $0x170] sm:$0xff] }
 0x915   :  { %5891 = vmatprep.subr.bf16.mxu1 %v5729_v6  ;;  %5973 = vmatprep.subr.bf16.mxu0 %v5731_v1  ;;  %v5589_v6 = vld [vmem:[#allocation4 + $0x1a8] sm:$0xff]  ;;  %v5591_v1 = vld [vmem:[#allocation4 + $0x1b8] sm:$0xff] }
 0x918   :  { %5892 = vmatpush1.bf16.msra.mxu1 %v5728_v44  ;;  %5974 = vmatpush1.bf16.msra.mxu0 %v5730_v21  ;;  %v5588_v44 = vld [vmem:[#allocation4 + $0x1a0] sm:$0xff]  ;;  %v5590_v21 = vld [vmem:[#allocation4 + $0x1b0] sm:$0xff] }
 0x919   :  { %5893 = vmatprep.subr.bf16.mxu1 %v5737_v33  ;;  %5975 = vmatprep.subr.bf16.mxu0 %v5739_v16  ;;  %v5597_v33 = vld [vmem:[#allocation4 + $0x1e8] sm:$0xff]  ;;  %v5599_v16 = vld [vmem:[#allocation4 + $0x1f8] sm:$0xff] }
 0x91c   :  { %5894 = vmatpush1.bf16.msra.mxu1 %v5736_v63  ;;  %5976 = vmatpush1.bf16.msra.mxu0 %v5738_v17  ;;  %v5596_v63 = vld [vmem:[#allocation4 + $0x1e0] sm:$0xff]  ;;  %v5598_v17 = vld [vmem:[#allocation4 + $0x1f0] sm:$0xff] }
 0x91d   :  { %5895 = vmatprep.subr.bf16.mxu1 %v5745_v62  ;;  %5977 = vmatprep.subr.bf16.mxu0 %v5747_v27  ;;  %v5605_v62 = vld [vmem:[#allocation4 + $0x228] sm:$0xff]  ;;  %v5607_v27 = vld [vmem:[#allocation4 + $0x238] sm:$0xff] }
 0x920   :  { %5896 = vmatpush1.bf16.msra.mxu1 %v5744_v8  ;;  %5978 = vmatpush1.bf16.msra.mxu0 %v5746_v0  ;;  %v5604_v8 = vld [vmem:[#allocation4 + $0x220] sm:$0xff]  ;;  %v5606_v0 = vld [vmem:[#allocation4 + $0x230] sm:$0xff] }
 0x921   :  { %5897 = vmatprep.subr.bf16.mxu1 %v5753_v2  ;;  %5979 = vmatprep.subr.bf16.mxu0 %v5755_v18  ;;  %v5613_v2 = vld [vmem:[#allocation4 + $0x268] sm:$0xff]  ;;  %v5615_v18 = vld [vmem:[#allocation4 + $0x278] sm:$0xff] }
 0x924   :  { %5898 = vmatpush1.bf16.msra.mxu1 %v5752_v39  ;;  %5980 = vmatpush1.bf16.msra.mxu0 %v5754_v56  ;;  %v5612_v39 = vld [vmem:[#allocation4 + $0x260] sm:$0xff]  ;;  %v5614_v56 = vld [vmem:[#allocation4 + $0x270] sm:$0xff] }
 0x925   :  { %5899 = vmatprep.subr.bf16.mxu1 %v5761_v59  ;;  %5981 = vmatprep.subr.bf16.mxu0 %v5763_v3  ;;  %v5621_v59 = vld [vmem:[#allocation4 + $0x2a8] sm:$0xff]  ;;  %v5623_v3 = vld [vmem:[#allocation4 + $0x2b8] sm:$0xff] }
 0x928   :  { %5900 = vmatpush1.bf16.msra.mxu1 %v5760_v22  ;;  %5982 = vmatpush1.bf16.msra.mxu0 %v5762_v7  ;;  %v5620_v22 = vld [vmem:[#allocation4 + $0x2a0] sm:$0xff]  ;;  %v5622_v7 = vld [vmem:[#allocation4 + $0x2b0] sm:$0xff] }
 0x929   :  { %5901 = vmatprep.subr.bf16.mxu1 %v5769_v55  ;;  %5983 = vmatprep.subr.bf16.mxu0 %v5771_v41  ;;  %v5629_v55 = vld [vmem:[#allocation4 + $0x2e8] sm:$0xff]  ;;  %v5631_v41 = vld [vmem:[#allocation4 + $0x2f8] sm:$0xff] }
 0x92c   :  { %5902 = vmatpush1.bf16.msra.mxu1 %v5768_v24  ;;  %5984 = vmatpush1.bf16.msra.mxu0 %v5770_v47  ;;  %v5628_v24 = vld [vmem:[#allocation4 + $0x2e0] sm:$0xff]  ;;  %v5630_v47 = vld [vmem:[#allocation4 + $0x2f0] sm:$0xff] }
 0x92d   :  { %5903 = vmatprep.subr.bf16.mxu1 %v5777_v9  ;;  %5985 = vmatprep.subr.bf16.mxu0 %v5779_v46  ;;  %v5637_v9 = vld [vmem:[#allocation4 + $0x328] sm:$0xff]  ;;  %v5639_v46 = vld [vmem:[#allocation4 + $0x338] sm:$0xff] }
 0x930   :  { %5904 = vmatpush1.bf16.msra.mxu1 %v5776_v52  ;;  %5986 = vmatpush1.bf16.msra.mxu0 %v5778_v10  ;;  %v5636_v52 = vld [vmem:[#allocation4 + $0x320] sm:$0xff]  ;;  %v5638_v10 = vld [vmem:[#allocation4 + $0x330] sm:$0xff] }
 0x931   :  { %5905 = vmatprep.subr.bf16.mxu1 %v5785_v34  ;;  %5987 = vmatprep.subr.bf16.mxu0 %v5787_v23  ;;  %v5645_v34 = vld [vmem:[#allocation4 + $0x368] sm:$0xff]  ;;  %v5647_v23 = vld [vmem:[#allocation4 + $0x378] sm:$0xff] }
 0x934   :  { %5906 = vmatpush1.bf16.msra.mxu1 %v5784_v51  ;;  %5988 = vmatpush1.bf16.msra.mxu0 %v5786_v31  ;;  %v5644_v51 = vld [vmem:[#allocation4 + $0x360] sm:$0xff]  ;;  %v5646_v31 = vld [vmem:[#allocation4 + $0x370] sm:$0xff] }
 0x935   :  { %5998 = vmatprep.subr.bf16.mxu1 %v5541_v37  ;;  %6080 = vmatprep.subr.bf16.mxu0 %v5543_v14  ;;  %v5653_v37 = vld [vmem:[#allocation4 + $0x3a8] sm:$0xff]  ;;  %v5655_v14 = vld [vmem:[#allocation4 + $0x3b8] sm:$0xff] }
 0x937   :  { %5908 = vmatmul.mubr.bf16.vlgmr.msra.gmra.mrb[64].mxu1 %v10643_v38  ;;  %5990 = vmatmul.mubr.bf16.vlgmr.msra.gmra.mrb[180].mxu0 %v10643_v38 }
 0x938   :  { %5999 = vmatpush1.bf16.msra.mxu1 %v5540_v43  ;;  %6081 = vmatpush1.bf16.msra.mxu0 %v5542_v30  ;;  %v5652_v43 = vld [vmem:[#allocation4 + $0x3a0] sm:$0xff]  ;;  %v5654_v30 = vld [vmem:[#allocation4 + $0x3b0] sm:$0xff] }
 0x939   :  { %6000 = vmatprep.subr.bf16.mxu1 %v5549_v11  ;;  %6082 = vmatprep.subr.bf16.mxu0 %v5551_v45  ;;  %v5661_v11 = vld [vmem:[#allocation4 + $0x3e8] sm:$0xff]  ;;  %v5663_v45 = vld [vmem:[#allocation4 + $0x3f8] sm:$0xff] }
 0x93a   :  { %6030 = vmatprep.mubr.bf16.mxu1 %v10641_v40  ;;  %6112 = vmatprep.mubr.bf16.mxu0 %v10641_v40  ;;  %v5572_v40 = vld [vmem:[#allocation4 + $0x120] sm:$0xff] }
 0x93c   :  { %6001 = vmatpush1.bf16.msra.mxu1 %v5548_v61  ;;  %6083 = vmatpush1.bf16.msra.mxu0 %v5550_v42  ;;  %v5660_v61 = vld [vmem:[#allocation4 + $0x3e0] sm:$0xff]  ;;  %v5662_v42 = vld [vmem:[#allocation4 + $0x3f0] sm:$0xff] }
 0x93d   :  { %6002 = vmatprep.subr.bf16.mxu1 %v5557_v15  ;;  %6084 = vmatprep.subr.bf16.mxu0 %v5559_v25  ;;  %v5669_v15 = vld [vmem:[#allocation4 + $0x428] sm:$0xff]  ;;  %v5671_v25 = vld [vmem:[#allocation4 + $0x438] sm:$0xff] }
 0x940   :  { %6003 = vmatpush1.bf16.msra.mxu1 %v5556_v57  ;;  %6085 = vmatpush1.bf16.msra.mxu0 %v5558_v53  ;;  %v5668_v57 = vld [vmem:[#allocation4 + $0x420] sm:$0xff]  ;;  %v5670_v53 = vld [vmem:[#allocation4 + $0x430] sm:$0xff] }
 0x941   :  { %6004 = vmatprep.subr.bf16.mxu1 %v5565_v13  ;;  %6086 = vmatprep.subr.bf16.mxu0 %v5567_v5  ;;  %v5677_v13 = vld [vmem:[#allocation4 + $0x468] sm:$0xff]  ;;  %v5679_v5 = vld [vmem:[#allocation4 + $0x478] sm:$0xff] }
 0x944   :  { %6005 = vmatpush1.bf16.msra.mxu1 %v5564_v60  ;;  %6087 = vmatpush1.bf16.msra.mxu0 %v5566_v35  ;;  %v5676_v60 = vld [vmem:[#allocation4 + $0x460] sm:$0xff]  ;;  %v5678_v35 = vld [vmem:[#allocation4 + $0x470] sm:$0xff] }
 0x945   :  { %6006 = vmatprep.subr.bf16.mxu1 %v5573_v48  ;;  %6088 = vmatprep.subr.bf16.mxu0 %v5575_v19  ;;  %v5685_v48 = vld [vmem:[#allocation4 + $0x4a8] sm:$0xff]  ;;  %v5687_v19 = vld [vmem:[#allocation4 + $0x4b8] sm:$0xff] }
 0x948   :  { %6007 = vmatpush1.bf16.msra.mxu1 %v5572_v40  ;;  %6089 = vmatpush1.bf16.msra.mxu0 %v5574_v29  ;;  %v5684_v40 = vld [vmem:[#allocation4 + $0x4a0] sm:$0xff]  ;;  %v5686_v29 = vld [vmem:[#allocation4 + $0x4b0] sm:$0xff] }
 0x949   :  { %6008 = vmatprep.subr.bf16.mxu1 %v5581_v50  ;;  %6090 = vmatprep.subr.bf16.mxu0 %v5583_v4  ;;  %v5693_v50 = vld [vmem:[#allocation4 + $0x4e8] sm:$0xff]  ;;  %v5692_v4 = vld [vmem:[#allocation4 + $0x4e0] sm:$0xff] }
 0x94c   :  { %6009 = vmatpush1.bf16.msra.mxu1 %v5580_v54  ;;  %6091 = vmatpush1.bf16.msra.mxu0 %v5582_v49  ;;  %v5694_v54 = vld [vmem:[#allocation4 + $0x4f0] sm:$0xff]  ;;  %v5701_v49 = vld [vmem:[#allocation4 + $0x528] sm:$0xff] }
 0x94d   :  { %6010 = vmatprep.subr.bf16.mxu1 %v5589_v6  ;;  %6092 = vmatprep.subr.bf16.mxu0 %v5591_v1  ;;  %v5703_v6 = vld [vmem:[#allocation4 + $0x538] sm:$0xff]  ;;  %v5702_v1 = vld [vmem:[#allocation4 + $0x530] sm:$0xff] }
 0x950   :  { %6011 = vmatpush1.bf16.msra.mxu1 %v5588_v44  ;;  %6093 = vmatpush1.bf16.msra.mxu0 %v5590_v21  ;;  %v5709_v44 = vld [vmem:[#allocation4 + $0x568] sm:$0xff]  ;;  %v5711_v21 = vld [vmem:[#allocation4 + $0x578] sm:$0xff] }
 0x951   :  { %6012 = vmatprep.subr.bf16.mxu1 %v5597_v33  ;;  %6094 = vmatprep.subr.bf16.mxu0 %v5599_v16  ;;  %v5708_v33 = vld [vmem:[#allocation4 + $0x560] sm:$0xff]  ;;  %v5710_v16 = vld [vmem:[#allocation4 + $0x570] sm:$0xff] }
 0x954   :  { %6013 = vmatpush1.bf16.msra.mxu1 %v5596_v63  ;;  %6095 = vmatpush1.bf16.msra.mxu0 %v5598_v17  ;;  %v5717_v63 = vld [vmem:[#allocation4 + $0x5a8] sm:$0xff]  ;;  %v5719_v17 = vld [vmem:[#allocation4 + $0x5b8] sm:$0xff] }
 0x955   :  { %6014 = vmatprep.subr.bf16.mxu1 %v5605_v62  ;;  %6096 = vmatprep.subr.bf16.mxu0 %v5607_v27  ;;  %v5716_v62 = vld [vmem:[#allocation4 + $0x5a0] sm:$0xff]  ;;  %v5718_v27 = vld [vmem:[#allocation4 + $0x5b0] sm:$0xff] }
 0x958   :  { %6015 = vmatpush1.bf16.msra.mxu1 %v5604_v8  ;;  %6097 = vmatpush1.bf16.msra.mxu0 %v5606_v0  ;;  %v5725_v8 = vld [vmem:[#allocation4 + $0x5e8] sm:$0xff]  ;;  %v5727_v0 = vld [vmem:[#allocation4 + $0x5f8] sm:$0xff] }
 0x959   :  { %6016 = vmatprep.subr.bf16.mxu1 %v5613_v2  ;;  %6098 = vmatprep.subr.bf16.mxu0 %v5615_v18  ;;  %v5724_v2 = vld [vmem:[#allocation4 + $0x5e0] sm:$0xff]  ;;  %v5726_v18 = vld [vmem:[#allocation4 + $0x5f0] sm:$0xff] }
 0x95c   :  { %6017 = vmatpush1.bf16.msra.mxu1 %v5612_v39  ;;  %6099 = vmatpush1.bf16.msra.mxu0 %v5614_v56  ;;  %v5733_v39 = vld [vmem:[#allocation4 + $0x628] sm:$0xff]  ;;  %v5735_v56 = vld [vmem:[#allocation4 + $0x638] sm:$0xff] }
 0x95d   :  { %6018 = vmatprep.subr.bf16.mxu1 %v5621_v59  ;;  %6100 = vmatprep.subr.bf16.mxu0 %v5623_v3  ;;  %v5732_v59 = vld [vmem:[#allocation4 + $0x620] sm:$0xff]  ;;  %v5734_v3 = vld [vmem:[#allocation4 + $0x630] sm:$0xff] }
 0x960   :  { %6019 = vmatpush1.bf16.msra.mxu1 %v5620_v22  ;;  %6101 = vmatpush1.bf16.msra.mxu0 %v5622_v7  ;;  %v5741_v22 = vld [vmem:[#allocation4 + $0x668] sm:$0xff]  ;;  %v5743_v7 = vld [vmem:[#allocation4 + $0x678] sm:$0xff] }
 0x961   :  { %6020 = vmatprep.subr.bf16.mxu1 %v5629_v55  ;;  %6102 = vmatprep.subr.bf16.mxu0 %v5631_v41  ;;  %v5740_v55 = vld [vmem:[#allocation4 + $0x660] sm:$0xff]  ;;  %v5742_v41 = vld [vmem:[#allocation4 + $0x670] sm:$0xff] }
 0x964   :  { %6021 = vmatpush1.bf16.msra.mxu1 %v5628_v24  ;;  %6103 = vmatpush1.bf16.msra.mxu0 %v5630_v47  ;;  %v5749_v24 = vld [vmem:[#allocation4 + $0x6a8] sm:$0xff]  ;;  %v5751_v47 = vld [vmem:[#allocation4 + $0x6b8] sm:$0xff] }
 0x965   :  { %6022 = vmatprep.subr.bf16.mxu1 %v5637_v9  ;;  %6104 = vmatprep.subr.bf16.mxu0 %v5639_v46  ;;  %v5748_v9 = vld [vmem:[#allocation4 + $0x6a0] sm:$0xff]  ;;  %v5750_v46 = vld [vmem:[#allocation4 + $0x6b0] sm:$0xff] }
 0x968   :  { %6023 = vmatpush1.bf16.msra.mxu1 %v5636_v52  ;;  %6105 = vmatpush1.bf16.msra.mxu0 %v5638_v10  ;;  %v5757_v52 = vld [vmem:[#allocation4 + $0x6e8] sm:$0xff]  ;;  %v5759_v10 = vld [vmem:[#allocation4 + $0x6f8] sm:$0xff] }
 0x969   :  { %6024 = vmatprep.subr.bf16.mxu1 %v5645_v34  ;;  %6106 = vmatprep.subr.bf16.mxu0 %v5647_v23  ;;  %v5756_v34 = vld [vmem:[#allocation4 + $0x6e0] sm:$0xff]  ;;  %v5758_v23 = vld [vmem:[#allocation4 + $0x6f0] sm:$0xff] }
 0x96c   :  { %6025 = vmatpush1.bf16.msra.mxu1 %v5644_v51  ;;  %6107 = vmatpush1.bf16.msra.mxu0 %v5646_v31  ;;  %v5765_v51 = vld [vmem:[#allocation4 + $0x728] sm:$0xff]  ;;  %v5767_v31 = vld [vmem:[#allocation4 + $0x738] sm:$0xff] }
 0x96d   :  { %6026 = vmatprep.subr.bf16.mxu1 %v5653_v37  ;;  %6108 = vmatprep.subr.bf16.mxu0 %v5655_v14  ;;  %v5764_v37 = vld [vmem:[#allocation4 + $0x720] sm:$0xff]  ;;  %v5766_v14 = vld [vmem:[#allocation4 + $0x730] sm:$0xff] }
 0x970   :  { %6027 = vmatpush1.bf16.msra.mxu1 %v5652_v43  ;;  %6109 = vmatpush1.bf16.msra.mxu0 %v5654_v30  ;;  %v5773_v43 = vld [vmem:[#allocation4 + $0x768] sm:$0xff]  ;;  %v5775_v30 = vld [vmem:[#allocation4 + $0x778] sm:$0xff] }
 0x971   :  { %6028 = vmatprep.subr.bf16.mxu1 %v5661_v11  ;;  %6110 = vmatprep.subr.bf16.mxu0 %v5663_v45  ;;  %v5772_v11 = vld [vmem:[#allocation4 + $0x760] sm:$0xff]  ;;  %v5774_v45 = vld [vmem:[#allocation4 + $0x770] sm:$0xff] }
 0x974   :  { %6029 = vmatpush1.bf16.msra.mxu1 %v5660_v61  ;;  %6111 = vmatpush1.bf16.msra.mxu0 %v5662_v42  ;;  %v5781_v61 = vld [vmem:[#allocation4 + $0x7a8] sm:$0xff]  ;;  %v5783_v42 = vld [vmem:[#allocation4 + $0x7b8] sm:$0xff] }
 0x975   :  { %6039 = vmatprep.subr.bf16.mxu1 %v5669_v15  ;;  %6121 = vmatprep.subr.bf16.mxu0 %v5671_v25  ;;  %v5780_v15 = vld [vmem:[#allocation4 + $0x7a0] sm:$0xff]  ;;  %v5782_v25 = vld [vmem:[#allocation4 + $0x7b0] sm:$0xff] }
 0x977   :  { %6031 = vmatmul.mubr.bf16.vlgmr.msra.gmra.mrb[68].mxu1 %v10639_v58  ;;  %6113 = vmatmul.mubr.bf16.vlgmr.msra.gmra.mrb[184].mxu0 %v10639_v58  ;;  %v5695_v58 = vld [vmem:[#allocation4 + $0x4f8] sm:$0xff] }
 0x978   :  { %6040 = vmatpush1.bf16.msra.mxu1 %v5668_v57  ;;  %6122 = vmatpush1.bf16.msra.mxu0 %v5670_v53  ;;  %v5789_v57 = vld [vmem:[#allocation4 + $0x7e8] sm:$0xff]  ;;  %v5791_v53 = vld [vmem:[#allocation4 + $0x7f8] sm:$0xff] }
 0x979   :  { %6041 = vmatprep.subr.bf16.mxu1 %v5677_v13  ;;  %6123 = vmatprep.subr.bf16.mxu0 %v5679_v5  ;;  %v5788_v13 = vld [vmem:[#allocation4 + $0x7e0] sm:$0xff]  ;;  %v5790_v5 = vld [vmem:[#allocation4 + $0x7f0] sm:$0xff] }
 0x97a   :  { %6071 = vmatprep.mubr.bf16.mxu1 %v10645_v12  ;;  %6153 = vmatprep.mubr.bf16.mxu0 %v10645_v12  ;;  %v5700_v12 = vld [vmem:[#allocation4 + $0x520] sm:$0xff] }
 0x97c   :  { %6042 = vmatpush1.bf16.msra.mxu1 %v5676_v60  ;;  %6124 = vmatpush1.bf16.msra.mxu0 %v5678_v35  ;;  %v5792_v60 = vld [vmem:[#allocation11] sm:$0xff]  ;;  %v5808_v35 = vsub.s32 3, %v9288_v26 }
 0x97d   :  { %6043 = vmatprep.subr.bf16.mxu1 %v5685_v48  ;;  %6125 = vmatprep.subr.bf16.mxu0 %v5687_v19  ;;  %v5797_v48 = vrot.slane %v5792_v60, %v9291_v28  ;;  %v5805_v19 = vrot.slane %v5792_v60, %v9301_v36 }
 0x980   :  { %6044 = vmatpush1.bf16.msra.mxu1 %v5684_v40  ;;  %6126 = vmatpush1.bf16.msra.mxu0 %v5686_v29  ;;  %v5801_v40 = vrot.slane %v5792_v60, %v9296_v32  ;;  %v5809_v29 = vrot.slane %v5792_v60, %v5808_v35 }
 0x981   :  { %6045 = vmatprep.subr.bf16.mxu1 %v5693_v50  ;;  %6127 = vmatprep.subr.bf16.mxu0 %v5695_v58 }
 0x984   :  { %6046 = vmatpush1.bf16.msra.mxu1 %v5692_v4  ;;  %6128 = vmatpush1.bf16.msra.mxu0 %v5694_v54 }
 0x985   :  { %6047 = vmatprep.subr.bf16.mxu1 %v5701_v49  ;;  %6129 = vmatprep.subr.bf16.mxu0 %v5703_v6 }
 0x988   :  { %6048 = vmatpush1.bf16.msra.mxu1 %v5700_v12  ;;  %6130 = vmatpush1.bf16.msra.mxu0 %v5702_v1 }
 0x989   :  { %6049 = vmatprep.subr.bf16.mxu1 %v5709_v44  ;;  %6131 = vmatprep.subr.bf16.mxu0 %v5711_v21 }
 0x98c   :  { %6050 = vmatpush1.bf16.msra.mxu1 %v5708_v33  ;;  %6132 = vmatpush1.bf16.msra.mxu0 %v5710_v16 }
 0x98d   :  { %6051 = vmatprep.subr.bf16.mxu1 %v5717_v63  ;;  %6133 = vmatprep.subr.bf16.mxu0 %v5719_v17 }
 0x990   :  { %6052 = vmatpush1.bf16.msra.mxu1 %v5716_v62  ;;  %6134 = vmatpush1.bf16.msra.mxu0 %v5718_v27  ;;  %v5812_v27 = vsub.s32 4, %v9288_v26 }
 0x991   :  { %6053 = vmatprep.subr.bf16.mxu1 %v5725_v8  ;;  %6135 = vmatprep.subr.bf16.mxu0 %v5727_v0  ;;  %v5820_v8 = vsub.s32 6, %v9288_v26  ;;  %v5816_v0 = vsub.s32 5, %v9288_v26 }
 0x994   :  { %6054 = vmatpush1.bf16.msra.mxu1 %v5724_v2  ;;  %6136 = vmatpush1.bf16.msra.mxu0 %v5726_v18  ;;  %v5824_v2 = vsub.s32 7, %v9288_v26  ;;  %v5813_v18 = vrot.slane %v5792_v60, %v5812_v27 }
 0x995   :  { %6055 = vmatprep.subr.bf16.mxu1 %v5733_v39  ;;  %6137 = vmatprep.subr.bf16.mxu0 %v5735_v56  ;;  %v5821_v39 = vrot.slane %v5792_v60, %v5820_v8  ;;  %v5817_v56 = vrot.slane %v5792_v60, %v5816_v0 }
 0x998   :  { %6056 = vmatpush1.bf16.msra.mxu1 %v5732_v59  ;;  %6138 = vmatpush1.bf16.msra.mxu0 %v5734_v3  ;;  %v5825_v59 = vrot.slane %v5792_v60, %v5824_v2 }
 0x999   :  { %6057 = vmatprep.subr.bf16.mxu1 %v5741_v22  ;;  %6139 = vmatprep.subr.bf16.mxu0 %v5743_v7 }
 0x99c   :  { %6058 = vmatpush1.bf16.msra.mxu1 %v5740_v55  ;;  %6140 = vmatpush1.bf16.msra.mxu0 %v5742_v41 }
 0x99d   :  { %6059 = vmatprep.subr.bf16.mxu1 %v5749_v24  ;;  %6141 = vmatprep.subr.bf16.mxu0 %v5751_v47 }
 0x9a0   :  { %6060 = vmatpush1.bf16.msra.mxu1 %v5748_v9  ;;  %6142 = vmatpush1.bf16.msra.mxu0 %v5750_v46 }
 0x9a1   :  { %6061 = vmatprep.subr.bf16.mxu1 %v5757_v52  ;;  %6143 = vmatprep.subr.bf16.mxu0 %v5759_v10 }
 0x9a4   :  { %6062 = vmatpush1.bf16.msra.mxu1 %v5756_v34  ;;  %6144 = vmatpush1.bf16.msra.mxu0 %v5758_v23 }
 0x9a5   :  { %6063 = vmatprep.subr.bf16.mxu1 %v5765_v51  ;;  %6145 = vmatprep.subr.bf16.mxu0 %v5767_v31 }
 0x9a8   :  { %6064 = vmatpush1.bf16.msra.mxu1 %v5764_v37  ;;  %6146 = vmatpush1.bf16.msra.mxu0 %v5766_v14 }
 0x9a9   :  { %6065 = vmatprep.subr.bf16.mxu1 %v5773_v43  ;;  %6147 = vmatprep.subr.bf16.mxu0 %v5775_v30 }
 0x9ac   :  { %6066 = vmatpush1.bf16.msra.mxu1 %v5772_v11  ;;  %6148 = vmatpush1.bf16.msra.mxu0 %v5774_v45 }
 0x9ad   :  { %6067 = vmatprep.subr.bf16.mxu1 %v5781_v61  ;;  %6149 = vmatprep.subr.bf16.mxu0 %v5783_v42 }
 0x9b0   :  { %6068 = vmatpush1.bf16.msra.mxu1 %v5780_v15  ;;  %6150 = vmatpush1.bf16.msra.mxu0 %v5782_v25 }
 0x9b1   :  { %6069 = vmatprep.subr.bf16.mxu1 %v5789_v57  ;;  %6151 = vmatprep.subr.bf16.mxu0 %v5791_v53 }
 0x9b4   :  { %6070 = vmatpush1.bf16.msra.mxu1 %v5788_v13  ;;  %6152 = vmatpush1.bf16.msra.mxu0 %v5790_v5 }
 0x9b7   :  { %6072 = vmatmul.mubr.bf16.vlgmr.msra.gmra.mrb[68].mxu1 %v10643_v38  ;;  %6154 = vmatmul.mubr.bf16.vlgmr.msra.gmra.mrb[184].mxu0 %v10643_v38 }
 0xa0a   :  { %v5909_v50 = vpop.f32.mrb[64].mxu1  ;;  %v5991_v58 = vpop.f32.mrb[180].mxu0 }
 0xa0b   :  { %v10669_v4 = vadd.f32 %v5909_v50, %v5797_v48  ;;  %v10671_v54 = vadd.f32 %v5991_v58, %v5805_v19  ;;  %v5911_v49 = vpop.f32.mrb[65].mxu1  ;;  %v5993_v38 = vpop.f32.mrb[181].mxu0 }
 0xa0c   :  { %v8261_v6 = vadd.f32 %v5911_v49, %v5801_v40  ;;  %v10673_v12 = vadd.f32 %v5993_v38, %v5809_v29  ;;  %v5913_v1 = vpop.f32.mrb[66].mxu1  ;;  %v5995_v44 = vpop.f32.mrb[182].mxu0 }
 0xa0d   :  { %v6162_v21 = vmax.f32 %v10669_v4, 0.0  ;;  %v6164_v33 = vmax.f32 %v10671_v54, 0.0  ;;  %v5914_v16 = vpop.f32.mrb[67].mxu1  ;;  %v5996_v63 = vpop.f32.mrb[183].mxu0 }
 0xa0e   :  { %v6163_v17 = vmax.f32 %v8261_v6, 0.0  ;;  %v6165_v62 = vmax.f32 %v10673_v12, 0.0 }
 0xa8a   :  { %v6073_v3 = vpop.f32.mrb[68].mxu1  ;;  %v6155_v22 = vpop.f32.mrb[184].mxu0 }
 0xa8b   :  { %v10682_v7 = vadd.f32 %v6073_v3, %v5813_v18  ;;  %v10684_v55 = vadd.f32 %v6155_v22, %v5821_v39  ;;  %v6075_v41 = vpop.f32.mrb[69].mxu1  ;;  %v6157_v24 = vpop.f32.mrb[185].mxu0 }
 0xa8c   :  { %v10686_v47 = vadd.f32 %v6075_v41, %v5817_v56  ;;  %v10688_v9 = vadd.f32 %v6157_v24, %v5825_v59  ;;  %v6077_v46 = vpop.f32.mrb[70].mxu1  ;;  %v6159_v52 = vpop.f32.mrb[186].mxu0 }
 0xa8d   :  { %v6166_v10 = vmax.f32 %v10682_v7, 0.0  ;;  %v6168_v34 = vmax.f32 %v10684_v55, 0.0  ;;  %v6078_v23 = vpop.f32.mrb[71].mxu1  ;;  %v6160_v51 = vpop.f32.mrb[187].mxu0 }
 0xa8e   :  { %v6167_v31 = vmax.f32 %v10686_v47, 0.0  ;;  %v6169_v37 = vmax.f32 %v10688_v9, 0.0 }
 0xa8f   :  { %8892 = dma.done.wait [#allocation6 + $0x2], 32768 }
 0xa90   :  { %8893 = vsyncadd [#allocation6 + $0x2], 4294934528  ;;  %v6175_v14 = vpack.c.bf16 %v6163_v17, %v6163_v17  ;;  %v6183_v43 = vld [vmem:[#allocation5 + $0x8] sm:$0xff]  ;;  %v6185_v30 = vld [vmem:[#allocation5 + $0x18] sm:$0xff] }
 0xa91   :  { %v6182_v11 = vld [vmem:[#allocation5] sm:$0xff]  ;;  %6460 = vmatprep.subr.bf16.mxu1 %v6183_v43  ;;  %6624 = vmatprep.subr.bf16.mxu0 %v6185_v30  ;;  %v6184_v45 = vld [vmem:[#allocation5 + $0x10] sm:$0xff]  ;;  %v6187_v61 = vld [vmem:[#allocation5 + $0x28] sm:$0xff] }
 0xa92   :  { %6492 = vmatprep.mubr.bf16.mxu1 %v6175_v14  ;;  %6656 = vmatprep.mubr.bf16.mxu0 %v6175_v14  ;;  %v6189_v42 = vld [vmem:[#allocation5 + $0x38] sm:$0xff]  ;;  %v6186_v15 = vld [vmem:[#allocation5 + $0x20] sm:$0xff]  ;;  %v6188_v25 = vld [vmem:[#allocation5 + $0x30] sm:$0xff] }
 0xa93   :  { %6461 = vmatpush1.bf16.msra.mxu1 %v6182_v11  ;;  %6625 = vmatpush1.bf16.msra.mxu0 %v6184_v45  ;;  %v6191_v57 = vld [vmem:[#allocation5 + $0x48] sm:$0xff]  ;;  %v6193_v53 = vld [vmem:[#allocation5 + $0x58] sm:$0xff]  ;;  %v6190_v13 = vld [vmem:[#allocation5 + $0x40] sm:$0xff] }
 0xa94   :  { %6462 = vmatprep.subr.bf16.mxu1 %v6187_v61  ;;  %6626 = vmatprep.subr.bf16.mxu0 %v6189_v42  ;;  %v6192_v5 = vld [vmem:[#allocation5 + $0x50] sm:$0xff]  ;;  %v6195_v60 = vld [vmem:[#allocation5 + $0x68] sm:$0xff]  ;;  %v6197_v48 = vld [vmem:[#allocation5 + $0x78] sm:$0xff] }
 0xa95   :  { %v6194_v19 = vld [vmem:[#allocation5 + $0x60] sm:$0xff]  ;;  %v6196_v40 = vld [vmem:[#allocation5 + $0x70] sm:$0xff]  ;;  %v6199_v29 = vld [vmem:[#allocation5 + $0x88] sm:$0xff] }
 0xa96   :  { %v6201_v50 = vld [vmem:[#allocation5 + $0x98] sm:$0xff]  ;;  %v6198_v58 = vld [vmem:[#allocation5 + $0x80] sm:$0xff]  ;;  %v6200_v49 = vld [vmem:[#allocation5 + $0x90] sm:$0xff] }
 0xa97   :  { %6463 = vmatpush1.bf16.msra.mxu1 %v6186_v15  ;;  %6627 = vmatpush1.bf16.msra.mxu0 %v6188_v25  ;;  %v6203_v38 = vld [vmem:[#allocation5 + $0xa8] sm:$0xff]  ;;  %v6205_v6 = vld [vmem:[#allocation5 + $0xb8] sm:$0xff]  ;;  %v6202_v1 = vld [vmem:[#allocation5 + $0xa0] sm:$0xff] }
 0xa98   :  { %6464 = vmatprep.subr.bf16.mxu1 %v6191_v57  ;;  %6628 = vmatprep.subr.bf16.mxu0 %v6193_v53  ;;  %v6204_v44 = vld [vmem:[#allocation5 + $0xb0] sm:$0xff]  ;;  %v6207_v16 = vld [vmem:[#allocation5 + $0xc8] sm:$0xff]  ;;  %v6209_v63 = vld [vmem:[#allocation5 + $0xd8] sm:$0xff] }
 0xa99   :  { %v6206_v17 = vld [vmem:[#allocation5 + $0xc0] sm:$0xff]  ;;  %v6208_v27 = vld [vmem:[#allocation5 + $0xd0] sm:$0xff]  ;;  %v6211_v8 = vld [vmem:[#allocation5 + $0xe8] sm:$0xff] }
 0xa9a   :  { %v6213_v0 = vld [vmem:[#allocation5 + $0xf8] sm:$0xff]  ;;  %v6210_v2 = vld [vmem:[#allocation5 + $0xe0] sm:$0xff]  ;;  %v6212_v18 = vld [vmem:[#allocation5 + $0xf0] sm:$0xff] }
 0xa9b   :  { %6465 = vmatpush1.bf16.msra.mxu1 %v6190_v13  ;;  %6629 = vmatpush1.bf16.msra.mxu0 %v6192_v5  ;;  %v6215_v39 = vld [vmem:[#allocation5 + $0x108] sm:$0xff]  ;;  %v6217_v56 = vld [vmem:[#allocation5 + $0x118] sm:$0xff]  ;;  %v6214_v59 = vld [vmem:[#allocation5 + $0x100] sm:$0xff] }
 0xa9c   :  { %6466 = vmatprep.subr.bf16.mxu1 %v6195_v60  ;;  %6630 = vmatprep.subr.bf16.mxu0 %v6197_v48  ;;  %v6216_v3 = vld [vmem:[#allocation5 + $0x110] sm:$0xff]  ;;  %v6219_v22 = vld [vmem:[#allocation5 + $0x128] sm:$0xff]  ;;  %v6221_v41 = vld [vmem:[#allocation5 + $0x138] sm:$0xff] }
 0xa9d   :  { %v6218_v24 = vld [vmem:[#allocation5 + $0x120] sm:$0xff]  ;;  %v6220_v46 = vld [vmem:[#allocation5 + $0x130] sm:$0xff]  ;;  %v6223_v52 = vld [vmem:[#allocation5 + $0x148] sm:$0xff] }
 0xa9e   :  { %v6225_v23 = vld [vmem:[#allocation5 + $0x158] sm:$0xff]  ;;  %v6222_v51 = vld [vmem:[#allocation5 + $0x140] sm:$0xff]  ;;  %v6224_v14 = vld [vmem:[#allocation5 + $0x150] sm:$0xff] }
 0xa9f   :  { %6467 = vmatpush1.bf16.msra.mxu1 %v6194_v19  ;;  %6631 = vmatpush1.bf16.msra.mxu0 %v6196_v40  ;;  %v6227_v43 = vld [vmem:[#allocation5 + $0x168] sm:$0xff]  ;;  %v6229_v30 = vld [vmem:[#allocation5 + $0x178] sm:$0xff]  ;;  %v6226_v11 = vld [vmem:[#allocation5 + $0x160] sm:$0xff] }
 0xaa0   :  { %6468 = vmatprep.subr.bf16.mxu1 %v6199_v29  ;;  %6632 = vmatprep.subr.bf16.mxu0 %v6201_v50  ;;  %v6228_v45 = vld [vmem:[#allocation5 + $0x170] sm:$0xff]  ;;  %v6231_v61 = vld [vmem:[#allocation5 + $0x188] sm:$0xff]  ;;  %v6233_v42 = vld [vmem:[#allocation5 + $0x198] sm:$0xff] }
 0xaa1   :  { %v6230_v15 = vld [vmem:[#allocation5 + $0x180] sm:$0xff]  ;;  %v6232_v25 = vld [vmem:[#allocation5 + $0x190] sm:$0xff]  ;;  %v6235_v57 = vld [vmem:[#allocation5 + $0x1a8] sm:$0xff] }
 0xaa2   :  { %v6237_v53 = vld [vmem:[#allocation5 + $0x1b8] sm:$0xff]  ;;  %v6234_v13 = vld [vmem:[#allocation5 + $0x1a0] sm:$0xff]  ;;  %v6236_v5 = vld [vmem:[#allocation5 + $0x1b0] sm:$0xff] }
 0xaa3   :  { %6469 = vmatpush1.bf16.msra.mxu1 %v6198_v58  ;;  %6633 = vmatpush1.bf16.msra.mxu0 %v6200_v49  ;;  %v6239_v60 = vld [vmem:[#allocation5 + $0x1c8] sm:$0xff]  ;;  %v6241_v48 = vld [vmem:[#allocation5 + $0x1d8] sm:$0xff]  ;;  %v6238_v19 = vld [vmem:[#allocation5 + $0x1c0] sm:$0xff] }
 0xaa4   :  { %6470 = vmatprep.subr.bf16.mxu1 %v6203_v38  ;;  %6634 = vmatprep.subr.bf16.mxu0 %v6205_v6  ;;  %v6240_v40 = vld [vmem:[#allocation5 + $0x1d0] sm:$0xff]  ;;  %v6243_v29 = vld [vmem:[#allocation5 + $0x1e8] sm:$0xff]  ;;  %v6245_v50 = vld [vmem:[#allocation5 + $0x1f8] sm:$0xff] }
 0xaa5   :  { %v6242_v58 = vld [vmem:[#allocation5 + $0x1e0] sm:$0xff]  ;;  %v6244_v49 = vld [vmem:[#allocation5 + $0x1f0] sm:$0xff]  ;;  %v6247_v38 = vld [vmem:[#allocation5 + $0x208] sm:$0xff] }
 0xaa6   :  { %v6249_v6 = vld [vmem:[#allocation5 + $0x218] sm:$0xff]  ;;  %v6252_v4 = vld [vmem:[#allocation5 + $0x230] sm:$0xff]  ;;  %v6259_v12 = vld [vmem:[#allocation5 + $0x268] sm:$0xff] }
 0xaa7   :  { %6471 = vmatpush1.bf16.msra.mxu1 %v6202_v1  ;;  %6635 = vmatpush1.bf16.msra.mxu0 %v6204_v44  ;;  %v6174_v1 = vpack.c.bf16 %v6162_v21, %v6162_v21  ;;  %v6246_v44 = vld [vmem:[#allocation5 + $0x200] sm:$0xff]  ;;  %v6255_v21 = vld [vmem:[#allocation5 + $0x248] sm:$0xff]  ;;  %v6320_v47 = vld [vmem:[#allocation5 + $0x450] sm:$0xff] }
 0xaa8   :  { %6472 = vmatprep.subr.bf16.mxu1 %v6207_v16  ;;  %6636 = vmatprep.subr.bf16.mxu0 %v6209_v63  ;;  %v6248_v16 = vld [vmem:[#allocation5 + $0x210] sm:$0xff]  ;;  %v6251_v63 = vld [vmem:[#allocation5 + $0x228] sm:$0xff]  ;;  %v6314_v54 = vld [vmem:[#allocation5 + $0x420] sm:$0xff] }
 0xaa9   :  { %v6378_v7 = vld [vmem:[#allocation5 + $0x620] sm:$0xff]  ;;  %v6384_v9 = vld [vmem:[#allocation5 + $0x650] sm:$0xff] }
 0xaaa   :  { %v8718_v55 = vld [vmem:[#allocation14 + $0x60] sm:$0xff]  }
 0xaab   :  { %6473 = vmatpush1.bf16.msra.mxu1 %v6206_v17  ;;  %6637 = vmatpush1.bf16.msra.mxu0 %v6208_v27  ;;  %v6253_v17 = vld [vmem:[#allocation5 + $0x238] sm:$0xff]  ;;  %v6177_v27 = vpack.c.bf16 %v6165_v62, %v6165_v62 }
 0xaac   :  { %6474 = vmatprep.subr.bf16.mxu1 %v6211_v8  ;;  %6638 = vmatprep.subr.bf16.mxu0 %v6213_v0  ;;  %v6250_v8 = vld [vmem:[#allocation5 + $0x220] sm:$0xff]  ;;  %v6257_v0 = vld [vmem:[#allocation5 + $0x258] sm:$0xff] }
 0xaad   :  { %v6261_v62 = vld [vmem:[#allocation5 + $0x278] sm:$0xff] }
 0xaaf   :  { %6475 = vmatpush1.bf16.msra.mxu1 %v6210_v2  ;;  %6639 = vmatpush1.bf16.msra.mxu0 %v6212_v18  ;;  %v6254_v2 = vld [vmem:[#allocation5 + $0x240] sm:$0xff]  ;;  %v6256_v18 = vld [vmem:[#allocation5 + $0x250] sm:$0xff] }
 0xab0   :  { %6476 = vmatprep.subr.bf16.mxu1 %v6215_v39  ;;  %6640 = vmatprep.subr.bf16.mxu0 %v6217_v56  ;;  %v6258_v39 = vld [vmem:[#allocation5 + $0x260] sm:$0xff]  ;;  %v6260_v56 = vld [vmem:[#allocation5 + $0x270] sm:$0xff] }
 0xab3   :  { %6477 = vmatpush1.bf16.msra.mxu1 %v6214_v59  ;;  %6641 = vmatpush1.bf16.msra.mxu0 %v6216_v3  ;;  %v6263_v59 = vld [vmem:[#allocation5 + $0x288] sm:$0xff]  ;;  %v6265_v3 = vld [vmem:[#allocation5 + $0x298] sm:$0xff] }
 0xab4   :  { %6478 = vmatprep.subr.bf16.mxu1 %v6219_v22  ;;  %6642 = vmatprep.subr.bf16.mxu0 %v6221_v41  ;;  %v6262_v22 = vld [vmem:[#allocation5 + $0x280] sm:$0xff]  ;;  %v6264_v41 = vld [vmem:[#allocation5 + $0x290] sm:$0xff] }
 0xab7   :  { %6479 = vmatpush1.bf16.msra.mxu1 %v6218_v24  ;;  %6643 = vmatpush1.bf16.msra.mxu0 %v6220_v46  ;;  %v6267_v24 = vld [vmem:[#allocation5 + $0x2a8] sm:$0xff]  ;;  %v6269_v46 = vld [vmem:[#allocation5 + $0x2b8] sm:$0xff] }
 0xab8   :  { %6480 = vmatprep.subr.bf16.mxu1 %v6223_v52  ;;  %6644 = vmatprep.subr.bf16.mxu0 %v6225_v23  ;;  %v6266_v52 = vld [vmem:[#allocation5 + $0x2a0] sm:$0xff]  ;;  %v6268_v23 = vld [vmem:[#allocation5 + $0x2b0] sm:$0xff] }
 0xabb   :  { %6481 = vmatpush1.bf16.msra.mxu1 %v6222_v51  ;;  %6645 = vmatpush1.bf16.msra.mxu0 %v6224_v14  ;;  %v6271_v51 = vld [vmem:[#allocation5 + $0x2c8] sm:$0xff]  ;;  %v6273_v14 = vld [vmem:[#allocation5 + $0x2d8] sm:$0xff] }
 0xabc   :  { %6482 = vmatprep.subr.bf16.mxu1 %v6227_v43  ;;  %6646 = vmatprep.subr.bf16.mxu0 %v6229_v30  ;;  %v6270_v43 = vld [vmem:[#allocation5 + $0x2c0] sm:$0xff]  ;;  %v6272_v30 = vld [vmem:[#allocation5 + $0x2d0] sm:$0xff] }
 0xabf   :  { %6483 = vmatpush1.bf16.msra.mxu1 %v6226_v11  ;;  %6647 = vmatpush1.bf16.msra.mxu0 %v6228_v45  ;;  %v6275_v11 = vld [vmem:[#allocation5 + $0x2e8] sm:$0xff]  ;;  %v6277_v45 = vld [vmem:[#allocation5 + $0x2f8] sm:$0xff] }
 0xac0   :  { %6484 = vmatprep.subr.bf16.mxu1 %v6231_v61  ;;  %6648 = vmatprep.subr.bf16.mxu0 %v6233_v42  ;;  %v6274_v61 = vld [vmem:[#allocation5 + $0x2e0] sm:$0xff]  ;;  %v6276_v42 = vld [vmem:[#allocation5 + $0x2f0] sm:$0xff] }
 0xac3   :  { %6485 = vmatpush1.bf16.msra.mxu1 %v6230_v15  ;;  %6649 = vmatpush1.bf16.msra.mxu0 %v6232_v25  ;;  %v6279_v15 = vld [vmem:[#allocation5 + $0x308] sm:$0xff]  ;;  %v6281_v25 = vld [vmem:[#allocation5 + $0x318] sm:$0xff] }
 0xac4   :  { %6486 = vmatprep.subr.bf16.mxu1 %v6235_v57  ;;  %6650 = vmatprep.subr.bf16.mxu0 %v6237_v53  ;;  %v6278_v57 = vld [vmem:[#allocation5 + $0x300] sm:$0xff]  ;;  %v6280_v53 = vld [vmem:[#allocation5 + $0x310] sm:$0xff] }
 0xac7   :  { %6487 = vmatpush1.bf16.msra.mxu1 %v6234_v13  ;;  %6651 = vmatpush1.bf16.msra.mxu0 %v6236_v5  ;;  %v6283_v13 = vld [vmem:[#allocation5 + $0x328] sm:$0xff]  ;;  %v6285_v5 = vld [vmem:[#allocation5 + $0x338] sm:$0xff] }
 0xac8   :  { %6488 = vmatprep.subr.bf16.mxu1 %v6239_v60  ;;  %6652 = vmatprep.subr.bf16.mxu0 %v6241_v48  ;;  %v6282_v60 = vld [vmem:[#allocation5 + $0x320] sm:$0xff]  ;;  %v6284_v48 = vld [vmem:[#allocation5 + $0x330] sm:$0xff] }
 0xacb   :  { %6489 = vmatpush1.bf16.msra.mxu1 %v6238_v19  ;;  %6653 = vmatpush1.bf16.msra.mxu0 %v6240_v40  ;;  %v6287_v19 = vld [vmem:[#allocation5 + $0x348] sm:$0xff]  ;;  %v6289_v40 = vld [vmem:[#allocation5 + $0x358] sm:$0xff] }
 0xacc   :  { %6490 = vmatprep.subr.bf16.mxu1 %v6243_v29  ;;  %6654 = vmatprep.subr.bf16.mxu0 %v6245_v50  ;;  %v6286_v29 = vld [vmem:[#allocation5 + $0x340] sm:$0xff]  ;;  %v6288_v50 = vld [vmem:[#allocation5 + $0x350] sm:$0xff] }
 0xacf   :  { %6491 = vmatpush1.bf16.msra.mxu1 %v6242_v58  ;;  %6655 = vmatpush1.bf16.msra.mxu0 %v6244_v49  ;;  %v6291_v58 = vld [vmem:[#allocation5 + $0x368] sm:$0xff]  ;;  %v6293_v49 = vld [vmem:[#allocation5 + $0x378] sm:$0xff] }
 0xad0   :  { %6501 = vmatprep.subr.bf16.mxu1 %v6247_v38  ;;  %6665 = vmatprep.subr.bf16.mxu0 %v6249_v6  ;;  %v6290_v38 = vld [vmem:[#allocation5 + $0x360] sm:$0xff]  ;;  %v6292_v6 = vld [vmem:[#allocation5 + $0x370] sm:$0xff] }
 0xad2   :  { %6493 = vmatmul.mubr.bf16.vlgmr.msra.gmra.mrb[72].mxu1 %v6174_v1  ;;  %6657 = vmatmul.mubr.bf16.vlgmr.msra.gmra.mrb[188].mxu0 %v6174_v1  ;;  %v6295_v1 = vld [vmem:[#allocation5 + $0x388] sm:$0xff] }
 0xad3   :  { %6502 = vmatpush1.bf16.msra.mxu1 %v6246_v44  ;;  %6666 = vmatpush1.bf16.msra.mxu0 %v6248_v16  ;;  %v6297_v44 = vld [vmem:[#allocation5 + $0x398] sm:$0xff]  ;;  %v6294_v16 = vld [vmem:[#allocation5 + $0x380] sm:$0xff] }
 0xad4   :  { %6503 = vmatprep.subr.bf16.mxu1 %v6251_v63  ;;  %6667 = vmatprep.subr.bf16.mxu0 %v6253_v17  ;;  %v6296_v63 = vld [vmem:[#allocation5 + $0x390] sm:$0xff]  ;;  %v6299_v17 = vld [vmem:[#allocation5 + $0x3a8] sm:$0xff] }
 0xad5   :  { %6533 = vmatprep.mubr.bf16.mxu1 %v6177_v27  ;;  %6697 = vmatprep.mubr.bf16.mxu0 %v6177_v27  ;;  %v6301_v27 = vld [vmem:[#allocation5 + $0x3b8] sm:$0xff] }
 0xad7   :  { %6504 = vmatpush1.bf16.msra.mxu1 %v6250_v8  ;;  %6668 = vmatpush1.bf16.msra.mxu0 %v6252_v4  ;;  %v6298_v8 = vld [vmem:[#allocation5 + $0x3a0] sm:$0xff]  ;;  %v6300_v4 = vld [vmem:[#allocation5 + $0x3b0] sm:$0xff] }
 0xad8   :  { %6505 = vmatprep.subr.bf16.mxu1 %v6255_v21  ;;  %6669 = vmatprep.subr.bf16.mxu0 %v6257_v0  ;;  %v6303_v21 = vld [vmem:[#allocation5 + $0x3c8] sm:$0xff]  ;;  %v6305_v0 = vld [vmem:[#allocation5 + $0x3d8] sm:$0xff] }
 0xadb   :  { %6506 = vmatpush1.bf16.msra.mxu1 %v6254_v2  ;;  %6670 = vmatpush1.bf16.msra.mxu0 %v6256_v18  ;;  %v6302_v2 = vld [vmem:[#allocation5 + $0x3c0] sm:$0xff]  ;;  %v6304_v18 = vld [vmem:[#allocation5 + $0x3d0] sm:$0xff] }
 0xadc   :  { %6507 = vmatprep.subr.bf16.mxu1 %v6259_v12  ;;  %6671 = vmatprep.subr.bf16.mxu0 %v6261_v62  ;;  %v6307_v12 = vld [vmem:[#allocation5 + $0x3e8] sm:$0xff]  ;;  %v6309_v62 = vld [vmem:[#allocation5 + $0x3f8] sm:$0xff] }
 0xadf   :  { %6508 = vmatpush1.bf16.msra.mxu1 %v6258_v39  ;;  %6672 = vmatpush1.bf16.msra.mxu0 %v6260_v56  ;;  %v6306_v39 = vld [vmem:[#allocation5 + $0x3e0] sm:$0xff]  ;;  %v6308_v56 = vld [vmem:[#allocation5 + $0x3f0] sm:$0xff] }
 0xae0   :  { %6509 = vmatprep.subr.bf16.mxu1 %v6263_v59  ;;  %6673 = vmatprep.subr.bf16.mxu0 %v6265_v3  ;;  %v6311_v59 = vld [vmem:[#allocation5 + $0x408] sm:$0xff]  ;;  %v6313_v3 = vld [vmem:[#allocation5 + $0x418] sm:$0xff] }
 0xae3   :  { %6510 = vmatpush1.bf16.msra.mxu1 %v6262_v22  ;;  %6674 = vmatpush1.bf16.msra.mxu0 %v6264_v41  ;;  %v6176_v22 = vpack.c.bf16 %v6164_v33, %v6164_v33  ;;  %v6310_v41 = vld [vmem:[#allocation5 + $0x400] sm:$0xff]  ;;  %v6316_v33 = vld [vmem:[#allocation5 + $0x430] sm:$0xff] }
 0xae4   :  { %6511 = vmatprep.subr.bf16.mxu1 %v6267_v24  ;;  %6675 = vmatprep.subr.bf16.mxu0 %v6269_v46  ;;  %v6312_v24 = vld [vmem:[#allocation5 + $0x410] sm:$0xff]  ;;  %v6315_v46 = vld [vmem:[#allocation5 + $0x428] sm:$0xff] }
 0xae7   :  { %6512 = vmatpush1.bf16.msra.mxu1 %v6266_v52  ;;  %6676 = vmatpush1.bf16.msra.mxu0 %v6268_v23  ;;  %v6317_v52 = vld [vmem:[#allocation5 + $0x438] sm:$0xff]  ;;  %v6179_v23 = vpack.c.bf16 %v6167_v31, %v6167_v31 }
 0xae8   :  { %6513 = vmatprep.subr.bf16.mxu1 %v6271_v51  ;;  %6677 = vmatprep.subr.bf16.mxu0 %v6273_v14  ;;  %v6319_v51 = vld [vmem:[#allocation5 + $0x448] sm:$0xff]  ;;  %v6321_v14 = vld [vmem:[#allocation5 + $0x458] sm:$0xff] }
 0xae9   :  { %v6325_v31 = vld [vmem:[#allocation5 + $0x478] sm:$0xff] }
 0xaeb   :  { %6514 = vmatpush1.bf16.msra.mxu1 %v6270_v43  ;;  %6678 = vmatpush1.bf16.msra.mxu0 %v6272_v30  ;;  %v6318_v43 = vld [vmem:[#allocation5 + $0x440] sm:$0xff]  ;;  %v6323_v30 = vld [vmem:[#allocation5 + $0x468] sm:$0xff] }
 0xaec   :  { %6515 = vmatprep.subr.bf16.mxu1 %v6275_v11  ;;  %6679 = vmatprep.subr.bf16.mxu0 %v6277_v45  ;;  %v6322_v11 = vld [vmem:[#allocation5 + $0x460] sm:$0xff]  ;;  %v6324_v45 = vld [vmem:[#allocation5 + $0x470] sm:$0xff] }
 0xaef   :  { %6516 = vmatpush1.bf16.msra.mxu1 %v6274_v61  ;;  %6680 = vmatpush1.bf16.msra.mxu0 %v6276_v42  ;;  %v6327_v61 = vld [vmem:[#allocation5 + $0x488] sm:$0xff]  ;;  %v6329_v42 = vld [vmem:[#allocation5 + $0x498] sm:$0xff] }
 0xaf0   :  { %6517 = vmatprep.subr.bf16.mxu1 %v6279_v15  ;;  %6681 = vmatprep.subr.bf16.mxu0 %v6281_v25  ;;  %v6326_v15 = vld [vmem:[#allocation5 + $0x480] sm:$0xff]  ;;  %v6328_v25 = vld [vmem:[#allocation5 + $0x490] sm:$0xff] }
 0xaf3   :  { %6518 = vmatpush1.bf16.msra.mxu1 %v6278_v57  ;;  %6682 = vmatpush1.bf16.msra.mxu0 %v6280_v53  ;;  %v6331_v57 = vld [vmem:[#allocation5 + $0x4a8] sm:$0xff]  ;;  %v6333_v53 = vld [vmem:[#allocation5 + $0x4b8] sm:$0xff] }
 0xaf4   :  { %6519 = vmatprep.subr.bf16.mxu1 %v6283_v13  ;;  %6683 = vmatprep.subr.bf16.mxu0 %v6285_v5  ;;  %v6330_v13 = vld [vmem:[#allocation5 + $0x4a0] sm:$0xff]  ;;  %v6332_v5 = vld [vmem:[#allocation5 + $0x4b0] sm:$0xff] }
 0xaf7   :  { %6520 = vmatpush1.bf16.msra.mxu1 %v6282_v60  ;;  %6684 = vmatpush1.bf16.msra.mxu0 %v6284_v48  ;;  %v6335_v60 = vld [vmem:[#allocation5 + $0x4c8] sm:$0xff]  ;;  %v6337_v48 = vld [vmem:[#allocation5 + $0x4d8] sm:$0xff] }
 0xaf8   :  { %6521 = vmatprep.subr.bf16.mxu1 %v6287_v19  ;;  %6685 = vmatprep.subr.bf16.mxu0 %v6289_v40  ;;  %v6334_v19 = vld [vmem:[#allocation5 + $0x4c0] sm:$0xff]  ;;  %v6336_v40 = vld [vmem:[#allocation5 + $0x4d0] sm:$0xff] }
 0xafb   :  { %6522 = vmatpush1.bf16.msra.mxu1 %v6286_v29  ;;  %6686 = vmatpush1.bf16.msra.mxu0 %v6288_v50  ;;  %v6339_v29 = vld [vmem:[#allocation5 + $0x4e8] sm:$0xff]  ;;  %v6341_v50 = vld [vmem:[#allocation5 + $0x4f8] sm:$0xff] }
 0xafc   :  { %6523 = vmatprep.subr.bf16.mxu1 %v6291_v58  ;;  %6687 = vmatprep.subr.bf16.mxu0 %v6293_v49  ;;  %v6338_v58 = vld [vmem:[#allocation5 + $0x4e0] sm:$0xff]  ;;  %v6340_v49 = vld [vmem:[#allocation5 + $0x4f0] sm:$0xff] }
 0xaff   :  { %6524 = vmatpush1.bf16.msra.mxu1 %v6290_v38  ;;  %6688 = vmatpush1.bf16.msra.mxu0 %v6292_v6  ;;  %v6343_v38 = vld [vmem:[#allocation5 + $0x508] sm:$0xff]  ;;  %v6345_v6 = vld [vmem:[#allocation5 + $0x518] sm:$0xff] }
 0xb00   :  { %6525 = vmatprep.subr.bf16.mxu1 %v6295_v1  ;;  %6689 = vmatprep.subr.bf16.mxu0 %v6297_v44  ;;  %v6342_v1 = vld [vmem:[#allocation5 + $0x500] sm:$0xff]  ;;  %v6344_v44 = vld [vmem:[#allocation5 + $0x510] sm:$0xff] }
 0xb03   :  { %6526 = vmatpush1.bf16.msra.mxu1 %v6294_v16  ;;  %6690 = vmatpush1.bf16.msra.mxu0 %v6296_v63  ;;  %v6347_v16 = vld [vmem:[#allocation5 + $0x528] sm:$0xff]  ;;  %v6349_v63 = vld [vmem:[#allocation5 + $0x538] sm:$0xff] }
 0xb04   :  { %6527 = vmatprep.subr.bf16.mxu1 %v6299_v17  ;;  %6691 = vmatprep.subr.bf16.mxu0 %v6301_v27  ;;  %v6346_v17 = vld [vmem:[#allocation5 + $0x520] sm:$0xff]  ;;  %v6348_v27 = vld [vmem:[#allocation5 + $0x530] sm:$0xff] }
 0xb07   :  { %6528 = vmatpush1.bf16.msra.mxu1 %v6298_v8  ;;  %6692 = vmatpush1.bf16.msra.mxu0 %v6300_v4  ;;  %v6351_v8 = vld [vmem:[#allocation5 + $0x548] sm:$0xff]  ;;  %v6353_v4 = vld [vmem:[#allocation5 + $0x558] sm:$0xff] }
 0xb08   :  { %6529 = vmatprep.subr.bf16.mxu1 %v6303_v21  ;;  %6693 = vmatprep.subr.bf16.mxu0 %v6305_v0  ;;  %v6350_v21 = vld [vmem:[#allocation5 + $0x540] sm:$0xff]  ;;  %v6352_v0 = vld [vmem:[#allocation5 + $0x550] sm:$0xff] }
 0xb0b   :  { %6530 = vmatpush1.bf16.msra.mxu1 %v6302_v2  ;;  %6694 = vmatpush1.bf16.msra.mxu0 %v6304_v18  ;;  %v6355_v2 = vld [vmem:[#allocation5 + $0x568] sm:$0xff]  ;;  %v6357_v18 = vld [vmem:[#allocation5 + $0x578] sm:$0xff] }
 0xb0c   :  { %6531 = vmatprep.subr.bf16.mxu1 %v6307_v12  ;;  %6695 = vmatprep.subr.bf16.mxu0 %v6309_v62  ;;  %v6354_v12 = vld [vmem:[#allocation5 + $0x560] sm:$0xff]  ;;  %v6356_v62 = vld [vmem:[#allocation5 + $0x570] sm:$0xff] }
 0xb0f   :  { %6532 = vmatpush1.bf16.msra.mxu1 %v6306_v39  ;;  %6696 = vmatpush1.bf16.msra.mxu0 %v6308_v56  ;;  %v6359_v39 = vld [vmem:[#allocation5 + $0x588] sm:$0xff]  ;;  %v6361_v56 = vld [vmem:[#allocation5 + $0x598] sm:$0xff] }
 0xb10   :  { %6542 = vmatprep.subr.bf16.mxu1 %v6311_v59  ;;  %6706 = vmatprep.subr.bf16.mxu0 %v6313_v3  ;;  %v6358_v59 = vld [vmem:[#allocation5 + $0x580] sm:$0xff]  ;;  %v6360_v3 = vld [vmem:[#allocation5 + $0x590] sm:$0xff] }
 0xb12   :  { %6534 = vmatmul.mubr.bf16.vlgmr.msra.gmra.mrb[72].mxu1 %v6176_v22  ;;  %6698 = vmatmul.mubr.bf16.vlgmr.msra.gmra.mrb[188].mxu0 %v6176_v22  ;;  %v6363_v22 = vld [vmem:[#allocation5 + $0x5a8] sm:$0xff] }
 0xb13   :  { %6543 = vmatpush1.bf16.msra.mxu1 %v6310_v41  ;;  %6707 = vmatpush1.bf16.msra.mxu0 %v6312_v24  ;;  %v6365_v41 = vld [vmem:[#allocation5 + $0x5b8] sm:$0xff]  ;;  %v6362_v24 = vld [vmem:[#allocation5 + $0x5a0] sm:$0xff] }
 0xb14   :  { %6544 = vmatprep.subr.bf16.mxu1 %v6315_v46  ;;  %6708 = vmatprep.subr.bf16.mxu0 %v6317_v52  ;;  %v6364_v46 = vld [vmem:[#allocation5 + $0x5b0] sm:$0xff]  ;;  %v6367_v52 = vld [vmem:[#allocation5 + $0x5c8] sm:$0xff] }
 0xb15   :  { %6574 = vmatprep.mubr.bf16.mxu1 %v6179_v23  ;;  %6738 = vmatprep.mubr.bf16.mxu0 %v6179_v23  ;;  %v6369_v23 = vld [vmem:[#allocation5 + $0x5d8] sm:$0xff] }
 0xb17   :  { %6545 = vmatpush1.bf16.msra.mxu1 %v6314_v54  ;;  %6709 = vmatpush1.bf16.msra.mxu0 %v6316_v33  ;;  %v6366_v54 = vld [vmem:[#allocation5 + $0x5c0] sm:$0xff]  ;;  %v6368_v33 = vld [vmem:[#allocation5 + $0x5d0] sm:$0xff] }
 0xb18   :  { %6546 = vmatprep.subr.bf16.mxu1 %v6319_v51  ;;  %6710 = vmatprep.subr.bf16.mxu0 %v6321_v14  ;;  %v6371_v51 = vld [vmem:[#allocation5 + $0x5e8] sm:$0xff]  ;;  %v6373_v14 = vld [vmem:[#allocation5 + $0x5f8] sm:$0xff] }
 0xb1b   :  { %6547 = vmatpush1.bf16.msra.mxu1 %v6318_v43  ;;  %6711 = vmatpush1.bf16.msra.mxu0 %v6320_v47  ;;  %v6370_v43 = vld [vmem:[#allocation5 + $0x5e0] sm:$0xff]  ;;  %v6372_v47 = vld [vmem:[#allocation5 + $0x5f0] sm:$0xff] }
 0xb1c   :  { %6548 = vmatprep.subr.bf16.mxu1 %v6323_v30  ;;  %6712 = vmatprep.subr.bf16.mxu0 %v6325_v31  ;;  %v6375_v30 = vld [vmem:[#allocation5 + $0x608] sm:$0xff]  ;;  %v6377_v31 = vld [vmem:[#allocation5 + $0x618] sm:$0xff] }
 0xb1f   :  { %6549 = vmatpush1.bf16.msra.mxu1 %v6322_v11  ;;  %6713 = vmatpush1.bf16.msra.mxu0 %v6324_v45  ;;  %v6178_v11 = vpack.c.bf16 %v6166_v10, %v6166_v10  ;;  %v6374_v45 = vld [vmem:[#allocation5 + $0x600] sm:$0xff]  ;;  %v6380_v10 = vld [vmem:[#allocation5 + $0x630] sm:$0xff] }
 0xb20   :  { %6550 = vmatprep.subr.bf16.mxu1 %v6327_v61  ;;  %6714 = vmatprep.subr.bf16.mxu0 %v6329_v42  ;;  %v6376_v61 = vld [vmem:[#allocation5 + $0x610] sm:$0xff]  ;;  %v6379_v42 = vld [vmem:[#allocation5 + $0x628] sm:$0xff] }
 0xb23   :  { %6551 = vmatpush1.bf16.msra.mxu1 %v6326_v15  ;;  %6715 = vmatpush1.bf16.msra.mxu0 %v6328_v25  ;;  %v6381_v15 = vld [vmem:[#allocation5 + $0x638] sm:$0xff]  ;;  %v6181_v25 = vpack.c.bf16 %v6169_v37, %v6169_v37 }
 0xb24   :  { %6552 = vmatprep.subr.bf16.mxu1 %v6331_v57  ;;  %6716 = vmatprep.subr.bf16.mxu0 %v6333_v53  ;;  %v6383_v57 = vld [vmem:[#allocation5 + $0x648] sm:$0xff]  ;;  %v6385_v53 = vld [vmem:[#allocation5 + $0x658] sm:$0xff] }
 0xb25   :  { %v6389_v37 = vld [vmem:[#allocation5 + $0x678] sm:$0xff] }
 0xb27   :  { %6553 = vmatpush1.bf16.msra.mxu1 %v6330_v13  ;;  %6717 = vmatpush1.bf16.msra.mxu0 %v6332_v5  ;;  %v6382_v13 = vld [vmem:[#allocation5 + $0x640] sm:$0xff]  ;;  %v6387_v5 = vld [vmem:[#allocation5 + $0x668] sm:$0xff] }
 0xb28   :  { %6554 = vmatprep.subr.bf16.mxu1 %v6335_v60  ;;  %6718 = vmatprep.subr.bf16.mxu0 %v6337_v48  ;;  %v6386_v60 = vld [vmem:[#allocation5 + $0x660] sm:$0xff]  ;;  %v6388_v48 = vld [vmem:[#allocation5 + $0x670] sm:$0xff] }
 0xb2b   :  { %6555 = vmatpush1.bf16.msra.mxu1 %v6334_v19  ;;  %6719 = vmatpush1.bf16.msra.mxu0 %v6336_v40  ;;  %v6391_v19 = vld [vmem:[#allocation5 + $0x688] sm:$0xff]  ;;  %v6393_v40 = vld [vmem:[#allocation5 + $0x698] sm:$0xff] }
 0xb2c   :  { %6556 = vmatprep.subr.bf16.mxu1 %v6339_v29  ;;  %6720 = vmatprep.subr.bf16.mxu0 %v6341_v50  ;;  %v6390_v29 = vld [vmem:[#allocation5 + $0x680] sm:$0xff]  ;;  %v6392_v50 = vld [vmem:[#allocation5 + $0x690] sm:$0xff] }
 0xb2f   :  { %6557 = vmatpush1.bf16.msra.mxu1 %v6338_v58  ;;  %6721 = vmatpush1.bf16.msra.mxu0 %v6340_v49  ;;  %v6395_v58 = vld [vmem:[#allocation5 + $0x6a8] sm:$0xff]  ;;  %v6397_v49 = vld [vmem:[#allocation5 + $0x6b8] sm:$0xff] }
 0xb30   :  { %6558 = vmatprep.subr.bf16.mxu1 %v6343_v38  ;;  %6722 = vmatprep.subr.bf16.mxu0 %v6345_v6  ;;  %v6394_v38 = vld [vmem:[#allocation5 + $0x6a0] sm:$0xff]  ;;  %v6396_v6 = vld [vmem:[#allocation5 + $0x6b0] sm:$0xff] }
 0xb33   :  { %6559 = vmatpush1.bf16.msra.mxu1 %v6342_v1  ;;  %6723 = vmatpush1.bf16.msra.mxu0 %v6344_v44  ;;  %v6399_v1 = vld [vmem:[#allocation5 + $0x6c8] sm:$0xff]  ;;  %v6401_v44 = vld [vmem:[#allocation5 + $0x6d8] sm:$0xff] }
 0xb34   :  { %6560 = vmatprep.subr.bf16.mxu1 %v6347_v16  ;;  %6724 = vmatprep.subr.bf16.mxu0 %v6349_v63  ;;  %v6398_v16 = vld [vmem:[#allocation5 + $0x6c0] sm:$0xff]  ;;  %v6400_v63 = vld [vmem:[#allocation5 + $0x6d0] sm:$0xff] }
 0xb37   :  { %6561 = vmatpush1.bf16.msra.mxu1 %v6346_v17  ;;  %6725 = vmatpush1.bf16.msra.mxu0 %v6348_v27  ;;  %v6403_v17 = vld [vmem:[#allocation5 + $0x6e8] sm:$0xff]  ;;  %v6405_v27 = vld [vmem:[#allocation5 + $0x6f8] sm:$0xff] }
 0xb38   :  { %6562 = vmatprep.subr.bf16.mxu1 %v6351_v8  ;;  %6726 = vmatprep.subr.bf16.mxu0 %v6353_v4  ;;  %v6402_v8 = vld [vmem:[#allocation5 + $0x6e0] sm:$0xff]  ;;  %v6404_v4 = vld [vmem:[#allocation5 + $0x6f0] sm:$0xff] }
 0xb3b   :  { %6563 = vmatpush1.bf16.msra.mxu1 %v6350_v21  ;;  %6727 = vmatpush1.bf16.msra.mxu0 %v6352_v0  ;;  %v6407_v21 = vld [vmem:[#allocation5 + $0x708] sm:$0xff]  ;;  %v6409_v0 = vld [vmem:[#allocation5 + $0x718] sm:$0xff] }
 0xb3c   :  { %6564 = vmatprep.subr.bf16.mxu1 %v6355_v2  ;;  %6728 = vmatprep.subr.bf16.mxu0 %v6357_v18  ;;  %v6406_v2 = vld [vmem:[#allocation5 + $0x700] sm:$0xff]  ;;  %v6408_v18 = vld [vmem:[#allocation5 + $0x710] sm:$0xff] }
 0xb3f   :  { %6565 = vmatpush1.bf16.msra.mxu1 %v6354_v12  ;;  %6729 = vmatpush1.bf16.msra.mxu0 %v6356_v62  ;;  %v6411_v12 = vld [vmem:[#allocation5 + $0x728] sm:$0xff]  ;;  %v6413_v62 = vld [vmem:[#allocation5 + $0x738] sm:$0xff] }
 0xb40   :  { %6566 = vmatprep.subr.bf16.mxu1 %v6359_v39  ;;  %6730 = vmatprep.subr.bf16.mxu0 %v6361_v56  ;;  %v6410_v39 = vld [vmem:[#allocation5 + $0x720] sm:$0xff]  ;;  %v6412_v56 = vld [vmem:[#allocation5 + $0x730] sm:$0xff] }
 0xb43   :  { %6567 = vmatpush1.bf16.msra.mxu1 %v6358_v59  ;;  %6731 = vmatpush1.bf16.msra.mxu0 %v6360_v3  ;;  %v6415_v59 = vld [vmem:[#allocation5 + $0x748] sm:$0xff]  ;;  %v6417_v3 = vld [vmem:[#allocation5 + $0x758] sm:$0xff] }
 0xb44   :  { %6568 = vmatprep.subr.bf16.mxu1 %v6363_v22  ;;  %6732 = vmatprep.subr.bf16.mxu0 %v6365_v41  ;;  %v6414_v22 = vld [vmem:[#allocation5 + $0x740] sm:$0xff]  ;;  %v6416_v41 = vld [vmem:[#allocation5 + $0x750] sm:$0xff] }
 0xb47   :  { %6569 = vmatpush1.bf16.msra.mxu1 %v6362_v24  ;;  %6733 = vmatpush1.bf16.msra.mxu0 %v6364_v46  ;;  %v6419_v24 = vld [vmem:[#allocation5 + $0x768] sm:$0xff]  ;;  %v6421_v46 = vld [vmem:[#allocation5 + $0x778] sm:$0xff] }
 0xb48   :  { %6570 = vmatprep.subr.bf16.mxu1 %v6367_v52  ;;  %6734 = vmatprep.subr.bf16.mxu0 %v6369_v23  ;;  %v6418_v52 = vld [vmem:[#allocation5 + $0x760] sm:$0xff]  ;;  %v6420_v23 = vld [vmem:[#allocation5 + $0x770] sm:$0xff] }
 0xb4b   :  { %6571 = vmatpush1.bf16.msra.mxu1 %v6366_v54  ;;  %6735 = vmatpush1.bf16.msra.mxu0 %v6368_v33  ;;  %v6423_v54 = vld [vmem:[#allocation5 + $0x788] sm:$0xff]  ;;  %v6425_v33 = vld [vmem:[#allocation5 + $0x798] sm:$0xff] }
 0xb4c   :  { %6572 = vmatprep.subr.bf16.mxu1 %v6371_v51  ;;  %6736 = vmatprep.subr.bf16.mxu0 %v6373_v14  ;;  %v6422_v51 = vld [vmem:[#allocation5 + $0x780] sm:$0xff]  ;;  %v6424_v14 = vld [vmem:[#allocation5 + $0x790] sm:$0xff] }
 0xb4f   :  { %6573 = vmatpush1.bf16.msra.mxu1 %v6370_v43  ;;  %6737 = vmatpush1.bf16.msra.mxu0 %v6372_v47  ;;  %v6427_v43 = vld [vmem:[#allocation5 + $0x7a8] sm:$0xff]  ;;  %v6429_v47 = vld [vmem:[#allocation5 + $0x7b8] sm:$0xff] }
 0xb50   :  { %6583 = vmatprep.subr.bf16.mxu1 %v6375_v30  ;;  %6747 = vmatprep.subr.bf16.mxu0 %v6377_v31  ;;  %v6426_v30 = vld [vmem:[#allocation5 + $0x7a0] sm:$0xff]  ;;  %v6428_v31 = vld [vmem:[#allocation5 + $0x7b0] sm:$0xff] }
 0xb52   :  { %6575 = vmatmul.mubr.bf16.vlgmr.msra.gmra.mrb[72].mxu1 %v6178_v11  ;;  %6739 = vmatmul.mubr.bf16.vlgmr.msra.gmra.mrb[188].mxu0 %v6178_v11  ;;  %v6431_v11 = vld [vmem:[#allocation5 + $0x7c8] sm:$0xff] }
 0xb53   :  { %6584 = vmatpush1.bf16.msra.mxu1 %v6374_v45  ;;  %6748 = vmatpush1.bf16.msra.mxu0 %v6376_v61  ;;  %v6433_v45 = vld [vmem:[#allocation5 + $0x7d8] sm:$0xff]  ;;  %v6430_v61 = vld [vmem:[#allocation5 + $0x7c0] sm:$0xff] }
 0xb54   :  { %6585 = vmatprep.subr.bf16.mxu1 %v6379_v42  ;;  %6749 = vmatprep.subr.bf16.mxu0 %v6381_v15  ;;  %v6432_v42 = vld [vmem:[#allocation5 + $0x7d0] sm:$0xff]  ;;  %v6435_v15 = vld [vmem:[#allocation5 + $0x7e8] sm:$0xff] }
 0xb55   :  { %6615 = vmatprep.mubr.bf16.mxu1 %v6181_v25  ;;  %6779 = vmatprep.mubr.bf16.mxu0 %v6181_v25  ;;  %v6437_v25 = vld [vmem:[#allocation5 + $0x7f8] sm:$0xff] }
 0xb57   :  { %6586 = vmatpush1.bf16.msra.mxu1 %v6378_v7  ;;  %6750 = vmatpush1.bf16.msra.mxu0 %v6380_v10  ;;  %v6434_v7 = vld [vmem:[#allocation5 + $0x7e0] sm:$0xff]  ;;  %v6436_v10 = vld [vmem:[#allocation5 + $0x7f0] sm:$0xff] }
 0xb58   :  { %6587 = vmatprep.subr.bf16.mxu1 %v6383_v57  ;;  %6751 = vmatprep.subr.bf16.mxu0 %v6385_v53  ;;  %v8710_v57 = vld [vmem:[#allocation14 + $0x40] sm:$0xff]   ;;  %v6180_v53 = vpack.c.bf16 %v6168_v34, %v6168_v34 }
 0xb59   :  { %v8719_v34 = vld [vmem:[#allocation14 + $0x20] sm:$0xff]  }
 0xb5b   :  { %6588 = vmatpush1.bf16.msra.mxu1 %v6382_v13  ;;  %6752 = vmatpush1.bf16.msra.mxu0 %v6384_v9  ;;  %v8711_v13 = vld [vmem:[#allocation14] sm:$0xff]   ;;  %v8712_v9 = vld [vmem:[#allocation14 + $0x48] sm:$0xff]  }
 0xb5c   :  { %6589 = vmatprep.subr.bf16.mxu1 %v6387_v5  ;;  %6753 = vmatprep.subr.bf16.mxu0 %v6389_v37  ;;  %v8713_v5 = vld [vmem:[#allocation14 + $0x8] sm:$0xff]   ;;  %v8714_v37 = vld [vmem:[#allocation14 + $0x50] sm:$0xff]  }
 0xb5f   :  { %6590 = vmatpush1.bf16.msra.mxu1 %v6386_v60  ;;  %6754 = vmatpush1.bf16.msra.mxu0 %v6388_v48  ;;  %v8715_v60 = vld [vmem:[#allocation14 + $0x10] sm:$0xff]   ;;  %v8716_v48 = vld [vmem:[#allocation14 + $0x58] sm:$0xff]  }
 0xb60   :  { %6591 = vmatprep.subr.bf16.mxu1 %v6391_v19  ;;  %6755 = vmatprep.subr.bf16.mxu0 %v6393_v40  ;;  %v8717_v19 = vld [vmem:[#allocation14 + $0x18] sm:$0xff]   ;;  %v8720_v40 = vld [vmem:[#allocation14 + $0x68] sm:$0xff]  }
 0xb63   :  { %6592 = vmatpush1.bf16.msra.mxu1 %v6390_v29  ;;  %6756 = vmatpush1.bf16.msra.mxu0 %v6392_v50  ;;  %v8721_v29 = vld [vmem:[#allocation14 + $0x28] sm:$0xff]   ;;  %v8722_v50 = vld [vmem:[#allocation14 + $0x70] sm:$0xff]  }
 0xb64   :  { %6593 = vmatprep.subr.bf16.mxu1 %v6395_v58  ;;  %6757 = vmatprep.subr.bf16.mxu0 %v6397_v49  ;;  %v8723_v58 = vld [vmem:[#allocation14 + $0x30] sm:$0xff]   ;;  %v8724_v49 = vld [vmem:[#allocation14 + $0x78] sm:$0xff]  }
 0xb67   :  { %6594 = vmatpush1.bf16.msra.mxu1 %v6394_v38  ;;  %6758 = vmatpush1.bf16.msra.mxu0 %v6396_v6  ;;  %v8725_v38 = vld [vmem:[#allocation14 + $0x38] sm:$0xff]   ;;  %v8726_v6 = vld [vmem:[#allocation14 + $0xc0] sm:$0xff]  }
 0xb68   :  { %6595 = vmatprep.subr.bf16.mxu1 %v6399_v1  ;;  %6759 = vmatprep.subr.bf16.mxu0 %v6401_v44  ;;  %v6438_v1 = vld [vmem:[#allocation12] sm:$0xf] }
 0xb69   :  { %v6443_v44 = vrot.slane %v6438_v1, %v9291_v28 }
 0xb6b   :  { %6596 = vmatpush1.bf16.msra.mxu1 %v6398_v16  ;;  %6760 = vmatpush1.bf16.msra.mxu0 %v6400_v63  ;;  %v6447_v16 = vrot.slane %v6438_v1, %v9296_v32  ;;  %v6455_v63 = vrot.slane %v6438_v1, %v5808_v35  ;;  %v8729_v35 = vld [vmem:[#allocation14 + $0x88] sm:$0xff]  }
 0xb6c   :  { %6597 = vmatprep.subr.bf16.mxu1 %v6403_v17  ;;  %6761 = vmatprep.subr.bf16.mxu0 %v6405_v27 }
 0xb6f   :  { %6598 = vmatpush1.bf16.msra.mxu1 %v6402_v8  ;;  %6762 = vmatpush1.bf16.msra.mxu0 %v6404_v4 }
 0xb70   :  { %6599 = vmatprep.subr.bf16.mxu1 %v6407_v21  ;;  %6763 = vmatprep.subr.bf16.mxu0 %v6409_v0 }
 0xb73   :  { %6600 = vmatpush1.bf16.msra.mxu1 %v6406_v2  ;;  %6764 = vmatpush1.bf16.msra.mxu0 %v6408_v18 }
 0xb74   :  { %6601 = vmatprep.subr.bf16.mxu1 %v6411_v12  ;;  %6765 = vmatprep.subr.bf16.mxu0 %v6413_v62 }
 0xb77   :  { %6602 = vmatpush1.bf16.msra.mxu1 %v6410_v39  ;;  %6766 = vmatpush1.bf16.msra.mxu0 %v6412_v56 }
 0xb78   :  { %6603 = vmatprep.subr.bf16.mxu1 %v6415_v59  ;;  %6767 = vmatprep.subr.bf16.mxu0 %v6417_v3 }
 0xb7b   :  { %6604 = vmatpush1.bf16.msra.mxu1 %v6414_v22  ;;  %6768 = vmatpush1.bf16.msra.mxu0 %v6416_v41  ;;  %v8727_v22 = vld [vmem:[#allocation14 + $0x80] sm:$0xff]   ;;  %v8728_v41 = vld [vmem:[#allocation14 + $0xc8] sm:$0xff]  }
 0xb7c   :  { %6605 = vmatprep.subr.bf16.mxu1 %v6419_v24  ;;  %6769 = vmatprep.subr.bf16.mxu0 %v6421_v46  ;;  %v8730_v24 = vld [vmem:[#allocation14 + $0xd0] sm:$0xff]  }
 0xb7d   :  { %v8731_v46 = vld [vmem:[#allocation14 + $0x90] sm:$0xff]  }
 0xb7f   :  { %6606 = vmatpush1.bf16.msra.mxu1 %v6418_v52  ;;  %6770 = vmatpush1.bf16.msra.mxu0 %v6420_v23  ;;  %v8732_v52 = vld [vmem:[#allocation14 + $0xd8] sm:$0xff]  }
 0xb80   :  { %6607 = vmatprep.subr.bf16.mxu1 %v6423_v54  ;;  %6771 = vmatprep.subr.bf16.mxu0 %v6425_v33  ;;  %v8733_v23 = vld [vmem:[#allocation14 + $0x98] sm:$0xff]   ;;  %v8734_v54 = vld [vmem:[#allocation14 + $0xe0] sm:$0xff]  }
 0xb81   :  { %v8735_v33 = vld [vmem:[#allocation14 + $0xa0] sm:$0xff]  }
 0xb83   :  { %6608 = vmatpush1.bf16.msra.mxu1 %v6422_v51  ;;  %6772 = vmatpush1.bf16.msra.mxu0 %v6424_v14  ;;  %v8736_v51 = vld [vmem:[#allocation14 + $0xe8] sm:$0xff]  }
 0xb84   :  { %6609 = vmatprep.subr.bf16.mxu1 %v6427_v43  ;;  %6773 = vmatprep.subr.bf16.mxu0 %v6429_v47  ;;  %v8737_v14 = vld [vmem:[#allocation14 + $0xa8] sm:$0xff]   ;;  %v6451_v43 = vrot.slane %v6438_v1, %v9301_v36  ;;  %v8738_v47 = vld [vmem:[#allocation14 + $0xf0] sm:$0xff]   ;;  %v7349_v36 = vld [vmem:[#allocation15] ss:$0 sm:$0xff] }
 0xb87   :  { %6610 = vmatpush1.bf16.msra.mxu1 %v6426_v30  ;;  %6774 = vmatpush1.bf16.msra.mxu0 %v6428_v31  ;;  %v8739_v30 = vld [vmem:[#allocation14 + $0xb0] sm:$0xff]  }
 0xb88   :  { %6611 = vmatprep.subr.bf16.mxu1 %v6431_v11  ;;  %6775 = vmatprep.subr.bf16.mxu0 %v6433_v45  ;;  %v8740_v11 = vld [vmem:[#allocation14 + $0xf8] sm:$0xff]  }
 0xb89   :  { %v8741_v45 = vld [vmem:[#allocation14 + $0xb8] sm:$0xff]  }
 0xb8b   :  { %6612 = vmatpush1.bf16.msra.mxu1 %v6430_v61  ;;  %6776 = vmatpush1.bf16.msra.mxu0 %v6432_v42 }
 0xb8c   :  { %6613 = vmatprep.subr.bf16.mxu1 %v6435_v15  ;;  %6777 = vmatprep.subr.bf16.mxu0 %v6437_v25 }
 0xb8f   :  { %6614 = vmatpush1.bf16.msra.mxu1 %v6434_v7  ;;  %6778 = vmatpush1.bf16.msra.mxu0 %v6436_v10 }
 0xb90   :  { %7898 = vmatprep.subr.bf16.mxu1 %v8710_v57 }
 0xb92   :  { %6616 = vmatmul.mubr.bf16.vlgmr.msra.gmra.mrb[72].mxu1 %v6180_v53  ;;  %6780 = vmatmul.mubr.bf16.vlgmr.msra.gmra.mrb[188].mxu0 %v6180_v53  ;;  %v7140_v53 = vand.u32 127, %v939_v20 }
 0xb93   :  { %7899 = vmatpush3.bf16.msra.mxu1 %v8711_v13 }
 0xb94   :  { %7900 = vmatprep.subr.bf16.mxu1 %v8712_v9  ;;  %vm7141_vm8 = vcmp.lt.s32.totalorder %v7140_v53, 65  ;;  %vm7155_vm9 = vcmp.eq.s32.totalorder %v7140_v53, 65 }
 0xb97   :  { %7901 = vmatpush3.bf16.msra.mxu1 %v8713_v5 }
 0xb98   :  { %7902 = vmatprep.subr.bf16.mxu1 %v8714_v37 }
 0xb9b   :  { %7903 = vmatpush3.bf16.msra.mxu1 %v8715_v60 }
 0xb9c   :  { %7904 = vmatprep.subr.bf16.mxu1 %v8716_v48 }
 0xb9f   :  { %7905 = vmatpush3.bf16.msra.mxu1 %v8717_v19 }
 0xba0   :  { %7906 = vmatprep.subr.bf16.mxu1 %v8718_v55 }
 0xba3   :  { %7907 = vmatpush3.bf16.msra.mxu1 %v8719_v34 }
 0xba4   :  { %7908 = vmatprep.subr.bf16.mxu1 %v8720_v40 }
 0xba7   :  { %7909 = vmatpush3.bf16.msra.mxu1 %v8721_v29 }
 0xba8   :  { %7910 = vmatprep.subr.bf16.mxu1 %v8722_v50 }
 0xbab   :  { %7911 = vmatpush3.bf16.msra.mxu1 %v8723_v58 }
 0xbac   :  { %7912 = vmatprep.subr.bf16.mxu1 %v8724_v49 }
 0xbaf   :  { %7913 = vmatpush3.bf16.msra.mxu1 %v8725_v38 }
 0xbb0   :  { %7920 = vmatprep.subr.bf16.mxu1 %v8726_v6 }
 0xc65   :  { %v6617_v17 = vpop.f32.mrb[72].mxu1  ;;  %v6781_v27 = vpop.f32.mrb[188].mxu0 }
 0xc66   :  { %v8268_v8 = vadd.f32 %v6617_v17, %v6443_v44  ;;  %v6619_v4 = vpop.f32.mrb[73].mxu1  ;;  %v6783_v21 = vpop.f32.mrb[189].mxu0  ;;  %v8270_v31 = vadd.f32 %v6781_v27, %v6451_v43 }
 0xc67   :  { %v8269_v0 = vadd.f32 %v6619_v4, %v6447_v16  ;;  %v8271_v2 = vadd.f32 %v6783_v21, %v6455_v63  ;;  %v6621_v18 = vpop.f32.mrb[74].mxu1  ;;  %v6785_v12 = vpop.f32.mrb[190].mxu0 }
 0xc68   :  { %v6788_v62 = vmax.f32 %v8268_v8, 0.0  ;;  %v6622_v39 = vpop.f32.mrb[75].mxu1  ;;  %v6786_v56 = vpop.f32.mrb[191].mxu0  ;;  %v6790_v61 = vmax.f32 %v8270_v31, 0.0 }
 0xc69   :  { %v6789_v59 = vmax.f32 %v8269_v0, 0.0  ;;  %v6791_v3 = vmax.f32 %v8271_v2, 0.0 }
 0xc6a   :  { %v6792_v32 = vpack.c.bf16 %v6788_v62, %v6788_v62  ;;  %v6794_v42 = vpack.c.bf16 %v6790_v61, %v6790_v61 }
 0xc6b   :  { %v6793_v28 = vpack.c.bf16 %v6789_v59, %v6789_v59  ;;  %v6795_v26 = vpack.c.bf16 %v6791_v3, %v6791_v3 }
 0xc6d   :  { %7091 = vmatprep.mubr.bf16.mxu1 %v6793_v28 }
 0xc6e   :  { %7092 = vmatmul.mubr.bf16.vlgmr.msra.gmra.mrb[76].mxu1 %v6792_v32 }
 0xc6f   :  { %7921 = vmatpush3.bf16.msra.mxu1 %v8727_v22  ;;  %7131 = vmatprep.mubr.bf16.mxu1 %v6795_v26 }
 0xc70   :  { %7922 = vmatprep.subr.bf16.mxu1 %v8728_v41 }
 0xc73   :  { %7923 = vmatpush3.bf16.msra.mxu1 %v8729_v35 }
 0xc74   :  { %7924 = vmatprep.subr.bf16.mxu1 %v8730_v24 }
 0xc77   :  { %7925 = vmatpush3.bf16.msra.mxu1 %v8731_v46 }
 0xc78   :  { %7926 = vmatprep.subr.bf16.mxu1 %v8732_v52 }
 0xc7b   :  { %7927 = vmatpush3.bf16.msra.mxu1 %v8733_v23 }
 0xc7c   :  { %7928 = vmatprep.subr.bf16.mxu1 %v8734_v54 }
 0xc7f   :  { %7929 = vmatpush3.bf16.msra.mxu1 %v8735_v33 }
 0xc80   :  { %7930 = vmatprep.subr.bf16.mxu1 %v8736_v51 }
 0xc83   :  { %7931 = vmatpush3.bf16.msra.mxu1 %v8737_v14 }
 0xc84   :  { %7932 = vmatprep.subr.bf16.mxu1 %v8738_v47 }
 0xc87   :  { %7933 = vmatpush3.bf16.msra.mxu1 %v8739_v30 }
 0xc88   :  { %7934 = vmatprep.subr.bf16.mxu1 %v8740_v11 }
 0xc8b   :  { %7935 = vmatpush3.bf16.msra.mxu1 %v8741_v45 }
 0xc8e   :  { %7132 = vmatmul.mubr.bf16.vlgmr.msra.gmra.mrb[80].mxu1 %v6794_v42 }
 0xd41   :  { %v7914_v15 = vpop.f32.mrb[76].mxu1 }
 0xd42   :  { %v7915_v25 = vpop.f32.mrb[77].mxu1 }
 0xd43   :  { %v7916_v7 = vadd.f32 %v7915_v25, %v7914_v15  ;;  %v7917_v10 = vpop.f32.mrb[78].mxu1 }
 0xd44   :  { %v7918_v57 = vpop.f32.mrb[79].mxu1 }
 0xd45   :  { %v7094_v5 = vadd.f32 %v7916_v7, %v7349_v36 }
 0xd61   :  { %v7936_v13 = vpop.f32.mrb[80].mxu1 }
 0xd62   :  { %v7937_v9 = vpop.f32.mrb[81].mxu1 }
 0xd63   :  { %v7938_v37 = vadd.f32 %v7937_v9, %v7936_v13  ;;  %v7939_v60 = vpop.f32.mrb[82].mxu1 }
 0xd64   :  { %v7940_v48 = vpop.f32.mrb[83].mxu1 }
 0xd65   :  { %v7134_v19 = vadd.f32 %v7938_v37, %v7094_v5 }
 0xd67   :  { %v7142_v55 = vsel %vm7141_vm8, %v7134_v19, -inf }
 0xd68   :  { %7143 = vmax.xlane.f32.xlu0 %v7142_v55 }
 0xdf5   :  { %v7144_v34 = vpop.xlane.xlu0 %7143 }
 0xdf6   :  { %v7145_v40 = vsub.f32 %v7134_v19, %v7144_v34 }
 0xdf8   :  { %v7146_v29 = vmul.f32 1.442695, %v7145_v40 }
 0xdfa   :  { %8742 = vpow2.f32 %v7146_v29 }
 0xe04   :  { %v8743_v50 = vpop.eup %8742 }
 0xe05   :  { %v7148_v58 = vsel %vm7141_vm8, %v8743_v50, 0.0 }
 0xe06   :  { %7149 = vadd.xlane.f32.xlu0 %v7148_v58 }
 0xe93   :  { %v7150_v20 = vpop.xlane.xlu0 %7149 }
 0xe94   :  { %8744 = vlog2.f32 %v7150_v20 }
 0xe95   :  { %8746 = vtanh.f32 %v7134_v19 }
 0xe9e   :  { %v8745_v49 = vpop.eup %8744 }
 0xe9f   :  { %v7152_v38 = vmul.f32 0.6931472, %v8745_v49  ;;  %v8747_v6 = vpop.eup %8746 }
 0xea0   :  { %v7157_v16 = vsel %vm7155_vm9, %v8747_v6, 0.0 }
 0xea1   :  { %v7153_v1 = vadd.f32 %v7152_v38, %v7144_v34 }
 0xea3   :  { %v7154_v44 = vsub.f32 %v7134_v19, %v7153_v1 }
 0xea5   :  { %v7158_v63 = vsel %vm7141_vm8, %v7154_v44, %v7157_v16 }
 0xea6   :  { %7159 = vst [vmem:[%s10739_s12] sm:$0xff] %v7158_v63 }
 0xea7   :  { %7164 = vsyncpa [#allocation8], 1 }
 0xea8   :  { %7165 = vsyncpa [#allocation10], 1 }
 0xea9   :  { %7166 = vsyncpa [#allocation13], 1 }
 0xeaa   :  { %7167 = vsyncpa [#allocation16], 1 }
 0xeab   :  { %7168 = vsyncmov [#allocation6] }
 0xeae   :  { %s7169_s19 = vpop.sfrf %7168 }
 0xeaf   :  { %p7382_p6 = scmp.ne.s32.totalorder %s7169_s19, 0 }
 0xeb1   :  { %7173 = shalt.err (%p7382_p6)  }
 0xeb2   :  { %7175 = vsyncmov [#allocation6 + $0x1] }
 0xeb5   :  { %s7176_s26 = vpop.sfrf %7175 }
 0xeb6   :  { %p7383_p7 = scmp.ne.s32.totalorder %s7176_s26, 0 }
 0xeb8   :  { %7180 = shalt.err (%p7383_p7)  }
 0xeb9   :  { %7182 = vsyncmov [#allocation6 + $0x2] }
 0xebc   :  { %s7183_s28 = vpop.sfrf %7182 }
 0xebd   :  { %p7384_p8 = scmp.ne.s32.totalorder %s7183_s28, 0 }
 0xebf   :  { %7187 = shalt.err (%p7384_p8)  }

</bundles_post_ra>
